<compile_context>
chip_gen: v6e
topology: v6e:2x2x1
jax: 0.10.0
libtpu: 0.0.40
codegen_flags: <defaults>
</compile_context>

<pallas_src>
import functools

import jax
import jax.numpy as jnp
from jax.experimental import pallas as pl
from jax.experimental.pallas import tpu as pltpu


# ------------------------------ helpers ------------------------------

def _pick_tile(dim, max_tile, mult):
    """Largest tile <= max_tile that is either the full dim or a multiple of
    `mult` that divides dim (keeps every BlockSpec (8,128)-legal, no masking)."""
    if dim <= max_tile:
        return dim
    t = (max_tile // mult) * mult
    while t >= mult:
        if dim % t == 0:
            return t
        t -= mult
    return dim  # fallback: single full block


_SQRT_HALF = 0.7071067811865476


def _erf_poly(x):
    # TODO(synk): exact-erf GELU approximated with Abramowitz&Stegun 7.1.26
    # (|err| < 1.5e-7) so the gate can be fused into the matmul epilogue
    # without relying on an erf lowering in Mosaic; error is negligible next
    # to bf16 matmul rounding.
    t = 1.0 / (1.0 + 0.3275911 * jnp.abs(x))
    poly = t * (0.254829592 + t * (-0.284496736 + t * (1.421413741
              + t * (-1.453152027 + t * 1.061405429))))
    y = 1.0 - poly * jnp.exp(-x * x)
    return jnp.where(x >= 0.0, y, -y)


def _gelu_exact(x):
    return 0.5 * x * (1.0 + _erf_poly(x * _SQRT_HALF))


def _layer_norm_ane(x_f32, lnw_ref, lnb_ref, eps):
    # ANE LayerNorm: ((x - mu) * rsqrt(var + eps) + bias) * weight, over channels.
    mean = jnp.mean(x_f32, axis=-1, keepdims=True)
    zm = x_f32 - mean
    var = jnp.mean(zm * zm, axis=-1, keepdims=True)
    normed = zm * jax.lax.rsqrt(var + eps)
    return (normed + lnb_ref[...]) * lnw_ref[...]


# ---------------- tiled matmul (+bias, +residual epilogue) ----------------

def _mm_kernel(x_ref, w_ref, *rest, has_bias, has_res):
    o_ref, acc_ref = rest[-2], rest[-1]
    extras = rest[:-2]
    b_ref = extras[0] if has_bias else None
    r_ref = extras[1 if has_bias else 0] if has_res else None

    k = pl.program_id(2)

    @pl.when(k == 0)
    def _():
        acc_ref[...] = jnp.zeros(acc_ref.shape, acc_ref.dtype)

    acc_ref[...] += jnp.dot(x_ref[...], w_ref[...],
                            preferred_element_type=jnp.float32)

    @pl.when(k == pl.num_programs(2) - 1)
    def _():
        out = acc_ref[...]
        if has_bias:
            out = out + b_ref[...].astype(jnp.float32)
        if has_res:
            out = out + r_ref[...].astype(jnp.float32)
        o_ref[...] = out.astype(o_ref.dtype)


def matmul(x, w, bias=None, residual=None, *, out_dtype=jnp.float32,
           tm=256, tn=512, tk=512):
    """out = x @ w (+ bias) (+ residual).  bf16 MXU inputs, f32 accumulation."""
    M, K = x.shape
    _, N = w.shape
    tm = _pick_tile(M, tm, 8)
    tn = _pick_tile(N, tn, 128)
    tk = _pick_tile(K, tk, 128)
    grid = (M // tm, N // tn, K // tk)

    in_specs = [pl.BlockSpec((tm, tk), lambda i, j, k: (i, k)),
                pl.BlockSpec((tk, tn), lambda i, j, k: (k, j))]
    args = [x.astype(jnp.bfloat16), w.astype(jnp.bfloat16)]
    if bias is not None:
        in_specs.append(pl.BlockSpec((1, tn), lambda i, j, k: (0, j)))
        args.append(bias.reshape(1, N).astype(jnp.float32))
    if residual is not None:
        in_specs.append(pl.BlockSpec((tm, tn), lambda i, j, k: (i, j)))
        args.append(residual)

    kern = functools.partial(_mm_kernel, has_bias=bias is not None,
                             has_res=residual is not None)
    return pl.pallas_call(
        kern,
        out_shape=jax.ShapeDtypeStruct((M, N), out_dtype),
        grid=grid,
        in_specs=in_specs,
        out_specs=pl.BlockSpec((tm, tn), lambda i, j, k: (i, j)),
        scratch_shapes=[pltpu.VMEM((tm, tn), jnp.float32)],
        compiler_params=pltpu.CompilerParams(
            dimension_semantics=("parallel", "parallel", "arbitrary")),
    )(*args)


# -------- (LayerNormANE) + projection against a stacked (R,K,N) weight --------

def _ln_proj_kernel(*refs, has_ln, eps):
    if has_ln:
        x_ref, lnw_ref, lnb_ref, w_ref, o_ref = refs
    else:
        x_ref, w_ref, o_ref = refs
        lnw_ref = lnb_ref = None
    x = x_ref[...].astype(jnp.float32)
    if has_ln:
        x = _layer_norm_ane(x, lnw_ref, lnb_ref, eps)
    o_ref[...] = jnp.dot(x.astype(jnp.bfloat16), w_ref[...],
                         preferred_element_type=jnp.float32).astype(o_ref.dtype)


def ln_proj(x, w_stacked, ln_w=None, ln_b=None, *, eps=1e-5, tm=256,
            out_dtype=jnp.bfloat16):
    """(optional ANE LayerNorm) + x @ w_r for each stacked weight r.
    x: (M, K); w_stacked: (R, K, N) -> (R, M, N).  The x tile is fetched once
    per row-tile and reused for all R projections (fused q/k/v)."""
    M, K = x.shape
    R, _, N = w_stacked.shape
    tm = _pick_tile(M, tm, 8)
    grid = (M // tm, R)

    has_ln = ln_w is not None
    in_specs = [pl.BlockSpec((tm, K), lambda i, r: (i, 0))]
    args = [x]
    if has_ln:
        in_specs += [pl.BlockSpec((1, K), lambda i, r: (0, 0)),
                     pl.BlockSpec((1, K), lambda i, r: (0, 0))]
        args += [ln_w.reshape(1, K).astype(jnp.float32),
                 ln_b.reshape(1, K).astype(jnp.float32)]
    in_specs.append(pl.BlockSpec((None, K, N), lambda i, r: (r, 0, 0)))
    args.append(w_stacked.astype(jnp.bfloat16))

    kern = functools.partial(_ln_proj_kernel, has_ln=has_ln, eps=eps)
    return pl.pallas_call(
        kern,
        out_shape=jax.ShapeDtypeStruct((R, M, N), out_dtype),
        grid=grid,
        in_specs=in_specs,
        out_specs=pl.BlockSpec((None, tm, N), lambda i, r: (r, i, 0)),
        compiler_params=pltpu.CompilerParams(
            dimension_semantics=("parallel", "arbitrary")),
    )(*args)


# ---------------- LayerNormANE + GEGLU (split/GELU/gate fused) ----------------

def _ln_geglu_kernel(x_ref, lnw_ref, lnb_ref, wh_ref, wg_ref, bh_ref, bg_ref,
                     o_ref, *, eps):
    x = _layer_norm_ane(x_ref[...].astype(jnp.float32), lnw_ref, lnb_ref, eps)
    xn = x.astype(jnp.bfloat16)
    h = jnp.dot(xn, wh_ref[...], preferred_element_type=jnp.float32) + bh_ref[...]
    g = jnp.dot(xn, wg_ref[...], preferred_element_type=jnp.float32) + bg_ref[...]
    o_ref[...] = (h * _gelu_exact(g)).astype(o_ref.dtype)


def ln_geglu(x, ln_w, ln_b, w_h, w_g, b_h, b_g, *, eps=1e-5, tm=256, tn=512,
             out_dtype=jnp.bfloat16):
    M, K = x.shape
    _, N = w_h.shape
    tm = _pick_tile(M, tm, 8)
    tn = _pick_tile(N, tn, 128)
    grid = (M // tm, N // tn)
    kern = functools.partial(_ln_geglu_kernel, eps=eps)
    return pl.pallas_call(
        kern,
        out_shape=jax.ShapeDtypeStruct((M, N), out_dtype),
        grid=grid,
        in_specs=[
            pl.BlockSpec((tm, K), lambda i, j: (i, 0)),
            pl.BlockSpec((1, K), lambda i, j: (0, 0)),
            pl.BlockSpec((1, K), lambda i, j: (0, 0)),
            pl.BlockSpec((K, tn), lambda i, j: (0, j)),
            pl.BlockSpec((K, tn), lambda i, j: (0, j)),
            pl.BlockSpec((1, tn), lambda i, j: (0, j)),
            pl.BlockSpec((1, tn), lambda i, j: (0, j)),
        ],
        out_specs=pl.BlockSpec((tm, tn), lambda i, j: (i, j)),
        compiler_params=pltpu.CompilerParams(
            dimension_semantics=("parallel", "parallel")),
    )(x,
      ln_w.reshape(1, K).astype(jnp.float32),
      ln_b.reshape(1, K).astype(jnp.float32),
      w_h.astype(jnp.bfloat16), w_g.astype(jnp.bfloat16),
      b_h.reshape(1, N).astype(jnp.float32),
      b_g.reshape(1, N).astype(jnp.float32))


# --------------------- flash attention (heads on lanes) ---------------------

def _mha_kernel(q_ref, k_ref, v_ref, o_ref, m_sc, l_sc, acc_sc, *, heads, scale):
    kvi = pl.program_id(2)

    @pl.when(kvi == 0)
    def _():
        m_sc[...] = jnp.full(m_sc.shape, -jnp.inf, m_sc.dtype)
        l_sc[...] = jnp.zeros(l_sc.shape, l_sc.dtype)
        acc_sc[...] = jnp.zeros(acc_sc.shape, acc_sc.dtype)

    inner = q_ref.shape[-1]
    dh = inner // heads
    # scale applied to q once (Sq*dh mults) instead of to the (Sq,Skv) logits.
    q = (q_ref[...].astype(jnp.float32) * scale).astype(jnp.bfloat16)
    k = k_ref[...].astype(jnp.bfloat16)
    v = v_ref[...].astype(jnp.bfloat16)

    for h in range(heads):  # static unroll over heads
        cs = slice(h * dh, (h + 1) * dh)
        hs = slice(h, h + 1)
        s = jax.lax.dot_general(q[:, cs], k[:, cs], (((1,), (1,)), ((), ())),
                                preferred_element_type=jnp.float32)  # (tq, tkv)
        m_prev = m_sc[:, hs]
        m_new = jnp.maximum(m_prev, jnp.max(s, axis=-1, keepdims=True))
        alpha = jnp.exp(m_prev - m_new)
        p = jnp.exp(s - m_new)
        l_sc[:, hs] = alpha * l_sc[:, hs] + jnp.sum(p, axis=-1, keepdims=True)
        pv = jnp.dot(p.astype(jnp.bfloat16), v[:, cs],
                     preferred_element_type=jnp.float32)             # (tq, dh)
        acc_sc[:, cs] = alpha * acc_sc[:, cs] + pv
        m_sc[:, hs] = m_new

    @pl.when(kvi == pl.num_programs(2) - 1)
    def _():
        cols = []
        for h in range(heads):
            inv_l = pl.reciprocal(l_sc[:, h:h + 1], approx=True)
            cols.append(acc_sc[:, h * dh:(h + 1) * dh] * inv_l)
        o_ref[...] = jnp.concatenate(cols, axis=-1).astype(o_ref.dtype)


def mha(q4, qsel, kv4, ksel, vsel, *, heads, scale, tq=256, tkv=512,
        out_dtype=jnp.bfloat16):
    """q4: (Rq, B, Sq, inner); kv4: (Rkv, B, Skv, inner).  q/k/v are selected
    on the stacked leading axis through BlockSpec index_maps (no HBM slicing
    or head-split transposes).  Online-softmax over the kv grid axis."""
    _, B, Sq, inner = q4.shape
    _, _, Skv, _ = kv4.shape
    tq = _pick_tile(Sq, tq, 8)
    tkv = _pick_tile(Skv, tkv, 8)
    grid = (B, Sq // tq, Skv // tkv)

    kern = functools.partial(_mha_kernel, heads=heads, scale=scale)
    return pl.pallas_call(
        kern,
        out_shape=jax.ShapeDtypeStruct((B, Sq, inner), out_dtype),
        grid=grid,
        in_specs=[
            pl.BlockSpec((None, None, tq, inner),
                         lambda b, qi, kvi: (qsel, b, qi, 0)),
            pl.BlockSpec((None, None, tkv, inner),
                         lambda b, qi, kvi: (ksel, b, kvi, 0)),
            pl.BlockSpec((None, None, tkv, inner),
                         lambda b, qi, kvi: (vsel, b, kvi, 0)),
        ],
        out_specs=pl.BlockSpec((None, tq, inner),
                               lambda b, qi, kvi: (b, qi, 0)),
        scratch_shapes=[
            pltpu.VMEM((tq, heads), jnp.float32),   # m
            pltpu.VMEM((tq, heads), jnp.float32),   # l
            pltpu.VMEM((tq, inner), jnp.float32),   # acc
        ],
        compiler_params=pltpu.CompilerParams(
            dimension_semantics=("parallel", "parallel", "arbitrary")),
    )(q4, kv4, kv4)


# --------------------------- block forward (glue) ---------------------------

def basic_transformer_block_tokens(p, t, ctx_tokens, *, B, heads, dim_head):
    """t: (B*S, dim) f32 token matrix; ctx_tokens: (B*S_ctx, ctx_dim) or None."""
    M, _ = t.shape
    inner = heads * dim_head
    S = M // B
    scale = dim_head ** -0.5

    # ---- attn1 (self): fused LN + stacked q/k/v projection -> flash MHA ----
    qkv = ln_proj(t, p["attn1"]["w_qkv"], p["norm1_w"], p["norm1_b"])  # (3,M,inner)
    qkv4 = qkv.reshape(3, B, S, inner)
    o = mha(qkv4, 0, qkv4, 1, 2, heads=heads, scale=scale)
    t = matmul(o.reshape(M, inner), p["attn1"]["wo"], bias=p["attn1"]["bo"],
               residual=t, out_dtype=jnp.float32)

    # ---- attn2 (cross): LN fused into q; k/v fused over (un-normed) context ----
    a2 = p["attn2"]
    if ctx_tokens is None:
        qkv = ln_proj(t, a2["w_qkv"], p["norm2_w"], p["norm2_b"])
        qkv4 = qkv.reshape(3, B, S, inner)
        o = mha(qkv4, 0, qkv4, 1, 2, heads=heads, scale=scale)
    else:
        Mc = ctx_tokens.shape[0]
        Sc = Mc // B
        q = ln_proj(t, a2["w_q"], p["norm2_w"], p["norm2_b"])     # (1, M, inner)
        kv = ln_proj(ctx_tokens, a2["w_kv"])                      # (2, Mc, inner)
        o = mha(q.reshape(1, B, S, inner), 0,
                kv.reshape(2, B, Sc, inner), 0, 1, heads=heads, scale=scale)
    t = matmul(o.reshape(M, inner), a2["wo"], bias=a2["bo"],
               residual=t, out_dtype=jnp.float32)

    # ---- feed-forward: fused LN + GEGLU, then out-proj with fused residual ----
    ff = p["ff"]
    h = ln_geglu(t, p["norm3_w"], p["norm3_b"], ff["w_h"], ff["w_g"],
                 ff["b_h"], ff["b_g"])                             # (M, 4*dim)
    t = matmul(h, ff["w_out"], bias=ff["b_out"], residual=t, out_dtype=jnp.float32)
    return t


def basic_transformer_block(params, hidden_states, context=None, *,
                            n_heads, d_head):
    """hidden_states: ANE layout (B, dim, 1, S); context: (B, ctx_dim, 1, S_ctx)."""
    B, C, _, S = hidden_states.shape
    # TODO(synk): NCHW<->token transposes kept as plain-JAX glue at the block
    # boundary (single pass each way); all per-block math runs in Pallas.
    t = hidden_states.reshape(B, C, S).transpose(0, 2, 1).reshape(B * S, C)
    if context is not None:
        Bc, Cc, _, Sc = context.shape
        ctx_tokens = context.reshape(Bc, Cc, Sc).transpose(0, 2, 1).reshape(Bc * Sc, Cc)
    else:
        ctx_tokens = None
    t = basic_transformer_block_tokens(params, t, ctx_tokens,
                                       B=B, heads=n_heads, dim_head=d_head)
    return t.reshape(B, S, C).transpose(0, 2, 1).reshape(B, C, 1, S)


# ----------------------------- parameter init -----------------------------

def init_params(key, dim, n_heads, d_head, context_dim):
    inner = n_heads * d_head
    ff_inner = 4 * dim
    keys = iter(jax.random.split(key, 64))
    bf = jnp.bfloat16

    def nrm(shape, scale=0.05, dtype=jnp.float32):
        return (scale * jax.random.normal(next(keys), shape, jnp.float32)).astype(dtype)

    p = {
        "norm1_w": 1.0 + nrm((dim,), 0.1), "norm1_b": nrm((dim,), 0.1),
        "norm2_w": 1.0 + nrm((dim,), 0.1), "norm2_b": nrm((dim,), 0.1),
        "norm3_w": 1.0 + nrm((dim,), 0.1), "norm3_b": nrm((dim,), 0.1),
        "attn1": {
            "w_qkv": nrm((3, dim, inner), dtype=bf),   # stacked q/k/v (no bias)
            "wo": nrm((inner, dim), dtype=bf),
            "bo": nrm((dim,)),
        },
        "ff": {
            "w_h": nrm((dim, ff_inner), dtype=bf),     # GEGLU hidden half
            "w_g": nrm((dim, ff_inner), dtype=bf),     # GEGLU gate half
            "b_h": nrm((ff_inner,)), "b_g": nrm((ff_inner,)),
            "w_out": nrm((ff_inner, dim), dtype=bf),
            "b_out": nrm((dim,)),
        },
    }
    if context_dim is None:
        p["attn2"] = {"w_qkv": nrm((3, dim, inner), dtype=bf),
                      "wo": nrm((inner, dim), dtype=bf), "bo": nrm((dim,))}
    else:
        p["attn2"] = {"w_q": nrm((1, dim, inner), dtype=bf),
                      "w_kv": nrm((2, context_dim, inner), dtype=bf),
                      "wo": nrm((inner, dim), dtype=bf), "bo": nrm((dim,))}
    return p


# ---------------------------------- main ----------------------------------

if __name__ == "__main__":
    key = jax.random.PRNGKey(0)
    B, dim, S = 2, 32, 64             # hidden_states: (2, 32, 1, 64) ANE layout
    n_heads, d_head = 2, 16           # inner_dim = 32 == dim
    context_dim, S_ctx = 64, 8

    kx, kc, kp = jax.random.split(key, 3)
    hidden = jax.random.normal(kx, (B, dim, 1, S), jnp.float32)
    context = jax.random.normal(kc, (B, context_dim, 1, S_ctx), jnp.float32)
    params = init_params(kp, dim, n_heads, d_head, context_dim)

    fwd = jax.jit(functools.partial(basic_transformer_block,
                                    n_heads=n_heads, d_head=d_head))
    out = fwd(params, hidden, context)
    jax.block_until_ready(out)
    assert out.shape == (B, dim, 1, S)
    assert bool(jnp.all(jnp.isfinite(out)))
    print("KERNEL_OK")
</pallas_src>

<mosaic_0001>
module attributes {stable_mosaic.version = 11 : i64} {
  func.func @_mm_kernel(%arg0: i32, %arg1: i32, %arg2: i32, %arg3: memref<128x32xbf16, #tpu.memory_space<vmem>>, %arg4: memref<32x32xbf16, #tpu.memory_space<vmem>>, %arg5: memref<1x32xf32, #tpu.memory_space<vmem>>, %arg6: memref<128x32xf32, #tpu.memory_space<vmem>>, %arg7: memref<128x32xf32, #tpu.memory_space<vmem>>, %arg8: memref<128x32xf32, #tpu.memory_space<vmem>>) attributes {dimension_semantics = [#tpu.dimension_semantics<parallel>, #tpu.dimension_semantics<parallel>, #tpu.dimension_semantics<arbitrary>], iteration_bounds = array<i64: 1, 1, 1>, scalar_prefetch = 0 : i64, scratch_operands = 1 : i64, tpu.core_type = #tpu.core_type<tc>, window_params = [{transform_indices = @transform_0, window_bounds = array<i64: 128, 32>}, {transform_indices = @transform_1, window_bounds = array<i64: 32, 32>}, {transform_indices = @transform_2, window_bounds = array<i64: 1, 32>}, {transform_indices = @transform_3, window_bounds = array<i64: 128, 32>}, {transform_indices = @transform_4, window_bounds = array<i64: 128, 32>}]} {
    %c0_i32 = arith.constant 0 : i32
    %0 = arith.cmpi eq, %arg2, %c0_i32 : i32
    %1 = arith.extui %0 : i1 to i32
    %c0_i32_0 = arith.constant 0 : i32
    %2 = arith.cmpi ne, %1, %c0_i32_0 : i32
    scf.if %2 {
      %cst_10 = arith.constant 0.000000e+00 : f32
      %12 = vector.broadcast %cst_10 : f32 to vector<128x32xf32>
      %c0_11 = arith.constant 0 : index
      %c0_12 = arith.constant 0 : index
      %13 = vector.load %arg8[%c0_11, %c0_12] : memref<128x32xf32, #tpu.memory_space<vmem>>, vector<128x32xf32>
      tpu.vector_store %arg8[%c0_11, %c0_12], %12 {strides = array<i32>} : memref<128x32xf32, #tpu.memory_space<vmem>>, vector<128x32xf32>,
    } else {
    }
    %c0 = arith.constant 0 : index
    %c0_1 = arith.constant 0 : index
    %3 = vector.load %arg8[%c0, %c0_1] : memref<128x32xf32, #tpu.memory_space<vmem>>, vector<128x32xf32>
    %c0_2 = arith.constant 0 : index
    %c0_3 = arith.constant 0 : index
    %4 = vector.load %arg3[%c0_2, %c0_3] : memref<128x32xbf16, #tpu.memory_space<vmem>>, vector<128x32xbf16>
    %c0_4 = arith.constant 0 : index
    %c0_5 = arith.constant 0 : index
    %5 = vector.load %arg4[%c0_4, %c0_5] : memref<32x32xbf16, #tpu.memory_space<vmem>>, vector<32x32xbf16>
    %cst = arith.constant dense<0.000000e+00> : vector<128x32xf32>
    %6 = tpu.matmul %4, %5, %cst {dimension_numbers = #tpu.dot_dimension_numbers<[1], [0], [0], [1], [0, 0, 1, 1], [], []>} : vector<128x32xbf16>, vector<32x32xbf16>, vector<128x32xf32> -> vector<128x32xf32>
    %7 = arith.addf %3, %6 : vector<128x32xf32>
    %c0_6 = arith.constant 0 : index
    %c0_7 = arith.constant 0 : index
    %8 = vector.load %arg8[%c0_6, %c0_7] : memref<128x32xf32, #tpu.memory_space<vmem>>, vector<128x32xf32>
    tpu.vector_store %arg8[%c0_6, %c0_7], %7 {strides = array<i32>} : memref<128x32xf32, #tpu.memory_space<vmem>>, vector<128x32xf32>,
    %c0_i32_8 = arith.constant 0 : i32
    %9 = arith.cmpi eq, %arg2, %c0_i32_8 : i32
    %10 = arith.extui %9 : i1 to i32
    %c0_i32_9 = arith.constant 0 : i32
    %11 = arith.cmpi ne, %10, %c0_i32_9 : i32
    scf.if %11 {
      %c0_10 = arith.constant 0 : index
      %c0_11 = arith.constant 0 : index
      %12 = vector.load %arg8[%c0_10, %c0_11] : memref<128x32xf32, #tpu.memory_space<vmem>>, vector<128x32xf32>
      %c0_12 = arith.constant 0 : index
      %c0_13 = arith.constant 0 : index
      %13 = vector.load %arg5[%c0_12, %c0_13] : memref<1x32xf32, #tpu.memory_space<vmem>>, vector<1x32xf32>
      %14 = vector.broadcast %13 : vector<1x32xf32> to vector<128x32xf32>
      %15 = arith.addf %12, %14 : vector<128x32xf32>
      %c0_14 = arith.constant 0 : index
      %c0_15 = arith.constant 0 : index
      %16 = vector.load %arg6[%c0_14, %c0_15] : memref<128x32xf32, #tpu.memory_space<vmem>>, vector<128x32xf32>
      %17 = arith.addf %15, %16 : vector<128x32xf32>
      %c0_16 = arith.constant 0 : index
      %c0_17 = arith.constant 0 : index
      %18 = vector.load %arg7[%c0_16, %c0_17] : memref<128x32xf32, #tpu.memory_space<vmem>>, vector<128x32xf32>
      tpu.vector_store %arg7[%c0_16, %c0_17], %17 {strides = array<i32>} : memref<128x32xf32, #tpu.memory_space<vmem>>, vector<128x32xf32>,
    } else {
    }
    return
  }
  func.func @transform_0(%arg0: i32, %arg1: i32, %arg2: i32) -> (i32, i32) {
    %c0_i32 = arith.constant 0 : i32
    return %arg0, %arg2 : i32, i32
  }
  func.func @transform_1(%arg0: i32, %arg1: i32, %arg2: i32) -> (i32, i32) {
    %c0_i32 = arith.constant 0 : i32
    return %arg2, %arg1 : i32, i32
  }
  func.func @transform_2(%arg0: i32, %arg1: i32, %arg2: i32) -> (i32, i32) {
    %c0_i32 = arith.constant 0 : i32
    %c0_i32_0 = arith.constant 0 : i32
    return %c0_i32, %arg1 : i32, i32
  }
  func.func @transform_3(%arg0: i32, %arg1: i32, %arg2: i32) -> (i32, i32) {
    %c0_i32 = arith.constant 0 : i32
    return %arg0, %arg1 : i32, i32
  }
  func.func @transform_4(%arg0: i32, %arg1: i32, %arg2: i32) -> (i32, i32) {
    %c0_i32 = arith.constant 0 : i32
    return %arg0, %arg1 : i32, i32
  }
}

module attributes {stable_mosaic.version = 11 : i64} {
  func.func @_mha_kernel(%arg0: i32, %arg1: i32, %arg2: i32, %arg3: memref<1x1x64x32xbf16, #tpu.memory_space<vmem>>, %arg4: memref<1x1x64x32xbf16, #tpu.memory_space<vmem>>, %arg5: memref<1x1x64x32xbf16, #tpu.memory_space<vmem>>, %arg6: memref<1x64x32xbf16, #tpu.memory_space<vmem>>, %arg7: memref<64x2xf32, #tpu.memory_space<vmem>>, %arg8: memref<64x2xf32, #tpu.memory_space<vmem>>, %arg9: memref<64x32xf32, #tpu.memory_space<vmem>>) attributes {dimension_semantics = [#tpu.dimension_semantics<parallel>, #tpu.dimension_semantics<parallel>, #tpu.dimension_semantics<arbitrary>], iteration_bounds = array<i64: 2, 1, 1>, scalar_prefetch = 0 : i64, scratch_operands = 3 : i64, tpu.core_type = #tpu.core_type<tc>, window_params = [{transform_indices = @transform_0, window_bounds = array<i64: 1, 1, 64, 32>}, {transform_indices = @transform_1, window_bounds = array<i64: 1, 1, 64, 32>}, {transform_indices = @transform_2, window_bounds = array<i64: 1, 1, 64, 32>}, {transform_indices = @transform_3, window_bounds = array<i64: 1, 64, 32>}]} {
    %c0_i32 = arith.constant 0 : i32
    %0 = arith.cmpi eq, %arg2, %c0_i32 : i32
    %1 = arith.extui %0 : i1 to i32
    %c0_i32_0 = arith.constant 0 : i32
    %2 = arith.cmpi ne, %1, %c0_i32_0 : i32
    scf.if %2 {
      %cst_44 = arith.constant 0xFF800000 : f32
      %70 = vector.broadcast %cst_44 : f32 to vector<64x2xf32>
      %c0_45 = arith.constant 0 : index
      %c0_46 = arith.constant 0 : index
      %71 = vector.load %arg7[%c0_45, %c0_46] : memref<64x2xf32, #tpu.memory_space<vmem>>, vector<64x2xf32>
      tpu.vector_store %arg7[%c0_45, %c0_46], %70 {strides = array<i32>} : memref<64x2xf32, #tpu.memory_space<vmem>>, vector<64x2xf32>,
      %cst_47 = arith.constant 0.000000e+00 : f32
      %72 = vector.broadcast %cst_47 : f32 to vector<64x2xf32>
      %c0_48 = arith.constant 0 : index
      %c0_49 = arith.constant 0 : index
      %73 = vector.load %arg8[%c0_48, %c0_49] : memref<64x2xf32, #tpu.memory_space<vmem>>, vector<64x2xf32>
      tpu.vector_store %arg8[%c0_48, %c0_49], %72 {strides = array<i32>} : memref<64x2xf32, #tpu.memory_space<vmem>>, vector<64x2xf32>,
      %cst_50 = arith.constant 0.000000e+00 : f32
      %74 = vector.broadcast %cst_50 : f32 to vector<64x32xf32>
      %c0_51 = arith.constant 0 : index
      %c0_52 = arith.constant 0 : index
      %75 = vector.load %arg9[%c0_51, %c0_52] : memref<64x32xf32, #tpu.memory_space<vmem>>, vector<64x32xf32>
      tpu.vector_store %arg9[%c0_51, %c0_52], %74 {strides = array<i32>} : memref<64x32xf32, #tpu.memory_space<vmem>>, vector<64x32xf32>,
    } else {
    }
    %c0 = arith.constant 0 : index
    %c0_1 = arith.constant 0 : index
    %c0_2 = arith.constant 0 : index
    %c0_3 = arith.constant 0 : index
    %3 = vector.load %arg3[%c0, %c0_1, %c0_2, %c0_3] : memref<1x1x64x32xbf16, #tpu.memory_space<vmem>>, vector<1x1x64x32xbf16>
    %4 = vector.shape_cast %3 : vector<1x1x64x32xbf16> to vector<64x32xbf16>
    %5 = arith.extf %4 : vector<64x32xbf16> to vector<64x32xf32>
    %cst = arith.constant 2.500000e-01 : f32
    %6 = vector.broadcast %cst : f32 to vector<64x32xf32>
    %7 = arith.mulf %5, %6 : vector<64x32xf32>
    %8 = arith.truncf %7 : vector<64x32xf32> to vector<64x32xbf16>
    %c0_4 = arith.constant 0 : index
    %c0_5 = arith.constant 0 : index
    %c0_6 = arith.constant 0 : index
    %c0_7 = arith.constant 0 : index
    %9 = vector.load %arg4[%c0_4, %c0_5, %c0_6, %c0_7] : memref<1x1x64x32xbf16, #tpu.memory_space<vmem>>, vector<1x1x64x32xbf16>
    %10 = vector.shape_cast %9 : vector<1x1x64x32xbf16> to vector<64x32xbf16>
    %c0_8 = arith.constant 0 : index
    %c0_9 = arith.constant 0 : index
    %c0_10 = arith.constant 0 : index
    %c0_11 = arith.constant 0 : index
    %11 = vector.load %arg5[%c0_8, %c0_9, %c0_10, %c0_11] : memref<1x1x64x32xbf16, #tpu.memory_space<vmem>>, vector<1x1x64x32xbf16>
    %12 = vector.shape_cast %11 : vector<1x1x64x32xbf16> to vector<64x32xbf16>
    %13 = vector.extract_strided_slice %8 {offsets = [0, 0], sizes = [64, 16], strides = [1, 1]} : vector<64x32xbf16> to vector<64x16xbf16>
    %14 = vector.extract_strided_slice %10 {offsets = [0, 0], sizes = [64, 16], strides = [1, 1]} : vector<64x32xbf16> to vector<64x16xbf16>
    %cst_12 = arith.constant dense<0.000000e+00> : vector<64x64xf32>
    %15 = tpu.matmul %13, %14, %cst_12 {dimension_numbers = #tpu.dot_dimension_numbers<[1], [1], [0], [0], [0, 0, 1, 0], [], []>} : vector<64x16xbf16>, vector<64x16xbf16>, vector<64x64xf32> -> vector<64x64xf32>
    %c0_13 = arith.constant 0 : index
    %c0_14 = arith.constant 0 : index
    %16 = vector.load %arg7[%c0_13, %c0_14] : memref<64x2xf32, #tpu.memory_space<vmem>>, vector<64x1xf32>
    %cst_15 = arith.constant dense<0xFF800000> : vector<64xf32>
    %17 = vector.multi_reduction <maximumf>, %15, %cst_15 [1] : vector<64x64xf32> to vector<64xf32>
    %18 = vector.shape_cast %17 : vector<64xf32> to vector<64x1xf32>
    %19 = arith.maximumf %16, %18 : vector<64x1xf32>
    %20 = arith.subf %16, %19 : vector<64x1xf32>
    %21 = math.exp %20 : vector<64x1xf32>
    %22 = vector.broadcast %19 : vector<64x1xf32> to vector<64x64xf32>
    %23 = arith.subf %15, %22 : vector<64x64xf32>
    %24 = math.exp %23 : vector<64x64xf32>
    %c0_16 = arith.constant 0 : index
    %c0_17 = arith.constant 0 : index
    %25 = vector.load %arg8[%c0_16, %c0_17] : memref<64x2xf32, #tpu.memory_space<vmem>>, vector<64x1xf32>
    %26 = arith.mulf %21, %25 : vector<64x1xf32>
    %cst_18 = arith.constant dense<0.000000e+00> : vector<64xf32>
    %27 = vector.multi_reduction <add>, %24, %cst_18 [1] : vector<64x64xf32> to vector<64xf32>
    %28 = vector.shape_cast %27 : vector<64xf32> to vector<64x1xf32>
    %29 = arith.addf %26, %28 : vector<64x1xf32>
    %c0_19 = arith.constant 0 : index
    %c0_20 = arith.constant 0 : index
    %30 = vector.load %arg8[%c0_19, %c0_20] : memref<64x2xf32, #tpu.memory_space<vmem>>, vector<64x1xf32>
    tpu.vector_store %arg8[%c0_19, %c0_20], %29 {strides = array<i32>} : memref<64x2xf32, #tpu.memory_space<vmem>>, vector<64x1xf32>,
    %31 = arith.truncf %24 : vector<64x64xf32> to vector<64x64xbf16>
    %32 = vector.extract_strided_slice %12 {offsets = [0, 0], sizes = [64, 16], strides = [1, 1]} : vector<64x32xbf16> to vector<64x16xbf16>
    %cst_21 = arith.constant dense<0.000000e+00> : vector<64x16xf32>
    %33 = tpu.matmul %31, %32, %cst_21 {dimension_numbers = #tpu.dot_dimension_numbers<[1], [0], [0], [1], [0, 0, 1, 1], [], []>} : vector<64x64xbf16>, vector<64x16xbf16>, vector<64x16xf32> -> vector<64x16xf32>
    %c0_22 = arith.constant 0 : index
    %c0_23 = arith.constant 0 : index
    %34 = vector.load %arg9[%c0_22, %c0_23] : memref<64x32xf32, #tpu.memory_space<vmem>>, vector<64x16xf32>
    %35 = vector.broadcast %21 : vector<64x1xf32> to vector<64x16xf32>
    %36 = arith.mulf %35, %34 : vector<64x16xf32>
    %37 = arith.addf %36, %33 : vector<64x16xf32>
    %c0_24 = arith.constant 0 : index
    %c0_25 = arith.constant 0 : index
    %38 = vector.load %arg9[%c0_24, %c0_25] : memref<64x32xf32, #tpu.memory_space<vmem>>, vector<64x16xf32>
    tpu.vector_store %arg9[%c0_24, %c0_25], %37 {strides = array<i32>} : memref<64x32xf32, #tpu.memory_space<vmem>>, vector<64x16xf32>,
    %c0_26 = arith.constant 0 : index
    %c0_27 = arith.constant 0 : index
    %39 = vector.load %arg7[%c0_26, %c0_27] : memref<64x2xf32, #tpu.memory_space<vmem>>, vector<64x1xf32>
    tpu.vector_store %arg7[%c0_26, %c0_27], %19 {strides = array<i32>} : memref<64x2xf32, #tpu.memory_space<vmem>>, vector<64x1xf32>,
    %40 = vector.extract_strided_slice %8 {offsets = [0, 16], sizes = [64, 16], strides = [1, 1]} : vector<64x32xbf16> to vector<64x16xbf16>
    %41 = vector.extract_strided_slice %10 {offsets = [0, 16], sizes = [64, 16], strides = [1, 1]} : vector<64x32xbf16> to vector<64x16xbf16>
    %cst_28 = arith.constant dense<0.000000e+00> : vector<64x64xf32>
    %42 = tpu.matmul %40, %41, %cst_28 {dimension_numbers = #tpu.dot_dimension_numbers<[1], [1], [0], [0], [0, 0, 1, 0], [], []>} : vector<64x16xbf16>, vector<64x16xbf16>, vector<64x64xf32> -> vector<64x64xf32>
    %c0_29 = arith.constant 0 : index
    %c1 = arith.constant 1 : index
    %43 = vector.load %arg7[%c0_29, %c1] : memref<64x2xf32, #tpu.memory_space<vmem>>, vector<64x1xf32>
    %cst_30 = arith.constant dense<0xFF800000> : vector<64xf32>
    %44 = vector.multi_reduction <maximumf>, %42, %cst_30 [1] : vector<64x64xf32> to vector<64xf32>
    %45 = vector.shape_cast %44 : vector<64xf32> to vector<64x1xf32>
    %46 = arith.maximumf %43, %45 : vector<64x1xf32>
    %47 = arith.subf %43, %46 : vector<64x1xf32>
    %48 = math.exp %47 : vector<64x1xf32>
    %49 = vector.broadcast %46 : vector<64x1xf32> to vector<64x64xf32>
    %50 = arith.subf %42, %49 : vector<64x64xf32>
    %51 = math.exp %50 : vector<64x64xf32>
    %c0_31 = arith.constant 0 : index
    %c1_32 = arith.constant 1 : index
    %52 = vector.load %arg8[%c0_31, %c1_32] : memref<64x2xf32, #tpu.memory_space<vmem>>, vector<64x1xf32>
    %53 = arith.mulf %48, %52 : vector<64x1xf32>
    %cst_33 = arith.constant dense<0.000000e+00> : vector<64xf32>
    %54 = vector.multi_reduction <add>, %51, %cst_33 [1] : vector<64x64xf32> to vector<64xf32>
    %55 = vector.shape_cast %54 : vector<64xf32> to vector<64x1xf32>
    %56 = arith.addf %53, %55 : vector<64x1xf32>
    %c0_34 = arith.constant 0 : index
    %c1_35 = arith.constant 1 : index
    %57 = vector.load %arg8[%c0_34, %c1_35] : memref<64x2xf32, #tpu.memory_space<vmem>>, vector<64x1xf32>
    tpu.vector_store %arg8[%c0_34, %c1_35], %56 {strides = array<i32>} : memref<64x2xf32, #tpu.memory_space<vmem>>, vector<64x1xf32>,
    %58 = arith.truncf %51 : vector<64x64xf32> to vector<64x64xbf16>
    %59 = vector.extract_strided_slice %12 {offsets = [0, 16], sizes = [64, 16], strides = [1, 1]} : vector<64x32xbf16> to vector<64x16xbf16>
    %cst_36 = arith.constant dense<0.000000e+00> : vector<64x16xf32>
    %60 = tpu.matmul %58, %59, %cst_36 {dimension_numbers = #tpu.dot_dimension_numbers<[1], [0], [0], [1], [0, 0, 1, 1], [], []>} : vector<64x64xbf16>, vector<64x16xbf16>, vector<64x16xf32> -> vector<64x16xf32>
    %c0_37 = arith.constant 0 : index
    %c16 = arith.constant 16 : index
    %61 = vector.load %arg9[%c0_37, %c16] : memref<64x32xf32, #tpu.memory_space<vmem>>, vector<64x16xf32>
    %62 = vector.broadcast %48 : vector<64x1xf32> to vector<64x16xf32>
    %63 = arith.mulf %62, %61 : vector<64x16xf32>
    %64 = arith.addf %63, %60 : vector<64x16xf32>
    %c0_38 = arith.constant 0 : index
    %c16_39 = arith.constant 16 : index
    %65 = vector.load %arg9[%c0_38, %c16_39] : memref<64x32xf32, #tpu.memory_space<vmem>>, vector<64x16xf32>
    tpu.vector_store %arg9[%c0_38, %c16_39], %64 {strides = array<i32>} : memref<64x32xf32, #tpu.memory_space<vmem>>, vector<64x16xf32>,
    %c0_40 = arith.constant 0 : index
    %c1_41 = arith.constant 1 : index
    %66 = vector.load %arg7[%c0_40, %c1_41] : memref<64x2xf32, #tpu.memory_space<vmem>>, vector<64x1xf32>
    tpu.vector_store %arg7[%c0_40, %c1_41], %46 {strides = array<i32>} : memref<64x2xf32, #tpu.memory_space<vmem>>, vector<64x1xf32>,
    %c0_i32_42 = arith.constant 0 : i32
    %67 = arith.cmpi eq, %arg2, %c0_i32_42 : i32
    %68 = arith.extui %67 : i1 to i32
    %c0_i32_43 = arith.constant 0 : i32
    %69 = arith.cmpi ne, %68, %c0_i32_43 : i32
    scf.if %69 {
      %c0_44 = arith.constant 0 : index
      %c0_45 = arith.constant 0 : index
      %70 = vector.load %arg8[%c0_44, %c0_45] : memref<64x2xf32, #tpu.memory_space<vmem>>, vector<64x1xf32>
      %71 = tpu.reciprocal %70 {approx = true} : vector<64x1xf32> -> vector<64x1xf32>
      %c0_46 = arith.constant 0 : index
      %c0_47 = arith.constant 0 : index
      %72 = vector.load %arg9[%c0_46, %c0_47] : memref<64x32xf32, #tpu.memory_space<vmem>>, vector<64x16xf32>
      %73 = vector.broadcast %71 : vector<64x1xf32> to vector<64x16xf32>
      %74 = arith.mulf %72, %73 : vector<64x16xf32>
      %c0_48 = arith.constant 0 : index
      %c1_49 = arith.constant 1 : index
      %75 = vector.load %arg8[%c0_48, %c1_49] : memref<64x2xf32, #tpu.memory_space<vmem>>, vector<64x1xf32>
      %76 = tpu.reciprocal %75 {approx = true} : vector<64x1xf32> -> vector<64x1xf32>
      %c0_50 = arith.constant 0 : index
      %c16_51 = arith.constant 16 : index
      %77 = vector.load %arg9[%c0_50, %c16_51] : memref<64x32xf32, #tpu.memory_space<vmem>>, vector<64x16xf32>
      %78 = vector.broadcast %76 : vector<64x1xf32> to vector<64x16xf32>
      %79 = arith.mulf %77, %78 : vector<64x16xf32>
      %80 = tpu.concatenate %74, %79 in 1 : vector<64x16xf32>, vector<64x16xf32> -> vector<64x32xf32>
      %81 = arith.truncf %80 : vector<64x32xf32> to vector<64x32xbf16>
      %c0_52 = arith.constant 0 : index
      %c0_53 = arith.constant 0 : index
      %c0_54 = arith.constant 0 : index
      %82 = vector.load %arg6[%c0_52, %c0_53, %c0_54] : memref<1x64x32xbf16, #tpu.memory_space<vmem>>, vector<1x64x32xbf16>
      %83 = vector.shape_cast %82 : vector<1x64x32xbf16> to vector<64x32xbf16>
      %84 = vector.shape_cast %81 : vector<64x32xbf16> to vector<1x64x32xbf16>
      tpu.vector_store %arg6[%c0_52, %c0_53, %c0_54], %84 {strides = array<i32>} : memref<1x64x32xbf16, #tpu.memory_space<vmem>>, vector<1x64x32xbf16>,
    } else {
    }
    return
  }
  func.func @transform_0(%arg0: i32, %arg1: i32, %arg2: i32) -> (i32, i32, i32, i32) {
    %c0_i32 = arith.constant 0 : i32
    %c0_i32_0 = arith.constant 0 : i32
    %c0_i32_1 = arith.constant 0 : i32
    return %c0_i32, %arg0, %arg1, %c0_i32_0 : i32, i32, i32, i32
  }
  func.func @transform_1(%arg0: i32, %arg1: i32, %arg2: i32) -> (i32, i32, i32, i32) {
    %c1_i32 = arith.constant 1 : i32
    %c0_i32 = arith.constant 0 : i32
    %c0_i32_0 = arith.constant 0 : i32
    return %c1_i32, %arg0, %arg2, %c0_i32 : i32, i32, i32, i32
  }
  func.func @transform_2(%arg0: i32, %arg1: i32, %arg2: i32) -> (i32, i32, i32, i32) {
    %c2_i32 = arith.constant 2 : i32
    %c0_i32 = arith.constant 0 : i32
    %c0_i32_0 = arith.constant 0 : i32
    return %c2_i32, %arg0, %arg2, %c0_i32 : i32, i32, i32, i32
  }
  func.func @transform_3(%arg0: i32, %arg1: i32, %arg2: i32) -> (i32, i32, i32) {
    %c0_i32 = arith.constant 0 : i32
    %c0_i32_0 = arith.constant 0 : i32
    return %arg0, %arg1, %c0_i32 : i32, i32, i32
  }
}

module attributes {stable_mosaic.version = 11 : i64} {
  func.func @_ln_proj_kernel(%arg0: i32, %arg1: i32, %arg2: memref<128x32xf32, #tpu.memory_space<vmem>>, %arg3: memref<1x32xf32, #tpu.memory_space<vmem>>, %arg4: memref<1x32xf32, #tpu.memory_space<vmem>>, %arg5: memref<1x32x32xbf16, #tpu.memory_space<vmem>>, %arg6: memref<1x128x32xbf16, #tpu.memory_space<vmem>>) attributes {dimension_semantics = [#tpu.dimension_semantics<parallel>, #tpu.dimension_semantics<arbitrary>], iteration_bounds = array<i64: 1, 3>, scalar_prefetch = 0 : i64, scratch_operands = 0 : i64, tpu.core_type = #tpu.core_type<tc>, window_params = [{transform_indices = @transform_0, window_bounds = array<i64: 128, 32>}, {pipeline_mode = #tpu.pipeline_mode<synchronous>, transform_indices = @transform_1, window_bounds = array<i64: 1, 32>}, {pipeline_mode = #tpu.pipeline_mode<synchronous>, transform_indices = @transform_2, window_bounds = array<i64: 1, 32>}, {transform_indices = @transform_3, window_bounds = array<i64: 1, 32, 32>}, {transform_indices = @transform_4, window_bounds = array<i64: 1, 128, 32>}]} {
    %c0 = arith.constant 0 : index
    %c0_0 = arith.constant 0 : index
    %0 = vector.load %arg2[%c0, %c0_0] : memref<128x32xf32, #tpu.memory_space<vmem>>, vector<128x32xf32>
    %cst = arith.constant dense<0.000000e+00> : vector<128xf32>
    %1 = vector.multi_reduction <add>, %0, %cst [1] : vector<128x32xf32> to vector<128xf32>
    %2 = vector.shape_cast %1 : vector<128xf32> to vector<128x1xf32>
    %cst_1 = arith.constant 3.200000e+01 : f32
    %3 = vector.broadcast %cst_1 : f32 to vector<128x1xf32>
    %4 = arith.divf %2, %3 : vector<128x1xf32>
    %5 = vector.broadcast %4 : vector<128x1xf32> to vector<128x32xf32>
    %6 = arith.subf %0, %5 : vector<128x32xf32>
    %7 = arith.mulf %6, %6 : vector<128x32xf32>
    %cst_2 = arith.constant dense<0.000000e+00> : vector<128xf32>
    %8 = vector.multi_reduction <add>, %7, %cst_2 [1] : vector<128x32xf32> to vector<128xf32>
    %9 = vector.shape_cast %8 : vector<128xf32> to vector<128x1xf32>
    %cst_3 = arith.constant 3.200000e+01 : f32
    %10 = vector.broadcast %cst_3 : f32 to vector<128x1xf32>
    %11 = arith.divf %9, %10 : vector<128x1xf32>
    %cst_4 = arith.constant 9.99999974E-6 : f32
    %12 = vector.broadcast %cst_4 : f32 to vector<128x1xf32>
    %13 = arith.addf %11, %12 : vector<128x1xf32>
    %14 = math.rsqrt %13 : vector<128x1xf32>
    %15 = vector.broadcast %14 : vector<128x1xf32> to vector<128x32xf32>
    %16 = arith.mulf %6, %15 : vector<128x32xf32>
    %c0_5 = arith.constant 0 : index
    %c0_6 = arith.constant 0 : index
    %17 = vector.load %arg4[%c0_5, %c0_6] : memref<1x32xf32, #tpu.memory_space<vmem>>, vector<1x32xf32>
    %18 = vector.broadcast %17 : vector<1x32xf32> to vector<128x32xf32>
    %19 = arith.addf %16, %18 : vector<128x32xf32>
    %c0_7 = arith.constant 0 : index
    %c0_8 = arith.constant 0 : index
    %20 = vector.load %arg3[%c0_7, %c0_8] : memref<1x32xf32, #tpu.memory_space<vmem>>, vector<1x32xf32>
    %21 = vector.broadcast %20 : vector<1x32xf32> to vector<128x32xf32>
    %22 = arith.mulf %19, %21 : vector<128x32xf32>
    %23 = arith.truncf %22 : vector<128x32xf32> to vector<128x32xbf16>
    %c0_9 = arith.constant 0 : index
    %c0_10 = arith.constant 0 : index
    %c0_11 = arith.constant 0 : index
    %24 = vector.load %arg5[%c0_9, %c0_10, %c0_11] : memref<1x32x32xbf16, #tpu.memory_space<vmem>>, vector<1x32x32xbf16>
    %25 = vector.shape_cast %24 : vector<1x32x32xbf16> to vector<32x32xbf16>
    %cst_12 = arith.constant dense<0.000000e+00> : vector<128x32xf32>
    %26 = tpu.matmul %23, %25, %cst_12 {dimension_numbers = #tpu.dot_dimension_numbers<[1], [0], [0], [1], [0, 0, 1, 1], [], []>} : vector<128x32xbf16>, vector<32x32xbf16>, vector<128x32xf32> -> vector<128x32xf32>
    %27 = arith.truncf %26 : vector<128x32xf32> to vector<128x32xbf16>
    %c0_13 = arith.constant 0 : index
    %c0_14 = arith.constant 0 : index
    %c0_15 = arith.constant 0 : index
    %28 = vector.load %arg6[%c0_13, %c0_14, %c0_15] : memref<1x128x32xbf16, #tpu.memory_space<vmem>>, vector<1x128x32xbf16>
    %29 = vector.shape_cast %28 : vector<1x128x32xbf16> to vector<128x32xbf16>
    %30 = vector.shape_cast %27 : vector<128x32xbf16> to vector<1x128x32xbf16>
    tpu.vector_store %arg6[%c0_13, %c0_14, %c0_15], %30 {strides = array<i32>} : memref<1x128x32xbf16, #tpu.memory_space<vmem>>, vector<1x128x32xbf16>,
    return
  }
  func.func @transform_0(%arg0: i32, %arg1: i32) -> (i32, i32) {
    %c0_i32 = arith.constant 0 : i32
    %c0_i32_0 = arith.constant 0 : i32
    return %arg0, %c0_i32 : i32, i32
  }
  func.func @transform_1(%arg0: i32, %arg1: i32) -> (i32, i32) {
    %c0_i32 = arith.constant 0 : i32
    %c0_i32_0 = arith.constant 0 : i32
    %c0_i32_1 = arith.constant 0 : i32
    return %c0_i32, %c0_i32_0 : i32, i32
  }
  func.func @transform_2(%arg0: i32, %arg1: i32) -> (i32, i32) {
    %c0_i32 = arith.constant 0 : i32
    %c0_i32_0 = arith.constant 0 : i32
    %c0_i32_1 = arith.constant 0 : i32
    return %c0_i32, %c0_i32_0 : i32, i32
  }
  func.func @transform_3(%arg0: i32, %arg1: i32) -> (i32, i32, i32) {
    %c0_i32 = arith.constant 0 : i32
    %c0_i32_0 = arith.constant 0 : i32
    %c0_i32_1 = arith.constant 0 : i32
    return %arg1, %c0_i32, %c0_i32_0 : i32, i32, i32
  }
  func.func @transform_4(%arg0: i32, %arg1: i32) -> (i32, i32, i32) {
    %c0_i32 = arith.constant 0 : i32
    %c0_i32_0 = arith.constant 0 : i32
    return %arg1, %arg0, %c0_i32 : i32, i32, i32
  }
}

module attributes {stable_mosaic.version = 11 : i64} {
  func.func @_ln_proj_kernel(%arg0: i32, %arg1: i32, %arg2: memref<128x32xf32, #tpu.memory_space<vmem>>, %arg3: memref<1x32xf32, #tpu.memory_space<vmem>>, %arg4: memref<1x32xf32, #tpu.memory_space<vmem>>, %arg5: memref<1x32x32xbf16, #tpu.memory_space<vmem>>, %arg6: memref<1x128x32xbf16, #tpu.memory_space<vmem>>) attributes {dimension_semantics = [#tpu.dimension_semantics<parallel>, #tpu.dimension_semantics<arbitrary>], iteration_bounds = array<i64: 1, 1>, scalar_prefetch = 0 : i64, scratch_operands = 0 : i64, tpu.core_type = #tpu.core_type<tc>, window_params = [{transform_indices = @transform_0, window_bounds = array<i64: 128, 32>}, {pipeline_mode = #tpu.pipeline_mode<synchronous>, transform_indices = @transform_1, window_bounds = array<i64: 1, 32>}, {pipeline_mode = #tpu.pipeline_mode<synchronous>, transform_indices = @transform_2, window_bounds = array<i64: 1, 32>}, {transform_indices = @transform_3, window_bounds = array<i64: 1, 32, 32>}, {transform_indices = @transform_4, window_bounds = array<i64: 1, 128, 32>}]} {
    %c0 = arith.constant 0 : index
    %c0_0 = arith.constant 0 : index
    %0 = vector.load %arg2[%c0, %c0_0] : memref<128x32xf32, #tpu.memory_space<vmem>>, vector<128x32xf32>
    %cst = arith.constant dense<0.000000e+00> : vector<128xf32>
    %1 = vector.multi_reduction <add>, %0, %cst [1] : vector<128x32xf32> to vector<128xf32>
    %2 = vector.shape_cast %1 : vector<128xf32> to vector<128x1xf32>
    %cst_1 = arith.constant 3.200000e+01 : f32
    %3 = vector.broadcast %cst_1 : f32 to vector<128x1xf32>
    %4 = arith.divf %2, %3 : vector<128x1xf32>
    %5 = vector.broadcast %4 : vector<128x1xf32> to vector<128x32xf32>
    %6 = arith.subf %0, %5 : vector<128x32xf32>
    %7 = arith.mulf %6, %6 : vector<128x32xf32>
    %cst_2 = arith.constant dense<0.000000e+00> : vector<128xf32>
    %8 = vector.multi_reduction <add>, %7, %cst_2 [1] : vector<128x32xf32> to vector<128xf32>
    %9 = vector.shape_cast %8 : vector<128xf32> to vector<128x1xf32>
    %cst_3 = arith.constant 3.200000e+01 : f32
    %10 = vector.broadcast %cst_3 : f32 to vector<128x1xf32>
    %11 = arith.divf %9, %10 : vector<128x1xf32>
    %cst_4 = arith.constant 9.99999974E-6 : f32
    %12 = vector.broadcast %cst_4 : f32 to vector<128x1xf32>
    %13 = arith.addf %11, %12 : vector<128x1xf32>
    %14 = math.rsqrt %13 : vector<128x1xf32>
    %15 = vector.broadcast %14 : vector<128x1xf32> to vector<128x32xf32>
    %16 = arith.mulf %6, %15 : vector<128x32xf32>
    %c0_5 = arith.constant 0 : index
    %c0_6 = arith.constant 0 : index
    %17 = vector.load %arg4[%c0_5, %c0_6] : memref<1x32xf32, #tpu.memory_space<vmem>>, vector<1x32xf32>
    %18 = vector.broadcast %17 : vector<1x32xf32> to vector<128x32xf32>
    %19 = arith.addf %16, %18 : vector<128x32xf32>
    %c0_7 = arith.constant 0 : index
    %c0_8 = arith.constant 0 : index
    %20 = vector.load %arg3[%c0_7, %c0_8] : memref<1x32xf32, #tpu.memory_space<vmem>>, vector<1x32xf32>
    %21 = vector.broadcast %20 : vector<1x32xf32> to vector<128x32xf32>
    %22 = arith.mulf %19, %21 : vector<128x32xf32>
    %23 = arith.truncf %22 : vector<128x32xf32> to vector<128x32xbf16>
    %c0_9 = arith.constant 0 : index
    %c0_10 = arith.constant 0 : index
    %c0_11 = arith.constant 0 : index
    %24 = vector.load %arg5[%c0_9, %c0_10, %c0_11] : memref<1x32x32xbf16, #tpu.memory_space<vmem>>, vector<1x32x32xbf16>
    %25 = vector.shape_cast %24 : vector<1x32x32xbf16> to vector<32x32xbf16>
    %cst_12 = arith.constant dense<0.000000e+00> : vector<128x32xf32>
    %26 = tpu.matmul %23, %25, %cst_12 {dimension_numbers = #tpu.dot_dimension_numbers<[1], [0], [0], [1], [0, 0, 1, 1], [], []>} : vector<128x32xbf16>, vector<32x32xbf16>, vector<128x32xf32> -> vector<128x32xf32>
    %27 = arith.truncf %26 : vector<128x32xf32> to vector<128x32xbf16>
    %c0_13 = arith.constant 0 : index
    %c0_14 = arith.constant 0 : index
    %c0_15 = arith.constant 0 : index
    %28 = vector.load %arg6[%c0_13, %c0_14, %c0_15] : memref<1x128x32xbf16, #tpu.memory_space<vmem>>, vector<1x128x32xbf16>
    %29 = vector.shape_cast %28 : vector<1x128x32xbf16> to vector<128x32xbf16>
    %30 = vector.shape_cast %27 : vector<128x32xbf16> to vector<1x128x32xbf16>
    tpu.vector_store %arg6[%c0_13, %c0_14, %c0_15], %30 {strides = array<i32>} : memref<1x128x32xbf16, #tpu.memory_space<vmem>>, vector<1x128x32xbf16>,
    return
  }
  func.func @transform_0(%arg0: i32, %arg1: i32) -> (i32, i32) {
    %c0_i32 = arith.constant 0 : i32
    %c0_i32_0 = arith.constant 0 : i32
    return %arg0, %c0_i32 : i32, i32
  }
  func.func @transform_1(%arg0: i32, %arg1: i32) -> (i32, i32) {
    %c0_i32 = arith.constant 0 : i32
    %c0_i32_0 = arith.constant 0 : i32
    %c0_i32_1 = arith.constant 0 : i32
    return %c0_i32, %c0_i32_0 : i32, i32
  }
  func.func @transform_2(%arg0: i32, %arg1: i32) -> (i32, i32) {
    %c0_i32 = arith.constant 0 : i32
    %c0_i32_0 = arith.constant 0 : i32
    %c0_i32_1 = arith.constant 0 : i32
    return %c0_i32, %c0_i32_0 : i32, i32
  }
  func.func @transform_3(%arg0: i32, %arg1: i32) -> (i32, i32, i32) {
    %c0_i32 = arith.constant 0 : i32
    %c0_i32_0 = arith.constant 0 : i32
    %c0_i32_1 = arith.constant 0 : i32
    return %arg1, %c0_i32, %c0_i32_0 : i32, i32, i32
  }
  func.func @transform_4(%arg0: i32, %arg1: i32) -> (i32, i32, i32) {
    %c0_i32 = arith.constant 0 : i32
    %c0_i32_0 = arith.constant 0 : i32
    return %arg1, %arg0, %c0_i32 : i32, i32, i32
  }
}

module attributes {stable_mosaic.version = 11 : i64} {
  func.func @_ln_proj_kernel(%arg0: i32, %arg1: i32, %arg2: memref<16x64xf32, #tpu.memory_space<vmem>>, %arg3: memref<1x64x32xbf16, #tpu.memory_space<vmem>>, %arg4: memref<1x16x32xbf16, #tpu.memory_space<vmem>>) attributes {dimension_semantics = [#tpu.dimension_semantics<parallel>, #tpu.dimension_semantics<arbitrary>], iteration_bounds = array<i64: 1, 2>, scalar_prefetch = 0 : i64, scratch_operands = 0 : i64, tpu.core_type = #tpu.core_type<tc>, window_params = [{transform_indices = @transform_0, window_bounds = array<i64: 16, 64>}, {transform_indices = @transform_1, window_bounds = array<i64: 1, 64, 32>}, {transform_indices = @transform_2, window_bounds = array<i64: 1, 16, 32>}]} {
    %c0 = arith.constant 0 : index
    %c0_0 = arith.constant 0 : index
    %0 = vector.load %arg2[%c0, %c0_0] : memref<16x64xf32, #tpu.memory_space<vmem>>, vector<16x64xf32>
    %1 = arith.truncf %0 : vector<16x64xf32> to vector<16x64xbf16>
    %c0_1 = arith.constant 0 : index
    %c0_2 = arith.constant 0 : index
    %c0_3 = arith.constant 0 : index
    %2 = vector.load %arg3[%c0_1, %c0_2, %c0_3] : memref<1x64x32xbf16, #tpu.memory_space<vmem>>, vector<1x64x32xbf16>
    %3 = vector.shape_cast %2 : vector<1x64x32xbf16> to vector<64x32xbf16>
    %cst = arith.constant dense<0.000000e+00> : vector<16x32xf32>
    %4 = tpu.matmul %1, %3, %cst {dimension_numbers = #tpu.dot_dimension_numbers<[1], [0], [0], [1], [0, 0, 1, 1], [], []>} : vector<16x64xbf16>, vector<64x32xbf16>, vector<16x32xf32> -> vector<16x32xf32>
    %5 = arith.truncf %4 : vector<16x32xf32> to vector<16x32xbf16>
    %c0_4 = arith.constant 0 : index
    %c0_5 = arith.constant 0 : index
    %c0_6 = arith.constant 0 : index
    %6 = vector.load %arg4[%c0_4, %c0_5, %c0_6] : memref<1x16x32xbf16, #tpu.memory_space<vmem>>, vector<1x16x32xbf16>
    %7 = vector.shape_cast %6 : vector<1x16x32xbf16> to vector<16x32xbf16>
    %8 = vector.shape_cast %5 : vector<16x32xbf16> to vector<1x16x32xbf16>
    tpu.vector_store %arg4[%c0_4, %c0_5, %c0_6], %8 {strides = array<i32>} : memref<1x16x32xbf16, #tpu.memory_space<vmem>>, vector<1x16x32xbf16>,
    return
  }
  func.func @transform_0(%arg0: i32, %arg1: i32) -> (i32, i32) {
    %c0_i32 = arith.constant 0 : i32
    %c0_i32_0 = arith.constant 0 : i32
    return %arg0, %c0_i32 : i32, i32
  }
  func.func @transform_1(%arg0: i32, %arg1: i32) -> (i32, i32, i32) {
    %c0_i32 = arith.constant 0 : i32
    %c0_i32_0 = arith.constant 0 : i32
    %c0_i32_1 = arith.constant 0 : i32
    return %arg1, %c0_i32, %c0_i32_0 : i32, i32, i32
  }
  func.func @transform_2(%arg0: i32, %arg1: i32) -> (i32, i32, i32) {
    %c0_i32 = arith.constant 0 : i32
    %c0_i32_0 = arith.constant 0 : i32
    return %arg1, %arg0, %c0_i32 : i32, i32, i32
  }
}

module attributes {stable_mosaic.version = 11 : i64} {
  func.func @_mha_kernel(%arg0: i32, %arg1: i32, %arg2: i32, %arg3: memref<1x1x64x32xbf16, #tpu.memory_space<vmem>>, %arg4: memref<1x1x8x32xbf16, #tpu.memory_space<vmem>>, %arg5: memref<1x1x8x32xbf16, #tpu.memory_space<vmem>>, %arg6: memref<1x64x32xbf16, #tpu.memory_space<vmem>>, %arg7: memref<64x2xf32, #tpu.memory_space<vmem>>, %arg8: memref<64x2xf32, #tpu.memory_space<vmem>>, %arg9: memref<64x32xf32, #tpu.memory_space<vmem>>) attributes {dimension_semantics = [#tpu.dimension_semantics<parallel>, #tpu.dimension_semantics<parallel>, #tpu.dimension_semantics<arbitrary>], iteration_bounds = array<i64: 2, 1, 1>, scalar_prefetch = 0 : i64, scratch_operands = 3 : i64, tpu.core_type = #tpu.core_type<tc>, window_params = [{transform_indices = @transform_0, window_bounds = array<i64: 1, 1, 64, 32>}, {transform_indices = @transform_1, window_bounds = array<i64: 1, 1, 8, 32>}, {transform_indices = @transform_2, window_bounds = array<i64: 1, 1, 8, 32>}, {transform_indices = @transform_3, window_bounds = array<i64: 1, 64, 32>}]} {
    %c0_i32 = arith.constant 0 : i32
    %0 = arith.cmpi eq, %arg2, %c0_i32 : i32
    %1 = arith.extui %0 : i1 to i32
    %c0_i32_0 = arith.constant 0 : i32
    %2 = arith.cmpi ne, %1, %c0_i32_0 : i32
    scf.if %2 {
      %cst_44 = arith.constant 0xFF800000 : f32
      %70 = vector.broadcast %cst_44 : f32 to vector<64x2xf32>
      %c0_45 = arith.constant 0 : index
      %c0_46 = arith.constant 0 : index
      %71 = vector.load %arg7[%c0_45, %c0_46] : memref<64x2xf32, #tpu.memory_space<vmem>>, vector<64x2xf32>
      tpu.vector_store %arg7[%c0_45, %c0_46], %70 {strides = array<i32>} : memref<64x2xf32, #tpu.memory_space<vmem>>, vector<64x2xf32>,
      %cst_47 = arith.constant 0.000000e+00 : f32
      %72 = vector.broadcast %cst_47 : f32 to vector<64x2xf32>
      %c0_48 = arith.constant 0 : index
      %c0_49 = arith.constant 0 : index
      %73 = vector.load %arg8[%c0_48, %c0_49] : memref<64x2xf32, #tpu.memory_space<vmem>>, vector<64x2xf32>
      tpu.vector_store %arg8[%c0_48, %c0_49], %72 {strides = array<i32>} : memref<64x2xf32, #tpu.memory_space<vmem>>, vector<64x2xf32>,
      %cst_50 = arith.constant 0.000000e+00 : f32
      %74 = vector.broadcast %cst_50 : f32 to vector<64x32xf32>
      %c0_51 = arith.constant 0 : index
      %c0_52 = arith.constant 0 : index
      %75 = vector.load %arg9[%c0_51, %c0_52] : memref<64x32xf32, #tpu.memory_space<vmem>>, vector<64x32xf32>
      tpu.vector_store %arg9[%c0_51, %c0_52], %74 {strides = array<i32>} : memref<64x32xf32, #tpu.memory_space<vmem>>, vector<64x32xf32>,
    } else {
    }
    %c0 = arith.constant 0 : index
    %c0_1 = arith.constant 0 : index
    %c0_2 = arith.constant 0 : index
    %c0_3 = arith.constant 0 : index
    %3 = vector.load %arg3[%c0, %c0_1, %c0_2, %c0_3] : memref<1x1x64x32xbf16, #tpu.memory_space<vmem>>, vector<1x1x64x32xbf16>
    %4 = vector.shape_cast %3 : vector<1x1x64x32xbf16> to vector<64x32xbf16>
    %5 = arith.extf %4 : vector<64x32xbf16> to vector<64x32xf32>
    %cst = arith.constant 2.500000e-01 : f32
    %6 = vector.broadcast %cst : f32 to vector<64x32xf32>
    %7 = arith.mulf %5, %6 : vector<64x32xf32>
    %8 = arith.truncf %7 : vector<64x32xf32> to vector<64x32xbf16>
    %c0_4 = arith.constant 0 : index
    %c0_5 = arith.constant 0 : index
    %c0_6 = arith.constant 0 : index
    %c0_7 = arith.constant 0 : index
    %9 = vector.load %arg4[%c0_4, %c0_5, %c0_6, %c0_7] : memref<1x1x8x32xbf16, #tpu.memory_space<vmem>>, vector<1x1x8x32xbf16>
    %10 = vector.shape_cast %9 : vector<1x1x8x32xbf16> to vector<8x32xbf16>
    %c0_8 = arith.constant 0 : index
    %c0_9 = arith.constant 0 : index
    %c0_10 = arith.constant 0 : index
    %c0_11 = arith.constant 0 : index
    %11 = vector.load %arg5[%c0_8, %c0_9, %c0_10, %c0_11] : memref<1x1x8x32xbf16, #tpu.memory_space<vmem>>, vector<1x1x8x32xbf16>
    %12 = vector.shape_cast %11 : vector<1x1x8x32xbf16> to vector<8x32xbf16>
    %13 = vector.extract_strided_slice %8 {offsets = [0, 0], sizes = [64, 16], strides = [1, 1]} : vector<64x32xbf16> to vector<64x16xbf16>
    %14 = vector.extract_strided_slice %10 {offsets = [0, 0], sizes = [8, 16], strides = [1, 1]} : vector<8x32xbf16> to vector<8x16xbf16>
    %cst_12 = arith.constant dense<0.000000e+00> : vector<64x8xf32>
    %15 = tpu.matmul %13, %14, %cst_12 {dimension_numbers = #tpu.dot_dimension_numbers<[1], [1], [0], [0], [0, 0, 1, 0], [], []>} : vector<64x16xbf16>, vector<8x16xbf16>, vector<64x8xf32> -> vector<64x8xf32>
    %c0_13 = arith.constant 0 : index
    %c0_14 = arith.constant 0 : index
    %16 = vector.load %arg7[%c0_13, %c0_14] : memref<64x2xf32, #tpu.memory_space<vmem>>, vector<64x1xf32>
    %cst_15 = arith.constant dense<0xFF800000> : vector<64xf32>
    %17 = vector.multi_reduction <maximumf>, %15, %cst_15 [1] : vector<64x8xf32> to vector<64xf32>
    %18 = vector.shape_cast %17 : vector<64xf32> to vector<64x1xf32>
    %19 = arith.maximumf %16, %18 : vector<64x1xf32>
    %20 = arith.subf %16, %19 : vector<64x1xf32>
    %21 = math.exp %20 : vector<64x1xf32>
    %22 = vector.broadcast %19 : vector<64x1xf32> to vector<64x8xf32>
    %23 = arith.subf %15, %22 : vector<64x8xf32>
    %24 = math.exp %23 : vector<64x8xf32>
    %c0_16 = arith.constant 0 : index
    %c0_17 = arith.constant 0 : index
    %25 = vector.load %arg8[%c0_16, %c0_17] : memref<64x2xf32, #tpu.memory_space<vmem>>, vector<64x1xf32>
    %26 = arith.mulf %21, %25 : vector<64x1xf32>
    %cst_18 = arith.constant dense<0.000000e+00> : vector<64xf32>
    %27 = vector.multi_reduction <add>, %24, %cst_18 [1] : vector<64x8xf32> to vector<64xf32>
    %28 = vector.shape_cast %27 : vector<64xf32> to vector<64x1xf32>
    %29 = arith.addf %26, %28 : vector<64x1xf32>
    %c0_19 = arith.constant 0 : index
    %c0_20 = arith.constant 0 : index
    %30 = vector.load %arg8[%c0_19, %c0_20] : memref<64x2xf32, #tpu.memory_space<vmem>>, vector<64x1xf32>
    tpu.vector_store %arg8[%c0_19, %c0_20], %29 {strides = array<i32>} : memref<64x2xf32, #tpu.memory_space<vmem>>, vector<64x1xf32>,
    %31 = arith.truncf %24 : vector<64x8xf32> to vector<64x8xbf16>
    %32 = vector.extract_strided_slice %12 {offsets = [0, 0], sizes = [8, 16], strides = [1, 1]} : vector<8x32xbf16> to vector<8x16xbf16>
    %cst_21 = arith.constant dense<0.000000e+00> : vector<64x16xf32>
    %33 = tpu.matmul %31, %32, %cst_21 {dimension_numbers = #tpu.dot_dimension_numbers<[1], [0], [0], [1], [0, 0, 1, 1], [], []>} : vector<64x8xbf16>, vector<8x16xbf16>, vector<64x16xf32> -> vector<64x16xf32>
    %c0_22 = arith.constant 0 : index
    %c0_23 = arith.constant 0 : index
    %34 = vector.load %arg9[%c0_22, %c0_23] : memref<64x32xf32, #tpu.memory_space<vmem>>, vector<64x16xf32>
    %35 = vector.broadcast %21 : vector<64x1xf32> to vector<64x16xf32>
    %36 = arith.mulf %35, %34 : vector<64x16xf32>
    %37 = arith.addf %36, %33 : vector<64x16xf32>
    %c0_24 = arith.constant 0 : index
    %c0_25 = arith.constant 0 : index
    %38 = vector.load %arg9[%c0_24, %c0_25] : memref<64x32xf32, #tpu.memory_space<vmem>>, vector<64x16xf32>
    tpu.vector_store %arg9[%c0_24, %c0_25], %37 {strides = array<i32>} : memref<64x32xf32, #tpu.memory_space<vmem>>, vector<64x16xf32>,
    %c0_26 = arith.constant 0 : index
    %c0_27 = arith.constant 0 : index
    %39 = vector.load %arg7[%c0_26, %c0_27] : memref<64x2xf32, #tpu.memory_space<vmem>>, vector<64x1xf32>
    tpu.vector_store %arg7[%c0_26, %c0_27], %19 {strides = array<i32>} : memref<64x2xf32, #tpu.memory_space<vmem>>, vector<64x1xf32>,
    %40 = vector.extract_strided_slice %8 {offsets = [0, 16], sizes = [64, 16], strides = [1, 1]} : vector<64x32xbf16> to vector<64x16xbf16>
    %41 = vector.extract_strided_slice %10 {offsets = [0, 16], sizes = [8, 16], strides = [1, 1]} : vector<8x32xbf16> to vector<8x16xbf16>
    %cst_28 = arith.constant dense<0.000000e+00> : vector<64x8xf32>
    %42 = tpu.matmul %40, %41, %cst_28 {dimension_numbers = #tpu.dot_dimension_numbers<[1], [1], [0], [0], [0, 0, 1, 0], [], []>} : vector<64x16xbf16>, vector<8x16xbf16>, vector<64x8xf32> -> vector<64x8xf32>
    %c0_29 = arith.constant 0 : index
    %c1 = arith.constant 1 : index
    %43 = vector.load %arg7[%c0_29, %c1] : memref<64x2xf32, #tpu.memory_space<vmem>>, vector<64x1xf32>
    %cst_30 = arith.constant dense<0xFF800000> : vector<64xf32>
    %44 = vector.multi_reduction <maximumf>, %42, %cst_30 [1] : vector<64x8xf32> to vector<64xf32>
    %45 = vector.shape_cast %44 : vector<64xf32> to vector<64x1xf32>
    %46 = arith.maximumf %43, %45 : vector<64x1xf32>
    %47 = arith.subf %43, %46 : vector<64x1xf32>
    %48 = math.exp %47 : vector<64x1xf32>
    %49 = vector.broadcast %46 : vector<64x1xf32> to vector<64x8xf32>
    %50 = arith.subf %42, %49 : vector<64x8xf32>
    %51 = math.exp %50 : vector<64x8xf32>
    %c0_31 = arith.constant 0 : index
    %c1_32 = arith.constant 1 : index
    %52 = vector.load %arg8[%c0_31, %c1_32] : memref<64x2xf32, #tpu.memory_space<vmem>>, vector<64x1xf32>
    %53 = arith.mulf %48, %52 : vector<64x1xf32>
    %cst_33 = arith.constant dense<0.000000e+00> : vector<64xf32>
    %54 = vector.multi_reduction <add>, %51, %cst_33 [1] : vector<64x8xf32> to vector<64xf32>
    %55 = vector.shape_cast %54 : vector<64xf32> to vector<64x1xf32>
    %56 = arith.addf %53, %55 : vector<64x1xf32>
    %c0_34 = arith.constant 0 : index
    %c1_35 = arith.constant 1 : index
    %57 = vector.load %arg8[%c0_34, %c1_35] : memref<64x2xf32, #tpu.memory_space<vmem>>, vector<64x1xf32>
    tpu.vector_store %arg8[%c0_34, %c1_35], %56 {strides = array<i32>} : memref<64x2xf32, #tpu.memory_space<vmem>>, vector<64x1xf32>,
    %58 = arith.truncf %51 : vector<64x8xf32> to vector<64x8xbf16>
    %59 = vector.extract_strided_slice %12 {offsets = [0, 16], sizes = [8, 16], strides = [1, 1]} : vector<8x32xbf16> to vector<8x16xbf16>
    %cst_36 = arith.constant dense<0.000000e+00> : vector<64x16xf32>
    %60 = tpu.matmul %58, %59, %cst_36 {dimension_numbers = #tpu.dot_dimension_numbers<[1], [0], [0], [1], [0, 0, 1, 1], [], []>} : vector<64x8xbf16>, vector<8x16xbf16>, vector<64x16xf32> -> vector<64x16xf32>
    %c0_37 = arith.constant 0 : index
    %c16 = arith.constant 16 : index
    %61 = vector.load %arg9[%c0_37, %c16] : memref<64x32xf32, #tpu.memory_space<vmem>>, vector<64x16xf32>
    %62 = vector.broadcast %48 : vector<64x1xf32> to vector<64x16xf32>
    %63 = arith.mulf %62, %61 : vector<64x16xf32>
    %64 = arith.addf %63, %60 : vector<64x16xf32>
    %c0_38 = arith.constant 0 : index
    %c16_39 = arith.constant 16 : index
    %65 = vector.load %arg9[%c0_38, %c16_39] : memref<64x32xf32, #tpu.memory_space<vmem>>, vector<64x16xf32>
    tpu.vector_store %arg9[%c0_38, %c16_39], %64 {strides = array<i32>} : memref<64x32xf32, #tpu.memory_space<vmem>>, vector<64x16xf32>,
    %c0_40 = arith.constant 0 : index
    %c1_41 = arith.constant 1 : index
    %66 = vector.load %arg7[%c0_40, %c1_41] : memref<64x2xf32, #tpu.memory_space<vmem>>, vector<64x1xf32>
    tpu.vector_store %arg7[%c0_40, %c1_41], %46 {strides = array<i32>} : memref<64x2xf32, #tpu.memory_space<vmem>>, vector<64x1xf32>,
    %c0_i32_42 = arith.constant 0 : i32
    %67 = arith.cmpi eq, %arg2, %c0_i32_42 : i32
    %68 = arith.extui %67 : i1 to i32
    %c0_i32_43 = arith.constant 0 : i32
    %69 = arith.cmpi ne, %68, %c0_i32_43 : i32
    scf.if %69 {
      %c0_44 = arith.constant 0 : index
      %c0_45 = arith.constant 0 : index
      %70 = vector.load %arg8[%c0_44, %c0_45] : memref<64x2xf32, #tpu.memory_space<vmem>>, vector<64x1xf32>
      %71 = tpu.reciprocal %70 {approx = true} : vector<64x1xf32> -> vector<64x1xf32>
      %c0_46 = arith.constant 0 : index
      %c0_47 = arith.constant 0 : index
      %72 = vector.load %arg9[%c0_46, %c0_47] : memref<64x32xf32, #tpu.memory_space<vmem>>, vector<64x16xf32>
      %73 = vector.broadcast %71 : vector<64x1xf32> to vector<64x16xf32>
      %74 = arith.mulf %72, %73 : vector<64x16xf32>
      %c0_48 = arith.constant 0 : index
      %c1_49 = arith.constant 1 : index
      %75 = vector.load %arg8[%c0_48, %c1_49] : memref<64x2xf32, #tpu.memory_space<vmem>>, vector<64x1xf32>
      %76 = tpu.reciprocal %75 {approx = true} : vector<64x1xf32> -> vector<64x1xf32>
      %c0_50 = arith.constant 0 : index
      %c16_51 = arith.constant 16 : index
      %77 = vector.load %arg9[%c0_50, %c16_51] : memref<64x32xf32, #tpu.memory_space<vmem>>, vector<64x16xf32>
      %78 = vector.broadcast %76 : vector<64x1xf32> to vector<64x16xf32>
      %79 = arith.mulf %77, %78 : vector<64x16xf32>
      %80 = tpu.concatenate %74, %79 in 1 : vector<64x16xf32>, vector<64x16xf32> -> vector<64x32xf32>
      %81 = arith.truncf %80 : vector<64x32xf32> to vector<64x32xbf16>
      %c0_52 = arith.constant 0 : index
      %c0_53 = arith.constant 0 : index
      %c0_54 = arith.constant 0 : index
      %82 = vector.load %arg6[%c0_52, %c0_53, %c0_54] : memref<1x64x32xbf16, #tpu.memory_space<vmem>>, vector<1x64x32xbf16>
      %83 = vector.shape_cast %82 : vector<1x64x32xbf16> to vector<64x32xbf16>
      %84 = vector.shape_cast %81 : vector<64x32xbf16> to vector<1x64x32xbf16>
      tpu.vector_store %arg6[%c0_52, %c0_53, %c0_54], %84 {strides = array<i32>} : memref<1x64x32xbf16, #tpu.memory_space<vmem>>, vector<1x64x32xbf16>,
    } else {
    }
    return
  }
  func.func @transform_0(%arg0: i32, %arg1: i32, %arg2: i32) -> (i32, i32, i32, i32) {
    %c0_i32 = arith.constant 0 : i32
    %c0_i32_0 = arith.constant 0 : i32
    %c0_i32_1 = arith.constant 0 : i32
    return %c0_i32, %arg0, %arg1, %c0_i32_0 : i32, i32, i32, i32
  }
  func.func @transform_1(%arg0: i32, %arg1: i32, %arg2: i32) -> (i32, i32, i32, i32) {
    %c0_i32 = arith.constant 0 : i32
    %c0_i32_0 = arith.constant 0 : i32
    %c0_i32_1 = arith.constant 0 : i32
    return %c0_i32, %arg0, %arg2, %c0_i32_0 : i32, i32, i32, i32
  }
  func.func @transform_2(%arg0: i32, %arg1: i32, %arg2: i32) -> (i32, i32, i32, i32) {
    %c1_i32 = arith.constant 1 : i32
    %c0_i32 = arith.constant 0 : i32
    %c0_i32_0 = arith.constant 0 : i32
    return %c1_i32, %arg0, %arg2, %c0_i32 : i32, i32, i32, i32
  }
  func.func @transform_3(%arg0: i32, %arg1: i32, %arg2: i32) -> (i32, i32, i32) {
    %c0_i32 = arith.constant 0 : i32
    %c0_i32_0 = arith.constant 0 : i32
    return %arg0, %arg1, %c0_i32 : i32, i32, i32
  }
}

module attributes {stable_mosaic.version = 11 : i64} {
  func.func @_ln_geglu_kernel(%arg0: i32, %arg1: i32, %arg2: memref<128x32xf32, #tpu.memory_space<vmem>>, %arg3: memref<1x32xf32, #tpu.memory_space<vmem>>, %arg4: memref<1x32xf32, #tpu.memory_space<vmem>>, %arg5: memref<32x128xbf16, #tpu.memory_space<vmem>>, %arg6: memref<32x128xbf16, #tpu.memory_space<vmem>>, %arg7: memref<1x128xf32, #tpu.memory_space<vmem>>, %arg8: memref<1x128xf32, #tpu.memory_space<vmem>>, %arg9: memref<128x128xbf16, #tpu.memory_space<vmem>>) attributes {dimension_semantics = [#tpu.dimension_semantics<parallel>, #tpu.dimension_semantics<parallel>], iteration_bounds = array<i64: 1, 1>, scalar_prefetch = 0 : i64, scratch_operands = 0 : i64, tpu.core_type = #tpu.core_type<tc>, window_params = [{transform_indices = @transform_0, window_bounds = array<i64: 128, 32>}, {pipeline_mode = #tpu.pipeline_mode<synchronous>, transform_indices = @transform_1, window_bounds = array<i64: 1, 32>}, {pipeline_mode = #tpu.pipeline_mode<synchronous>, transform_indices = @transform_2, window_bounds = array<i64: 1, 32>}, {transform_indices = @transform_3, window_bounds = array<i64: 32, 128>}, {transform_indices = @transform_4, window_bounds = array<i64: 32, 128>}, {transform_indices = @transform_5, window_bounds = array<i64: 1, 128>}, {transform_indices = @transform_6, window_bounds = array<i64: 1, 128>}, {transform_indices = @transform_7, window_bounds = array<i64: 128, 128>}]} {
    %c0 = arith.constant 0 : index
    %c0_0 = arith.constant 0 : index
    %0 = vector.load %arg2[%c0, %c0_0] : memref<128x32xf32, #tpu.memory_space<vmem>>, vector<128x32xf32>
    %cst = arith.constant dense<0.000000e+00> : vector<128xf32>
    %1 = vector.multi_reduction <add>, %0, %cst [1] : vector<128x32xf32> to vector<128xf32>
    %2 = vector.shape_cast %1 : vector<128xf32> to vector<128x1xf32>
    %cst_1 = arith.constant 3.200000e+01 : f32
    %3 = vector.broadcast %cst_1 : f32 to vector<128x1xf32>
    %4 = arith.divf %2, %3 : vector<128x1xf32>
    %5 = vector.broadcast %4 : vector<128x1xf32> to vector<128x32xf32>
    %6 = arith.subf %0, %5 : vector<128x32xf32>
    %7 = arith.mulf %6, %6 : vector<128x32xf32>
    %cst_2 = arith.constant dense<0.000000e+00> : vector<128xf32>
    %8 = vector.multi_reduction <add>, %7, %cst_2 [1] : vector<128x32xf32> to vector<128xf32>
    %9 = vector.shape_cast %8 : vector<128xf32> to vector<128x1xf32>
    %cst_3 = arith.constant 3.200000e+01 : f32
    %10 = vector.broadcast %cst_3 : f32 to vector<128x1xf32>
    %11 = arith.divf %9, %10 : vector<128x1xf32>
    %cst_4 = arith.constant 9.99999974E-6 : f32
    %12 = vector.broadcast %cst_4 : f32 to vector<128x1xf32>
    %13 = arith.addf %11, %12 : vector<128x1xf32>
    %14 = math.rsqrt %13 : vector<128x1xf32>
    %15 = vector.broadcast %14 : vector<128x1xf32> to vector<128x32xf32>
    %16 = arith.mulf %6, %15 : vector<128x32xf32>
    %c0_5 = arith.constant 0 : index
    %c0_6 = arith.constant 0 : index
    %17 = vector.load %arg4[%c0_5, %c0_6] : memref<1x32xf32, #tpu.memory_space<vmem>>, vector<1x32xf32>
    %18 = vector.broadcast %17 : vector<1x32xf32> to vector<128x32xf32>
    %19 = arith.addf %16, %18 : vector<128x32xf32>
    %c0_7 = arith.constant 0 : index
    %c0_8 = arith.constant 0 : index
    %20 = vector.load %arg3[%c0_7, %c0_8] : memref<1x32xf32, #tpu.memory_space<vmem>>, vector<1x32xf32>
    %21 = vector.broadcast %20 : vector<1x32xf32> to vector<128x32xf32>
    %22 = arith.mulf %19, %21 : vector<128x32xf32>
    %23 = arith.truncf %22 : vector<128x32xf32> to vector<128x32xbf16>
    %c0_9 = arith.constant 0 : index
    %c0_10 = arith.constant 0 : index
    %24 = vector.load %arg5[%c0_9, %c0_10] : memref<32x128xbf16, #tpu.memory_space<vmem>>, vector<32x128xbf16>
    %cst_11 = arith.constant dense<0.000000e+00> : vector<128x128xf32>
    %25 = tpu.matmul %23, %24, %cst_11 {dimension_numbers = #tpu.dot_dimension_numbers<[1], [0], [0], [1], [0, 0, 1, 1], [], []>} : vector<128x32xbf16>, vector<32x128xbf16>, vector<128x128xf32> -> vector<128x128xf32>
    %c0_12 = arith.constant 0 : index
    %c0_13 = arith.constant 0 : index
    %26 = vector.load %arg7[%c0_12, %c0_13] : memref<1x128xf32, #tpu.memory_space<vmem>>, vector<1x128xf32>
    %27 = vector.broadcast %26 : vector<1x128xf32> to vector<128x128xf32>
    %28 = arith.addf %25, %27 : vector<128x128xf32>
    %c0_14 = arith.constant 0 : index
    %c0_15 = arith.constant 0 : index
    %29 = vector.load %arg6[%c0_14, %c0_15] : memref<32x128xbf16, #tpu.memory_space<vmem>>, vector<32x128xbf16>
    %cst_16 = arith.constant dense<0.000000e+00> : vector<128x128xf32>
    %30 = tpu.matmul %23, %29, %cst_16 {dimension_numbers = #tpu.dot_dimension_numbers<[1], [0], [0], [1], [0, 0, 1, 1], [], []>} : vector<128x32xbf16>, vector<32x128xbf16>, vector<128x128xf32> -> vector<128x128xf32>
    %c0_17 = arith.constant 0 : index
    %c0_18 = arith.constant 0 : index
    %31 = vector.load %arg8[%c0_17, %c0_18] : memref<1x128xf32, #tpu.memory_space<vmem>>, vector<1x128xf32>
    %32 = vector.broadcast %31 : vector<1x128xf32> to vector<128x128xf32>
    %33 = arith.addf %30, %32 : vector<128x128xf32>
    %cst_19 = arith.constant 5.000000e-01 : f32
    %34 = vector.broadcast %cst_19 : f32 to vector<128x128xf32>
    %35 = arith.mulf %34, %33 : vector<128x128xf32>
    %cst_20 = arith.constant 0.707106769 : f32
    %36 = vector.broadcast %cst_20 : f32 to vector<128x128xf32>
    %37 = arith.mulf %33, %36 : vector<128x128xf32>
    %38 = math.absf %37 : vector<128x128xf32>
    %cst_21 = arith.constant 0.327591091 : f32
    %39 = vector.broadcast %cst_21 : f32 to vector<128x128xf32>
    %40 = arith.mulf %39, %38 : vector<128x128xf32>
    %cst_22 = arith.constant 1.000000e+00 : f32
    %41 = vector.broadcast %cst_22 : f32 to vector<128x128xf32>
    %42 = arith.addf %41, %40 : vector<128x128xf32>
    %cst_23 = arith.constant 1.000000e+00 : f32
    %43 = vector.broadcast %cst_23 : f32 to vector<128x128xf32>
    %44 = arith.divf %43, %42 : vector<128x128xf32>
    %cst_24 = arith.constant 1.06140542 : f32
    %45 = vector.broadcast %cst_24 : f32 to vector<128x128xf32>
    %46 = arith.mulf %44, %45 : vector<128x128xf32>
    %cst_25 = arith.constant -1.45315206 : f32
    %47 = vector.broadcast %cst_25 : f32 to vector<128x128xf32>
    %48 = arith.addf %47, %46 : vector<128x128xf32>
    %49 = arith.mulf %44, %48 : vector<128x128xf32>
    %cst_26 = arith.constant 1.42141378 : f32
    %50 = vector.broadcast %cst_26 : f32 to vector<128x128xf32>
    %51 = arith.addf %50, %49 : vector<128x128xf32>
    %52 = arith.mulf %44, %51 : vector<128x128xf32>
    %cst_27 = arith.constant -0.284496725 : f32
    %53 = vector.broadcast %cst_27 : f32 to vector<128x128xf32>
    %54 = arith.addf %53, %52 : vector<128x128xf32>
    %55 = arith.mulf %44, %54 : vector<128x128xf32>
    %cst_28 = arith.constant 0.254829586 : f32
    %56 = vector.broadcast %cst_28 : f32 to vector<128x128xf32>
    %57 = arith.addf %56, %55 : vector<128x128xf32>
    %58 = arith.mulf %44, %57 : vector<128x128xf32>
    %cst_29 = arith.constant 0.000000e+00 : f32
    %59 = vector.broadcast %cst_29 : f32 to vector<128x128xf32>
    %60 = arith.subf %59, %37 : vector<128x128xf32>
    %61 = arith.mulf %60, %37 : vector<128x128xf32>
    %62 = math.exp %61 : vector<128x128xf32>
    %63 = arith.mulf %58, %62 : vector<128x128xf32>
    %cst_30 = arith.constant 1.000000e+00 : f32
    %64 = vector.broadcast %cst_30 : f32 to vector<128x128xf32>
    %65 = arith.subf %64, %63 : vector<128x128xf32>
    %cst_31 = arith.constant 0.000000e+00 : f32
    %66 = vector.broadcast %cst_31 : f32 to vector<128x128xf32>
    %67 = arith.cmpf oge, %37, %66 : vector<128x128xf32>
    %cst_32 = arith.constant 0.000000e+00 : f32
    %68 = vector.broadcast %cst_32 : f32 to vector<128x128xf32>
    %69 = arith.subf %68, %65 : vector<128x128xf32>
    %70 = arith.select %67, %65, %69 : vector<128x128xi1>, vector<128x128xf32>
    %cst_33 = arith.constant 1.000000e+00 : f32
    %71 = vector.broadcast %cst_33 : f32 to vector<128x128xf32>
    %72 = arith.addf %71, %70 : vector<128x128xf32>
    %73 = arith.mulf %35, %72 : vector<128x128xf32>
    %74 = arith.mulf %28, %73 : vector<128x128xf32>
    %75 = arith.truncf %74 : vector<128x128xf32> to vector<128x128xbf16>
    %c0_34 = arith.constant 0 : index
    %c0_35 = arith.constant 0 : index
    %76 = vector.load %arg9[%c0_34, %c0_35] : memref<128x128xbf16, #tpu.memory_space<vmem>>, vector<128x128xbf16>
    tpu.vector_store %arg9[%c0_34, %c0_35], %75 {strides = array<i32>} : memref<128x128xbf16, #tpu.memory_space<vmem>>, vector<128x128xbf16>,
    return
  }
  func.func @transform_0(%arg0: i32, %arg1: i32) -> (i32, i32) {
    %c0_i32 = arith.constant 0 : i32
    %c0_i32_0 = arith.constant 0 : i32
    return %arg0, %c0_i32 : i32, i32
  }
  func.func @transform_1(%arg0: i32, %arg1: i32) -> (i32, i32) {
    %c0_i32 = arith.constant 0 : i32
    %c0_i32_0 = arith.constant 0 : i32
    %c0_i32_1 = arith.constant 0 : i32
    return %c0_i32, %c0_i32_0 : i32, i32
  }
  func.func @transform_2(%arg0: i32, %arg1: i32) -> (i32, i32) {
    %c0_i32 = arith.constant 0 : i32
    %c0_i32_0 = arith.constant 0 : i32
    %c0_i32_1 = arith.constant 0 : i32
    return %c0_i32, %c0_i32_0 : i32, i32
  }
  func.func @transform_3(%arg0: i32, %arg1: i32) -> (i32, i32) {
    %c0_i32 = arith.constant 0 : i32
    %c0_i32_0 = arith.constant 0 : i32
    return %c0_i32, %arg1 : i32, i32
  }
  func.func @transform_4(%arg0: i32, %arg1: i32) -> (i32, i32) {
    %c0_i32 = arith.constant 0 : i32
    %c0_i32_0 = arith.constant 0 : i32
    return %c0_i32, %arg1 : i32, i32
  }
  func.func @transform_5(%arg0: i32, %arg1: i32) -> (i32, i32) {
    %c0_i32 = arith.constant 0 : i32
    %c0_i32_0 = arith.constant 0 : i32
    return %c0_i32, %arg1 : i32, i32
  }
  func.func @transform_6(%arg0: i32, %arg1: i32) -> (i32, i32) {
    %c0_i32 = arith.constant 0 : i32
    %c0_i32_0 = arith.constant 0 : i32
    return %c0_i32, %arg1 : i32, i32
  }
  func.func @transform_7(%arg0: i32, %arg1: i32) -> (i32, i32) {
    %c0_i32 = arith.constant 0 : i32
    return %arg0, %arg1 : i32, i32
  }
}

module attributes {stable_mosaic.version = 11 : i64} {
  func.func @_mm_kernel(%arg0: i32, %arg1: i32, %arg2: i32, %arg3: memref<128x128xbf16, #tpu.memory_space<vmem>>, %arg4: memref<128x32xbf16, #tpu.memory_space<vmem>>, %arg5: memref<1x32xf32, #tpu.memory_space<vmem>>, %arg6: memref<128x32xf32, #tpu.memory_space<vmem>>, %arg7: memref<128x32xf32, #tpu.memory_space<vmem>>, %arg8: memref<128x32xf32, #tpu.memory_space<vmem>>) attributes {dimension_semantics = [#tpu.dimension_semantics<parallel>, #tpu.dimension_semantics<parallel>, #tpu.dimension_semantics<arbitrary>], iteration_bounds = array<i64: 1, 1, 1>, scalar_prefetch = 0 : i64, scratch_operands = 1 : i64, tpu.core_type = #tpu.core_type<tc>, window_params = [{transform_indices = @transform_0, window_bounds = array<i64: 128, 128>}, {transform_indices = @transform_1, window_bounds = array<i64: 128, 32>}, {transform_indices = @transform_2, window_bounds = array<i64: 1, 32>}, {transform_indices = @transform_3, window_bounds = array<i64: 128, 32>}, {transform_indices = @transform_4, window_bounds = array<i64: 128, 32>}]} {
    %c0_i32 = arith.constant 0 : i32
    %0 = arith.cmpi eq, %arg2, %c0_i32 : i32
    %1 = arith.extui %0 : i1 to i32
    %c0_i32_0 = arith.constant 0 : i32
    %2 = arith.cmpi ne, %1, %c0_i32_0 : i32
    scf.if %2 {
      %cst_10 = arith.constant 0.000000e+00 : f32
      %12 = vector.broadcast %cst_10 : f32 to vector<128x32xf32>
      %c0_11 = arith.constant 0 : index
      %c0_12 = arith.constant 0 : index
      %13 = vector.load %arg8[%c0_11, %c0_12] : memref<128x32xf32, #tpu.memory_space<vmem>>, vector<128x32xf32>
      tpu.vector_store %arg8[%c0_11, %c0_12], %12 {strides = array<i32>} : memref<128x32xf32, #tpu.memory_space<vmem>>, vector<128x32xf32>,
    } else {
    }
    %c0 = arith.constant 0 : index
    %c0_1 = arith.constant 0 : index
    %3 = vector.load %arg8[%c0, %c0_1] : memref<128x32xf32, #tpu.memory_space<vmem>>, vector<128x32xf32>
    %c0_2 = arith.constant 0 : index
    %c0_3 = arith.constant 0 : index
    %4 = vector.load %arg3[%c0_2, %c0_3] : memref<128x128xbf16, #tpu.memory_space<vmem>>, vector<128x128xbf16>
    %c0_4 = arith.constant 0 : index
    %c0_5 = arith.constant 0 : index
    %5 = vector.load %arg4[%c0_4, %c0_5] : memref<128x32xbf16, #tpu.memory_space<vmem>>, vector<128x32xbf16>
    %cst = arith.constant dense<0.000000e+00> : vector<128x32xf32>
    %6 = tpu.matmul %4, %5, %cst {dimension_numbers = #tpu.dot_dimension_numbers<[1], [0], [0], [1], [0, 0, 1, 1], [], []>} : vector<128x128xbf16>, vector<128x32xbf16>, vector<128x32xf32> -> vector<128x32xf32>
    %7 = arith.addf %3, %6 : vector<128x32xf32>
    %c0_6 = arith.constant 0 : index
    %c0_7 = arith.constant 0 : index
    %8 = vector.load %arg8[%c0_6, %c0_7] : memref<128x32xf32, #tpu.memory_space<vmem>>, vector<128x32xf32>
    tpu.vector_store %arg8[%c0_6, %c0_7], %7 {strides = array<i32>} : memref<128x32xf32, #tpu.memory_space<vmem>>, vector<128x32xf32>,
    %c0_i32_8 = arith.constant 0 : i32
    %9 = arith.cmpi eq, %arg2, %c0_i32_8 : i32
    %10 = arith.extui %9 : i1 to i32
    %c0_i32_9 = arith.constant 0 : i32
    %11 = arith.cmpi ne, %10, %c0_i32_9 : i32
    scf.if %11 {
      %c0_10 = arith.constant 0 : index
      %c0_11 = arith.constant 0 : index
      %12 = vector.load %arg8[%c0_10, %c0_11] : memref<128x32xf32, #tpu.memory_space<vmem>>, vector<128x32xf32>
      %c0_12 = arith.constant 0 : index
      %c0_13 = arith.constant 0 : index
      %13 = vector.load %arg5[%c0_12, %c0_13] : memref<1x32xf32, #tpu.memory_space<vmem>>, vector<1x32xf32>
      %14 = vector.broadcast %13 : vector<1x32xf32> to vector<128x32xf32>
      %15 = arith.addf %12, %14 : vector<128x32xf32>
      %c0_14 = arith.constant 0 : index
      %c0_15 = arith.constant 0 : index
      %16 = vector.load %arg6[%c0_14, %c0_15] : memref<128x32xf32, #tpu.memory_space<vmem>>, vector<128x32xf32>
      %17 = arith.addf %15, %16 : vector<128x32xf32>
      %c0_16 = arith.constant 0 : index
      %c0_17 = arith.constant 0 : index
      %18 = vector.load %arg7[%c0_16, %c0_17] : memref<128x32xf32, #tpu.memory_space<vmem>>, vector<128x32xf32>
      tpu.vector_store %arg7[%c0_16, %c0_17], %17 {strides = array<i32>} : memref<128x32xf32, #tpu.memory_space<vmem>>, vector<128x32xf32>,
    } else {
    }
    return
  }
  func.func @transform_0(%arg0: i32, %arg1: i32, %arg2: i32) -> (i32, i32) {
    %c0_i32 = arith.constant 0 : i32
    return %arg0, %arg2 : i32, i32
  }
  func.func @transform_1(%arg0: i32, %arg1: i32, %arg2: i32) -> (i32, i32) {
    %c0_i32 = arith.constant 0 : i32
    return %arg2, %arg1 : i32, i32
  }
  func.func @transform_2(%arg0: i32, %arg1: i32, %arg2: i32) -> (i32, i32) {
    %c0_i32 = arith.constant 0 : i32
    %c0_i32_0 = arith.constant 0 : i32
    return %c0_i32, %arg1 : i32, i32
  }
  func.func @transform_3(%arg0: i32, %arg1: i32, %arg2: i32) -> (i32, i32) {
    %c0_i32 = arith.constant 0 : i32
    return %arg0, %arg1 : i32, i32
  }
  func.func @transform_4(%arg0: i32, %arg1: i32, %arg2: i32) -> (i32, i32) {
    %c0_i32 = arith.constant 0 : i32
    return %arg0, %arg1 : i32, i32
  }
}

</mosaic_0001>

<bundles_post_ra>
// kernel: basic_transformer_block.9
= control target key start
LH: loop header
LB: loop body
LE: loop exit
PB: predicated region body
PF: predicated region fallthrough
CT: control target
= control target key end

     0   :  { %s1037_s15 = smov 0   ;;  %s1039_s16 = smov 0   ;;  %s1362_s0 = inlined_call_operand.vmem [shape: f32[128,32], index: 0, kind: input, shape index: {}]   ;;  %s1363_s1 = inlined_call_operand.vmem [shape: f32[1,32], index: 1, kind: input, shape index: {}]   ;;  %s1364_s2 = inlined_call_operand.vmem [shape: f32[1,32], index: 2, kind: input, shape index: {}]   ;;  %s1365_s3 = inlined_call_operand.vmem [shape: bf16[3,32,32], index: 3, kind: input, shape index: {}]   ;;  %s1366_s4 = inlined_call_operand.vmem [shape: bf16[3,128,32], index: 4, kind: output, shape index: {}]  }
   0x1   :  { %s1041_s17 = smov 0  }
   0x2 LB: > { %s23_s18 = sadd.s32 1, %s1006_s16  ;;  %p843_p0 = scmp.ge.s32.totalorder %s1010_s17, 1  ;;  %s1010_s17 = sphi %s1041_s17, %s14_s17   ;;  %s1006_s16 = sphi %s1039_s16, %s1368_s16   ;;  %s1002_s15 = sphi %s1037_s15, %s1367_s15  }
   0x3   : > { %p24_p1 = scmp.ge.s32.totalorder %s23_s18, 3  ;;  %p187_p2 = scmp.lt.s32.totalorder %s1010_s17, 4 }
   0x5   : > { %s1370_s18 = smov (%p24_p1, %s23_s18), 0  ;;  %p188_p3 = pnand %p843_p0, %p187_p2 }
   0x6   : > { %p228_p4 = scmp.lt.s32.totalorder (!%p188_p3), %s1002_s15, 2 }
   0x7   : > { %191 = sbr.rel (%p188_p3) target bundleno = 557 (0x22d), region = 36 }
   0xc   : > { %v244_v0 = vld [vmem:[%s1362_s0] sm:$0xff]  ;;  %vm260_vm0 = vcmask 261120   ;;  %v245_v2 = vld [vmem:[%s1362_s0 + $0x8] sm:$0xff]  ;;  %v246_v8 = vld [vmem:[%s1362_s0 + $0x10] sm:$0xff]  ;;  %s1372_s15 = smov (!%p228_p4, %s1002_s15), 2  ;;  %vm725_vm1 = vcmask 257024  }
   0xd   : > { %v252_v1 = vld [vmem:[%s1362_s0 + $0x40] sm:$0xff]  ;;  %v261_v3 = vsel %vm260_vm0, %v244_v0, 0.0  ;;  %v253_v5 = vld [vmem:[%s1362_s0 + $0x48] sm:$0xff]  ;;  %v264_v6 = vsel %vm260_vm0, %v245_v2, 0.0  ;;  %v247_v9 = vld [vmem:[%s1362_s0 + $0x18] sm:$0xff]  ;;  %v267_v10 = vsel %vm260_vm0, %v246_v8, 0.0 }
   0xe   : > { %v285_v4 = vsel %vm260_vm0, %v252_v1, 0.0  ;;  %262 = vadd.xlane.f32.xlu0 %v261_v3  ;;  %v288_v7 = vsel %vm260_vm0, %v253_v5, 0.0  ;;  %v270_v11 = vsel %vm260_vm0, %v247_v9, 0.0  ;;  %v1084_v12 = vld [vmem:[%s1362_s0 + $0x50] sm:$0xff]  ;;  %v1089_v13 = vld [vmem:[%s1362_s0 + $0x58] sm:$0xff]  ;;  %v1098_v16 = vld [vmem:[%s1362_s0 + $0x20] sm:$0xff] }
   0xf   : > { %286 = vadd.xlane.f32.xlu1 %v285_v4  ;;  %v291_v14 = vsel %vm260_vm0, %v1084_v12, 0.0  ;;  %v294_v15 = vsel %vm260_vm0, %v1089_v13, 0.0  ;;  %v1103_v17 = vld [vmem:[%s1362_s0 + $0x28] sm:$0xff]  ;;  %v273_v18 = vsel %vm260_vm0, %v1098_v16, 0.0  ;;  %v1112_v20 = vld [vmem:[%s1362_s0 + $0x60] sm:$0xff]  ;;  %v1126_v24 = vld [vmem:[%s1362_s0 + $0x30] sm:$0xff] }
  0x10   : > { %v276_v19 = vsel %vm260_vm0, %v1103_v17, 0.0  ;;  %v1117_v21 = vld [vmem:[%s1362_s0 + $0x68] sm:$0xff]  ;;  %v297_v22 = vsel %vm260_vm0, %v1112_v20, 0.0  ;;  %v1131_v25 = vld [vmem:[%s1362_s0 + $0x38] sm:$0xff]  ;;  %v279_v26 = vsel %vm260_vm0, %v1126_v24, 0.0  ;;  %v1140_v28 = vld [vmem:[%s1362_s0 + $0x70] sm:$0xff] }
  0x11   : > { %v300_v23 = vsel %vm260_vm0, %v1117_v21, 0.0  ;;  %v282_v27 = vsel %vm260_vm0, %v1131_v25, 0.0  ;;  %v1145_v29 = vld [vmem:[%s1362_s0 + $0x78] sm:$0xff]  ;;  %v303_v30 = vsel %vm260_vm0, %v1140_v28, 0.0  ;;  %s878_s29 = sshll.u32 %s1372_s15, 4  ;;  %s879_s11 = sshll.u32 %s1372_s15, 6 }
  0x12   : > { %265 = vadd.xlane.f32.xlu0 %v264_v6  ;;  %v306_v31 = vsel %vm260_vm0, %v1145_v29, 0.0  ;;  %s232_s6 = scalar_lea.vmem %s1365_s3, %s878_s29  ;;  %s1319_s14 = scalar_lea.vmem %s1366_s4, %s879_s11 }
  0x13   : > { %289 = vadd.xlane.f32.xlu1 %v288_v7 }
  0x16   : > { %268 = vadd.xlane.f32.xlu0 %v267_v10 }
  0x17   : > { %271 = vadd.xlane.f32.xlu1 %v270_v11 }
  0x1a   : > { %292 = vadd.xlane.f32.xlu0 %v291_v14 }
  0x1b   : > { %295 = vadd.xlane.f32.xlu1 %v294_v15 }
  0x1e   : > { %274 = vadd.xlane.f32.xlu0 %v273_v18 }
  0x1f   : > { %277 = vadd.xlane.f32.xlu1 %v276_v19 }
  0x22   : > { %298 = vadd.xlane.f32.xlu0 %v297_v22 }
  0x23   : > { %301 = vadd.xlane.f32.xlu1 %v300_v23 }
  0x26   : > { %280 = vadd.xlane.f32.xlu0 %v279_v26 }
  0x27   : > { %283 = vadd.xlane.f32.xlu1 %v282_v27 }
  0x2a   : > { %304 = vadd.xlane.f32.xlu0 %v303_v30 }
  0x2b   : > { %307 = vadd.xlane.f32.xlu1 %v306_v31 }
  0x97   : > { %v263_v32 = vpop.xlane.xlu0 %262 }
  0x98   : > { %v287_v33 = vpop.xlane.xlu1 %286  ;;  %v310_v34 = vmul.f32 0.03125, %v263_v32 }
  0x99   : > { %v318_v35 = vmul.f32 0.03125, %v287_v33 }
  0x9a   : > { %v1151_v36 = vsub.f32 %v244_v0, %v310_v34 }
  0x9b   : > { %v1153_v37 = vsub.f32 %v252_v1, %v318_v35  ;;  %v266_v38 = vpop.xlane.xlu0 %265 }
  0x9c   : > { %v290_v39 = vpop.xlane.xlu1 %289  ;;  %v311_v40 = vmul.f32 0.03125, %v266_v38  ;;  %v342_v42 = vmul.f32 %v1151_v36, %v1151_v36 }
  0x9d   : > { %v319_v41 = vmul.f32 0.03125, %v290_v39  ;;  %v350_v43 = vmul.f32 %v1153_v37, %v1153_v37 }
  0x9e   : > { %v1159_v44 = vsub.f32 %v245_v2, %v311_v40  ;;  %v358_v46 = vsel %vm260_vm0, %v342_v42, 0.0 }
  0x9f   : > { %v1161_v45 = vsub.f32 %v253_v5, %v319_v41  ;;  %359 = vadd.xlane.f32.xlu0 %v358_v46  ;;  %v269_v47 = vpop.xlane.xlu0 %268  ;;  %v382_v49 = vsel %vm260_vm0, %v350_v43, 0.0 }
  0xa0   : > { %v272_v48 = vpop.xlane.xlu1 %271  ;;  %v312_v50 = vmul.f32 0.03125, %v269_v47  ;;  %v343_v52 = vmul.f32 %v1159_v44, %v1159_v44 }
  0xa1   : > { %v313_v51 = vmul.f32 0.03125, %v272_v48  ;;  %v351_v53 = vmul.f32 %v1161_v45, %v1161_v45 }
  0xa2   : > { %v1169_v54 = vsub.f32 %v246_v8, %v312_v50  ;;  %v361_v56 = vsel %vm260_vm0, %v343_v52, 0.0 }
  0xa3   : > { %v1171_v55 = vsub.f32 %v247_v9, %v313_v51  ;;  %383 = vadd.xlane.f32.xlu0 %v382_v49  ;;  %362 = vadd.xlane.f32.xlu1 %v361_v56  ;;  %v293_v57 = vpop.xlane.xlu0 %292  ;;  %v385_v59 = vsel %vm260_vm0, %v351_v53, 0.0  ;;  %v955_v53 = vld [vmem:[%s232_s6] sm:$0xff]  }
  0xa4   : > { %v296_v58 = vpop.xlane.xlu1 %295  ;;  %v320_v60 = vmul.f32 0.03125, %v293_v57  ;;  %v344_v62 = vmul.f32 %v1169_v54, %v1169_v54 }
  0xa5   : > { %v321_v61 = vmul.f32 0.03125, %v296_v58  ;;  %v345_v63 = vmul.f32 %v1171_v55, %v1171_v55 }
  0xa6   : > { %v1180_v0 = vsub.f32 %v1084_v12, %v320_v60  ;;  %v364_v2 = vsel %vm260_vm0, %v344_v62, 0.0 }
  0xa7   : > { %v1183_v1 = vsub.f32 %v1089_v13, %v321_v61  ;;  %386 = vadd.xlane.f32.xlu1 %v385_v59  ;;  %365 = vadd.xlane.f32.xlu0 %v364_v2  ;;  %v275_v3 = vpop.xlane.xlu0 %274  ;;  %v367_v5 = vsel %vm260_vm0, %v345_v63, 0.0 }
  0xa8   : > { %v278_v4 = vpop.xlane.xlu1 %277  ;;  %v314_v6 = vmul.f32 0.03125, %v275_v3  ;;  %v352_v8 = vmul.f32 %v1180_v0, %v1180_v0 }
  0xa9   : > { %v315_v7 = vmul.f32 0.03125, %v278_v4  ;;  %v353_v9 = vmul.f32 %v1183_v1, %v1183_v1 }
  0xaa   : > { %v1192_v10 = vsub.f32 %v1098_v16, %v314_v6  ;;  %v388_v12 = vsel %vm260_vm0, %v352_v8, 0.0 }
  0xab   : > { %v1195_v11 = vsub.f32 %v1103_v17, %v315_v7  ;;  %368 = vadd.xlane.f32.xlu1 %v367_v5  ;;  %389 = vadd.xlane.f32.xlu0 %v388_v12  ;;  %v299_v13 = vpop.xlane.xlu0 %298  ;;  %v391_v15 = vsel %vm260_vm0, %v353_v9, 0.0 }
  0xac   : > { %v302_v14 = vpop.xlane.xlu1 %301  ;;  %v322_v18 = vmul.f32 0.03125, %v299_v13  ;;  %v346_v22 = vmul.f32 %v1192_v10, %v1192_v10 }
  0xad   : > { %v323_v19 = vmul.f32 0.03125, %v302_v14  ;;  %v347_v16 = vmul.f32 %v1195_v11, %v1195_v11 }
  0xae   : > { %v1204_v23 = vsub.f32 %v1112_v20, %v322_v18  ;;  %v370_v26 = vsel %vm260_vm0, %v346_v22, 0.0 }
  0xaf   : > { %v1207_v17 = vsub.f32 %v1117_v21, %v323_v19  ;;  %392 = vadd.xlane.f32.xlu1 %v391_v15  ;;  %371 = vadd.xlane.f32.xlu0 %v370_v26  ;;  %v281_v27 = vpop.xlane.xlu0 %280  ;;  %v373_v31 = vsel %vm260_vm0, %v347_v16, 0.0 }
  0xb0   : > { %v284_v30 = vpop.xlane.xlu1 %283  ;;  %v316_v32 = vmul.f32 0.03125, %v281_v27  ;;  %v354_v34 = vmul.f32 %v1204_v23, %v1204_v23 }
  0xb1   : > { %v317_v33 = vmul.f32 0.03125, %v284_v30  ;;  %v355_v20 = vmul.f32 %v1207_v17, %v1207_v17 }
  0xb2   : > { %v1216_v35 = vsub.f32 %v1126_v24, %v316_v32  ;;  %v394_v38 = vsel %vm260_vm0, %v354_v34, 0.0 }
  0xb3   : > { %v1219_v21 = vsub.f32 %v1131_v25, %v317_v33  ;;  %374 = vadd.xlane.f32.xlu1 %v373_v31  ;;  %395 = vadd.xlane.f32.xlu0 %v394_v38  ;;  %v305_v39 = vpop.xlane.xlu0 %304  ;;  %v397_v41 = vsel %vm260_vm0, %v355_v20, 0.0  ;;  %v1253_v33 = vld [vmem:[%s1364_s2] ss:$0 sm:$0xff] }
  0xb4   : > { %v308_v40 = vpop.xlane.xlu1 %307  ;;  %v324_v42 = vmul.f32 0.03125, %v305_v39  ;;  %v348_v46 = vmul.f32 %v1216_v35, %v1216_v35 }
  0xb5   : > { %v325_v43 = vmul.f32 0.03125, %v308_v40  ;;  %v349_v24 = vmul.f32 %v1219_v21, %v1219_v21 }
  0xb6   : > { %v1228_v25 = vsub.f32 %v1140_v28, %v324_v42  ;;  %v376_v48 = vsel %vm260_vm0, %v348_v46, 0.0 }
  0xb7   : > { %v1231_v47 = vsub.f32 %v1145_v29, %v325_v43  ;;  %398 = vadd.xlane.f32.xlu1 %v397_v41  ;;  %377 = vadd.xlane.f32.xlu0 %v376_v48  ;;  %v379_v49 = vsel %vm260_vm0, %v349_v24, 0.0  ;;  %v954_v29 = vld [vmem:[%s232_s6 + $0x8] sm:$0xff]  }
  0xb8   : > { %v356_v50 = vmul.f32 %v1228_v25, %v1228_v25  ;;  %906 = vmatprep.subr.bf16.mxu0 %v954_v29  ;;  %926 = vmatprep.subr.bf16.mxu1 %v954_v29 }
  0xb9   : > { %v357_v51 = vmul.f32 %v1231_v47, %v1231_v47  ;;  %907 = vmatpush3.bf16.msra.mxu0 %v954_v29  ;;  %928 = vmatpush3.bf16.msra.mxu1 %v954_v29 }
  0xba   : > { %v400_v52 = vsel %vm260_vm0, %v356_v50, 0.0  ;;  %908 = vmatprep.subr.bf16.mxu0 %v955_v53  ;;  %927 = vmatprep.subr.bf16.mxu1 %v955_v53 }
  0xbb   : > { %380 = vadd.xlane.f32.xlu1 %v379_v49  ;;  %401 = vadd.xlane.f32.xlu0 %v400_v52  ;;  %v403_v28 = vsel %vm260_vm0, %v357_v51, 0.0 }
  0xbd   : > { %909 = vmatpush3.bf16.msra.mxu0 %v955_v53  ;;  %929 = vmatpush3.bf16.msra.mxu1 %v955_v53 }
  0xbf   : > { %404 = vadd.xlane.f32.xlu1 %v403_v28 }
 0x128   : > { %v360_v56 = vpop.xlane.xlu0 %359 }
 0x129   : > { %v406_v57 = vmul.f32 0.03125, %v360_v56 }
 0x12b   : > { %v422_v58 = vadd.f32 1e-05, %v406_v57 }
 0x12c   : > { %v363_v59 = vpop.xlane.xlu1 %362  ;;  %v384_v60 = vpop.xlane.xlu0 %383 }
 0x12d   : > { %956 = vrsqrt.f32 %v422_v58  ;;  %v407_v61 = vmul.f32 0.03125, %v363_v59  ;;  %v414_v62 = vmul.f32 0.03125, %v384_v60 }
 0x12f   : > { %v423_v63 = vadd.f32 1e-05, %v407_v61  ;;  %v430_v2 = vadd.f32 1e-05, %v414_v62 }
 0x130   : > { %v387_v3 = vpop.xlane.xlu1 %386  ;;  %v366_v4 = vpop.xlane.xlu0 %365 }
 0x131   : > { %958 = vrsqrt.f32 %v423_v63  ;;  %v415_v5 = vmul.f32 0.03125, %v387_v3  ;;  %v408_v6 = vmul.f32 0.03125, %v366_v4 }
 0x132   : > { %960 = vrsqrt.f32 %v430_v2 }
 0x133   : > { %v431_v7 = vadd.f32 1e-05, %v415_v5  ;;  %v424_v8 = vadd.f32 1e-05, %v408_v6 }
 0x134   : > { %v369_v9 = vpop.xlane.xlu1 %368  ;;  %v390_v12 = vpop.xlane.xlu0 %389 }
 0x135   : > { %962 = vrsqrt.f32 %v431_v7  ;;  %v409_v13 = vmul.f32 0.03125, %v369_v9  ;;  %v416_v14 = vmul.f32 0.03125, %v390_v12 }
 0x136   : > { %964 = vrsqrt.f32 %v424_v8 }
 0x137   : > { %v425_v15 = vadd.f32 1e-05, %v409_v13  ;;  %v432_v18 = vadd.f32 1e-05, %v416_v14 }
 0x138   : > { %v393_v19 = vpop.xlane.xlu1 %392  ;;  %v372_v22 = vpop.xlane.xlu0 %371 }
 0x139   : > { %966 = vrsqrt.f32 %v425_v15  ;;  %v417_v16 = vmul.f32 0.03125, %v393_v19  ;;  %v410_v26 = vmul.f32 0.03125, %v372_v22 }
 0x13a   : > { %v957_v27 = vpop.eup %956  ;;  %968 = vrsqrt.f32 %v432_v18 }
 0x13b   : > { %v433_v30 = vadd.f32 1e-05, %v417_v16  ;;  %v426_v31 = vadd.f32 1e-05, %v410_v26  ;;  %v454_v32 = vmul.f32 %v957_v27, %v1151_v36  ;;  %v1260_v36 = vld [vmem:[%s1363_s1] ss:$0 sm:$0xff] }
 0x13c   : > { %v375_v34 = vpop.xlane.xlu1 %374  ;;  %v396_v20 = vpop.xlane.xlu0 %395 }
 0x13d   : > { %970 = vrsqrt.f32 %v433_v30  ;;  %v411_v38 = vmul.f32 0.03125, %v375_v34  ;;  %v418_v39 = vmul.f32 0.03125, %v396_v20  ;;  %v477_v41 = vadd.f32 %v1253_v33, %v454_v32 }
 0x13e   : > { %v959_v40 = vpop.eup %958  ;;  %972 = vrsqrt.f32 %v426_v31 }
 0x13f   : > { %v961_v42 = vpop.eup %960  ;;  %v427_v43 = vadd.f32 1e-05, %v411_v38  ;;  %v434_v46 = vadd.f32 1e-05, %v418_v39  ;;  %v455_v24 = vmul.f32 %v959_v40, %v1159_v44  ;;  %v500_v53 = vmul.f32 %v1260_v36, %v477_v41 }
 0x140   : > { %v399_v48 = vpop.xlane.xlu1 %398  ;;  %v378_v49 = vpop.xlane.xlu0 %377  ;;  %v462_v50 = vmul.f32 %v961_v42, %v1153_v37 }
 0x141   : > { %974 = vrsqrt.f32 %v427_v43  ;;  %v419_v51 = vmul.f32 0.03125, %v399_v48  ;;  %v412_v52 = vmul.f32 0.03125, %v378_v49  ;;  %v478_v28 = vadd.f32 %v1253_v33, %v455_v24 }
 0x142   : > { %v963_v29 = vpop.eup %962  ;;  %976 = vrsqrt.f32 %v434_v46  ;;  %v485_v37 = vadd.f32 %v1253_v33, %v462_v50 }
 0x143   : > { %v965_v56 = vpop.eup %964  ;;  %v435_v44 = vadd.f32 1e-05, %v419_v51  ;;  %v428_v57 = vadd.f32 1e-05, %v412_v52  ;;  %v501_v58 = vmul.f32 %v1260_v36, %v478_v28  ;;  %v463_v59 = vmul.f32 %v963_v29, %v1161_v45 }
 0x144   : > { %v381_v60 = vpop.xlane.xlu1 %380  ;;  %v402_v61 = vpop.xlane.xlu0 %401  ;;  %v456_v62 = vmul.f32 %v965_v56, %v1169_v54  ;;  %v508_v54 = vmul.f32 %v1260_v36, %v485_v37 }
 0x145   : > { %978 = vrsqrt.f32 %v435_v44  ;;  %v413_v63 = vmul.f32 0.03125, %v381_v60  ;;  %v420_v2 = vmul.f32 0.03125, %v402_v61  ;;  %v516_v3 = vpack.c.bf16 %v501_v58, %v500_v53 }
 0x146   : > { %v967_v4 = vpop.eup %966  ;;  %980 = vrsqrt.f32 %v428_v57  ;;  %v486_v5 = vadd.f32 %v1253_v33, %v463_v59  ;;  %v479_v6 = vadd.f32 %v1253_v33, %v456_v62 }
 0x147   : > { %v969_v7 = vpop.eup %968  ;;  %v429_v8 = vadd.f32 1e-05, %v413_v63  ;;  %v436_v9 = vadd.f32 1e-05, %v420_v2  ;;  %910 = vmatprep.mubr.msk.bf16.mxu0 %vm260_vm0, %v516_v3  ;;  %v457_v45 = vmul.f32 %v967_v4, %v1171_v55 }
 0x148   : > { %v405_v12 = vpop.xlane.xlu1 %404  ;;  %v509_v13 = vmul.f32 %v1260_v36, %v486_v5  ;;  %v464_v14 = vmul.f32 %v969_v7, %v1180_v0  ;;  %v502_v16 = vmul.f32 %v1260_v36, %v479_v6 }
 0x149   : > { %982 = vrsqrt.f32 %v429_v8  ;;  %v421_v15 = vmul.f32 0.03125, %v405_v12  ;;  %v480_v18 = vadd.f32 %v1253_v33, %v457_v45 }
 0x14a   : > { %v971_v19 = vpop.eup %970  ;;  %984 = vrsqrt.f32 %v436_v9  ;;  %v520_v22 = vpack.c.bf16 %v509_v13, %v508_v54  ;;  %v487_v31 = vadd.f32 %v1253_v33, %v464_v14 }
 0x14b   : > { %v973_v26 = vpop.eup %972  ;;  %v437_v27 = vadd.f32 1e-05, %v421_v15  ;;  %v503_v55 = vmul.f32 %v1260_v36, %v480_v18  ;;  %v465_v30 = vmul.f32 %v971_v19, %v1183_v1 }
 0x14c   : > { %918 = vmatprep.mubr.msk.bf16.mxu1 %vm260_vm0, %v520_v22  ;;  %v458_v0 = vmul.f32 %v973_v26, %v1192_v10  ;;  %v510_v39 = vmul.f32 %v1260_v36, %v487_v31 }
 0x14d   : > { %986 = vrsqrt.f32 %v437_v27  ;;  %v517_v32 = vpack.c.bf16 %v503_v55, %v502_v16  ;;  %v488_v34 = vadd.f32 %v1253_v33, %v465_v30 }
 0x14e   : > { %v975_v20 = vpop.eup %974  ;;  %v481_v41 = vadd.f32 %v1253_v33, %v458_v0 }
 0x14f   : > { %v977_v38 = vpop.eup %976  ;;  %911 = vmatmul.mubr.msk.bf16.vlgmr.msra.gmra.mxu0 %vm260_vm0, %v517_v32  ;;  %v511_v40 = vmul.f32 %v1260_v36, %v488_v34  ;;  %v459_v1 = vmul.f32 %v975_v20, %v1195_v11 }
 0x150   : > { %v466_v42 = vmul.f32 %v977_v38, %v1204_v23  ;;  %v504_v48 = vmul.f32 %v1260_v36, %v481_v41 }
 0x151   : > { %v521_v43 = vpack.c.bf16 %v511_v40, %v510_v39  ;;  %v482_v10 = vadd.f32 %v1253_v33, %v459_v1 }
 0x152   : > { %v979_v46 = vpop.eup %978  ;;  %v489_v51 = vadd.f32 %v1253_v33, %v466_v42 }
 0x153   : > { %v981_v24 = vpop.eup %980  ;;  %919 = vmatmul.mubr.msk.bf16.vlgmr.msra.gmra.mxu1 %vm260_vm0, %v521_v43  ;;  %v505_v49 = vmul.f32 %v1260_v36, %v482_v10  ;;  %v467_v50 = vmul.f32 %v979_v46, %v1207_v17 }
 0x154   : > { %v460_v11 = vmul.f32 %v981_v24, %v1216_v35  ;;  %v512_v53 = vmul.f32 %v1260_v36, %v489_v51 }
 0x155   : > { %v518_v52 = vpack.c.bf16 %v505_v49, %v504_v48  ;;  %v490_v23 = vadd.f32 %v1253_v33, %v467_v50 }
 0x156   : > { %v983_v28 = vpop.eup %982  ;;  %v483_v57 = vadd.f32 %v1253_v33, %v460_v11 }
 0x157   : > { %v985_v29 = vpop.eup %984  ;;  %914 = vmatprep.mubr.msk.bf16.mxu0 %vm260_vm0, %v518_v52  ;;  %v513_v56 = vmul.f32 %v1260_v36, %v490_v23  ;;  %v461_v44 = vmul.f32 %v983_v28, %v1219_v21 }
 0x158   : > { %v468_v17 = vmul.f32 %v985_v29, %v1228_v25  ;;  %v506_v60 = vmul.f32 %v1260_v36, %v483_v57 }
 0x159   : > { %v522_v58 = vpack.c.bf16 %v513_v56, %v512_v53  ;;  %v484_v35 = vadd.f32 %v1253_v33, %v461_v44 }
 0x15a   : > { %v987_v59 = vpop.eup %986  ;;  %v491_v62 = vadd.f32 %v1253_v33, %v468_v17 }
 0x15b   : > { %922 = vmatprep.mubr.msk.bf16.mxu1 %vm260_vm0, %v522_v58  ;;  %v507_v61 = vmul.f32 %v1260_v36, %v484_v35  ;;  %v469_v37 = vmul.f32 %v987_v59, %v1231_v47 }
 0x15c   : > { %v514_v25 = vmul.f32 %v1260_v36, %v491_v62 }
 0x15d   : > { %v519_v21 = vpack.c.bf16 %v507_v61, %v506_v60  ;;  %v492_v63 = vadd.f32 %v1253_v33, %v469_v37 }
 0x15f   : > { %915 = vmatmul.mubr.msk.bf16.gmra.mxu0 %vm260_vm0, %v519_v21  ;;  %v515_v2 = vmul.f32 %v1260_v36, %v492_v63 }
 0x161   : > { %v523_v3 = vpack.c.bf16 %v515_v2, %v514_v25 }
 0x163   : > { %923 = vmatmul.mubr.msk.bf16.gmra.mxu1 %vm260_vm0, %v523_v3 }
 0x20f   : > { %v912_v47 = vpop.f32.mrf.mxu0 }
 0x210   : > { %v882_v33 = vpack.c.bf16 %v912_v47, %v912_v47 }
 0x211   : > { %v598_v4 = vpop.f32.mrf.mxu0 }
 0x212   : > { %728 = vst.msk [vmem:[%s1319_s14 + $0x8] sm:$0xf] %vm725_vm1, %v882_v33  ;;  %v880_v36 = vpack.c.bf16 %v598_v4, %v598_v4 }
 0x213   : > { %v913_v5 = vpop.f32.mrf.mxu0  ;;  %v920_v6 = vpop.f32.mrf.mxu1 }
 0x214   : > { %726 = vst.msk [vmem:[%s1319_s14] sm:$0xf] %vm725_vm1, %v880_v36  ;;  %v883_v7 = vpack.c.bf16 %v913_v5, %v913_v5  ;;  %v890_v8 = vpack.c.bf16 %v920_v6, %v920_v6 }
 0x215   : > { %v601_v9 = vpop.f32.mrf.mxu0  ;;  %v630_v45 = vpop.f32.mrf.mxu1 }
 0x216   : > { %729 = vst.msk [vmem:[%s1319_s14 + $0xc] sm:$0xf] %vm725_vm1, %v883_v7  ;;  %736 = vst.msk [vmem:[%s1319_s14 + $0x28] sm:$0xf] %vm725_vm1, %v890_v8  ;;  %v881_v12 = vpack.c.bf16 %v601_v9, %v601_v9  ;;  %v888_v54 = vpack.c.bf16 %v630_v45, %v630_v45 }
 0x217   : > { %v921_v13 = vpop.f32.mrf.mxu1 }
 0x218   : > { %727 = vst.msk [vmem:[%s1319_s14 + $0x4] sm:$0xf] %vm725_vm1, %v881_v12  ;;  %734 = vst.msk [vmem:[%s1319_s14 + $0x20] sm:$0xf] %vm725_vm1, %v888_v54  ;;  %v891_v14 = vpack.c.bf16 %v921_v13, %v921_v13 }
 0x219   : > { %v633_v15 = vpop.f32.mrf.mxu1 }
 0x21a   : > { %737 = vst.msk [vmem:[%s1319_s14 + $0x2c] sm:$0xf] %vm725_vm1, %v891_v14  ;;  %v889_v18 = vpack.c.bf16 %v633_v15, %v633_v15 }
 0x21c   : > { %735 = vst.msk [vmem:[%s1319_s14 + $0x24] sm:$0xf] %vm725_vm1, %v889_v18 }
 0x21f   : > { %v916_v19 = vpop.f32.mrf.mxu0 }
 0x220   : > { %v886_v22 = vpack.c.bf16 %v916_v19, %v916_v19 }
 0x221   : > { %v614_v16 = vpop.f32.mrf.mxu0 }
 0x222   : > { %732 = vst.msk [vmem:[%s1319_s14 + $0x18] sm:$0xf] %vm725_vm1, %v886_v22  ;;  %v884_v26 = vpack.c.bf16 %v614_v16, %v614_v16 }
 0x223   : > { %v917_v27 = vpop.f32.mrf.mxu0  ;;  %v924_v55 = vpop.f32.mrf.mxu1 }
 0x224   : > { %730 = vst.msk [vmem:[%s1319_s14 + $0x10] sm:$0xf] %vm725_vm1, %v884_v26  ;;  %v887_v30 = vpack.c.bf16 %v917_v27, %v917_v27  ;;  %v894_v31 = vpack.c.bf16 %v924_v55, %v924_v55 }
 0x225   : > { %v617_v0 = vpop.f32.mrf.mxu0  ;;  %v646_v32 = vpop.f32.mrf.mxu1 }
 0x226   : > { %733 = vst.msk [vmem:[%s1319_s14 + $0x1c] sm:$0xf] %vm725_vm1, %v887_v30  ;;  %740 = vst.msk [vmem:[%s1319_s14 + $0x38] sm:$0xf] %vm725_vm1, %v894_v31  ;;  %v885_v34 = vpack.c.bf16 %v617_v0, %v617_v0  ;;  %v892_v20 = vpack.c.bf16 %v646_v32, %v646_v32 }
 0x227   : > { %v925_v38 = vpop.f32.mrf.mxu1 }
 0x228   : > { %731 = vst.msk [vmem:[%s1319_s14 + $0x14] sm:$0xf] %vm725_vm1, %v885_v34  ;;  %738 = vst.msk [vmem:[%s1319_s14 + $0x30] sm:$0xf] %vm725_vm1, %v892_v20  ;;  %v895_v39 = vpack.c.bf16 %v925_v38, %v925_v38 }
 0x229   : > { %v649_v40 = vpop.f32.mrf.mxu1 }
 0x22a   : > { %741 = vst.msk [vmem:[%s1319_s14 + $0x3c] sm:$0xf] %vm725_vm1, %v895_v39  ;;  %v893_v1 = vpack.c.bf16 %v649_v40, %v649_v40 }
 0x22c   : > { %739 = vst.msk [vmem:[%s1319_s14 + $0x34] sm:$0xf] %vm725_vm1, %v893_v1 }
 0x22d PF: > { %s14_s17 = sadd.s32 1, %s1010_s17   ;;  %s1367_s15 = smov %s1006_s16 }
 0x22e   : > { %p11_p5 = scmp.ge.s32.totalorder %s14_s17, 5   ;;  %s1368_s16 = smov %s1370_s18 }
 0x230   :  { %13 = sbr.rel (!%p11_p5) target bundleno = 2 (0x2), region = 69 }

// kernel: basic_transformer_block.11
= control target key start
LH: loop header
LB: loop body
LE: loop exit
PB: predicated region body
PF: predicated region fallthrough
CT: control target
= control target key end

     0   :  { %vm22_vm0 = vcmask 261120   ;;  %v439_v1 = vmov 0.0   ;;  %s668_s1 = inlined_call_operand.vmem [shape: bf16[32,32], index: 1, kind: input, shape index: {}]   ;;  %s669_s0 = inlined_call_operand.vmem [shape: bf16[128,32], index: 0, kind: input, shape index: {}]   ;;  %s670_s2 = inlined_call_operand.vmem [shape: f32[1,32], index: 2, kind: input, shape index: {}]   ;;  %s671_s3 = inlined_call_operand.vmem [shape: f32[128,32], index: 3, kind: input, shape index: {}]   ;;  %s672_s4 = inlined_call_operand.vmem [shape: f32[128,32], index: 4, kind: output, shape index: {}]  }
   0x1   :  { %v429_v0 = vld [vmem:[%s668_s1 + $0x8] sm:$0xff]   ;;  %25 = vst.msk [vmem:[#allocation2 + $0x10] sm:$0xff] %vm22_vm0, %v439_v1  ;;  %23 = vst.msk [vmem:[#allocation2] sm:$0xff] %vm22_vm0, %v439_v1  ;;  %v430_v2 = vld [vmem:[%s668_s1] sm:$0xff]  }
   0x2   :  { %24 = vst.msk [vmem:[#allocation2 + $0x8] sm:$0xff] %vm22_vm0, %v439_v1  ;;  %26 = vst.msk [vmem:[#allocation2 + $0x18] sm:$0xff] %vm22_vm0, %v439_v1  ;;  %404 = vmatprep.subr.bf16.mxu0 %v429_v0  ;;  %424 = vmatprep.subr.bf16.mxu1 %v429_v0  ;;  %v431_v3 = vld [vmem:[%s669_s0] sm:$0xff]   ;;  %v433_v5 = vld [vmem:[%s669_s0 + $0x8] sm:$0xff]  }
   0x3   :  { %27 = vst.msk [vmem:[#allocation2 + $0x20] sm:$0xff] %vm22_vm0, %v439_v1  ;;  %28 = vst.msk [vmem:[#allocation2 + $0x28] sm:$0xff] %vm22_vm0, %v439_v1  ;;  %405 = vmatpush3.bf16.msra.mxu0 %v429_v0  ;;  %426 = vmatpush3.bf16.msra.mxu1 %v429_v0  ;;  %v432_v4 = vld [vmem:[%s669_s0 + $0x20] sm:$0xff]   ;;  %v434_v6 = vld [vmem:[%s669_s0 + $0x28] sm:$0xff]  }
   0x4   :  { %29 = vst.msk [vmem:[#allocation2 + $0x30] sm:$0xff] %vm22_vm0, %v439_v1  ;;  %30 = vst.msk [vmem:[#allocation2 + $0x38] sm:$0xff] %vm22_vm0, %v439_v1  ;;  %406 = vmatprep.subr.bf16.mxu0 %v430_v2  ;;  %425 = vmatprep.subr.bf16.mxu1 %v430_v2  ;;  %v435_v7 = vld [vmem:[%s669_s0 + $0x10] sm:$0xff]   ;;  %v437_v9 = vld [vmem:[%s669_s0 + $0x18] sm:$0xff]  }
   0x5   :  { %31 = vst.msk [vmem:[#allocation2 + $0x40] sm:$0xff] %vm22_vm0, %v439_v1  ;;  %32 = vst.msk [vmem:[#allocation2 + $0x48] sm:$0xff] %vm22_vm0, %v439_v1  ;;  %408 = vmatprep.mubr.msk.bf16.mxu0 %vm22_vm0, %v431_v3  ;;  %416 = vmatprep.mubr.msk.bf16.mxu1 %vm22_vm0, %v432_v4  ;;  %v436_v8 = vld [vmem:[%s669_s0 + $0x30] sm:$0xff]   ;;  %v438_v10 = vld [vmem:[%s669_s0 + $0x38] sm:$0xff]  }
   0x6   :  { %33 = vst.msk [vmem:[#allocation2 + $0x50] sm:$0xff] %vm22_vm0, %v439_v1  ;;  %34 = vst.msk [vmem:[#allocation2 + $0x58] sm:$0xff] %vm22_vm0, %v439_v1  ;;  %v528_v37 = vld [vmem:[%s670_s2] ss:$0 sm:$0xff]  ;;  %v325_v42 = vld [vmem:[%s671_s3 + $0x10] sm:$0xff] }
   0x7   :  { %35 = vst.msk [vmem:[#allocation2 + $0x60] sm:$0xff] %vm22_vm0, %v439_v1  ;;  %36 = vst.msk [vmem:[#allocation2 + $0x68] sm:$0xff] %vm22_vm0, %v439_v1  ;;  %407 = vmatpush3.bf16.msra.mxu0 %v430_v2  ;;  %427 = vmatpush3.bf16.msra.mxu1 %v430_v2  ;;  %v333_v47 = vld [vmem:[%s671_s3 + $0x50] sm:$0xff]  ;;  %v323_v52 = vld [vmem:[%s671_s3] sm:$0xff] }
   0x8   :  { %37 = vst.msk [vmem:[#allocation2 + $0x70] sm:$0xff] %vm22_vm0, %v439_v1  ;;  %38 = vst.msk [vmem:[#allocation2 + $0x78] sm:$0xff] %vm22_vm0, %v439_v1  ;;  %v41_v11 = vld [vmem:[#allocation2 + $0x10] sm:$0xff]  ;;  %v39_v15 = vld [vmem:[#allocation2] sm:$0xff] }
   0x9   :  { %v42_v21 = vld [vmem:[#allocation2 + $0x18] sm:$0xff]  ;;  %v40_v27 = vld [vmem:[#allocation2 + $0x8] sm:$0xff]  ;;  %v331_v59 = vld [vmem:[%s671_s3 + $0x40] sm:$0xff] }
   0xa   :  { %409 = vmatmul.mubr.msk.bf16.vlgmr.msra.gmra.mxu0 %vm22_vm0, %v433_v5  ;;  %417 = vmatmul.mubr.msk.bf16.vlgmr.msra.gmra.mxu1 %vm22_vm0, %v434_v6  ;;  %v43_v40 = vld [vmem:[#allocation2 + $0x20] sm:$0xff]  ;;  %v326_v2 = vld [vmem:[%s671_s3 + $0x18] sm:$0xff]  ;;  %v44_v3 = vld [vmem:[#allocation2 + $0x28] sm:$0xff] }
   0xb   :  { %412 = vmatprep.mubr.msk.bf16.mxu0 %vm22_vm0, %v435_v7  ;;  %420 = vmatprep.mubr.msk.bf16.mxu1 %vm22_vm0, %v436_v8  ;;  %v45_v33 = vld [vmem:[#allocation2 + $0x30] sm:$0xff]  ;;  %v46_v55 = vld [vmem:[#allocation2 + $0x38] sm:$0xff] }
   0xc   :  { %v47_v16 = vld [vmem:[#allocation2 + $0x40] sm:$0xff]  ;;  %v48_v28 = vld [vmem:[#allocation2 + $0x48] sm:$0xff]  ;;  %v334_v7 = vld [vmem:[%s671_s3 + $0x58] sm:$0xff] }
   0xd   :  { %v49_v12 = vld [vmem:[#allocation2 + $0x50] sm:$0xff]  ;;  %v50_v22 = vld [vmem:[#allocation2 + $0x58] sm:$0xff] }
   0xe   :  { %v51_v41 = vld [vmem:[#allocation2 + $0x60] sm:$0xff]  ;;  %v52_v4 = vld [vmem:[#allocation2 + $0x68] sm:$0xff] }
   0xf   :  { %v53_v34 = vld [vmem:[#allocation2 + $0x70] sm:$0xff]  ;;  %v54_v56 = vld [vmem:[#allocation2 + $0x78] sm:$0xff] }
  0x12   :  { %413 = vmatmul.mubr.msk.bf16.gmra.mxu0 %vm22_vm0, %v437_v9  ;;  %421 = vmatmul.mubr.msk.bf16.gmra.mxu1 %vm22_vm0, %v438_v10 }
  0xca   :  { %v410_v13 = vpop.f32.mrf.mxu0  ;;  %v418_v14 = vpop.f32.mrf.mxu1 }
  0xcb   :  { %v251_v17 = vadd.f32 %v410_v13, %v41_v11  ;;  %v259_v18 = vadd.f32 %v418_v14, %v49_v12 }
  0xcc   :  { %v186_v19 = vpop.f32.mrf.mxu0  ;;  %v218_v20 = vpop.f32.mrf.mxu1 }
  0xcd   :  { %267 = vst.msk [vmem:[#allocation2 + $0x10] sm:$0xff] %vm22_vm0, %v251_v17  ;;  %275 = vst.msk [vmem:[#allocation2 + $0x50] sm:$0xff] %vm22_vm0, %v259_v18  ;;  %v249_v23 = vadd.f32 %v186_v19, %v39_v15  ;;  %v257_v24 = vadd.f32 %v218_v20, %v47_v16  ;;  %v324_v16 = vld [vmem:[%s671_s3 + $0x8] sm:$0xff] }
  0xce   :  { %v411_v25 = vpop.f32.mrf.mxu0  ;;  %v419_v26 = vpop.f32.mrf.mxu1  ;;  %v332_v19 = vld [vmem:[%s671_s3 + $0x48] sm:$0xff] }
  0xcf   :  { %265 = vst.msk [vmem:[#allocation2] sm:$0xff] %vm22_vm0, %v249_v23  ;;  %273 = vst.msk [vmem:[#allocation2 + $0x40] sm:$0xff] %vm22_vm0, %v257_v24  ;;  %v252_v29 = vadd.f32 %v411_v25, %v42_v21  ;;  %v260_v30 = vadd.f32 %v419_v26, %v50_v22  ;;  %v329_v26 = vld [vmem:[%s671_s3 + $0x30] sm:$0xff] }
  0xd0   :  { %v189_v31 = vpop.f32.mrf.mxu0  ;;  %v221_v32 = vpop.f32.mrf.mxu1 }
  0xd1   :  { %268 = vst.msk [vmem:[#allocation2 + $0x18] sm:$0xff] %vm22_vm0, %v252_v29  ;;  %276 = vst.msk [vmem:[#allocation2 + $0x58] sm:$0xff] %vm22_vm0, %v260_v30  ;;  %v250_v35 = vadd.f32 %v189_v31, %v40_v27  ;;  %v258_v36 = vadd.f32 %v221_v32, %v48_v28  ;;  %v337_v29 = vld [vmem:[%s671_s3 + $0x70] sm:$0xff] }
  0xd2   :  { %v414_v38 = vpop.f32.mrf.mxu0  ;;  %v422_v39 = vpop.f32.mrf.mxu1 }
  0xd3   :  { %266 = vst.msk [vmem:[#allocation2 + $0x8] sm:$0xff] %vm22_vm0, %v250_v35  ;;  %274 = vst.msk [vmem:[#allocation2 + $0x48] sm:$0xff] %vm22_vm0, %v258_v36  ;;  %v255_v43 = vadd.f32 %v414_v38, %v45_v33  ;;  %v263_v44 = vadd.f32 %v422_v39, %v53_v34  ;;  %v327_v34 = vld [vmem:[%s671_s3 + $0x20] sm:$0xff] }
  0xd4   :  { %v286_v45 = vld [vmem:[#allocation2 + $0x10] sm:$0xff]  ;;  %v202_v48 = vpop.f32.mrf.mxu0  ;;  %v234_v49 = vpop.f32.mrf.mxu1  ;;  %v335_v38 = vld [vmem:[%s671_s3 + $0x60] sm:$0xff] }
  0xd5   :  { %v294_v46 = vld [vmem:[#allocation2 + $0x50] sm:$0xff]  ;;  %v309_v50 = vadd.f32 %v528_v37, %v286_v45  ;;  %271 = vst.msk [vmem:[#allocation2 + $0x30] sm:$0xff] %vm22_vm0, %v255_v43  ;;  %279 = vst.msk [vmem:[#allocation2 + $0x70] sm:$0xff] %vm22_vm0, %v263_v44  ;;  %v253_v53 = vadd.f32 %v202_v48, %v43_v40  ;;  %v261_v54 = vadd.f32 %v234_v49, %v51_v41  ;;  %v330_v43 = vld [vmem:[%s671_s3 + $0x38] sm:$0xff] }
  0xd6   :  { %v317_v51 = vadd.f32 %v528_v37, %v294_v46  ;;  %v284_v57 = vld [vmem:[#allocation2] sm:$0xff]  ;;  %v415_v60 = vpop.f32.mrf.mxu0  ;;  %v423_v61 = vpop.f32.mrf.mxu1  ;;  %v338_v48 = vld [vmem:[%s671_s3 + $0x78] sm:$0xff] }
  0xd7   :  { %v292_v58 = vld [vmem:[#allocation2 + $0x40] sm:$0xff]  ;;  %v341_v62 = vadd.f32 %v325_v42, %v309_v50  ;;  %v307_v0 = vadd.f32 %v528_v37, %v284_v57  ;;  %269 = vst.msk [vmem:[#allocation2 + $0x20] sm:$0xff] %vm22_vm0, %v253_v53  ;;  %277 = vst.msk [vmem:[#allocation2 + $0x60] sm:$0xff] %vm22_vm0, %v261_v54  ;;  %v256_v8 = vadd.f32 %v415_v60, %v46_v55  ;;  %v336_v54 = vld [vmem:[%s671_s3 + $0x68] sm:$0xff] }
  0xd8   :  { %v349_v63 = vadd.f32 %v333_v47, %v317_v51  ;;  %v315_v1 = vadd.f32 %v528_v37, %v292_v58  ;;  %v287_v5 = vld [vmem:[#allocation2 + $0x18] sm:$0xff]  ;;  %v264_v9 = vadd.f32 %v423_v61, %v54_v56  ;;  %v205_v10 = vpop.f32.mrf.mxu0  ;;  %v237_v11 = vpop.f32.mrf.mxu1  ;;  %v328_v51 = vld [vmem:[%s671_s3 + $0x28] sm:$0xff] }
  0xd9   :  { %v295_v6 = vld [vmem:[#allocation2 + $0x58] sm:$0xff]  ;;  %357 = vst.msk [vmem:[%s672_s4 + $0x10] sm:$0xff] %vm22_vm0, %v341_v62  ;;  %v339_v12 = vadd.f32 %v323_v52, %v307_v0  ;;  %v310_v14 = vadd.f32 %v528_v37, %v287_v5  ;;  %272 = vst.msk [vmem:[#allocation2 + $0x38] sm:$0xff] %vm22_vm0, %v256_v8  ;;  %v254_v20 = vadd.f32 %v205_v10, %v44_v3 }
  0xda   :  { %365 = vst.msk [vmem:[%s672_s4 + $0x50] sm:$0xff] %vm22_vm0, %v349_v63  ;;  %v347_v13 = vadd.f32 %v331_v59, %v315_v1  ;;  %v318_v15 = vadd.f32 %v528_v37, %v295_v6  ;;  %v285_v17 = vld [vmem:[#allocation2 + $0x8] sm:$0xff]  ;;  %280 = vst.msk [vmem:[#allocation2 + $0x78] sm:$0xff] %vm22_vm0, %v264_v9  ;;  %v262_v21 = vadd.f32 %v237_v11, %v52_v4 }
  0xdb   :  { %v293_v18 = vld [vmem:[#allocation2 + $0x48] sm:$0xff]  ;;  %355 = vst.msk [vmem:[%s672_s4] sm:$0xff] %vm22_vm0, %v339_v12  ;;  %v342_v22 = vadd.f32 %v326_v2, %v310_v14  ;;  %v308_v24 = vadd.f32 %v528_v37, %v285_v17  ;;  %270 = vst.msk [vmem:[#allocation2 + $0x28] sm:$0xff] %vm22_vm0, %v254_v20 }
  0xdc   :  { %363 = vst.msk [vmem:[%s672_s4 + $0x40] sm:$0xff] %vm22_vm0, %v347_v13  ;;  %v350_v23 = vadd.f32 %v334_v7, %v318_v15  ;;  %v316_v25 = vadd.f32 %v528_v37, %v293_v18  ;;  %v290_v27 = vld [vmem:[#allocation2 + $0x30] sm:$0xff]  ;;  %278 = vst.msk [vmem:[#allocation2 + $0x68] sm:$0xff] %vm22_vm0, %v262_v21 }
  0xdd   :  { %v298_v28 = vld [vmem:[#allocation2 + $0x70] sm:$0xff]  ;;  %358 = vst.msk [vmem:[%s672_s4 + $0x18] sm:$0xff] %vm22_vm0, %v342_v22  ;;  %v340_v30 = vadd.f32 %v324_v16, %v308_v24  ;;  %v313_v32 = vadd.f32 %v528_v37, %v290_v27 }
  0xde   :  { %366 = vst.msk [vmem:[%s672_s4 + $0x58] sm:$0xff] %vm22_vm0, %v350_v23  ;;  %v348_v31 = vadd.f32 %v332_v19, %v316_v25  ;;  %v321_v33 = vadd.f32 %v528_v37, %v298_v28  ;;  %v288_v35 = vld [vmem:[#allocation2 + $0x20] sm:$0xff] }
  0xdf   :  { %v296_v36 = vld [vmem:[#allocation2 + $0x60] sm:$0xff]  ;;  %356 = vst.msk [vmem:[%s672_s4 + $0x8] sm:$0xff] %vm22_vm0, %v340_v30  ;;  %v345_v39 = vadd.f32 %v329_v26, %v313_v32  ;;  %v311_v41 = vadd.f32 %v528_v37, %v288_v35 }
  0xe0   :  { %364 = vst.msk [vmem:[%s672_s4 + $0x48] sm:$0xff] %vm22_vm0, %v348_v31  ;;  %v353_v40 = vadd.f32 %v337_v29, %v321_v33  ;;  %v319_v42 = vadd.f32 %v528_v37, %v296_v36  ;;  %v291_v46 = vld [vmem:[#allocation2 + $0x38] sm:$0xff] }
  0xe1   :  { %361 = vst.msk [vmem:[%s672_s4 + $0x30] sm:$0xff] %vm22_vm0, %v345_v39  ;;  %v343_v44 = vadd.f32 %v327_v34, %v311_v41  ;;  %v299_v47 = vld [vmem:[#allocation2 + $0x78] sm:$0xff]  ;;  %v314_v49 = vadd.f32 %v528_v37, %v291_v46 }
  0xe2   :  { %369 = vst.msk [vmem:[%s672_s4 + $0x70] sm:$0xff] %vm22_vm0, %v353_v40  ;;  %v351_v45 = vadd.f32 %v335_v38, %v319_v42  ;;  %v322_v50 = vadd.f32 %v528_v37, %v299_v47  ;;  %v289_v52 = vld [vmem:[#allocation2 + $0x28] sm:$0xff] }
  0xe3   :  { %359 = vst.msk [vmem:[%s672_s4 + $0x20] sm:$0xff] %vm22_vm0, %v343_v44  ;;  %v297_v53 = vld [vmem:[#allocation2 + $0x68] sm:$0xff]  ;;  %v346_v55 = vadd.f32 %v330_v43, %v314_v49  ;;  %v312_v57 = vadd.f32 %v528_v37, %v289_v52 }
  0xe4   :  { %367 = vst.msk [vmem:[%s672_s4 + $0x60] sm:$0xff] %vm22_vm0, %v351_v45  ;;  %v354_v56 = vadd.f32 %v338_v48, %v322_v50  ;;  %v320_v58 = vadd.f32 %v528_v37, %v297_v53 }
  0xe5   :  { %362 = vst.msk [vmem:[%s672_s4 + $0x38] sm:$0xff] %vm22_vm0, %v346_v55  ;;  %v344_v59 = vadd.f32 %v328_v51, %v312_v57 }
  0xe6   :  { %370 = vst.msk [vmem:[%s672_s4 + $0x78] sm:$0xff] %vm22_vm0, %v354_v56  ;;  %v352_v60 = vadd.f32 %v336_v54, %v320_v58 }
  0xe7   :  { %360 = vst.msk [vmem:[%s672_s4 + $0x28] sm:$0xff] %vm22_vm0, %v344_v59 }
  0xe8   :  { %368 = vst.msk [vmem:[%s672_s4 + $0x68] sm:$0xff] %vm22_vm0, %v352_v60 }

// kernel: basic_transformer_block.12
= control target key start
LH: loop header
LB: loop body
LE: loop exit
PB: predicated region body
PF: predicated region fallthrough
CT: control target
= control target key end

     0   :  { %vm34_vm0 = vcmask 261120   ;;  %vm499_vm1 = vcmask 257024   ;;  %s977_s0 = inlined_call_operand.vmem [shape: f32[128,32], index: 0, kind: input, shape index: {}]   ;;  %s978_s3 = inlined_call_operand.vmem [shape: bf16[1,32,32], index: 3, kind: input, shape index: {}]   ;;  %s979_s2 = inlined_call_operand.vmem [shape: f32[1,32], index: 2, kind: input, shape index: {}]   ;;  %s980_s1 = inlined_call_operand.vmem [shape: f32[1,32], index: 1, kind: input, shape index: {}]   ;;  %s981_s4 = inlined_call_operand.vmem [shape: bf16[1,128,32], index: 4, kind: output, shape index: {}]  }
   0x1   :  { %v18_v0 = vld [vmem:[%s977_s0] sm:$0xff]  ;;  %v19_v2 = vld [vmem:[%s977_s0 + $0x8] sm:$0xff]  ;;  %v20_v8 = vld [vmem:[%s977_s0 + $0x10] sm:$0xff] }
   0x2   :  { %v26_v1 = vld [vmem:[%s977_s0 + $0x40] sm:$0xff]  ;;  %v35_v3 = vsel %vm34_vm0, %v18_v0, 0.0  ;;  %v27_v5 = vld [vmem:[%s977_s0 + $0x48] sm:$0xff]  ;;  %v38_v6 = vsel %vm34_vm0, %v19_v2, 0.0  ;;  %v21_v9 = vld [vmem:[%s977_s0 + $0x18] sm:$0xff]  ;;  %v41_v10 = vsel %vm34_vm0, %v20_v8, 0.0 }
   0x3   :  { %v59_v4 = vsel %vm34_vm0, %v26_v1, 0.0  ;;  %36 = vadd.xlane.f32.xlu0 %v35_v3  ;;  %v62_v7 = vsel %vm34_vm0, %v27_v5, 0.0  ;;  %v44_v11 = vsel %vm34_vm0, %v21_v9, 0.0  ;;  %v684_v12 = vld [vmem:[%s977_s0 + $0x50] sm:$0xff]  ;;  %v689_v13 = vld [vmem:[%s977_s0 + $0x58] sm:$0xff]  ;;  %v698_v16 = vld [vmem:[%s977_s0 + $0x20] sm:$0xff] }
   0x4   :  { %60 = vadd.xlane.f32.xlu1 %v59_v4  ;;  %v65_v14 = vsel %vm34_vm0, %v684_v12, 0.0  ;;  %v68_v15 = vsel %vm34_vm0, %v689_v13, 0.0  ;;  %v703_v17 = vld [vmem:[%s977_s0 + $0x28] sm:$0xff]  ;;  %v47_v18 = vsel %vm34_vm0, %v698_v16, 0.0  ;;  %v712_v20 = vld [vmem:[%s977_s0 + $0x60] sm:$0xff]  ;;  %v726_v24 = vld [vmem:[%s977_s0 + $0x30] sm:$0xff] }
   0x5   :  { %v50_v19 = vsel %vm34_vm0, %v703_v17, 0.0  ;;  %v717_v21 = vld [vmem:[%s977_s0 + $0x68] sm:$0xff]  ;;  %v71_v22 = vsel %vm34_vm0, %v712_v20, 0.0  ;;  %v731_v25 = vld [vmem:[%s977_s0 + $0x38] sm:$0xff]  ;;  %v53_v26 = vsel %vm34_vm0, %v726_v24, 0.0  ;;  %v740_v28 = vld [vmem:[%s977_s0 + $0x70] sm:$0xff] }
   0x6   :  { %v74_v23 = vsel %vm34_vm0, %v717_v21, 0.0  ;;  %v56_v27 = vsel %vm34_vm0, %v731_v25, 0.0  ;;  %v745_v29 = vld [vmem:[%s977_s0 + $0x78] sm:$0xff]  ;;  %v77_v30 = vsel %vm34_vm0, %v740_v28, 0.0 }
   0x7   :  { %39 = vadd.xlane.f32.xlu0 %v38_v6  ;;  %v80_v31 = vsel %vm34_vm0, %v745_v29, 0.0 }
   0x8   :  { %63 = vadd.xlane.f32.xlu1 %v62_v7 }
   0xb   :  { %42 = vadd.xlane.f32.xlu0 %v41_v10 }
   0xc   :  { %45 = vadd.xlane.f32.xlu1 %v44_v11 }
   0xf   :  { %66 = vadd.xlane.f32.xlu0 %v65_v14 }
  0x10   :  { %69 = vadd.xlane.f32.xlu1 %v68_v15 }
  0x13   :  { %48 = vadd.xlane.f32.xlu0 %v47_v18 }
  0x14   :  { %51 = vadd.xlane.f32.xlu1 %v50_v19 }
  0x17   :  { %72 = vadd.xlane.f32.xlu0 %v71_v22 }
  0x18   :  { %75 = vadd.xlane.f32.xlu1 %v74_v23 }
  0x1b   :  { %54 = vadd.xlane.f32.xlu0 %v53_v26 }
  0x1c   :  { %57 = vadd.xlane.f32.xlu1 %v56_v27 }
  0x1f   :  { %78 = vadd.xlane.f32.xlu0 %v77_v30 }
  0x20   :  { %81 = vadd.xlane.f32.xlu1 %v80_v31 }
  0x8c   :  { %v37_v32 = vpop.xlane.xlu0 %36 }
  0x8d   :  { %v61_v33 = vpop.xlane.xlu1 %60  ;;  %v84_v34 = vmul.f32 0.03125, %v37_v32 }
  0x8e   :  { %v92_v35 = vmul.f32 0.03125, %v61_v33 }
  0x8f   :  { %v751_v36 = vsub.f32 %v18_v0, %v84_v34 }
  0x90   :  { %v753_v37 = vsub.f32 %v26_v1, %v92_v35  ;;  %v40_v38 = vpop.xlane.xlu0 %39 }
  0x91   :  { %v64_v39 = vpop.xlane.xlu1 %63  ;;  %v85_v40 = vmul.f32 0.03125, %v40_v38  ;;  %v116_v42 = vmul.f32 %v751_v36, %v751_v36 }
  0x92   :  { %v93_v41 = vmul.f32 0.03125, %v64_v39  ;;  %v124_v43 = vmul.f32 %v753_v37, %v753_v37 }
  0x93   :  { %v759_v44 = vsub.f32 %v19_v2, %v85_v40  ;;  %v132_v46 = vsel %vm34_vm0, %v116_v42, 0.0 }
  0x94   :  { %v761_v45 = vsub.f32 %v27_v5, %v93_v41  ;;  %133 = vadd.xlane.f32.xlu0 %v132_v46  ;;  %v43_v47 = vpop.xlane.xlu0 %42  ;;  %v156_v49 = vsel %vm34_vm0, %v124_v43, 0.0 }
  0x95   :  { %v46_v48 = vpop.xlane.xlu1 %45  ;;  %v86_v50 = vmul.f32 0.03125, %v43_v47  ;;  %v117_v52 = vmul.f32 %v759_v44, %v759_v44 }
  0x96   :  { %v87_v51 = vmul.f32 0.03125, %v46_v48  ;;  %v125_v53 = vmul.f32 %v761_v45, %v761_v45 }
  0x97   :  { %v769_v54 = vsub.f32 %v20_v8, %v86_v50  ;;  %v135_v56 = vsel %vm34_vm0, %v117_v52, 0.0 }
  0x98   :  { %v771_v55 = vsub.f32 %v21_v9, %v87_v51  ;;  %157 = vadd.xlane.f32.xlu0 %v156_v49  ;;  %136 = vadd.xlane.f32.xlu1 %v135_v56  ;;  %v67_v57 = vpop.xlane.xlu0 %66  ;;  %v159_v59 = vsel %vm34_vm0, %v125_v53, 0.0  ;;  %v599_v53 = vld [vmem:[%s978_s3] sm:$0xff]  }
  0x99   :  { %v70_v58 = vpop.xlane.xlu1 %69  ;;  %v94_v60 = vmul.f32 0.03125, %v67_v57  ;;  %v118_v62 = vmul.f32 %v769_v54, %v769_v54 }
  0x9a   :  { %v95_v61 = vmul.f32 0.03125, %v70_v58  ;;  %v119_v63 = vmul.f32 %v771_v55, %v771_v55 }
  0x9b   :  { %v780_v0 = vsub.f32 %v684_v12, %v94_v60  ;;  %v138_v2 = vsel %vm34_vm0, %v118_v62, 0.0 }
  0x9c   :  { %v783_v1 = vsub.f32 %v689_v13, %v95_v61  ;;  %160 = vadd.xlane.f32.xlu1 %v159_v59  ;;  %139 = vadd.xlane.f32.xlu0 %v138_v2  ;;  %v49_v3 = vpop.xlane.xlu0 %48  ;;  %v141_v5 = vsel %vm34_vm0, %v119_v63, 0.0 }
  0x9d   :  { %v52_v4 = vpop.xlane.xlu1 %51  ;;  %v88_v6 = vmul.f32 0.03125, %v49_v3  ;;  %v126_v8 = vmul.f32 %v780_v0, %v780_v0 }
  0x9e   :  { %v89_v7 = vmul.f32 0.03125, %v52_v4  ;;  %v127_v9 = vmul.f32 %v783_v1, %v783_v1 }
  0x9f   :  { %v792_v10 = vsub.f32 %v698_v16, %v88_v6  ;;  %v162_v12 = vsel %vm34_vm0, %v126_v8, 0.0 }
  0xa0   :  { %v795_v11 = vsub.f32 %v703_v17, %v89_v7  ;;  %142 = vadd.xlane.f32.xlu1 %v141_v5  ;;  %163 = vadd.xlane.f32.xlu0 %v162_v12  ;;  %v73_v13 = vpop.xlane.xlu0 %72  ;;  %v165_v15 = vsel %vm34_vm0, %v127_v9, 0.0 }
  0xa1   :  { %v76_v14 = vpop.xlane.xlu1 %75  ;;  %v96_v18 = vmul.f32 0.03125, %v73_v13  ;;  %v120_v22 = vmul.f32 %v792_v10, %v792_v10 }
  0xa2   :  { %v97_v19 = vmul.f32 0.03125, %v76_v14  ;;  %v121_v16 = vmul.f32 %v795_v11, %v795_v11 }
  0xa3   :  { %v804_v23 = vsub.f32 %v712_v20, %v96_v18  ;;  %v144_v26 = vsel %vm34_vm0, %v120_v22, 0.0 }
  0xa4   :  { %v807_v17 = vsub.f32 %v717_v21, %v97_v19  ;;  %166 = vadd.xlane.f32.xlu1 %v165_v15  ;;  %145 = vadd.xlane.f32.xlu0 %v144_v26  ;;  %v55_v27 = vpop.xlane.xlu0 %54  ;;  %v147_v31 = vsel %vm34_vm0, %v121_v16, 0.0 }
  0xa5   :  { %v58_v30 = vpop.xlane.xlu1 %57  ;;  %v90_v32 = vmul.f32 0.03125, %v55_v27  ;;  %v128_v34 = vmul.f32 %v804_v23, %v804_v23 }
  0xa6   :  { %v91_v33 = vmul.f32 0.03125, %v58_v30  ;;  %v129_v20 = vmul.f32 %v807_v17, %v807_v17 }
  0xa7   :  { %v816_v35 = vsub.f32 %v726_v24, %v90_v32  ;;  %v168_v38 = vsel %vm34_vm0, %v128_v34, 0.0 }
  0xa8   :  { %v819_v21 = vsub.f32 %v731_v25, %v91_v33  ;;  %148 = vadd.xlane.f32.xlu1 %v147_v31  ;;  %169 = vadd.xlane.f32.xlu0 %v168_v38  ;;  %v79_v39 = vpop.xlane.xlu0 %78  ;;  %v171_v41 = vsel %vm34_vm0, %v129_v20, 0.0  ;;  %v851_v33 = vld [vmem:[%s979_s2] ss:$0 sm:$0xff] }
  0xa9   :  { %v82_v40 = vpop.xlane.xlu1 %81  ;;  %v98_v42 = vmul.f32 0.03125, %v79_v39  ;;  %v122_v46 = vmul.f32 %v816_v35, %v816_v35 }
  0xaa   :  { %v99_v43 = vmul.f32 0.03125, %v82_v40  ;;  %v123_v24 = vmul.f32 %v819_v21, %v819_v21 }
  0xab   :  { %v828_v47 = vsub.f32 %v740_v28, %v98_v42  ;;  %v150_v48 = vsel %vm34_vm0, %v122_v46, 0.0 }
  0xac   :  { %v831_v25 = vsub.f32 %v745_v29, %v99_v43  ;;  %172 = vadd.xlane.f32.xlu1 %v171_v41  ;;  %151 = vadd.xlane.f32.xlu0 %v150_v48  ;;  %v153_v49 = vsel %vm34_vm0, %v123_v24, 0.0  ;;  %v598_v29 = vld [vmem:[%s978_s3 + $0x8] sm:$0xff]  }
  0xad   :  { %v130_v50 = vmul.f32 %v828_v47, %v828_v47  ;;  %574 = vmatprep.subr.bf16.mxu0 %v598_v29  ;;  %594 = vmatprep.subr.bf16.mxu1 %v598_v29 }
  0xae   :  { %v131_v51 = vmul.f32 %v831_v25, %v831_v25  ;;  %575 = vmatpush3.bf16.msra.mxu0 %v598_v29  ;;  %596 = vmatpush3.bf16.msra.mxu1 %v598_v29 }
  0xaf   :  { %v174_v52 = vsel %vm34_vm0, %v130_v50, 0.0  ;;  %576 = vmatprep.subr.bf16.mxu0 %v599_v53  ;;  %595 = vmatprep.subr.bf16.mxu1 %v599_v53 }
  0xb0   :  { %154 = vadd.xlane.f32.xlu1 %v153_v49  ;;  %175 = vadd.xlane.f32.xlu0 %v174_v52  ;;  %v177_v28 = vsel %vm34_vm0, %v131_v51, 0.0 }
  0xb2   :  { %577 = vmatpush3.bf16.msra.mxu0 %v599_v53  ;;  %597 = vmatpush3.bf16.msra.mxu1 %v599_v53 }
  0xb4   :  { %178 = vadd.xlane.f32.xlu1 %v177_v28 }
 0x11d   :  { %v134_v56 = vpop.xlane.xlu0 %133 }
 0x11e   :  { %v180_v57 = vmul.f32 0.03125, %v134_v56 }
 0x120   :  { %v196_v58 = vadd.f32 1e-05, %v180_v57 }
 0x121   :  { %v137_v59 = vpop.xlane.xlu1 %136  ;;  %v158_v60 = vpop.xlane.xlu0 %157 }
 0x122   :  { %600 = vrsqrt.f32 %v196_v58  ;;  %v181_v61 = vmul.f32 0.03125, %v137_v59  ;;  %v188_v62 = vmul.f32 0.03125, %v158_v60 }
 0x124   :  { %v197_v63 = vadd.f32 1e-05, %v181_v61  ;;  %v204_v2 = vadd.f32 1e-05, %v188_v62 }
 0x125   :  { %v161_v3 = vpop.xlane.xlu1 %160  ;;  %v140_v4 = vpop.xlane.xlu0 %139 }
 0x126   :  { %602 = vrsqrt.f32 %v197_v63  ;;  %v189_v5 = vmul.f32 0.03125, %v161_v3  ;;  %v182_v6 = vmul.f32 0.03125, %v140_v4 }
 0x127   :  { %604 = vrsqrt.f32 %v204_v2 }
 0x128   :  { %v205_v7 = vadd.f32 1e-05, %v189_v5  ;;  %v198_v8 = vadd.f32 1e-05, %v182_v6 }
 0x129   :  { %v143_v9 = vpop.xlane.xlu1 %142  ;;  %v164_v12 = vpop.xlane.xlu0 %163 }
 0x12a   :  { %606 = vrsqrt.f32 %v205_v7  ;;  %v183_v13 = vmul.f32 0.03125, %v143_v9  ;;  %v190_v14 = vmul.f32 0.03125, %v164_v12 }
 0x12b   :  { %608 = vrsqrt.f32 %v198_v8 }
 0x12c   :  { %v199_v15 = vadd.f32 1e-05, %v183_v13  ;;  %v206_v18 = vadd.f32 1e-05, %v190_v14 }
 0x12d   :  { %v167_v19 = vpop.xlane.xlu1 %166  ;;  %v146_v22 = vpop.xlane.xlu0 %145 }
 0x12e   :  { %610 = vrsqrt.f32 %v199_v15  ;;  %v191_v16 = vmul.f32 0.03125, %v167_v19  ;;  %v184_v26 = vmul.f32 0.03125, %v146_v22 }
 0x12f   :  { %v601_v27 = vpop.eup %600  ;;  %612 = vrsqrt.f32 %v206_v18 }
 0x130   :  { %v207_v30 = vadd.f32 1e-05, %v191_v16  ;;  %v200_v31 = vadd.f32 1e-05, %v184_v26  ;;  %v228_v32 = vmul.f32 %v601_v27, %v751_v36  ;;  %v858_v36 = vld [vmem:[%s980_s1] ss:$0 sm:$0xff] }
 0x131   :  { %v149_v34 = vpop.xlane.xlu1 %148  ;;  %v170_v20 = vpop.xlane.xlu0 %169 }
 0x132   :  { %614 = vrsqrt.f32 %v207_v30  ;;  %v185_v38 = vmul.f32 0.03125, %v149_v34  ;;  %v192_v39 = vmul.f32 0.03125, %v170_v20  ;;  %v251_v41 = vadd.f32 %v851_v33, %v228_v32 }
 0x133   :  { %v603_v40 = vpop.eup %602  ;;  %616 = vrsqrt.f32 %v200_v31 }
 0x134   :  { %v605_v42 = vpop.eup %604  ;;  %v201_v43 = vadd.f32 1e-05, %v185_v38  ;;  %v208_v46 = vadd.f32 1e-05, %v192_v39  ;;  %v229_v24 = vmul.f32 %v603_v40, %v759_v44  ;;  %v274_v53 = vmul.f32 %v858_v36, %v251_v41 }
 0x135   :  { %v173_v48 = vpop.xlane.xlu1 %172  ;;  %v152_v49 = vpop.xlane.xlu0 %151  ;;  %v236_v50 = vmul.f32 %v605_v42, %v753_v37 }
 0x136   :  { %618 = vrsqrt.f32 %v201_v43  ;;  %v193_v51 = vmul.f32 0.03125, %v173_v48  ;;  %v186_v52 = vmul.f32 0.03125, %v152_v49  ;;  %v252_v28 = vadd.f32 %v851_v33, %v229_v24 }
 0x137   :  { %v607_v29 = vpop.eup %606  ;;  %620 = vrsqrt.f32 %v208_v46  ;;  %v259_v37 = vadd.f32 %v851_v33, %v236_v50 }
 0x138   :  { %v609_v56 = vpop.eup %608  ;;  %v209_v44 = vadd.f32 1e-05, %v193_v51  ;;  %v202_v57 = vadd.f32 1e-05, %v186_v52  ;;  %v275_v58 = vmul.f32 %v858_v36, %v252_v28  ;;  %v237_v59 = vmul.f32 %v607_v29, %v761_v45 }
 0x139   :  { %v155_v60 = vpop.xlane.xlu1 %154  ;;  %v176_v61 = vpop.xlane.xlu0 %175  ;;  %v230_v62 = vmul.f32 %v609_v56, %v769_v54  ;;  %v282_v54 = vmul.f32 %v858_v36, %v259_v37 }
 0x13a   :  { %622 = vrsqrt.f32 %v209_v44  ;;  %v187_v63 = vmul.f32 0.03125, %v155_v60  ;;  %v194_v2 = vmul.f32 0.03125, %v176_v61  ;;  %v290_v3 = vpack.c.bf16 %v275_v58, %v274_v53 }
 0x13b   :  { %v611_v4 = vpop.eup %610  ;;  %624 = vrsqrt.f32 %v202_v57  ;;  %v260_v5 = vadd.f32 %v851_v33, %v237_v59  ;;  %v253_v6 = vadd.f32 %v851_v33, %v230_v62 }
 0x13c   :  { %v613_v7 = vpop.eup %612  ;;  %v203_v8 = vadd.f32 1e-05, %v187_v63  ;;  %v210_v9 = vadd.f32 1e-05, %v194_v2  ;;  %578 = vmatprep.mubr.msk.bf16.mxu0 %vm34_vm0, %v290_v3  ;;  %v231_v45 = vmul.f32 %v611_v4, %v771_v55 }
 0x13d   :  { %v179_v12 = vpop.xlane.xlu1 %178  ;;  %v283_v13 = vmul.f32 %v858_v36, %v260_v5  ;;  %v238_v14 = vmul.f32 %v613_v7, %v780_v0  ;;  %v276_v16 = vmul.f32 %v858_v36, %v253_v6 }
 0x13e   :  { %626 = vrsqrt.f32 %v203_v8  ;;  %v195_v15 = vmul.f32 0.03125, %v179_v12  ;;  %v254_v18 = vadd.f32 %v851_v33, %v231_v45 }
 0x13f   :  { %v615_v19 = vpop.eup %614  ;;  %628 = vrsqrt.f32 %v210_v9  ;;  %v294_v22 = vpack.c.bf16 %v283_v13, %v282_v54  ;;  %v261_v31 = vadd.f32 %v851_v33, %v238_v14 }
 0x140   :  { %v617_v26 = vpop.eup %616  ;;  %v211_v27 = vadd.f32 1e-05, %v195_v15  ;;  %v277_v55 = vmul.f32 %v858_v36, %v254_v18  ;;  %v239_v30 = vmul.f32 %v615_v19, %v783_v1 }
 0x141   :  { %586 = vmatprep.mubr.msk.bf16.mxu1 %vm34_vm0, %v294_v22  ;;  %v232_v0 = vmul.f32 %v617_v26, %v792_v10  ;;  %v284_v39 = vmul.f32 %v858_v36, %v261_v31 }
 0x142   :  { %630 = vrsqrt.f32 %v211_v27  ;;  %v291_v32 = vpack.c.bf16 %v277_v55, %v276_v16  ;;  %v262_v34 = vadd.f32 %v851_v33, %v239_v30 }
 0x143   :  { %v619_v20 = vpop.eup %618  ;;  %v255_v41 = vadd.f32 %v851_v33, %v232_v0 }
 0x144   :  { %v621_v38 = vpop.eup %620  ;;  %579 = vmatmul.mubr.msk.bf16.vlgmr.msra.gmra.mxu0 %vm34_vm0, %v291_v32  ;;  %v285_v40 = vmul.f32 %v858_v36, %v262_v34  ;;  %v233_v1 = vmul.f32 %v619_v20, %v795_v11 }
 0x145   :  { %v240_v42 = vmul.f32 %v621_v38, %v804_v23  ;;  %v278_v48 = vmul.f32 %v858_v36, %v255_v41 }
 0x146   :  { %v295_v43 = vpack.c.bf16 %v285_v40, %v284_v39  ;;  %v256_v10 = vadd.f32 %v851_v33, %v233_v1 }
 0x147   :  { %v623_v46 = vpop.eup %622  ;;  %v263_v51 = vadd.f32 %v851_v33, %v240_v42 }
 0x148   :  { %v625_v24 = vpop.eup %624  ;;  %587 = vmatmul.mubr.msk.bf16.vlgmr.msra.gmra.mxu1 %vm34_vm0, %v295_v43  ;;  %v279_v49 = vmul.f32 %v858_v36, %v256_v10  ;;  %v241_v50 = vmul.f32 %v623_v46, %v807_v17 }
 0x149   :  { %v234_v11 = vmul.f32 %v625_v24, %v816_v35  ;;  %v286_v53 = vmul.f32 %v858_v36, %v263_v51 }
 0x14a   :  { %v292_v52 = vpack.c.bf16 %v279_v49, %v278_v48  ;;  %v264_v23 = vadd.f32 %v851_v33, %v241_v50 }
 0x14b   :  { %v627_v28 = vpop.eup %626  ;;  %v257_v57 = vadd.f32 %v851_v33, %v234_v11 }
 0x14c   :  { %v629_v29 = vpop.eup %628  ;;  %582 = vmatprep.mubr.msk.bf16.mxu0 %vm34_vm0, %v292_v52  ;;  %v287_v56 = vmul.f32 %v858_v36, %v264_v23  ;;  %v235_v44 = vmul.f32 %v627_v28, %v819_v21 }
 0x14d   :  { %v242_v17 = vmul.f32 %v629_v29, %v828_v47  ;;  %v280_v60 = vmul.f32 %v858_v36, %v257_v57 }
 0x14e   :  { %v296_v58 = vpack.c.bf16 %v287_v56, %v286_v53  ;;  %v258_v35 = vadd.f32 %v851_v33, %v235_v44 }
 0x14f   :  { %v631_v59 = vpop.eup %630  ;;  %v265_v62 = vadd.f32 %v851_v33, %v242_v17 }
 0x150   :  { %590 = vmatprep.mubr.msk.bf16.mxu1 %vm34_vm0, %v296_v58  ;;  %v281_v61 = vmul.f32 %v858_v36, %v258_v35  ;;  %v243_v37 = vmul.f32 %v631_v59, %v831_v25 }
 0x151   :  { %v288_v47 = vmul.f32 %v858_v36, %v265_v62 }
 0x152   :  { %v293_v63 = vpack.c.bf16 %v281_v61, %v280_v60  ;;  %v266_v21 = vadd.f32 %v851_v33, %v243_v37 }
 0x154   :  { %583 = vmatmul.mubr.msk.bf16.gmra.mxu0 %vm34_vm0, %v293_v63  ;;  %v289_v2 = vmul.f32 %v858_v36, %v266_v21 }
 0x156   :  { %v297_v3 = vpack.c.bf16 %v289_v2, %v288_v47 }
 0x158   :  { %591 = vmatmul.mubr.msk.bf16.gmra.mxu1 %vm34_vm0, %v297_v3 }
 0x204   :  { %v580_v4 = vpop.f32.mrf.mxu0 }
 0x205   :  { %v550_v5 = vpack.c.bf16 %v580_v4, %v580_v4 }
 0x206   :  { %v372_v6 = vpop.f32.mrf.mxu0 }
 0x207   :  { %502 = vst.msk [vmem:[%s981_s4 + $0x8] sm:$0xf] %vm499_vm1, %v550_v5  ;;  %v548_v25 = vpack.c.bf16 %v372_v6, %v372_v6 }
 0x208   :  { %v581_v33 = vpop.f32.mrf.mxu0  ;;  %v588_v7 = vpop.f32.mrf.mxu1 }
 0x209   :  { %500 = vst.msk [vmem:[%s981_s4] sm:$0xf] %vm499_vm1, %v548_v25  ;;  %v551_v36 = vpack.c.bf16 %v581_v33, %v581_v33  ;;  %v558_v8 = vpack.c.bf16 %v588_v7, %v588_v7 }
 0x20a   :  { %v375_v9 = vpop.f32.mrf.mxu0  ;;  %v404_v45 = vpop.f32.mrf.mxu1 }
 0x20b   :  { %503 = vst.msk [vmem:[%s981_s4 + $0xc] sm:$0xf] %vm499_vm1, %v551_v36  ;;  %510 = vst.msk [vmem:[%s981_s4 + $0x28] sm:$0xf] %vm499_vm1, %v558_v8  ;;  %v549_v12 = vpack.c.bf16 %v375_v9, %v375_v9  ;;  %v556_v54 = vpack.c.bf16 %v404_v45, %v404_v45 }
 0x20c   :  { %v589_v13 = vpop.f32.mrf.mxu1 }
 0x20d   :  { %501 = vst.msk [vmem:[%s981_s4 + $0x4] sm:$0xf] %vm499_vm1, %v549_v12  ;;  %508 = vst.msk [vmem:[%s981_s4 + $0x20] sm:$0xf] %vm499_vm1, %v556_v54  ;;  %v559_v14 = vpack.c.bf16 %v589_v13, %v589_v13 }
 0x20e   :  { %v407_v15 = vpop.f32.mrf.mxu1 }
 0x20f   :  { %511 = vst.msk [vmem:[%s981_s4 + $0x2c] sm:$0xf] %vm499_vm1, %v559_v14  ;;  %v557_v18 = vpack.c.bf16 %v407_v15, %v407_v15 }
 0x211   :  { %509 = vst.msk [vmem:[%s981_s4 + $0x24] sm:$0xf] %vm499_vm1, %v557_v18 }
 0x214   :  { %v584_v19 = vpop.f32.mrf.mxu0 }
 0x215   :  { %v554_v22 = vpack.c.bf16 %v584_v19, %v584_v19 }
 0x216   :  { %v388_v16 = vpop.f32.mrf.mxu0 }
 0x217   :  { %506 = vst.msk [vmem:[%s981_s4 + $0x18] sm:$0xf] %vm499_vm1, %v554_v22  ;;  %v552_v26 = vpack.c.bf16 %v388_v16, %v388_v16 }
 0x218   :  { %v585_v27 = vpop.f32.mrf.mxu0  ;;  %v592_v55 = vpop.f32.mrf.mxu1 }
 0x219   :  { %504 = vst.msk [vmem:[%s981_s4 + $0x10] sm:$0xf] %vm499_vm1, %v552_v26  ;;  %v555_v30 = vpack.c.bf16 %v585_v27, %v585_v27  ;;  %v562_v31 = vpack.c.bf16 %v592_v55, %v592_v55 }
 0x21a   :  { %v391_v0 = vpop.f32.mrf.mxu0  ;;  %v420_v32 = vpop.f32.mrf.mxu1 }
 0x21b   :  { %507 = vst.msk [vmem:[%s981_s4 + $0x1c] sm:$0xf] %vm499_vm1, %v555_v30  ;;  %514 = vst.msk [vmem:[%s981_s4 + $0x38] sm:$0xf] %vm499_vm1, %v562_v31  ;;  %v553_v34 = vpack.c.bf16 %v391_v0, %v391_v0  ;;  %v560_v20 = vpack.c.bf16 %v420_v32, %v420_v32 }
 0x21c   :  { %v593_v38 = vpop.f32.mrf.mxu1 }
 0x21d   :  { %505 = vst.msk [vmem:[%s981_s4 + $0x14] sm:$0xf] %vm499_vm1, %v553_v34  ;;  %512 = vst.msk [vmem:[%s981_s4 + $0x30] sm:$0xf] %vm499_vm1, %v560_v20  ;;  %v563_v39 = vpack.c.bf16 %v593_v38, %v593_v38 }
 0x21e   :  { %v423_v40 = vpop.f32.mrf.mxu1 }
 0x21f   :  { %515 = vst.msk [vmem:[%s981_s4 + $0x3c] sm:$0xf] %vm499_vm1, %v563_v39  ;;  %v561_v1 = vpack.c.bf16 %v423_v40, %v423_v40 }
 0x221   :  { %513 = vst.msk [vmem:[%s981_s4 + $0x34] sm:$0xf] %vm499_vm1, %v561_v1 }

// kernel: basic_transformer_block.10
= control target key start
LH: loop header
LB: loop body
LE: loop exit
PB: predicated region body
PF: predicated region fallthrough
CT: control target
= control target key end

     0   :  { %s2029_s12 = smov 0   ;;  %s2031_s13 = smov 0   ;;  %s2730_s0 = inlined_call_operand.vmem [shape: bf16[3,2,64,32], index: 0, kind: input, shape index: {}, may-alias: {0,1,2}]   ;;  %s2731_s1 = inlined_call_operand.vmem [shape: bf16[3,2,64,32], index: 1, kind: input, shape index: {}, may-alias: {0,1,2}]   ;;  %s2732_s2 = inlined_call_operand.vmem [shape: bf16[3,2,64,32], index: 2, kind: input, shape index: {}, may-alias: {0,1,2}]   ;;  %s2733_s3 = inlined_call_operand.vmem [shape: bf16[2,64,32], index: 3, kind: output, shape index: {}]  }
   0x1   :  { %s2033_s14 = smov 0  }
   0x2 LB: > { %s32_s15 = sadd.s32 1, %s1997_s13  ;;  %p1651_p0 = scmp.ge.s32.totalorder %s2001_s14, 1  ;;  %s2001_s14 = sphi %s2033_s14, %s13_s14   ;;  %s1997_s13 = sphi %s2031_s13, %s2758_s13   ;;  %s1993_s12 = sphi %s2029_s12, %s2757_s12  }
   0x3   : > { %p34_p1 = scmp.ge.s32.totalorder %s32_s15, 2  ;;  %p201_p2 = scmp.lt.s32.totalorder %s2001_s14, 3 }
   0x5   : > { %s2760_s15 = smov (%p34_p1, %s32_s15), 0  ;;  %p202_p3 = pnand %p1651_p0, %p201_p2 }
   0x6   : > { %p254_p4 = scmp.lt.s32.totalorder (!%p202_p3), %s1993_s12, 1  ;;  %s2006_s23 = smov (!%p202_p3), 112  }
   0x7   : > { %205 = sbr.rel (%p202_p3) target bundleno = 1428 (0x594), region = 32  ;;  %s2008_s27 = smov (!%p202_p3), 16  }
   0xc   : > { %s2762_s12 = smov (!%p254_p4, %s1993_s12), 1  ;;  %vm390_vm0 = vcmask 130048   ;;  %vm300_vm1 = vcmask 15360   ;;  %v2003_v32 = vmov -inf   ;;  %vm488_vm2 = vcmask 523264  }
   0xd   : > { %s2047_s16 = sshll.u32 %s2762_s12, 5  ;;  %303 = vst.msk [vmem:[#allocation2 + $0x10] sm:$0xff] %vm300_vm1, %v2003_v32  ;;  %301 = vst.msk [vmem:[#allocation2] sm:$0xff] %vm300_vm1, %v2003_v32  ;;  %v2738_v45 = vmov 0   ;;  %v2736_v50 = vmov 0.0   ;;  %vm657_vm3 = vcmask 7168  }
   0xe   : > { %s1584_s19 = scalar_lea.vmem %s2731_s1, %s2047_s16  ;;  %s2061_s22 = scalar_lea.vmem %s2730_s0, %s2047_s16  ;;  %302 = vst.msk [vmem:[#allocation2 + $0x8] sm:$0xff] %vm300_vm1, %v2003_v32  ;;  %304 = vst.msk [vmem:[#allocation2 + $0x18] sm:$0xff] %vm300_vm1, %v2003_v32  ;;  %1876 = vset.pattern.permute.xlu1 %v2738_v45  ;;  %1875 = vset.pattern.permute.xlu0 %v2738_v45  ;;  %vm1136_vm4 = vcmask 15368   ;;  %vm317_vm5 = vcmask 261120   ;;  %vm1334_vm6 = vcmask 261248   ;;  %vm1506_vm7 = vcmask 257024  }
   0xf   : > { %v2053_v0 = vld [vmem:[%s1584_s19 + $0x58] sm:$0xff]   ;;  %v2055_v1 = vld [vmem:[%s1584_s19 + $0x50] sm:$0xff]   ;;  %v1723_v3 = vld [vmem:[%s2061_s22] sm:$0xff]   ;;  %305 = vst.msk [vmem:[#allocation2 + $0x20] sm:$0xff] %vm300_vm1, %v2003_v32  ;;  %s2215_s26 = scalar_lea.vmem %s2732_s2, %s2047_s16  ;;  %s2687_s30 = scalar_lea.vmem %s2733_s3, %s2047_s16 }
  0x10   : > { %1837 = vmatprep.subr.msk.bf16.mxu0 %vm390_vm0, %v2053_v0  ;;  %v413_v2 = vsel %vm390_vm0, %v2053_v0, 0  ;;  %v1724_v4 = vunpack.c.l.bf16 %v1723_v3  ;;  %v1725_v5 = vunpack.c.h.bf16 %v1723_v3  ;;  %v410_v8 = vsel %vm390_vm0, %v2055_v1, 0  ;;  %v2072_v9 = vld [vmem:[%s1584_s19 + $0x48] sm:$0xff]   ;;  %v2082_v12 = vld [vmem:[%s1584_s19 + $0x40] sm:$0xff]   ;;  %v1739_v14 = vld [vmem:[%s2061_s22 + $0x10] sm:$0xff]   ;;  %306 = vst.msk [vmem:[#allocation2 + $0x28] sm:$0xff] %vm300_vm1, %v2003_v32 }
  0x11   : > { %1774 = vmatpush3.bf16.xpose.msra.mxu0 %v413_v2  ;;  %v407_v11 = vsel %vm390_vm0, %v2072_v9, 0  ;;  %v1738_v13 = vld [vmem:[%s2061_s22 + $0x8] sm:$0xff]   ;;  %v1732_v17 = vunpack.c.l.bf16 %v1739_v14  ;;  %v1733_v18 = vunpack.c.h.bf16 %v1739_v14  ;;  %v404_v19 = vsel %vm390_vm0, %v2082_v12, 0  ;;  %v1740_v24 = vld [vmem:[%s2061_s22 + $0x18] sm:$0xff]   ;;  %307 = vst.msk [vmem:[#allocation2 + $0x30] sm:$0xff] %vm300_vm1, %v2003_v32  ;;  %308 = vst.msk [vmem:[#allocation2 + $0x38] sm:$0xff] %vm300_vm1, %v2003_v32 }
  0x12   : > { %1838 = vmatprep.subr.msk.bf16.mxu0 %vm390_vm0, %v2055_v1  ;;  %v342_v6 = vmul.f32 0.25, %v1724_v4  ;;  %v343_v7 = vmul.f32 0.25, %v1725_v5  ;;  %v1728_v15 = vunpack.c.l.bf16 %v1738_v13  ;;  %v1729_v16 = vunpack.c.h.bf16 %v1738_v13  ;;  %310 = vst.msk [vmem:[#allocation3 + $0x8] sm:$0xff] %vm300_vm1, %v2736_v50  ;;  %309 = vst.msk [vmem:[#allocation3] sm:$0xff] %vm300_vm1, %v2736_v50  ;;  %v2218_v13 = vld [vmem:[%s2215_s26 + $0x98] sm:$0xff]  }
  0x13   : > { %v346_v22 = vmul.f32 0.25, %v1732_v17  ;;  %v347_v23 = vmul.f32 0.25, %v1733_v18  ;;  %v1736_v26 = vunpack.c.l.bf16 %v1740_v24  ;;  %v1737_v27 = vunpack.c.h.bf16 %v1740_v24  ;;  %311 = vst.msk [vmem:[#allocation3 + $0x10] sm:$0xff] %vm300_vm1, %v2736_v50  ;;  %312 = vst.msk [vmem:[#allocation3 + $0x18] sm:$0xff] %vm300_vm1, %v2736_v50  ;;  %1789 = vmatprep.subr.bf16.mxu1 %v2218_v13 }
  0x14   : > { %v2074_v10 = vpack.c.bf16 %v343_v7, %v342_v6  ;;  %v344_v20 = vmul.f32 0.25, %v1728_v15  ;;  %v345_v21 = vmul.f32 0.25, %v1729_v16  ;;  %313 = vst.msk [vmem:[#allocation3 + $0x20] sm:$0xff] %vm300_vm1, %v2736_v50  ;;  %314 = vst.msk [vmem:[#allocation3 + $0x28] sm:$0xff] %vm300_vm1, %v2736_v50  ;;  %v2161_v51 = vld [vmem:[#allocation2 + $0x10] sm:$0xff]  ;;  %v2163_v53 = vld [vmem:[#allocation2] sm:$0xff]  ;;  %1790 = vmatpush3.bf16.msra.mxu1 %v2218_v13 }
  0x15   : > { %v2093_v28 = vpack.c.bf16 %v347_v23, %v346_v22  ;;  %v348_v29 = vmul.f32 0.25, %v1736_v26  ;;  %v349_v30 = vmul.f32 0.25, %v1737_v27  ;;  %315 = vst.msk [vmem:[#allocation3 + $0x30] sm:$0xff] %vm300_vm1, %v2736_v50  ;;  %316 = vst.msk [vmem:[#allocation3 + $0x38] sm:$0xff] %vm300_vm1, %v2736_v50  ;;  %v2168_v56 = vld [vmem:[#allocation2 + $0x18] sm:$0xff]  ;;  %v2178_v60 = vld [vmem:[#allocation2 + $0x8] sm:$0xff] }
  0x16   : > { %1781 = vmatprep.mubr.msk.bf16.mxu0 %vm390_vm0, %v2074_v10  ;;  %v2091_v25 = vpack.c.bf16 %v345_v21, %v344_v20  ;;  %v2195_v4 = vld [vmem:[#allocation2 + $0x20] sm:$0xff]  ;;  %v2257_v23 = vld [vmem:[%s2215_s26 + $0x88] sm:$0xff]  }
  0x17   : > { %v2099_v31 = vpack.c.bf16 %v349_v30, %v348_v29 }
  0x18   : > { %v2235_v18 = vld [vmem:[#allocation2 + $0x38] sm:$0xff] }
  0x19   : > { %1776 = vmatpush3.bf16.xpose.msra.mxu0 %v410_v8  ;;  %v2207_v8 = vld [vmem:[#allocation2 + $0x30] sm:$0xff] }
  0x1a   : > { %1839 = vmatprep.subr.msk.bf16.mxu0 %vm390_vm0, %v2072_v9 }
  0x21   : > { %1778 = vmatpush3.bf16.xpose.msra.mxu0 %v407_v11  ;;  %v2209_v11 = vld [vmem:[#allocation2 + $0x28] sm:$0xff] }
  0x22   : > { %1840 = vmatprep.subr.msk.bf16.mxu0 %vm390_vm0, %v2082_v12 }
  0x29   : > { %1780 = vmatpush3.bf16.xpose.msra.mxu0 %v404_v19  ;;  %v2238_v19 = vld [vmem:[%s2215_s26 + $0x90] sm:$0xff]  }
  0x2a   : > { %1791 = vmatprep.subr.bf16.mxu1 %v2238_v19 }
  0x2b   : > { %1792 = vmatpush3.bf16.msra.mxu1 %v2238_v19 }
  0x2c   : > { %1793 = vmatprep.subr.bf16.mxu1 %v2257_v23 }
  0x2f   : > { %1794 = vmatpush3.bf16.msra.mxu1 %v2257_v23 }
  0x30   : > { %1782 = vmatmul.mubr.msk.bf16.vlgmr.msra.gmra.mxu0 %vm390_vm0, %v2091_v25 }
  0x31   : > { %1785 = vmatprep.mubr.msk.bf16.mxu0 %vm390_vm0, %v2093_v28 }
  0x38   : > { %1786 = vmatmul.mubr.msk.bf16.gmra.mxu0 %vm390_vm0, %v2099_v31 }
  0xf0   : > { %v2111_v33 = vpop.f32.mrf.mxu0 }
  0xf1   : > { %v495_v34 = vsel %vm488_vm2, %v2111_v33, -inf }
  0xf2   : > { %496 = vmax.xlane.f32.xlu1 %v495_v34  ;;  %v2115_v35 = vpop.f32.mrf.mxu0 }
  0xf3   : > { %v489_v36 = vsel %vm488_vm2, %v2115_v35, -inf }
  0xf4   : > { %490 = vmax.xlane.f32.xlu0 %v489_v36  ;;  %v2119_v37 = vpop.f32.mrf.mxu0 }
  0xf5   : > { %v498_v38 = vsel %vm488_vm2, %v2119_v37, -inf }
  0xf6   : > { %499 = vmax.xlane.f32.xlu1 %v498_v38  ;;  %v2123_v39 = vpop.f32.mrf.mxu0 }
  0xf7   : > { %v492_v40 = vsel %vm488_vm2, %v2123_v39, -inf }
  0xf8   : > { %493 = vmax.xlane.f32.xlu0 %v492_v40  ;;  %v2127_v41 = vpop.f32.mrf.mxu0 }
  0xf9   : > { %v507_v47 = vsel %vm488_vm2, %v2127_v41, -inf }
  0xfa   : > { %v2129_v42 = vpop.f32.mrf.mxu0 }
  0xfb   : > { %v501_v43 = vsel %vm488_vm2, %v2129_v42, -inf }
  0xfc   : > { %502 = vmax.xlane.f32.xlu0 %v501_v43  ;;  %v2133_v44 = vpop.f32.mrf.mxu0 }
  0xfd   : > { %v510_v49 = vsel %vm488_vm2, %v2133_v44, -inf }
  0xfe   : > { %v2137_v46 = vpop.f32.mrf.mxu0 }
  0xff   : > { %v504_v48 = vsel %vm488_vm2, %v2137_v46, -inf }
 0x100   : > { %508 = vmax.xlane.f32.xlu0 %v507_v47  ;;  %505 = vmax.xlane.f32.xlu1 %v504_v48 }
 0x104   : > { %511 = vmax.xlane.f32.xlu1 %v510_v49 }
 0x17b   : > { %v497_v52 = vpop.xlane.xlu1 %496 }
 0x17c   : > { %v2166_v54 = vmax.f32 %v2161_v51, %v497_v52 }
 0x17d   : > { %v491_v55 = vpop.xlane.xlu0 %490 }
 0x17e   : > { %845 = vst.msk [vmem:[#allocation2 + $0x10] sm:$0xff] %vm657_vm3, %v2166_v54  ;;  %v2175_v58 = vmax.f32 %v2163_v53, %v491_v55  ;;  %557 = vperm.xlu1 %1876, %v2166_v54  }
 0x17f   : > { %v500_v59 = vpop.xlane.xlu1 %499 }
 0x180   : > { %843 = vst.msk [vmem:[#allocation2] sm:$0xff] %vm657_vm3, %v2175_v58  ;;  %v2185_v62 = vmax.f32 %v2168_v56, %v500_v59  ;;  %547 = vperm.xlu0 %1875, %v2175_v58  }
 0x181   : > { %v494_v63 = vpop.xlane.xlu0 %493 }
 0x182   : > { %846 = vst.msk [vmem:[#allocation2 + $0x18] sm:$0xff] %vm657_vm3, %v2185_v62  ;;  %v2193_v3 = vmax.f32 %v2178_v60, %v494_v63 }
 0x184   : > { %v522_v5 = vsub.f32 %v2178_v60, %v2193_v3  ;;  %844 = vst.msk [vmem:[#allocation2 + $0x8] sm:$0xff] %vm657_vm3, %v2193_v3  ;;  %552 = vperm.xlu1 %1876, %v2193_v3   ;;  %867 = vrot.lane.b32.xlu0 %v2055_v1, %s2006_s23  ;;  %v2741_v3 = vsub.f32 %v2163_v53, %v2175_v58 }
 0x185   : > { %v503_v6 = vpop.xlane.xlu0 %502 }
 0x186   : > { %v2205_v7 = vmax.f32 %v2195_v4, %v503_v6 }
 0x188   : > { %847 = vst.msk [vmem:[#allocation2 + $0x20] sm:$0xff] %vm657_vm3, %v2205_v7  ;;  %562 = vperm.xlu1 %1876, %v2185_v62   ;;  %863 = vrot.lane.b32.xlu0 %v2082_v12, %s2006_s23 }
 0x189   : > { %v509_v14 = vpop.xlane.xlu0 %508  ;;  %v506_v15 = vpop.xlane.xlu1 %505 }
 0x18a   : > { %v2229_v16 = vmax.f32 %v2207_v8, %v509_v14  ;;  %v2232_v17 = vmax.f32 %v2209_v11, %v506_v15 }
 0x18c   : > { %849 = vst.msk [vmem:[#allocation2 + $0x30] sm:$0xff] %vm657_vm3, %v2229_v16  ;;  %848 = vst.msk [vmem:[#allocation2 + $0x28] sm:$0xff] %vm657_vm3, %v2232_v17  ;;  %577 = vperm.xlu1 %1876, %v2229_v16   ;;  %857 = vrot.lane.b32.xlu0 %v2091_v25, %s2006_s23  ;;  %v2269_v25 = vld [vmem:[%s2215_s26 + $0x80] sm:$0xff]   ;;  %v2745_v58 = vsub.f32 %v2209_v11, %v2232_v17  ;;  %v2747_v11 = vmov 1  }
 0x18d   : > { %v512_v21 = vpop.xlane.xlu1 %511  ;;  %1795 = vmatprep.subr.bf16.mxu1 %v2269_v25 }
 0x18e   : > { %v2253_v22 = vmax.f32 %v2235_v18, %v512_v21  ;;  %1796 = vmatpush3.bf16.msra.mxu1 %v2269_v25 }
 0x190   : > { %850 = vst.msk [vmem:[#allocation2 + $0x38] sm:$0xff] %vm657_vm3, %v2253_v22  ;;  %567 = vperm.xlu1 %1876, %v2205_v7   ;;  %861 = vrot.lane.b32.xlu0 %v2099_v31, %s2006_s23 }
 0x193   : > { %v2426_v12 = vld [vmem:[#allocation2 + $0x28] sm:$0xff]  ;;  %v2443_v2 = vld [vmem:[#allocation2 + $0x30] sm:$0xff] }
 0x194   : > { %582 = vperm.xlu1 %1876, %v2253_v22  }
 0x197   : > { %v2445_v57 = vld [vmem:[#allocation2 + $0x38] sm:$0xff] }
 0x198   : > { %572 = vperm.xlu1 %1876, %v2232_v17  }
 0x19c   : > { %869 = vrot.lane.b32.xlu1 %v2053_v0, %s2006_s23 }
 0x1a0   : > { %865 = vrot.lane.b32.xlu1 %v2072_v9, %s2006_s23 }
 0x1a4   : > { %855 = vrot.lane.b32.xlu1 %v2074_v10, %s2006_s23 }
 0x1a8   : > { %859 = vrot.lane.b32.xlu1 %v2093_v28, %s2006_s23 }
 0x1f9   : > { %v558_v26 = vpop.permute.xlu1 %557 }
 0x1fa   : > { %v587_v30 = vsub.f32 %v2111_v33, %v558_v26 }
 0x1fb   : > { %v548_v27 = vpop.permute.xlu0 %547 }
 0x1fc   : > { %v585_v29 = vsub.f32 %v2115_v35, %v548_v27  ;;  %v597_v36 = vmul.f32 1.442695, %v587_v30 }
 0x1fe   : > { %v593_v31 = vmul.f32 1.442695, %v585_v29 }
 0x1ff   : > { %v553_v32 = vpop.permute.xlu1 %552  ;;  %v868_v15 = vpop.permute.xlu0 %867 }
 0x200   : > { %v586_v34 = vsub.f32 %v2123_v39, %v553_v32  ;;  %1899 = vpow2.f32 %v593_v31 }
 0x202   : > { %v595_v0 = vmul.f32 1.442695, %v586_v34 }
 0x203   : > { %v563_v9 = vpop.permute.xlu1 %562 }
 0x204   : > { %1901 = vpow2.f32 %v595_v0  ;;  %v588_v10 = vsub.f32 %v2119_v37, %v563_v9  ;;  %v864_v9 = vpop.permute.xlu0 %863 }
 0x205   : > { %1903 = vpow2.f32 %v597_v36 }
 0x206   : > { %v599_v38 = vmul.f32 1.442695, %v588_v10  ;;  %v884_v10 = vsel %vm390_vm0, %v864_v9, 0 }
 0x207   : > { %v578_v28 = vpop.permute.xlu1 %577 }
 0x208   : > { %1905 = vpow2.f32 %v599_v38  ;;  %v591_v48 = vsub.f32 %v2127_v41, %v578_v28  ;;  %v858_v38 = vpop.permute.xlu0 %857 }
 0x20a   : > { %v605_v6 = vmul.f32 1.442695, %v591_v48 }
 0x20b   : > { %v568_v40 = vpop.permute.xlu1 %567 }
 0x20c   : > { %v589_v35 = vsub.f32 %v2129_v42, %v568_v40  ;;  %v862_v40 = vpop.permute.xlu0 %861 }
 0x20d   : > { %v2288_v33 = vpop.eup %1899 }
 0x20e   : > { %v601_v49 = vmul.f32 1.442695, %v589_v35 }
 0x20f   : > { %v583_v43 = vpop.permute.xlu1 %582 }
 0x210   : > { %v592_v47 = vsub.f32 %v2133_v44, %v583_v43  ;;  %1907 = vpow2.f32 %v601_v49 }
 0x211   : > { %v2291_v39 = vpop.eup %1901 }
 0x212   : > { %v666_v37 = vpack.c.bf16 %v2291_v39, %v2288_v33  ;;  %v607_v52 = vmul.f32 1.442695, %v592_v47  ;;  %v2296_v59 = vpop.eup %1903 }
 0x213   : > { %v573_v55 = vpop.permute.xlu1 %572 }
 0x214   : > { %v590_v63 = vsub.f32 %v2137_v46, %v573_v55  ;;  %1797 = vmatprep.mubr.msk.bf16.mxu1 %vm488_vm2, %v666_v37  ;;  %1909 = vpow2.f32 %v607_v52  ;;  %v890_v46 = vsel %vm390_vm0, %v868_v15, 0 }
 0x215   : > { %v2300_v42 = vpop.eup %1905 }
 0x216   : > { %v603_v44 = vmul.f32 1.442695, %v590_v63  ;;  %v667_v41 = vpack.c.bf16 %v2300_v42, %v2296_v59  ;;  %v634_v50 = vsel %vm488_vm2, %v2300_v42, 0.0 }
 0x217   : > { %v870_v14 = vpop.permute.xlu1 %869 }
 0x218   : > { %1911 = vpow2.f32 %v603_v44  ;;  %v893_v21 = vsel %vm390_vm0, %v870_v14, 0  ;;  %1798 = vmatmul.mubr.msk.bf16.vlgmr.msra.gmra.mxu1 %vm488_vm2, %v667_v41  ;;  %1841 = vmatprep.subr.msk.bf16.mxu1 %vm390_vm0, %v870_v14 }
 0x219   : > { %1913 = vpow2.f32 %v605_v6  ;;  %1806 = vmatpush3.bf16.xpose.msra.mxu1 %v893_v21 }
 0x21a   : > { %1842 = vmatprep.subr.msk.bf16.mxu1 %vm390_vm0, %v868_v15 }
 0x21b   : > { %v866_v26 = vpop.permute.xlu1 %865 }
 0x21c   : > { %v887_v34 = vsel %vm390_vm0, %v866_v26, 0 }
 0x21d   : > { %v2310_v27 = vpop.eup %1907 }
 0x21e   : > { %v637_v60 = vsel %vm488_vm2, %v2310_v27, 0.0 }
 0x21f   : > { %v856_v36 = vpop.permute.xlu1 %855 }
 0x221   : > { %1808 = vmatpush3.bf16.xpose.msra.mxu1 %v890_v46  ;;  %v2312_v29 = vpop.eup %1909 }
 0x222   : > { %1843 = vmatprep.subr.msk.bf16.mxu1 %vm390_vm0, %v866_v26 }
 0x223   : > { %v860_v28 = vpop.permute.xlu1 %859 }
 0x225   : > { %v2314_v30 = vpop.eup %1911 }
 0x226   : > { %v2316_v31 = vpop.eup %1913  ;;  %v668_v32 = vpack.c.bf16 %v2314_v30, %v2310_v27  ;;  %v2744_v27 = vsub.f32 %v2195_v4, %v2205_v7 }
 0x227   : > { %v669_v0 = vpack.c.bf16 %v2312_v29, %v2316_v31 }
 0x228   : > { %1801 = vmatprep.mubr.msk.bf16.mxu1 %vm488_vm2, %v668_v32  ;;  %v537_v53 = vmul.f32 1.442695, %v2744_v27 }
 0x229   : > { %1802 = vmatmul.mubr.msk.bf16.gmra.mxu1 %vm488_vm2, %v669_v0 }
 0x22a   : > { %1810 = vmatpush3.bf16.xpose.msra.mxu1 %v887_v34  ;;  %1813 = vmatprep.mubr.msk.bf16.mxu1 %vm390_vm0, %v856_v36 }
 0x22b   : > { %1844 = vmatprep.subr.msk.bf16.mxu1 %vm390_vm0, %v864_v9 }
 0x232   : > { %1812 = vmatpush3.bf16.xpose.msra.mxu1 %v884_v10  ;;  %v2734_v10 = vmov 1  }
 0x233   : > { %1877 = vset.pattern.permute.xlu0 %v2734_v10  ;;  %1878 = vset.pattern.permute.xlu1 %v2734_v10 }
 0x239   : > { %1814 = vmatmul.mubr.msk.bf16.vlgmr.msra.gmra.mxu1 %vm390_vm0, %v858_v38 }
 0x23a   : > { %1817 = vmatprep.mubr.msk.bf16.mxu1 %vm390_vm0, %v860_v28 }
 0x241   : > { %1818 = vmatmul.mubr.msk.bf16.gmra.mxu1 %vm390_vm0, %v862_v40  ;;  %v2381_v40 = vld [vmem:[#allocation2] sm:$0xff] }
 0x2d8   : > { %v2331_v35 = vpop.f32.mrf.mxu1 }
 0x2da   : > { %v2333_v43 = vpop.f32.mrf.mxu1 }
 0x2dc   : > { %v2335_v47 = vpop.f32.mrf.mxu1 }
 0x2de   : > { %v2337_v48 = vpop.f32.mrf.mxu1 }
 0x2e9   : > { %v2339_v49 = vpop.f32.mrf.mxu1 }
 0x2eb   : > { %v2341_v37 = vpop.f32.mrf.mxu1 }
 0x2ed   : > { %v2343_v52 = vpop.f32.mrf.mxu1 }
 0x2ef   : > { %v2345_v55 = vpop.f32.mrf.mxu1 }
 0x2f9   : > { %v2347_v63 = vpop.f32.mrf.mxu1 }
 0x2fa   : > { %v974_v32 = vsel %vm488_vm2, %v2347_v63, -inf }
 0x2fb   : > { %v2349_v6 = vpop.f32.mrf.mxu1 }
 0x2fc   : > { %v968_v44 = vsel %vm488_vm2, %v2349_v6, -inf }
 0x2fd   : > { %969 = vmax.xlane.f32.xlu1 %v968_v44  ;;  %v2353_v41 = vpop.f32.mrf.mxu1 }
 0x2fe   : > { %v977_v15 = vsel %vm488_vm2, %v2353_v41, -inf }
 0x2ff   : > { %v2355_v14 = vpop.f32.mrf.mxu1 }
 0x300   : > { %v971_v21 = vsel %vm488_vm2, %v2355_v14, -inf }
 0x301   : > { %978 = vmax.xlane.f32.xlu1 %v977_v15  ;;  %972 = vmax.xlane.f32.xlu0 %v971_v21  ;;  %v2361_v46 = vpop.f32.mrf.mxu1 }
 0x302   : > { %v986_v38 = vsel %vm488_vm2, %v2361_v46, -inf }
 0x303   : > { %v2363_v26 = vpop.f32.mrf.mxu1 }
 0x304   : > { %v980_v0 = vsel %vm488_vm2, %v2363_v26, -inf }
 0x305   : > { %975 = vmax.xlane.f32.xlu0 %v974_v32  ;;  %v2367_v34 = vpop.f32.mrf.mxu1  ;;  %v2391_v32 = vld [vmem:[#allocation2 + $0x8] sm:$0xff] }
 0x306   : > { %v989_v28 = vsel %vm488_vm2, %v2367_v34, -inf }
 0x307   : > { %v2371_v36 = vpop.f32.mrf.mxu1 }
 0x308   : > { %v983_v9 = vsel %vm488_vm2, %v2371_v36, -inf }
 0x309   : > { %981 = vmax.xlane.f32.xlu0 %v980_v0  ;;  %984 = vmax.xlane.f32.xlu1 %v983_v9  ;;  %v2393_v9 = vld [vmem:[#allocation2 + $0x18] sm:$0xff] }
 0x30d   : > { %987 = vmax.xlane.f32.xlu0 %v986_v38  ;;  %990 = vmax.xlane.f32.xlu1 %v989_v28 }
 0x386   : > { %v970_v44 = vpop.xlane.xlu1 %969 }
 0x387   : > { %v2384_v15 = vmax.f32 %v2381_v40, %v970_v44 }
 0x389   : > { %1343 = vst.msk [vmem:[#allocation2] sm:$0xff] %vm1136_vm4, %v2384_v15  ;;  %1026 = vperm.xlu0 %1877, %v2384_v15  }
 0x38a   : > { %v973_v0 = vpop.xlane.xlu0 %972  ;;  %v979_v38 = vpop.xlane.xlu1 %978 }
 0x38b   : > { %v2396_v28 = vmax.f32 %v2391_v32, %v973_v0  ;;  %v2399_v44 = vmax.f32 %v2393_v9, %v979_v38  ;;  %v2411_v0 = vld [vmem:[#allocation2 + $0x10] sm:$0xff] }
 0x38d   : > { %1344 = vst.msk [vmem:[#allocation2 + $0x8] sm:$0xff] %vm1136_vm4, %v2396_v28  ;;  %1346 = vst.msk [vmem:[#allocation2 + $0x18] sm:$0xff] %vm1136_vm4, %v2399_v44  ;;  %1153 = vrot.lane.b32.xlu0 %v2238_v19, %s2006_s23  ;;  %v2424_v19 = vld [vmem:[#allocation2 + $0x20] sm:$0xff] }
 0x38e   : > { %v976_v10 = vpop.xlane.xlu0 %975  ;;  %1880 = vset.pattern.permute.xlu0 %v2738_v45 }
 0x38f   : > { %v2415_v38 = vmax.f32 %v2411_v0, %v976_v10 }
 0x391   : > { %1345 = vst.msk [vmem:[#allocation2 + $0x10] sm:$0xff] %vm1136_vm4, %v2415_v38  ;;  %1036 = vperm.xlu1 %1878, %v2415_v38   ;;  %1149 = vrot.lane.b32.xlu0 %v2269_v25, %s2006_s23 }
 0x392   : > { %v982_v24 = vpop.xlane.xlu0 %981  ;;  %v985_v20 = vpop.xlane.xlu1 %984 }
 0x393   : > { %v2429_v10 = vmax.f32 %v2424_v19, %v982_v24  ;;  %v2432_v1 = vmax.f32 %v2426_v12, %v985_v20 }
 0x395   : > { %1347 = vst.msk [vmem:[#allocation2 + $0x20] sm:$0xff] %vm1136_vm4, %v2429_v10  ;;  %1348 = vst.msk [vmem:[#allocation2 + $0x28] sm:$0xff] %vm1136_vm4, %v2432_v1  ;;  %1041 = vperm.xlu1 %1878, %v2399_v44  }
 0x396   : > { %v988_v24 = vpop.xlane.xlu0 %987  ;;  %v991_v20 = vpop.xlane.xlu1 %990 }
 0x397   : > { %v2448_v61 = vmax.f32 %v2443_v2, %v988_v24  ;;  %v2451_v21 = vmax.f32 %v2445_v57, %v991_v20  ;;  %v628_v24 = vsel %vm488_vm2, %v2291_v39, 0.0  ;;  %v631_v20 = vsel %vm488_vm2, %v2296_v59, 0.0 }
 0x398   : > { %v2740_v39 = vmov 0.0   ;;  %v643_v59 = vsel %vm488_vm2, %v2316_v31, 0.0  ;;  %v539_v31 = vmul.f32 1.442695, %v2745_v58 }
 0x399   : > { %v1006_v25 = vsub.f32 %v2443_v2, %v2448_v61  ;;  %1349 = vst.msk [vmem:[#allocation2 + $0x30] sm:$0xff] %vm1136_vm4, %v2448_v61  ;;  %1350 = vst.msk [vmem:[#allocation2 + $0x38] sm:$0xff] %vm1136_vm4, %v2451_v21  ;;  %1031 = vperm.xlu1 %1878, %v2396_v28  }
 0x39a   : > { %319 = vst.msk [vmem:[#allocation4 + $0x8] sm:$0xff] %vm317_vm5, %v2740_v39  ;;  %318 = vst.msk [vmem:[#allocation4] sm:$0xff] %vm317_vm5, %v2740_v39 }
 0x39b   : > { %320 = vst.msk [vmem:[#allocation4 + $0x10] sm:$0xff] %vm317_vm5, %v2740_v39  ;;  %321 = vst.msk [vmem:[#allocation4 + $0x18] sm:$0xff] %vm317_vm5, %v2740_v39 }
 0x39c   : > { %322 = vst.msk [vmem:[#allocation4 + $0x20] sm:$0xff] %vm317_vm5, %v2740_v39  ;;  %323 = vst.msk [vmem:[#allocation4 + $0x28] sm:$0xff] %vm317_vm5, %v2740_v39 }
 0x39d   : > { %1056 = vperm.xlu1 %1878, %v2448_v61   ;;  %324 = vst.msk [vmem:[#allocation4 + $0x30] sm:$0xff] %vm317_vm5, %v2740_v39  ;;  %325 = vst.msk [vmem:[#allocation4 + $0x38] sm:$0xff] %vm317_vm5, %v2740_v39 }
 0x3a1   : > { %1046 = vperm.xlu1 %1878, %v2429_v10  }
 0x3a5   : > { %1061 = vperm.xlu1 %1878, %v2451_v21  }
 0x3a9   : > { %1051 = vperm.xlu1 %1878, %v2432_v1  }
 0x3ad   : > { %1155 = vrot.lane.b32.xlu1 %v2218_v13, %s2006_s23  ;;  %v640_v13 = vsel %vm488_vm2, %v2314_v30, 0.0 }
 0x3ae   : > { %1879 = vset.pattern.permute.xlu1 %v2738_v45  ;;  %v646_v45 = vsel %vm488_vm2, %v2312_v29, 0.0  ;;  %v2743_v29 = vsub.f32 %v2168_v56, %v2185_v62 }
 0x3b0   : > { %629 = vadd.xlane.f32.xlu0 %v628_v24  ;;  %v535_v30 = vmul.f32 1.442695, %v2743_v29 }
 0x3b1   : > { %1151 = vrot.lane.b32.xlu1 %v2257_v23, %s2006_s23  ;;  %v531_v23 = vmul.f32 1.442695, %v522_v5  ;;  %v529_v5 = vmul.f32 1.442695, %v2741_v3 }
 0x3b3   : > { %1915 = vpow2.f32 %v531_v23 }
 0x3b4   : > { %632 = vadd.xlane.f32.xlu0 %v631_v20  ;;  %1917 = vpow2.f32 %v529_v5 }
 0x3b8   : > { %635 = vadd.xlane.f32.xlu0 %v634_v50 }
 0x3bc   : > { %641 = vadd.xlane.f32.xlu0 %v640_v13 }
 0x3c0   : > { %647 = vadd.xlane.f32.xlu0 %v646_v45  ;;  %v625_v45 = vsel %vm488_vm2, %v2288_v33, 0.0  ;;  %v2494_v50 = vpop.eup %1915  ;;  %v2742_v33 = vsub.f32 %v2161_v51, %v2166_v54  ;;  %v2746_v51 = vsub.f32 %v2207_v8, %v2229_v16 }
 0x3c1   : > { %v2516_v24 = vpop.eup %1917 }
 0x3c2   : > { %v533_v42 = vmul.f32 1.442695, %v2742_v33  ;;  %v541_v54 = vmul.f32 1.442695, %v2746_v51 }
 0x3c4   : > { %1919 = vpow2.f32 %v533_v42 }
 0x3c5   : > { %1921 = vpow2.f32 %v535_v30 }
 0x3c6   : > { %1923 = vpow2.f32 %v537_v53 }
 0x3c7   : > { %1925 = vpow2.f32 %v539_v31 }
 0x3c8   : > { %1927 = vpow2.f32 %v541_v54 }
 0x3d1   : > { %v2522_v56 = vpop.eup %1919 }
 0x3d2   : > { %v2525_v62 = vpop.eup %1921 }
 0x3d3   : > { %v2528_v4 = vpop.eup %1923 }
 0x3d4   : > { %v2531_v7 = vpop.eup %1925 }
 0x3d5   : > { %626 = vadd.xlane.f32.xlu1 %v625_v45  ;;  %v2534_v8 = vpop.eup %1927 }
 0x3d6   : > { %786 = vperm.xlu0 %1880, %v2494_v50  }
 0x3d9   : > { %638 = vadd.xlane.f32.xlu1 %v637_v60 }
 0x3dd   : > { %644 = vadd.xlane.f32.xlu1 %v643_v59 }
 0x3ee   : > { %781 = vperm.xlu1 %1879, %v2516_v24  }
 0x3f2   : > { %791 = vperm.xlu1 %1879, %v2522_v56  }
 0x3f6   : > { %796 = vperm.xlu1 %1879, %v2525_v62  }
 0x3fa   : > { %801 = vperm.xlu1 %1879, %v2528_v4  }
 0x3fe   : > { %806 = vperm.xlu1 %1879, %v2531_v7  }
 0x402   : > { %811 = vperm.xlu1 %1879, %v2534_v8  }
 0x404   : > { %v1027_v17 = vpop.permute.xlu0 %1026 }
 0x405   : > { %v1064_v13 = vsub.f32 %v2349_v6, %v1027_v17 }
 0x406   : > { %1881 = vset.pattern.permute.xlu1 %v2747_v11 }
 0x407   : > { %v1072_v45 = vmul.f32 1.442695, %v1064_v13 }
 0x40c   : > { %v1037_v16 = vpop.permute.xlu1 %1036 }
 0x40d   : > { %v1066_v20 = vsub.f32 %v2347_v63, %v1037_v16 }
 0x40f   : > { %v1076_v39 = vmul.f32 1.442695, %v1066_v20 }
 0x410   : > { %v1042_v23 = vpop.permute.xlu1 %1041 }
 0x411   : > { %1929 = vpow2.f32 %v1076_v39  ;;  %v1067_v3 = vsub.f32 %v2353_v41, %v1042_v23  ;;  %v1154_v23 = vpop.permute.xlu0 %1153 }
 0x412   : > { %1931 = vpow2.f32 %v1072_v45 }
 0x413   : > { %v1078_v42 = vmul.f32 1.442695, %v1067_v3 }
 0x414   : > { %v1032_v60 = vpop.permute.xlu1 %1031 }
 0x415   : > { %v1065_v5 = vsub.f32 %v2355_v14, %v1032_v60  ;;  %v1150_v3 = vpop.permute.xlu0 %1149 }
 0x417   : > { %v1074_v59 = vmul.f32 1.442695, %v1065_v5 }
 0x418   : > { %v1057_v33 = vpop.permute.xlu1 %1056 }
 0x419   : > { %1933 = vpow2.f32 %v1074_v59  ;;  %v1070_v29 = vsub.f32 %v2361_v46, %v1057_v33 }
 0x41a   : > { %1935 = vpow2.f32 %v1078_v42 }
 0x41b   : > { %v1084_v63 = vmul.f32 1.442695, %v1070_v29  ;;  %v2748_v29 = vsub.f32 %v2235_v18, %v2253_v22  ;;  %v2750_v22 = vsub.f32 %v2391_v32, %v2396_v28 }
 0x41c   : > { %v1047_v30 = vpop.permute.xlu1 %1046 }
 0x41d   : > { %v1068_v6 = vsub.f32 %v2363_v26, %v1047_v30  ;;  %1937 = vpow2.f32 %v1084_v63  ;;  %v543_v30 = vmul.f32 1.442695, %v2748_v29  ;;  %v2749_v63 = vsub.f32 %v2381_v40, %v2384_v15 }
 0x41e   : > { %v1930_v41 = vpop.eup %1929  ;;  %v1010_v40 = vmul.f32 1.442695, %v2750_v22  ;;  %v615_v22 = vld [vmem:[#allocation3 + $0x30] sm:$0xff] }
 0x41f   : > { %v1080_v27 = vmul.f32 1.442695, %v1068_v6  ;;  %v1932_v51 = vpop.eup %1931  ;;  %v1110_v46 = vsel %vm488_vm2, %v1930_v41, 0.0  ;;  %v1008_v6 = vmul.f32 1.442695, %v2749_v63 }
 0x420   : > { %v1062_v53 = vpop.permute.xlu1 %1061 }
 0x421   : > { %v1071_v58 = vsub.f32 %v2367_v34, %v1062_v53  ;;  %1939 = vpow2.f32 %v1080_v27  ;;  %v1104_v34 = vsel %vm488_vm2, %v1932_v51, 0.0  ;;  %v610_v53 = vld [vmem:[#allocation3 + $0x8] sm:$0xff] }
 0x422   : > { %v618_v18 = vmul.f32 %v2494_v50, %v610_v53  ;;  %v2751_v50 = vsub.f32 %v2393_v9, %v2399_v44  ;;  %v614_v9 = vld [vmem:[#allocation3 + $0x28] sm:$0xff]  ;;  %v2756_v53 = vmov 0  }
 0x423   : > { %v1086_v31 = vmul.f32 1.442695, %v1071_v58 }
 0x424   : > { %v1052_v14 = vpop.permute.xlu1 %1051 }
 0x425   : > { %1941 = vpow2.f32 %v1086_v31  ;;  %v1069_v54 = vsub.f32 %v2371_v36, %v1052_v14 }
 0x426   : > { %v1934_v16 = vpop.eup %1933  ;;  %1111 = vadd.xlane.f32.xlu1 %v1110_v46 }
 0x427   : > { %v1082_v17 = vmul.f32 1.442695, %v1069_v54  ;;  %v1107_v26 = vsel %vm488_vm2, %v1934_v16, 0.0  ;;  %v1145_v20 = vpack.c.bf16 %v1934_v16, %v1932_v51  ;;  %v1936_v39 = vpop.eup %1935  ;;  %v611_v54 = vld [vmem:[#allocation3 + $0x10] sm:$0xff]  ;;  %v1014_v16 = vmul.f32 1.442695, %v2751_v50 }
 0x428   : > { %1108 = vadd.xlane.f32.xlu0 %v1107_v26  ;;  %v1156_v13 = vpop.permute.xlu1 %1155  ;;  %v1113_v45 = vsel %vm488_vm2, %v1936_v39, 0.0  ;;  %v1146_v31 = vpack.c.bf16 %v1936_v39, %v1930_v41  ;;  %v619_v41 = vmul.f32 %v2522_v56, %v611_v54  ;;  %v612_v26 = vld [vmem:[#allocation3 + $0x18] sm:$0xff]  ;;  %v2753_v56 = vsub.f32 %v2424_v19, %v2429_v10 }
 0x429   : > { %1943 = vpow2.f32 %v1082_v17  ;;  %1821 = vmatprep.subr.bf16.mxu0 %v1156_v13  ;;  %1829 = vmatprep.mubr.msk.bf16.mxu0 %vm488_vm2, %v1145_v20  ;;  %v2752_v20 = vsub.f32 %v2411_v0, %v2415_v38  ;;  %v622_v38 = vmul.f32 %v2531_v7, %v614_v9  ;;  %v1020_v19 = vmul.f32 1.442695, %v1006_v25  ;;  %v772_v25 = vld [vmem:[#allocation4 + $0x8] sm:$0xff] }
 0x42a   : > { %1105 = vadd.xlane.f32.xlu1 %v1104_v34  ;;  %1822 = vmatpush3.bf16.msra.mxu0 %v1156_v13  ;;  %v1938_v60 = vpop.eup %1937  ;;  %1945 = vpow2.f32 %v543_v30  ;;  %v1016_v34 = vmul.f32 1.442695, %v2753_v56 }
 0x42b   : > { %1823 = vmatprep.subr.bf16.mxu0 %v1154_v23  ;;  %v1122_v59 = vsel %vm488_vm2, %v1938_v60, 0.0  ;;  %1947 = vpow2.f32 %v1008_v6  ;;  %v1012_v13 = vmul.f32 1.442695, %v2752_v20 }
 0x42c   : > { %v1152_v36 = vpop.permute.xlu1 %1151  ;;  %1949 = vpow2.f32 %v1010_v40 }
 0x42d   : > { %1951 = vpow2.f32 %v1014_v16  ;;  %v773_v16 = vld [vmem:[#allocation4 + $0x10] sm:$0xff] }
 0x42e   : > { %1114 = vadd.xlane.f32.xlu1 %v1113_v45  ;;  %1824 = vmatpush3.bf16.msra.mxu0 %v1154_v23  ;;  %v1940_v5 = vpop.eup %1939  ;;  %v620_v23 = vmul.f32 %v2525_v62, %v612_v26  ;;  %1953 = vpow2.f32 %v1012_v13  ;;  %v616_v45 = vld [vmem:[#allocation3 + $0x38] sm:$0xff]  ;;  %v775_v13 = vld [vmem:[#allocation4 + $0x20] sm:$0xff] }
 0x42f   : > { %1825 = vmatprep.subr.bf16.mxu0 %v1152_v36  ;;  %v1116_v27 = vsel %vm488_vm2, %v1940_v5, 0.0  ;;  %1955 = vpow2.f32 %v1016_v34 }
 0x432   : > { %v1942_v33 = vpop.eup %1941  ;;  %1123 = vadd.xlane.f32.xlu1 %v1122_v59  ;;  %1826 = vmatpush3.bf16.msra.mxu0 %v1152_v36  ;;  %v2754_v36 = vsub.f32 %v2426_v12, %v2432_v1  ;;  %v2755_v12 = vsub.f32 %v2445_v57, %v2451_v21 }
 0x433   : > { %v1125_v42 = vsel %vm488_vm2, %v1942_v33, 0.0  ;;  %1827 = vmatprep.subr.bf16.mxu0 %v1150_v3  ;;  %v1148_v28 = vpack.c.bf16 %v1942_v33, %v1938_v60 }
 0x434   : > { %1126 = vadd.xlane.f32.xlu0 %v1125_v42  ;;  %v1018_v0 = vmul.f32 1.442695, %v2754_v36  ;;  %v1022_v7 = vmul.f32 1.442695, %v2755_v12  ;;  %v777_v36 = vld [vmem:[#allocation4 + $0x30] sm:$0xff] }
 0x436   : > { %v1944_v58 = vpop.eup %1943  ;;  %1117 = vadd.xlane.f32.xlu1 %v1116_v27  ;;  %1828 = vmatpush3.bf16.msra.mxu0 %v1150_v3  ;;  %1957 = vpow2.f32 %v1018_v0  ;;  %v609_v27 = vld [vmem:[#allocation3] sm:$0xff] }
 0x437   : > { %v1119_v14 = vsel %vm488_vm2, %v1944_v58, 0.0  ;;  %v1147_v51 = vpack.c.bf16 %v1944_v58, %v1940_v5  ;;  %v1946_v62 = vpop.eup %1945  ;;  %1959 = vpow2.f32 %v1020_v19  ;;  %v617_v58 = vmul.f32 %v2516_v24, %v609_v27 }
 0x438   : > { %1120 = vadd.xlane.f32.xlu0 %v1119_v14  ;;  %v2589_v60 = vpop.eup %1947  ;;  %v624_v1 = vmul.f32 %v1946_v62, %v616_v45  ;;  %1961 = vpow2.f32 %v1022_v7 }
 0x439   : > { %v630_v15 = vpop.xlane.xlu0 %629  ;;  %1830 = vmatmul.mubr.msk.bf16.vlgmr.msra.gmra.mxu0 %vm488_vm2, %v1146_v31  ;;  %v2596_v59 = vpop.eup %1949  ;;  %v613_v31 = vld [vmem:[#allocation3 + $0x20] sm:$0xff] }
 0x43a   : > { %v650_v46 = vadd.f32 %v630_v15, %v618_v18  ;;  %1833 = vmatprep.mubr.msk.bf16.mxu0 %vm488_vm2, %v1147_v51  ;;  %v2600_v2 = vpop.eup %1951  ;;  %v621_v51 = vmul.f32 %v2528_v4, %v613_v31  ;;  %v623_v15 = vmul.f32 %v2534_v8, %v615_v22 }
 0x43b   : > { %v2603_v33 = vpop.eup %1953 }
 0x43c   : > { %659 = vst.msk [vmem:[#allocation3 + $0x8] sm:$0xff] %vm657_vm3, %v650_v46  ;;  %v2605_v57 = vpop.eup %1955 }
 0x43d   : > { %v633_v17 = vpop.xlane.xlu0 %632 }
 0x43e   : > { %v651_v32 = vadd.f32 %v633_v17, %v619_v41  ;;  %v771_v41 = vld [vmem:[#allocation4] sm:$0xff] }
 0x440   : > { %660 = vst.msk [vmem:[#allocation3 + $0x10] sm:$0xff] %vm657_vm3, %v651_v32  ;;  %v774_v32 = vld [vmem:[#allocation4 + $0x18] sm:$0xff] }
 0x441   : > { %v636_v39 = vpop.xlane.xlu0 %635  ;;  %1834 = vmatmul.mubr.msk.bf16.gmra.mxu0 %vm488_vm2, %v1148_v28 }
 0x442   : > { %v652_v44 = vadd.f32 %v636_v39, %v620_v23  ;;  %v776_v39 = vld [vmem:[#allocation4 + $0x28] sm:$0xff] }
 0x443   : > { %v2611_v30 = vpop.eup %1957  ;;  %v1089_v19 = vld [vmem:[#allocation3 + $0x8] sm:$0xff] }
 0x444   : > { %661 = vst.msk [vmem:[#allocation3 + $0x18] sm:$0xff] %vm657_vm3, %v652_v44  ;;  %v2613_v63 = vpop.eup %1959 }
 0x445   : > { %v642_v10 = vpop.xlane.xlu0 %641  ;;  %v2618_v6 = vpop.eup %1961 }
 0x446   : > { %v654_v3 = vadd.f32 %v642_v10, %v622_v38 }
 0x447   : > { %1248 = vperm.xlu1 %1881, %v2589_v60  }
 0x448   : > { %663 = vst.msk [vmem:[#allocation3 + $0x28] sm:$0xff] %vm657_vm3, %v654_v3 }
 0x449   : > { %v648_v5 = vpop.xlane.xlu0 %647 }
 0x44a   : > { %v656_v61 = vadd.f32 %v648_v5, %v624_v1  ;;  %v1097_v1 = vmul.f32 %v2596_v59, %v1089_v19 }
 0x44b   : > { %1253 = vperm.xlu1 %1881, %v2596_v59  }
 0x44c   : > { %665 = vst.msk [vmem:[#allocation3 + $0x38] sm:$0xff] %vm657_vm3, %v656_v61  ;;  %v1091_v61 = vld [vmem:[#allocation3 + $0x18] sm:$0xff] }
 0x44e   : > { %816 = vperm.xlu0 %1880, %v1946_v62   ;;  %v1090_v62 = vld [vmem:[#allocation3 + $0x10] sm:$0xff] }
 0x44f   : > { %1263 = vperm.xlu1 %1881, %v2600_v2   ;;  %v1098_v10 = vmul.f32 %v2603_v33, %v1090_v62 }
 0x451   : > { %v787_v42 = vpop.permute.xlu0 %786 }
 0x452   : > { %v820_v21 = vmul.f32 %v787_v42, %v772_v25  ;;  %1882 = vset.pattern.permute.xlu0 %v2747_v11  ;;  %v1099_v25 = vmul.f32 %v2600_v2, %v1091_v61 }
 0x453   : > { %1268 = vperm.xlu1 %1881, %v2605_v57   ;;  %1258 = vperm.xlu0 %1882, %v2603_v33  }
 0x454   : > { %v828_v29 = vadd.f32 %v820_v21, %v2337_v48 }
 0x456   : > { %836 = vst.msk [vmem:[#allocation4 + $0x8] sm:$0xff] %vm390_vm0, %v828_v29  ;;  %v1095_v29 = vld [vmem:[#allocation3 + $0x38] sm:$0xff] }
 0x457   : > { %1278 = vperm.xlu1 %1881, %v2613_v63   ;;  %1273 = vperm.xlu0 %1882, %v2611_v30   ;;  %v1103_v31 = vmul.f32 %v2618_v6, %v1095_v29 }
 0x45b   : > { %1283 = vperm.xlu0 %1882, %v2618_v6   ;;  %1883 = vset.pattern.permute.xlu1 %v2756_v53 }
 0x45e   : > { %v627_v48 = vpop.xlane.xlu1 %626 }
 0x45f   : > { %v649_v14 = vadd.f32 %v627_v48, %v617_v58 }
 0x461   : > { %658 = vst.msk [vmem:[#allocation3] sm:$0xff] %vm657_vm3, %v649_v14 }
 0x462   : > { %v639_v18 = vpop.xlane.xlu1 %638 }
 0x463   : > { %v653_v40 = vadd.f32 %v639_v18, %v621_v51  ;;  %v1093_v51 = vld [vmem:[#allocation3 + $0x28] sm:$0xff] }
 0x465   : > { %662 = vst.msk [vmem:[#allocation3 + $0x20] sm:$0xff] %vm657_vm3, %v653_v40 }
 0x466   : > { %v645_v54 = vpop.xlane.xlu1 %644 }
 0x467   : > { %v655_v46 = vadd.f32 %v645_v54, %v623_v15 }
 0x468   : > { %v1088_v45 = vld [vmem:[#allocation3] sm:$0xff] }
 0x469   : > { %664 = vst.msk [vmem:[#allocation3 + $0x30] sm:$0xff] %vm657_vm3, %v655_v46  ;;  %v1096_v7 = vmul.f32 %v2589_v60, %v1088_v45 }
 0x46a   : > { %v782_v24 = vpop.permute.xlu1 %781 }
 0x46b   : > { %v819_v50 = vmul.f32 %v782_v24, %v771_v41 }
 0x46c   : > { %v1092_v58 = vld [vmem:[#allocation3 + $0x20] sm:$0xff] }
 0x46d   : > { %v827_v17 = vadd.f32 %v819_v50, %v2333_v43  ;;  %v1100_v22 = vmul.f32 %v2605_v57, %v1092_v58  ;;  %v778_v50 = vld [vmem:[#allocation4 + $0x38] sm:$0xff] }
 0x46e   : > { %v792_v26 = vpop.permute.xlu1 %791 }
 0x46f   : > { %835 = vst.msk [vmem:[#allocation4] sm:$0xff] %vm390_vm0, %v827_v17  ;;  %v821_v4 = vmul.f32 %v792_v26, %v773_v16 }
 0x470   : > { %v1094_v42 = vld [vmem:[#allocation3 + $0x30] sm:$0xff] }
 0x471   : > { %v829_v28 = vadd.f32 %v2331_v35, %v821_v4  ;;  %v1102_v27 = vmul.f32 %v2613_v63, %v1094_v42  ;;  %v1101_v63 = vmul.f32 %v2611_v30, %v1093_v51 }
 0x472   : > { %v797_v20 = vpop.permute.xlu1 %796 }
 0x473   : > { %837 = vst.msk [vmem:[#allocation4 + $0x10] sm:$0xff] %vm390_vm0, %v829_v28  ;;  %v822_v8 = vmul.f32 %v797_v20, %v774_v32 }
 0x475   : > { %v830_v23 = vadd.f32 %v2335_v47, %v822_v8 }
 0x476   : > { %v802_v56 = vpop.permute.xlu1 %801 }
 0x477   : > { %838 = vst.msk [vmem:[#allocation4 + $0x18] sm:$0xff] %vm390_vm0, %v830_v23  ;;  %v823_v34 = vmul.f32 %v802_v56, %v775_v13 }
 0x479   : > { %v831_v43 = vadd.f32 %v823_v34, %v2341_v37 }
 0x47a   : > { %v807_v9 = vpop.permute.xlu1 %806  ;;  %v1240_v42 = vld [vmem:[#allocation4 + $0x10] sm:$0xff] }
 0x47b   : > { %839 = vst.msk [vmem:[#allocation4 + $0x20] sm:$0xff] %vm390_vm0, %v831_v43  ;;  %v824_v44 = vmul.f32 %v807_v9, %v776_v39 }
 0x47d   : > { %v832_v35 = vadd.f32 %v824_v44, %v2345_v55 }
 0x47e   : > { %v812_v0 = vpop.permute.xlu1 %811  ;;  %v1241_v58 = vld [vmem:[#allocation4 + $0x18] sm:$0xff] }
 0x47f   : > { %840 = vst.msk [vmem:[#allocation4 + $0x28] sm:$0xff] %vm390_vm0, %v832_v35  ;;  %v825_v38 = vmul.f32 %v812_v0, %v777_v36 }
 0x481   : > { %v833_v47 = vadd.f32 %v2339_v49, %v825_v38 }
 0x483   : > { %841 = vst.msk [vmem:[#allocation4 + $0x30] sm:$0xff] %vm390_vm0, %v833_v47 }
 0x4af   : > { %v1112_v37 = vpop.xlane.xlu1 %1111 }
 0x4b0   : > { %v1130_v3 = vadd.f32 %v1112_v37, %v1098_v10 }
 0x4b1   : > { %v1109_v12 = vpop.xlane.xlu0 %1108 }
 0x4b2   : > { %1139 = vst.msk [vmem:[#allocation3 + $0x10] sm:$0xff] %vm1136_vm4, %v1130_v3  ;;  %v1129_v55 = vadd.f32 %v1109_v12, %v1097_v1 }
 0x4b3   : > { %v1106_v5 = vpop.xlane.xlu1 %1105 }
 0x4b4   : > { %1138 = vst.msk [vmem:[#allocation3 + $0x8] sm:$0xff] %vm1136_vm4, %v1129_v55  ;;  %v1128_v49 = vadd.f32 %v1106_v5, %v1096_v7 }
 0x4b6   : > { %1137 = vst.msk [vmem:[#allocation3] sm:$0xff] %vm1136_vm4, %v1128_v49 }
 0x4b7   : > { %v1115_v33 = vpop.xlane.xlu1 %1114 }
 0x4b8   : > { %v1131_v21 = vadd.f32 %v1115_v33, %v1099_v25 }
 0x4b9   : > { %v1356_v59 = vld [vmem:[#allocation3 + $0x10] sm:$0xff] }
 0x4ba   : > { %1140 = vst.msk [vmem:[#allocation3 + $0x18] sm:$0xff] %vm1136_vm4, %v1131_v21  ;;  %1963 = vrcp.f32 %v1356_v59 }
 0x4bb   : > { %v1124_v60 = vpop.xlane.xlu1 %1123  ;;  %v1355_v41 = vld [vmem:[#allocation3 + $0x8] sm:$0xff] }
 0x4bc   : > { %v1134_v48 = vadd.f32 %v1124_v60, %v1102_v27  ;;  %v1238_v60 = vld [vmem:[#allocation4] sm:$0xff] }
 0x4bd   : > { %v1127_v14 = vpop.xlane.xlu0 %1126  ;;  %v1354_v18 = vld [vmem:[#allocation3] sm:$0xff] }
 0x4be   : > { %1143 = vst.msk [vmem:[#allocation3 + $0x30] sm:$0xff] %vm1136_vm4, %v1134_v48  ;;  %v1135_v2 = vadd.f32 %v1127_v14, %v1103_v31  ;;  %1965 = vrcp.f32 %v1354_v18 }
 0x4bf   : > { %v1118_v40 = vpop.xlane.xlu1 %1117 }
 0x4c0   : > { %1144 = vst.msk [vmem:[#allocation3 + $0x38] sm:$0xff] %vm1136_vm4, %v1135_v2  ;;  %v1132_v15 = vadd.f32 %v1118_v40, %v1100_v22  ;;  %v1239_v22 = vld [vmem:[#allocation4 + $0x8] sm:$0xff]  ;;  %v1244_v40 = vld [vmem:[#allocation4 + $0x30] sm:$0xff] }
 0x4c1   : > { %v1121_v54 = vpop.xlane.xlu0 %1120  ;;  %v1357_v46 = vld [vmem:[#allocation3 + $0x18] sm:$0xff] }
 0x4c2   : > { %1141 = vst.msk [vmem:[#allocation3 + $0x20] sm:$0xff] %vm1136_vm4, %v1132_v15  ;;  %v1133_v6 = vadd.f32 %v1121_v54, %v1101_v63  ;;  %1967 = vrcp.f32 %v1357_v46 }
 0x4c3   : > { %1969 = vrcp.f32 %v1355_v41 }
 0x4c4   : > { %1142 = vst.msk [vmem:[#allocation3 + $0x28] sm:$0xff] %vm1136_vm4, %v1133_v6 }
 0x4c5   : > { %v1360_v57 = vld [vmem:[#allocation3 + $0x30] sm:$0xff] }
 0x4c6   : > { %1971 = vrcp.f32 %v1360_v57 }
 0x4c7   : > { %v1964_v24 = vpop.eup %1963  ;;  %v1361_v28 = vld [vmem:[#allocation3 + $0x38] sm:$0xff] }
 0x4c8   : > { %1390 = vperm.xlu1 %1883, %v1964_v24  }
 0x4c9   : > { %v817_v16 = vpop.permute.xlu0 %816  ;;  %v1358_v4 = vld [vmem:[#allocation3 + $0x20] sm:$0xff] }
 0x4ca   : > { %v826_v17 = vmul.f32 %v817_v16, %v778_v50  ;;  %1973 = vrcp.f32 %v1358_v4  ;;  %v1242_v50 = vld [vmem:[#allocation4 + $0x20] sm:$0xff] }
 0x4cb   : > { %v1966_v26 = vpop.eup %1965  ;;  %1975 = vrcp.f32 %v1361_v28  ;;  %v1359_v20 = vld [vmem:[#allocation3 + $0x28] sm:$0xff] }
 0x4cc   : > { %v834_v30 = vadd.f32 %v2343_v52, %v826_v17  ;;  %1884 = vset.pattern.permute.xlu1 %v2747_v11  ;;  %1427 = vperm.xlu0 %1882, %v1966_v26   ;;  %1977 = vrcp.f32 %v1359_v20  ;;  %v1243_v28 = vld [vmem:[#allocation4 + $0x28] sm:$0xff] }
 0x4cd   : > { %1435 = vperm.xlu1 %1884, %v1964_v24  }
 0x4ce   : > { %842 = vst.msk [vmem:[#allocation4 + $0x38] sm:$0xff] %vm390_vm0, %v834_v30  ;;  %v1259_v19 = vpop.permute.xlu0 %1258 }
 0x4cf   : > { %v1968_v32 = vpop.eup %1967  ;;  %v1288_v21 = vmul.f32 %v1259_v19, %v1240_v42 }
 0x4d0   : > { %1439 = vperm.xlu0 %1882, %v1968_v32   ;;  %v1970_v8 = vpop.eup %1969 }
 0x4d1   : > { %1885 = vset.pattern.permute.xlu1 %v2756_v53 }
 0x4d2   : > { %1380 = vperm.xlu1 %1885, %v1966_v26   ;;  %v1274_v37 = vpop.permute.xlu0 %1273 }
 0x4d3   : > { %v1972_v52 = vpop.eup %1971 }
 0x4d4   : > { %1886 = vset.pattern.permute.xlu0 %v2756_v53 }
 0x4d5   : > { %1385 = vperm.xlu0 %1886, %v1970_v8   ;;  %v1245_v54 = vld [vmem:[#allocation4 + $0x38] sm:$0xff] }
 0x4d6   : > { %1395 = vperm.xlu1 %1885, %v1968_v32   ;;  %v1284_v3 = vpop.permute.xlu0 %1283 }
 0x4d7   : > { %v1974_v13 = vpop.eup %1973  ;;  %v1293_v17 = vmul.f32 %v1284_v3, %v1245_v54 }
 0x4d8   : > { %v1976_v23 = vpop.eup %1975 }
 0x4d9   : > { %1410 = vperm.xlu0 %1886, %v1972_v52   ;;  %v1978_v56 = vpop.eup %1977 }
 0x4da   : > { %1887 = vset.pattern.permute.xlu1 %v2747_v11 }
 0x4db   : > { %1431 = vperm.xlu1 %1887, %v1970_v8  }
 0x4dd   : > { %1400 = vperm.xlu0 %1886, %v1974_v13  }
 0x4df   : > { %1888 = vset.pattern.permute.xlu1 %v2756_v53 }
 0x4e0   : > { %1415 = vperm.xlu1 %1888, %v1976_v23  }
 0x4e1   : > { %1890 = vset.pattern.permute.xlu0 %v2747_v11 }
 0x4e4   : > { %1405 = vperm.xlu1 %1888, %v1978_v56  }
 0x4e8   : > { %1889 = vset.pattern.permute.xlu1 %v2747_v11  ;;  %v1249_v11 = vpop.permute.xlu1 %1248 }
 0x4e9   : > { %v1286_v48 = vmul.f32 %v1249_v11, %v1238_v60 }
 0x4ec   : > { %v1254_v0 = vpop.permute.xlu1 %1253 }
 0x4ed   : > { %v1287_v15 = vmul.f32 %v1254_v0, %v1239_v22 }
 0x4f0   : > { %v1264_v38 = vpop.permute.xlu1 %1263 }
 0x4f1   : > { %v1289_v31 = vmul.f32 %v1264_v38, %v1241_v58 }
 0x4f4   : > { %v1269_v47 = vpop.permute.xlu1 %1268 }
 0x4f5   : > { %v1290_v16 = vmul.f32 %v1269_v47, %v1242_v50 }
 0x4f8   : > { %v1279_v62 = vpop.permute.xlu1 %1278 }
 0x4f9   : > { %v1831_v34 = vpop.f32.mrf.mxu0  ;;  %v1292_v63 = vmul.f32 %v1279_v62, %v1244_v40 }
 0x4fa   : > { %1306 = vrot.lane.b32.xlu1 %v1831_v34, %s2008_s27 }
 0x4fb   : > { %v1207_v39 = vpop.f32.mrf.mxu0 }
 0x4fd   : > { %v1832_v43 = vpop.f32.mrf.mxu0 }
 0x4fe   : > { %1302 = vrot.lane.b32.xlu1 %v1207_v39, %s2008_s27  ;;  %1308 = vrot.lane.b32.xlu0 %v1832_v43, %s2008_s27 }
 0x4ff   : > { %v1210_v9 = vpop.f32.mrf.mxu0 }
 0x501   : > { %v1835_v44 = vpop.f32.mrf.mxu0 }
 0x502   : > { %1314 = vrot.lane.b32.xlu1 %v1835_v44, %s2008_s27  ;;  %1304 = vrot.lane.b32.xlu0 %v1210_v9, %s2008_s27 }
 0x503   : > { %v1223_v36 = vpop.f32.mrf.mxu0 }
 0x505   : > { %v1836_v53 = vpop.f32.mrf.mxu0 }
 0x506   : > { %1310 = vrot.lane.b32.xlu1 %v1223_v36, %s2008_s27  ;;  %1316 = vrot.lane.b32.xlu0 %v1836_v53, %s2008_s27 }
 0x507   : > { %v1226_v35 = vpop.f32.mrf.mxu0 }
 0x50a   : > { %1443 = vperm.xlu1 %1889, %v1974_v13   ;;  %1312 = vrot.lane.b32.xlu0 %v1226_v35, %s2008_s27  ;;  %v1291_v13 = vmul.f32 %v1274_v37, %v1243_v28 }
 0x50e   : > { %1451 = vperm.xlu1 %1889, %v1972_v52   ;;  %1447 = vperm.xlu0 %1890, %v1978_v56  }
 0x512   : > { %1455 = vperm.xlu0 %1890, %v1976_v23  }
 0x543   : > { %v1391_v10 = vpop.permute.xlu1 %1390 }
 0x547   : > { %v1428_v12 = vpop.permute.xlu0 %1427 }
 0x548   : > { %v1436_v45 = vpop.permute.xlu1 %1435 }
 0x54b   : > { %v1440_v7 = vpop.permute.xlu0 %1439 }
 0x54d   : > { %v1381_v1 = vpop.permute.xlu1 %1380 }
 0x550   : > { %v2667_v61 = vpop.permute.xlu0 %1385 }
 0x551   : > { %v1396_v55 = vpop.permute.xlu1 %1395 }
 0x554   : > { %v2671_v25 = vpop.permute.xlu0 %1410 }
 0x556   : > { %v2665_v5 = vpop.permute.xlu1 %1431 }
 0x558   : > { %v2675_v29 = vpop.permute.xlu0 %1400 }
 0x55b   : > { %v2669_v49 = vpop.permute.xlu1 %1415 }
 0x55f   : > { %v2673_v33 = vpop.permute.xlu1 %1405 }
 0x56c   : > { %v1307_v59 = vpop.permute.xlu1 %1306 }
 0x56d   : > { %v1328_v27 = vadd.f32 %v1307_v59, %v1288_v21 }
 0x56f   : > { %1337 = vst.msk [vmem:[#allocation4 + $0x10] sm:$0xff] %vm1334_vm6, %v1328_v27 }
 0x570   : > { %v1309_v14 = vpop.permute.xlu0 %1308  ;;  %v1303_v51 = vpop.permute.xlu1 %1302 }
 0x571   : > { %v1329_v18 = vadd.f32 %v1309_v14, %v1289_v31  ;;  %v1326_v2 = vadd.f32 %v1303_v51, %v1286_v48 }
 0x573   : > { %1338 = vst.msk [vmem:[#allocation4 + $0x18] sm:$0xff] %vm1334_vm6, %v1329_v18  ;;  %1335 = vst.msk [vmem:[#allocation4] sm:$0xff] %vm1334_vm6, %v1326_v2 }
 0x574   : > { %v1305_v46 = vpop.permute.xlu0 %1304  ;;  %v1315_v6 = vpop.permute.xlu1 %1314 }
 0x575   : > { %v1327_v41 = vadd.f32 %v1305_v46, %v1287_v15  ;;  %v1332_v24 = vadd.f32 %v1315_v6, %v1292_v63 }
 0x576   : > { %v1372_v57 = vld [vmem:[#allocation4 + $0x10] sm:$0xff] }
 0x577   : > { %v1420_v26 = vmul.f32 %v1391_v10, %v1372_v57  ;;  %v1460_v30 = vmul.f32 %v1436_v45, %v1372_v57  ;;  %1336 = vst.msk [vmem:[#allocation4 + $0x8] sm:$0xff] %vm1334_vm6, %v1327_v41  ;;  %1341 = vst.msk [vmem:[#allocation4 + $0x30] sm:$0xff] %vm1334_vm6, %v1332_v24 }
 0x578   : > { %v1317_v4 = vpop.permute.xlu0 %1316  ;;  %v1311_v32 = vpop.permute.xlu1 %1310 }
 0x579   : > { %v1468_v20 = vsel %vm390_vm0, %v1420_v26, %v1460_v30  ;;  %v1333_v8 = vadd.f32 %v1317_v4, %v1293_v17  ;;  %v1330_v52 = vadd.f32 %v1311_v32, %v1290_v16 }
 0x57a   : > { %v1373_v23 = vld [vmem:[#allocation4 + $0x18] sm:$0xff]  ;;  %v1370_v56 = vld [vmem:[#allocation4] sm:$0xff]  ;;  %v1716_v34 = vpack.c.bf16 %v1468_v20, %v1468_v20 }
 0x57b   : > { %v1421_v39 = vmul.f32 %v1396_v55, %v1373_v23  ;;  %v1461_v43 = vmul.f32 %v1440_v7, %v1373_v23  ;;  %v1418_v9 = vmul.f32 %v1381_v1, %v1370_v56  ;;  %v1458_v44 = vmul.f32 %v1428_v12, %v1370_v56  ;;  %1342 = vst.msk [vmem:[#allocation4 + $0x38] sm:$0xff] %vm1334_vm6, %v1333_v8 }
 0x57c   : > { %1339 = vst.msk [vmem:[#allocation4 + $0x20] sm:$0xff] %vm1334_vm6, %v1330_v52  ;;  %v1313_v36 = vpop.permute.xlu0 %1312 }
 0x57d   : > { %1509 = vst.msk [vmem:[%s2687_s30 + $0x8] sm:$0xf] %vm1506_vm7, %v1716_v34  ;;  %v1469_v53 = vsel %vm390_vm0, %v1421_v39, %v1461_v43  ;;  %v1466_v35 = vsel %vm390_vm0, %v1418_v9, %v1458_v44  ;;  %v1331_v11 = vadd.f32 %v1313_v36, %v1291_v13 }
 0x57e   : > { %v1371_v0 = vld [vmem:[#allocation4 + $0x8] sm:$0xff]  ;;  %v1714_v38 = vpack.c.bf16 %v1466_v35, %v1466_v35  ;;  %v1717_v47 = vpack.c.bf16 %v1469_v53, %v1469_v53  ;;  %v1376_v7 = vld [vmem:[#allocation4 + $0x30] sm:$0xff] }
 0x57f   : > { %v1419_v62 = vmul.f32 %v2667_v61, %v1371_v0  ;;  %v1459_v19 = vmul.f32 %v2665_v5, %v1371_v0  ;;  %1340 = vst.msk [vmem:[#allocation4 + $0x28] sm:$0xff] %vm1334_vm6, %v1331_v11  ;;  %v1424_v60 = vmul.f32 %v2671_v25, %v1376_v7 }
 0x580   : > { %1507 = vst.msk [vmem:[%s2687_s30] sm:$0xf] %vm1506_vm7, %v1714_v38  ;;  %1510 = vst.msk [vmem:[%s2687_s30 + $0xc] sm:$0xf] %vm1506_vm7, %v1717_v47 }
 0x581   : > { %v1467_v10 = vsel %vm390_vm0, %v1419_v62, %v1459_v19 }
 0x582   : > { %v1715_v37 = vpack.c.bf16 %v1467_v10, %v1467_v10 }
 0x583   : > { %v1374_v45 = vld [vmem:[#allocation4 + $0x20] sm:$0xff] }
 0x584   : > { %1508 = vst.msk [vmem:[%s2687_s30 + $0x4] sm:$0xf] %vm1506_vm7, %v1715_v37  ;;  %v1422_v1 = vmul.f32 %v2675_v29, %v1374_v45  ;;  %v1377_v29 = vld [vmem:[#allocation4 + $0x38] sm:$0xff] }
 0x585   : > { %v1444_v3 = vpop.permute.xlu1 %1443  ;;  %v1425_v2 = vmul.f32 %v2669_v49, %v1377_v29 }
 0x586   : > { %v1462_v12 = vmul.f32 %v1444_v3, %v1374_v45  ;;  %v1375_v55 = vld [vmem:[#allocation4 + $0x28] sm:$0xff] }
 0x587   : > { %v1423_v59 = vmul.f32 %v2673_v33, %v1375_v55 }
 0x588   : > { %v1470_v5 = vsel %vm390_vm0, %v1422_v1, %v1462_v12 }
 0x589   : > { %v1718_v61 = vpack.c.bf16 %v1470_v5, %v1470_v5  ;;  %v1448_v42 = vpop.permute.xlu0 %1447  ;;  %v1452_v21 = vpop.permute.xlu1 %1451 }
 0x58a   : > { %v1463_v27 = vmul.f32 %v1448_v42, %v1375_v55  ;;  %v1464_v58 = vmul.f32 %v1452_v21, %v1376_v7 }
 0x58b   : > { %1511 = vst.msk [vmem:[%s2687_s30 + $0x10] sm:$0xf] %vm1506_vm7, %v1718_v61 }
 0x58c   : > { %v1471_v48 = vsel %vm390_vm0, %v1423_v59, %v1463_v27  ;;  %v1472_v31 = vsel %vm390_vm0, %v1424_v60, %v1464_v58 }
 0x58d   : > { %v1719_v14 = vpack.c.bf16 %v1471_v48, %v1471_v48  ;;  %v1720_v51 = vpack.c.bf16 %v1472_v31, %v1472_v31  ;;  %v1456_v18 = vpop.permute.xlu0 %1455 }
 0x58e   : > { %v1465_v22 = vmul.f32 %v1456_v18, %v1377_v29 }
 0x58f   : > { %1512 = vst.msk [vmem:[%s2687_s30 + $0x14] sm:$0xf] %vm1506_vm7, %v1719_v14  ;;  %1513 = vst.msk [vmem:[%s2687_s30 + $0x18] sm:$0xf] %vm1506_vm7, %v1720_v51 }
 0x590   : > { %v1473_v25 = vsel %vm390_vm0, %v1425_v2, %v1465_v22 }
 0x591   : > { %v1721_v33 = vpack.c.bf16 %v1473_v25, %v1473_v25 }
 0x593   : > { %1514 = vst.msk [vmem:[%s2687_s30 + $0x1c] sm:$0xf] %vm1506_vm7, %v1721_v33 }
 0x594 PF: > { %s13_s14 = sadd.s32 1, %s2001_s14   ;;  %s2757_s12 = smov %s1997_s13 }
 0x595   : > { %p10_p5 = scmp.ge.s32.totalorder %s13_s14, 4   ;;  %s2758_s13 = smov %s2760_s15 }
 0x597   :  { %12 = sbr.rel (!%p10_p5) target bundleno = 2 (0x2), region = 76 }

// kernel: basic_transformer_block.13
= control target key start
LH: loop header
LB: loop body
LE: loop exit
PB: predicated region body
PF: predicated region fallthrough
CT: control target
= control target key end

     0   :  { %s488_s9 = smov 0   ;;  %s490_s10 = smov 0   ;;  %s527_s0 = inlined_call_operand.vmem [shape: f32[16,64], index: 0, kind: input, shape index: {}]   ;;  %s528_s1 = inlined_call_operand.vmem [shape: bf16[2,64,32], index: 1, kind: input, shape index: {}]   ;;  %s529_s2 = inlined_call_operand.vmem [shape: bf16[2,16,32], index: 2, kind: output, shape index: {}]  }
   0x1   :  { %s492_s11 = smov 0  }
   0x2 LB: > { %s21_s12 = sadd.s32 1, %s465_s10  ;;  %p382_p0 = scmp.ge.s32.totalorder %s469_s11, 1  ;;  %s469_s11 = sphi %s492_s11, %s12_s11   ;;  %s465_s10 = sphi %s490_s10, %s531_s10   ;;  %s461_s9 = sphi %s488_s9, %s530_s9  }
   0x3   : > { %p22_p1 = scmp.ge.s32.totalorder %s21_s12, 2  ;;  %p137_p2 = scmp.lt.s32.totalorder %s469_s11, 3 }
   0x5   : > { %s533_s12 = smov (%p22_p1, %s21_s12), 0  ;;  %p138_p3 = pnand %p382_p0, %p137_p2 }
   0x6   : > { %p174_p4 = scmp.lt.s32.totalorder (!%p138_p3), %s461_s9, 1 }
   0x7   : > { %141 = sbr.rel (%p138_p3) target bundleno = 231 (0xe7), region = 28 }
   0xc   : > { %v471_v0 = vmov 0.0   ;;  %vm472_vm0 = vmmov 0   ;;  %s535_s9 = smov (!%p174_p4, %s461_s9), 1  ;;  %v190_v5 = vld [vmem:[%s527_s0] sm:$0xff]  ;;  %v191_v6 = vld [vmem:[%s527_s0 + $0x8] sm:$0xff]  ;;  %vm225_vm1 = vcmask 523264  }
   0xd   : > { %405 = vmatprep.subr.bf16.mxu0 %v471_v0  ;;  %413 = vmatprep.mubr.msk.bf16.mxu0 %vm472_vm0, %v471_v0  ;;  %s396_s13 = sshll.u32 %s535_s9, 5  ;;  %v192_v7 = vpack.c.bf16 %v191_v6, %v190_v5  ;;  %s397_s21 = sshll.u32 %s535_s9, 3  ;;  %vm278_vm2 = vcmask 257024  }
   0xe   : > { %s178_s16 = scalar_lea.vmem %s528_s1, %s396_s13  ;;  %s187_s24 = scalar_lea.vmem %s529_s2, %s397_s21 }
   0xf   : > { %v443_v1 = vld [vmem:[%s178_s16 + $0x18] sm:$0xff]   ;;  %v444_v2 = vld [vmem:[%s178_s16 + $0x10] sm:$0xff]   ;;  %v445_v3 = vld [vmem:[%s178_s16 + $0x8] sm:$0xff]  }
  0x10   : > { %406 = vmatpush3.bf16.msra.mxu0 %v443_v1  ;;  %v446_v4 = vld [vmem:[%s178_s16] sm:$0xff]  }
  0x11   : > { %407 = vmatprep.subr.bf16.mxu0 %v471_v0 }
  0x14   : > { %408 = vmatpush3.bf16.msra.mxu0 %v444_v2 }
  0x15   : > { %409 = vmatprep.subr.bf16.mxu0 %v471_v0 }
  0x18   : > { %410 = vmatpush3.bf16.msra.mxu0 %v445_v3 }
  0x19   : > { %411 = vmatprep.subr.bf16.mxu0 %v471_v0 }
  0x1c   : > { %412 = vmatpush3.bf16.msra.mxu0 %v446_v4 }
  0x1f   : > { %414 = vmatmul.mubr.msk.bf16.vlgmr.msra.gmra.mxu0 %vm225_vm1, %v192_v7 }
  0xdf   : > { %v263_v8 = vpop.f32.mrf.mxu0 }
  0xe0   : > { %v398_v9 = vpack.c.bf16 %v263_v8, %v263_v8 }
  0xe1   : > { %v415_v10 = vpop.f32.mrf.mxu0 }
  0xe2   : > { %279 = vst.msk [vmem:[%s187_s24] sm:$0xf] %vm278_vm2, %v398_v9 }
  0xe3   : > { %v266_v11 = vpop.f32.mrf.mxu0 }
  0xe4   : > { %v399_v12 = vpack.c.bf16 %v266_v11, %v266_v11 }
  0xe5   : > { %v416_v13 = vpop.f32.mrf.mxu0 }
  0xe6   : > { %280 = vst.msk [vmem:[%s187_s24 + $0x4] sm:$0xf] %vm278_vm2, %v399_v12 }
  0xe7 PF: > { %s12_s11 = sadd.s32 1, %s469_s11   ;;  %s530_s9 = smov %s465_s10 }
  0xe8   : > { %p9_p5 = scmp.ge.s32.totalorder %s12_s11, 4   ;;  %s531_s10 = smov %s533_s12 }
  0xea   :  { %11 = sbr.rel (!%p9_p5) target bundleno = 2 (0x2), region = 61 }

// kernel: basic_transformer_block.14
= control target key start
LH: loop header
LB: loop body
LE: loop exit
PB: predicated region body
PF: predicated region fallthrough
CT: control target
= control target key end

     0   :  { %s1849_s12 = smov 0   ;;  %s1851_s13 = smov 0   ;;  %s2495_s0 = inlined_call_operand.vmem [shape: bf16[1,2,64,32], index: 0, kind: input, shape index: {}]   ;;  %s2496_s1 = inlined_call_operand.vmem [shape: bf16[2,2,8,32], index: 1, kind: input, shape index: {}, may-alias: {1,2}]   ;;  %s2497_s2 = inlined_call_operand.vmem [shape: bf16[2,2,8,32], index: 2, kind: input, shape index: {}, may-alias: {1,2}]   ;;  %s2498_s3 = inlined_call_operand.vmem [shape: bf16[2,64,32], index: 3, kind: output, shape index: {}]  }
   0x1   :  { %s1853_s14 = smov 0  }
   0x2 LB: > { %s32_s15 = sadd.s32 1, %s1817_s13  ;;  %p1544_p0 = scmp.ge.s32.totalorder %s1821_s14, 1  ;;  %s1821_s14 = sphi %s1853_s14, %s13_s14   ;;  %s1817_s13 = sphi %s1851_s13, %s2521_s13   ;;  %s1813_s12 = sphi %s1849_s12, %s2520_s12  }
   0x3   : > { %p34_p1 = scmp.ge.s32.totalorder %s32_s15, 2  ;;  %p194_p2 = scmp.lt.s32.totalorder %s1821_s14, 3 }
   0x5   : > { %s2523_s15 = smov (%p34_p1, %s32_s15), 0  ;;  %p195_p3 = pnand %p1544_p0, %p194_p2 }
   0x6   : > { %p242_p4 = scmp.lt.s32.totalorder (!%p195_p3), %s1813_s12, 1  ;;  %s1826_s24 = smov (!%p195_p3), 112  }
   0x7   : > { %198 = sbr.rel (%p195_p3) target bundleno = 1379 (0x563), region = 32  ;;  %s1828_s28 = smov (!%p195_p3), 16  }
   0xc   : > { %s2525_s12 = smov (!%p242_p4, %s1813_s12), 1  ;;  %vm337_vm0 = vcmask 130048   ;;  %vm281_vm1 = vcmask 15360   ;;  %v1823_v26 = vmov -inf   ;;  %vm426_vm2 = vcmask 64512  }
   0xd   : > { %s1580_s16 = sshll.u32 %s2525_s12, 5  ;;  %s1547_s17 = sshll.u32 %s2525_s12, 2  ;;  %284 = vst.msk [vmem:[#allocation2 + $0x10] sm:$0xff] %vm281_vm1, %v1823_v26  ;;  %282 = vst.msk [vmem:[#allocation2] sm:$0xff] %vm281_vm1, %v1823_v26  ;;  %v1824_v39 = vmov 0   ;;  %v2501_v44 = vmov 0.0  }
   0xe   : > { %s249_s20 = scalar_lea.vmem %s2495_s0, %s1580_s16  ;;  %s257_s23 = scalar_lea.vmem %s2496_s1, %s1547_s17  ;;  %283 = vst.msk [vmem:[#allocation2 + $0x8] sm:$0xff] %vm281_vm1, %v1823_v26  ;;  %285 = vst.msk [vmem:[#allocation2 + $0x18] sm:$0xff] %vm281_vm1, %v1823_v26  ;;  %1704 = vset.pattern.permute.xlu1 %v1824_v39  ;;  %1703 = vset.pattern.permute.xlu0 %v1824_v39  ;;  %vm595_vm3 = vcmask 7168   ;;  %vm620_vm4 = vcmask 1043456   ;;  %vm1042_vm5 = vcmask 15368   ;;  %vm298_vm6 = vcmask 261120  }
   0xf   : > { %v1881_v0 = vld [vmem:[%s257_s23] sm:$0xf]  ;;  %v1606_v2 = vld [vmem:[%s249_s20 + $0x8] sm:$0xff]   ;;  %v1607_v7 = vld [vmem:[%s249_s20 + $0x10] sm:$0xff]   ;;  %286 = vst.msk [vmem:[#allocation2 + $0x20] sm:$0xff] %vm281_vm1, %v1823_v26  ;;  %s1482_s27 = scalar_lea.vmem %s2497_s2, %s1547_s17  ;;  %vm1236_vm7 = vcmask 261248   ;;  %s2451_s4 = scalar_lea.vmem %s2498_s3, %s1580_s16 }
  0x10   : > { %v1591_v1 = vld [vmem:[%s249_s20] sm:$0xff]   ;;  %1669 = vmatprep.subr.msk.bf16.mxu0 %vm337_vm0, %v1881_v0  ;;  %v351_v3 = vsel %vm337_vm0, %v1881_v0, 0  ;;  %v1596_v6 = vunpack.c.l.bf16 %v1606_v2  ;;  %v1597_v8 = vunpack.c.h.bf16 %v1606_v2  ;;  %v1600_v9 = vunpack.c.l.bf16 %v1607_v7  ;;  %v1608_v11 = vld [vmem:[%s249_s20 + $0x18] sm:$0xff]   ;;  %287 = vst.msk [vmem:[#allocation2 + $0x28] sm:$0xff] %vm281_vm1, %v1823_v26  ;;  %288 = vst.msk [vmem:[#allocation2 + $0x30] sm:$0xff] %vm281_vm1, %v1823_v26 }
  0x11   : > { %v1592_v4 = vunpack.c.l.bf16 %v1591_v1  ;;  %v1593_v5 = vunpack.c.h.bf16 %v1591_v1  ;;  %1630 = vmatpush3.bf16.xpose.msra.mxu0 %v351_v3  ;;  %v1601_v10 = vunpack.c.h.bf16 %v1607_v7  ;;  %v1604_v19 = vunpack.c.l.bf16 %v1608_v11  ;;  %289 = vst.msk [vmem:[#allocation2 + $0x38] sm:$0xff] %vm281_vm1, %v1823_v26  ;;  %291 = vst.msk [vmem:[#allocation3 + $0x8] sm:$0xff] %vm281_vm1, %v2501_v44 }
  0x12   : > { %v325_v14 = vmul.f32 0.25, %v1596_v6  ;;  %v326_v15 = vmul.f32 0.25, %v1597_v8  ;;  %v327_v16 = vmul.f32 0.25, %v1600_v9  ;;  %v1605_v20 = vunpack.c.h.bf16 %v1608_v11  ;;  %290 = vst.msk [vmem:[#allocation3] sm:$0xff] %vm281_vm1, %v2501_v44  ;;  %292 = vst.msk [vmem:[#allocation3 + $0x10] sm:$0xff] %vm281_vm1, %v2501_v44 }
  0x13   : > { %v323_v12 = vmul.f32 0.25, %v1592_v4  ;;  %v324_v13 = vmul.f32 0.25, %v1593_v5  ;;  %v328_v17 = vmul.f32 0.25, %v1601_v10  ;;  %v329_v23 = vmul.f32 0.25, %v1604_v19  ;;  %293 = vst.msk [vmem:[#allocation3 + $0x18] sm:$0xff] %vm281_vm1, %v2501_v44  ;;  %294 = vst.msk [vmem:[#allocation3 + $0x20] sm:$0xff] %vm281_vm1, %v2501_v44 }
  0x14   : > { %v1889_v21 = vpack.c.bf16 %v326_v15, %v325_v14  ;;  %v330_v24 = vmul.f32 0.25, %v1605_v20  ;;  %295 = vst.msk [vmem:[#allocation3 + $0x28] sm:$0xff] %vm281_vm1, %v2501_v44  ;;  %296 = vst.msk [vmem:[#allocation3 + $0x30] sm:$0xff] %vm281_vm1, %v2501_v44  ;;  %v1961_v45 = vld [vmem:[#allocation2 + $0x10] sm:$0xff]  ;;  %v1963_v47 = vld [vmem:[#allocation2] sm:$0xff]  ;;  %vm1408_vm8 = vcmask 257024  }
  0x15   : > { %v1887_v18 = vpack.c.bf16 %v324_v13, %v323_v12  ;;  %v1891_v22 = vpack.c.bf16 %v328_v17, %v327_v16  ;;  %297 = vst.msk [vmem:[#allocation3 + $0x38] sm:$0xff] %vm281_vm1, %v2501_v44  ;;  %v1968_v50 = vld [vmem:[#allocation2 + $0x18] sm:$0xff]  ;;  %v1978_v54 = vld [vmem:[#allocation2 + $0x8] sm:$0xff]  ;;  %v1560_v16 = vcombine.low %v1881_v0, %v1881_v0 }
  0x16   : > { %v1899_v25 = vpack.c.bf16 %v330_v24, %v329_v23  ;;  %v1996_v60 = vld [vmem:[#allocation2 + $0x20] sm:$0xff]  ;;  %v2048_v14 = vld [vmem:[%s1482_s27 + $0x8] sm:$0xf] }
  0x17   : > { %1631 = vmatprep.mubr.msk.bf16.mxu0 %vm337_vm0, %v1887_v18  ;;  %v2008_v1 = vld [vmem:[#allocation2 + $0x30] sm:$0xff]  ;;  %v2010_v2 = vld [vmem:[#allocation2 + $0x28] sm:$0xff]  ;;  %1670 = vmatprep.subr.msk.bf16.mxu1 %vm620_vm4, %v2048_v14  ;;  %v622_v15 = vsel %vm620_vm4, %v2048_v14, 0  ;;  %v1565_v58 = vcombine.low %v2048_v14, %v2048_v14 }
  0x18   : > { %1632 = vmatmul.mubr.msk.bf16.vlgmr.msra.gmra.mxu0 %vm337_vm0, %v1889_v21  ;;  %v2024_v8 = vld [vmem:[#allocation2 + $0x38] sm:$0xff]  ;;  %1640 = vmatpush3.bf16.msra.mxu1 %v622_v15 }
  0x19   : > { %1635 = vmatprep.mubr.msk.bf16.mxu0 %vm337_vm0, %v1891_v22 }
  0x20   : > { %1636 = vmatmul.mubr.msk.bf16.gmra.mxu0 %vm337_vm0, %v1899_v25 }
  0xd8   : > { %v1911_v27 = vpop.f32.mrf.mxu0 }
  0xd9   : > { %v433_v28 = vsel %vm426_vm2, %v1911_v27, -inf }
  0xda   : > { %434 = vmax.xlane.f32.xlu1 %v433_v28  ;;  %v1915_v29 = vpop.f32.mrf.mxu0 }
  0xdb   : > { %v427_v30 = vsel %vm426_vm2, %v1915_v29, -inf }
  0xdc   : > { %428 = vmax.xlane.f32.xlu0 %v427_v30  ;;  %v1919_v31 = vpop.f32.mrf.mxu0 }
  0xdd   : > { %v436_v32 = vsel %vm426_vm2, %v1919_v31, -inf }
  0xde   : > { %437 = vmax.xlane.f32.xlu1 %v436_v32  ;;  %v1923_v33 = vpop.f32.mrf.mxu0 }
  0xdf   : > { %v430_v34 = vsel %vm426_vm2, %v1923_v33, -inf }
  0xe0   : > { %431 = vmax.xlane.f32.xlu0 %v430_v34  ;;  %v1927_v35 = vpop.f32.mrf.mxu0 }
  0xe1   : > { %v445_v41 = vsel %vm426_vm2, %v1927_v35, -inf }
  0xe2   : > { %v1929_v36 = vpop.f32.mrf.mxu0 }
  0xe3   : > { %v439_v37 = vsel %vm426_vm2, %v1929_v36, -inf }
  0xe4   : > { %440 = vmax.xlane.f32.xlu0 %v439_v37  ;;  %v1933_v38 = vpop.f32.mrf.mxu0 }
  0xe5   : > { %v448_v43 = vsel %vm426_vm2, %v1933_v38, -inf }
  0xe6   : > { %v1937_v40 = vpop.f32.mrf.mxu0 }
  0xe7   : > { %v442_v42 = vsel %vm426_vm2, %v1937_v40, -inf }
  0xe8   : > { %446 = vmax.xlane.f32.xlu0 %v445_v41  ;;  %443 = vmax.xlane.f32.xlu1 %v442_v42 }
  0xec   : > { %449 = vmax.xlane.f32.xlu1 %v448_v43 }
 0x163   : > { %v435_v46 = vpop.xlane.xlu1 %434 }
 0x164   : > { %v1966_v48 = vmax.f32 %v1961_v45, %v435_v46 }
 0x165   : > { %v429_v49 = vpop.xlane.xlu0 %428 }
 0x166   : > { %763 = vst.msk [vmem:[#allocation2 + $0x10] sm:$0xff] %vm595_vm3, %v1966_v48  ;;  %v1975_v52 = vmax.f32 %v1963_v47, %v429_v49  ;;  %495 = vperm.xlu1 %1704, %v1966_v48  }
 0x167   : > { %v438_v53 = vpop.xlane.xlu1 %437 }
 0x168   : > { %761 = vst.msk [vmem:[#allocation2] sm:$0xff] %vm595_vm3, %v1975_v52  ;;  %v1985_v56 = vmax.f32 %v1968_v50, %v438_v53  ;;  %485 = vperm.xlu0 %1703, %v1975_v52  }
 0x169   : > { %v432_v57 = vpop.xlane.xlu0 %431 }
 0x16a   : > { %764 = vst.msk [vmem:[#allocation2 + $0x18] sm:$0xff] %vm595_vm3, %v1985_v56  ;;  %v1993_v59 = vmax.f32 %v1978_v54, %v432_v57  ;;  %500 = vperm.xlu1 %1704, %v1985_v56  }
 0x16c   : > { %v460_v61 = vsub.f32 %v1978_v54, %v1993_v59  ;;  %762 = vst.msk [vmem:[#allocation2 + $0x8] sm:$0xff] %vm595_vm3, %v1993_v59  ;;  %773 = vrot.lane.b32.xlu0 %v1887_v18, %s1826_s24 }
 0x16d   : > { %v441_v62 = vpop.xlane.xlu0 %440 }
 0x16e   : > { %v2005_v63 = vmax.f32 %v1996_v60, %v441_v62  ;;  %490 = vperm.xlu1 %1704, %v1993_v59   ;;  %v469_v14 = vmul.f32 1.442695, %v460_v61 }
 0x170   : > { %765 = vst.msk [vmem:[#allocation2 + $0x20] sm:$0xff] %vm595_vm3, %v2005_v63  ;;  %777 = vrot.lane.b32.xlu0 %v1891_v22, %s1826_s24 }
 0x171   : > { %v447_v4 = vpop.xlane.xlu0 %446  ;;  %v444_v5 = vpop.xlane.xlu1 %443 }
 0x172   : > { %v2019_v6 = vmax.f32 %v2008_v1, %v447_v4  ;;  %v2022_v7 = vmax.f32 %v2010_v2, %v444_v5 }
 0x174   : > { %767 = vst.msk [vmem:[#allocation2 + $0x30] sm:$0xff] %vm595_vm3, %v2019_v6  ;;  %766 = vst.msk [vmem:[#allocation2 + $0x28] sm:$0xff] %vm595_vm3, %v2022_v7  ;;  %515 = vperm.xlu1 %1704, %v2019_v6  }
 0x175   : > { %v450_v11 = vpop.xlane.xlu1 %449 }
 0x176   : > { %v2036_v12 = vmax.f32 %v2024_v8, %v450_v11 }
 0x178   : > { %768 = vst.msk [vmem:[#allocation2 + $0x38] sm:$0xff] %vm595_vm3, %v2036_v12  ;;  %505 = vperm.xlu1 %1704, %v2005_v63  }
 0x17b   : > { %v2207_v9 = vld [vmem:[#allocation2 + $0x30] sm:$0xff] }
 0x17c   : > { %510 = vperm.xlu1 %1704, %v2022_v7  }
 0x17f   : > { %v2224_v51 = vld [vmem:[#allocation2 + $0x38] sm:$0xff] }
 0x180   : > { %520 = vperm.xlu1 %1704, %v2036_v12  }
 0x184   : > { %784 = vrot.lane.b32.xlu1 %v1560_v16, %s1826_s24 }
 0x188   : > { %775 = vrot.lane.b32.xlu1 %v1889_v21, %s1826_s24 }
 0x18c   : > { %779 = vrot.lane.b32.xlu1 %v1899_v25, %s1826_s24 }
 0x1e1   : > { %v496_v17 = vpop.permute.xlu1 %495 }
 0x1e2   : > { %v525_v23 = vsub.f32 %v1911_v27, %v496_v17 }
 0x1e3   : > { %v486_v18 = vpop.permute.xlu0 %485 }
 0x1e4   : > { %v523_v19 = vsub.f32 %v1915_v29, %v486_v18  ;;  %v535_v30 = vmul.f32 1.442695, %v525_v23 }
 0x1e5   : > { %v501_v20 = vpop.permute.xlu1 %500 }
 0x1e6   : > { %v526_v22 = vsub.f32 %v1919_v31, %v501_v20  ;;  %v531_v24 = vmul.f32 1.442695, %v523_v19 }
 0x1e7   : > { %v774_v18 = vpop.permute.xlu0 %773 }
 0x1e8   : > { %v537_v26 = vmul.f32 1.442695, %v526_v22  ;;  %1719 = vpow2.f32 %v531_v24 }
 0x1e9   : > { %v491_v0 = vpop.permute.xlu1 %490 }
 0x1ea   : > { %v524_v28 = vsub.f32 %v1923_v33, %v491_v0  ;;  %1721 = vpow2.f32 %v537_v26 }
 0x1eb   : > { %v778_v20 = vpop.permute.xlu0 %777 }
 0x1ec   : > { %v533_v21 = vmul.f32 1.442695, %v524_v28 }
 0x1ee   : > { %1723 = vpow2.f32 %v533_v21 }
 0x1ef   : > { %1725 = vpow2.f32 %v535_v30  ;;  %v516_v25 = vpop.permute.xlu1 %515 }
 0x1f0   : > { %v529_v34 = vsub.f32 %v1927_v35, %v516_v25 }
 0x1f2   : > { %v543_v46 = vmul.f32 1.442695, %v529_v34 }
 0x1f3   : > { %v506_v32 = vpop.permute.xlu1 %505 }
 0x1f4   : > { %v527_v29 = vsub.f32 %v1929_v36, %v506_v32 }
 0x1f5   : > { %v2070_v41 = vpop.eup %1719 }
 0x1f6   : > { %v539_v31 = vmul.f32 1.442695, %v527_v29 }
 0x1f7   : > { %v511_v37 = vpop.permute.xlu1 %510  ;;  %v2072_v42 = vpop.eup %1721 }
 0x1f8   : > { %v528_v27 = vsub.f32 %v1937_v40, %v511_v37  ;;  %1727 = vpow2.f32 %v539_v31  ;;  %v572_v55 = vsel %vm426_vm2, %v2072_v42, 0.0 }
 0x1fa   : > { %v541_v33 = vmul.f32 1.442695, %v528_v27 }
 0x1fb   : > { %v2074_v43 = vpop.eup %1723  ;;  %v521_v49 = vpop.permute.xlu1 %520 }
 0x1fc   : > { %v2076_v53 = vpop.eup %1725  ;;  %1729 = vpow2.f32 %v541_v33  ;;  %v530_v36 = vsub.f32 %v1933_v38, %v521_v49  ;;  %v604_v35 = vpack.c.bf16 %v2074_v43, %v2070_v41 }
 0x1fd   : > { %v605_v40 = vpack.c.bf16 %v2072_v42, %v2076_v53  ;;  %1731 = vpow2.f32 %v543_v46 }
 0x1fe   : > { %v545_v57 = vmul.f32 1.442695, %v530_v36  ;;  %1641 = vmatprep.mubr.msk.bf16.mxu1 %vm426_vm2, %v604_v35 }
 0x1ff   : > { %1642 = vmatmul.mubr.msk.bf16.vlgmr.msra.gmra.mxu1 %vm426_vm2, %v605_v40  ;;  %v785_v62 = vpop.permute.xlu1 %784 }
 0x200   : > { %1733 = vpow2.f32 %v545_v57  ;;  %v799_v4 = vsel %vm337_vm0, %v785_v62, 0  ;;  %1671 = vmatprep.subr.msk.bf16.mxu1 %vm337_vm0, %v785_v62 }
 0x201   : > { %1650 = vmatpush3.bf16.xpose.msra.mxu1 %v799_v4  ;;  %1735 = vpow2.f32 %v469_v14 }
 0x203   : > { %v776_v19 = vpop.permute.xlu1 %775 }
 0x205   : > { %v2087_v38 = vpop.eup %1727 }
 0x206   : > { %v575_v54 = vsel %vm426_vm2, %v2087_v38, 0.0 }
 0x207   : > { %v780_v22 = vpop.permute.xlu1 %779 }
 0x209   : > { %v2089_v5 = vpop.eup %1729 }
 0x20a   : > { %v606_v11 = vpack.c.bf16 %v2089_v5, %v2087_v38  ;;  %v2093_v15 = vpop.eup %1731  ;;  %v578_v44 = vsel %vm426_vm2, %v2089_v5, 0.0  ;;  %v2506_v38 = vsub.f32 %v1968_v50, %v1985_v56 }
 0x20b   : > { %v581_v61 = vsel %vm426_vm2, %v2093_v15, 0.0 }
 0x20c   : > { %1645 = vmatprep.mubr.msk.bf16.mxu1 %vm426_vm2, %v606_v11  ;;  %v2499_v11 = vmov 1   ;;  %v473_v5 = vmul.f32 1.442695, %v2506_v38 }
 0x20d   : > { %v2096_v16 = vpop.eup %1733  ;;  %1705 = vset.pattern.permute.xlu1 %v2499_v11  ;;  %1706 = vset.pattern.permute.xlu0 %v2499_v11  ;;  %v569_v11 = vsel %vm426_vm2, %v2076_v53, 0.0 }
 0x20e   : > { %v607_v17 = vpack.c.bf16 %v2096_v16, %v2093_v15  ;;  %v2270_v42 = vpop.eup %1735  ;;  %v2508_v15 = vsub.f32 %v2010_v2, %v2022_v7  ;;  %v2510_v2 = vmov 1  }
 0x210   : > { %1646 = vmatmul.mubr.msk.bf16.gmra.mxu1 %vm426_vm2, %v607_v17 }
 0x211   : > { %1651 = vmatprep.mubr.msk.bf16.mxu1 %vm337_vm0, %v774_v18  ;;  %v2155_v18 = vld [vmem:[#allocation2] sm:$0xff] }
 0x218   : > { %1652 = vmatmul.mubr.msk.bf16.vlgmr.msra.gmra.mxu1 %vm337_vm0, %v776_v19 }
 0x219   : > { %1655 = vmatprep.mubr.msk.bf16.mxu1 %vm337_vm0, %v778_v20 }
 0x220   : > { %1656 = vmatmul.mubr.msk.bf16.gmra.mxu1 %vm337_vm0, %v780_v22 }
 0x2bf   : > { %v2105_v23 = vpop.f32.mrf.mxu1 }
 0x2c1   : > { %v2107_v24 = vpop.f32.mrf.mxu1 }
 0x2c3   : > { %v2109_v26 = vpop.f32.mrf.mxu1 }
 0x2c5   : > { %v2111_v0 = vpop.f32.mrf.mxu1 }
 0x2d0   : > { %v2113_v28 = vpop.f32.mrf.mxu1 }
 0x2d2   : > { %v2115_v30 = vpop.f32.mrf.mxu1 }
 0x2d4   : > { %v2117_v21 = vpop.f32.mrf.mxu1 }
 0x2d6   : > { %v2119_v25 = vpop.f32.mrf.mxu1 }
 0x2d8   : > { %v2121_v32 = vpop.f32.mrf.mxu1 }
 0x2d9   : > { %v880_v27 = vsel %vm426_vm2, %v2121_v32, -inf }
 0x2da   : > { %v2123_v29 = vpop.f32.mrf.mxu1 }
 0x2db   : > { %v874_v34 = vsel %vm426_vm2, %v2123_v29, -inf }
 0x2dc   : > { %875 = vmax.xlane.f32.xlu0 %v874_v34  ;;  %v2127_v31 = vpop.f32.mrf.mxu1  ;;  %v2165_v34 = vld [vmem:[#allocation2 + $0x10] sm:$0xff] }
 0x2dd   : > { %v883_v36 = vsel %vm426_vm2, %v2127_v31, -inf }
 0x2de   : > { %v2129_v37 = vpop.f32.mrf.mxu1 }
 0x2df   : > { %v877_v33 = vsel %vm426_vm2, %v2129_v37, -inf }
 0x2e0   : > { %881 = vmax.xlane.f32.xlu0 %v880_v27  ;;  %878 = vmax.xlane.f32.xlu1 %v877_v33  ;;  %v2135_v46 = vpop.f32.mrf.mxu1  ;;  %v2167_v33 = vld [vmem:[#allocation2 + $0x8] sm:$0xff] }
 0x2e1   : > { %v892_v62 = vsel %vm426_vm2, %v2135_v46, -inf }
 0x2e2   : > { %v2137_v49 = vpop.f32.mrf.mxu1 }
 0x2e3   : > { %v886_v35 = vsel %vm426_vm2, %v2137_v49, -inf }
 0x2e4   : > { %884 = vmax.xlane.f32.xlu0 %v883_v36  ;;  %887 = vmax.xlane.f32.xlu1 %v886_v35  ;;  %v2143_v40 = vpop.f32.mrf.mxu1 }
 0x2e5   : > { %v895_v17 = vsel %vm426_vm2, %v2143_v40, -inf }
 0x2e6   : > { %v2145_v57 = vpop.f32.mrf.mxu1 }
 0x2e7   : > { %v889_v4 = vsel %vm426_vm2, %v2145_v57, -inf }
 0x2e8   : > { %893 = vmax.xlane.f32.xlu1 %v892_v62  ;;  %890 = vmax.xlane.f32.xlu0 %v889_v4 }
 0x2ec   : > { %896 = vmax.xlane.f32.xlu0 %v895_v17 }
 0x365   : > { %v876_v19 = vpop.xlane.xlu0 %875 }
 0x366   : > { %v2158_v20 = vmax.f32 %v2155_v18, %v876_v19  ;;  %v2185_v19 = vld [vmem:[#allocation2 + $0x18] sm:$0xff] }
 0x368   : > { %1245 = vst.msk [vmem:[#allocation2] sm:$0xff] %vm1042_vm5, %v2158_v20  ;;  %932 = vperm.xlu1 %1705, %v2158_v20  }
 0x369   : > { %v882_v27 = vpop.xlane.xlu0 %881  ;;  %v879_v36 = vpop.xlane.xlu1 %878 }
 0x36a   : > { %v2170_v35 = vmax.f32 %v2165_v34, %v882_v27  ;;  %v2173_v62 = vmax.f32 %v2167_v33, %v879_v36  ;;  %v2187_v36 = vld [vmem:[#allocation2 + $0x20] sm:$0xff] }
 0x36c   : > { %1247 = vst.msk [vmem:[#allocation2 + $0x10] sm:$0xff] %vm1042_vm5, %v2170_v35  ;;  %1246 = vst.msk [vmem:[#allocation2 + $0x8] sm:$0xff] %vm1042_vm5, %v2173_v62  ;;  %942 = vperm.xlu1 %1705, %v2170_v35   ;;  %937 = vperm.xlu0 %1706, %v2173_v62  }
 0x36d   : > { %v885_v27 = vpop.xlane.xlu0 %884  ;;  %v888_v13 = vpop.xlane.xlu1 %887 }
 0x36e   : > { %v2190_v4 = vmax.f32 %v2185_v19, %v885_v27  ;;  %v2193_v22 = vmax.f32 %v2187_v36, %v888_v13  ;;  %v2205_v27 = vld [vmem:[#allocation2 + $0x28] sm:$0xff] }
 0x370   : > { %1248 = vst.msk [vmem:[#allocation2 + $0x18] sm:$0xff] %vm1042_vm5, %v2190_v4  ;;  %1249 = vst.msk [vmem:[#allocation2 + $0x20] sm:$0xff] %vm1042_vm5, %v2193_v22  ;;  %947 = vperm.xlu1 %1705, %v2190_v4   ;;  %1708 = vset.pattern.permute.xlu0 %v1824_v39 }
 0x371   : > { %v891_v13 = vpop.xlane.xlu0 %890  ;;  %v894_v10 = vpop.xlane.xlu1 %893 }
 0x372   : > { %v2210_v17 = vmax.f32 %v2205_v27, %v891_v13  ;;  %v2213_v3 = vmax.f32 %v2207_v9, %v894_v10 }
 0x374   : > { %1250 = vst.msk [vmem:[#allocation2 + $0x28] sm:$0xff] %vm1042_vm5, %v2210_v17  ;;  %1251 = vst.msk [vmem:[#allocation2 + $0x30] sm:$0xff] %vm1042_vm5, %v2213_v3  ;;  %962 = vperm.xlu1 %1705, %v2213_v3  }
 0x375   : > { %v897_v13 = vpop.xlane.xlu0 %896 }
 0x376   : > { %v2227_v10 = vmax.f32 %v2224_v51, %v897_v13  ;;  %v566_v13 = vsel %vm426_vm2, %v2074_v43, 0.0  ;;  %v2503_v43 = vmov 0.0  }
 0x377   : > { %300 = vst.msk [vmem:[#allocation4 + $0x8] sm:$0xff] %vm298_vm6, %v2503_v43  ;;  %299 = vst.msk [vmem:[#allocation4] sm:$0xff] %vm298_vm6, %v2503_v43 }
 0x378   : > { %1252 = vst.msk [vmem:[#allocation2 + $0x38] sm:$0xff] %vm1042_vm5, %v2227_v10  ;;  %952 = vperm.xlu1 %1705, %v2193_v22  }
 0x379   : > { %301 = vst.msk [vmem:[#allocation4 + $0x10] sm:$0xff] %vm298_vm6, %v2503_v43  ;;  %302 = vst.msk [vmem:[#allocation4 + $0x18] sm:$0xff] %vm298_vm6, %v2503_v43 }
 0x37a   : > { %303 = vst.msk [vmem:[#allocation4 + $0x20] sm:$0xff] %vm298_vm6, %v2503_v43  ;;  %304 = vst.msk [vmem:[#allocation4 + $0x28] sm:$0xff] %vm298_vm6, %v2503_v43 }
 0x37b   : > { %305 = vst.msk [vmem:[#allocation4 + $0x30] sm:$0xff] %vm298_vm6, %v2503_v43  ;;  %306 = vst.msk [vmem:[#allocation4 + $0x38] sm:$0xff] %vm298_vm6, %v2503_v43 }
 0x37c   : > { %957 = vperm.xlu1 %1705, %v2210_v17  }
 0x380   : > { %967 = vperm.xlu1 %1705, %v2227_v10  }
 0x384   : > { %1058 = vrot.lane.b32.xlu1 %v1565_v58, %s1826_s24  ;;  %v584_v58 = vsel %vm426_vm2, %v2096_v16, 0.0  ;;  %v477_v16 = vmul.f32 1.442695, %v2508_v15 }
 0x385   : > { %1707 = vset.pattern.permute.xlu1 %v1824_v39 }
 0x38b   : > { %567 = vadd.xlane.f32.xlu0 %v566_v13 }
 0x38f   : > { %570 = vadd.xlane.f32.xlu0 %v569_v11 }
 0x393   : > { %573 = vadd.xlane.f32.xlu0 %v572_v55  ;;  %v2504_v55 = vsub.f32 %v1963_v47, %v1975_v52  ;;  %v2507_v47 = vsub.f32 %v1996_v60, %v2005_v63 }
 0x395   : > { %v467_v59 = vmul.f32 1.442695, %v2504_v55  ;;  %v475_v52 = vmul.f32 1.442695, %v2507_v47 }
 0x397   : > { %579 = vadd.xlane.f32.xlu0 %v578_v44  ;;  %v563_v44 = vsel %vm426_vm2, %v2070_v41, 0.0  ;;  %v2505_v41 = vsub.f32 %v1961_v45, %v1966_v48  ;;  %1737 = vpow2.f32 %v467_v59  ;;  %v2509_v45 = vsub.f32 %v2008_v1, %v2019_v6 }
 0x399   : > { %v471_v53 = vmul.f32 1.442695, %v2505_v41  ;;  %v479_v48 = vmul.f32 1.442695, %v2509_v45 }
 0x39b   : > { %585 = vadd.xlane.f32.xlu0 %v584_v58  ;;  %1739 = vpow2.f32 %v471_v53 }
 0x39c   : > { %1741 = vpow2.f32 %v473_v5 }
 0x39d   : > { %1743 = vpow2.f32 %v475_v52 }
 0x39e   : > { %1745 = vpow2.f32 %v477_v16 }
 0x39f   : > { %1747 = vpow2.f32 %v479_v48 }
 0x3a4   : > { %v2285_v11 = vpop.eup %1737 }
 0x3a8   : > { %564 = vadd.xlane.f32.xlu1 %v563_v44  ;;  %v2291_v50 = vpop.eup %1739 }
 0x3a9   : > { %v2294_v56 = vpop.eup %1741 }
 0x3aa   : > { %v2297_v60 = vpop.eup %1743 }
 0x3ab   : > { %v2300_v63 = vpop.eup %1745 }
 0x3ac   : > { %576 = vadd.xlane.f32.xlu1 %v575_v54  ;;  %v2303_v1 = vpop.eup %1747 }
 0x3b0   : > { %582 = vadd.xlane.f32.xlu1 %v581_v61 }
 0x3b1   : > { %704 = vperm.xlu0 %1708, %v2270_v42  }
 0x3c1   : > { %699 = vperm.xlu1 %1707, %v2285_v11  }
 0x3c5   : > { %709 = vperm.xlu1 %1707, %v2291_v50  }
 0x3c9   : > { %714 = vperm.xlu1 %1707, %v2294_v56  }
 0x3cd   : > { %719 = vperm.xlu1 %1707, %v2297_v60  }
 0x3d1   : > { %724 = vperm.xlu1 %1707, %v2300_v63  }
 0x3d5   : > { %729 = vperm.xlu1 %1707, %v2303_v1  }
 0x3d9   : > { %1709 = vset.pattern.permute.xlu1 %v2510_v2 }
 0x3e3   : > { %v933_v6 = vpop.permute.xlu1 %932 }
 0x3e4   : > { %v970_v7 = vsub.f32 %v2123_v29, %v933_v6 }
 0x3e6   : > { %v978_v13 = vmul.f32 1.442695, %v970_v7 }
 0x3e7   : > { %v938_v58 = vpop.permute.xlu0 %937  ;;  %v943_v14 = vpop.permute.xlu1 %942 }
 0x3e8   : > { %v971_v43 = vsub.f32 %v2129_v37, %v938_v58  ;;  %v972_v44 = vsub.f32 %v2121_v32, %v943_v14  ;;  %1749 = vpow2.f32 %v978_v13 }
 0x3ea   : > { %v980_v54 = vmul.f32 1.442695, %v971_v43  ;;  %v982_v55 = vmul.f32 1.442695, %v972_v44 }
 0x3eb   : > { %v948_v59 = vpop.permute.xlu1 %947 }
 0x3ec   : > { %1751 = vpow2.f32 %v980_v54  ;;  %v973_v61 = vsub.f32 %v2127_v31, %v948_v59 }
 0x3ed   : > { %1753 = vpow2.f32 %v982_v55 }
 0x3ee   : > { %v984_v41 = vmul.f32 1.442695, %v973_v61 }
 0x3ef   : > { %v963_v53 = vpop.permute.xlu1 %962 }
 0x3f0   : > { %v976_v38 = vsub.f32 %v2135_v46, %v963_v53  ;;  %1755 = vpow2.f32 %v984_v41  ;;  %v2511_v53 = vsub.f32 %v2155_v18, %v2158_v20  ;;  %v548_v18 = vld [vmem:[#allocation3 + $0x8] sm:$0xff] }
 0x3f2   : > { %v990_v29 = vmul.f32 1.442695, %v976_v38  ;;  %v914_v38 = vmul.f32 1.442695, %v2511_v53 }
 0x3f3   : > { %v953_v5 = vpop.permute.xlu1 %952 }
 0x3f4   : > { %v974_v47 = vsub.f32 %v2137_v49, %v953_v5  ;;  %1757 = vpow2.f32 %v990_v29 }
 0x3f5   : > { %v1750_v52 = vpop.eup %1749 }
 0x3f6   : > { %v986_v37 = vmul.f32 1.442695, %v974_v47  ;;  %v2512_v47 = vsub.f32 %v2024_v8, %v2036_v12  ;;  %v2514_v8 = vsub.f32 %v2185_v19, %v2190_v4  ;;  %v2516_v4 = vsub.f32 %v2207_v9, %v2213_v3 }
 0x3f7   : > { %v958_v32 = vpop.permute.xlu1 %957 }
 0x3f8   : > { %v975_v15 = vsub.f32 %v2145_v57, %v958_v32  ;;  %1759 = vpow2.f32 %v986_v37  ;;  %v1010_v57 = vsel %vm426_vm2, %v1750_v52, 0.0  ;;  %v481_v37 = vmul.f32 1.442695, %v2512_v47 }
 0x3f9   : > { %v1752_v16 = vpop.eup %1751  ;;  %v920_v12 = vmul.f32 1.442695, %v2514_v8  ;;  %v926_v19 = vmul.f32 1.442695, %v2516_v4  ;;  %v693_v4 = vld [vmem:[#allocation4 + $0x20] sm:$0xff] }
 0x3fa   : > { %v1754_v45 = vpop.eup %1753  ;;  %v988_v48 = vmul.f32 1.442695, %v975_v15  ;;  %v1013_v31 = vsel %vm426_vm2, %v1752_v16, 0.0  ;;  %v1051_v6 = vpack.c.bf16 %v1752_v16, %v1750_v52  ;;  %v2513_v15 = vsub.f32 %v2167_v33, %v2173_v62 }
 0x3fb   : > { %1014 = vadd.xlane.f32.xlu0 %v1013_v31  ;;  %v1016_v46 = vsel %vm426_vm2, %v1754_v45, 0.0  ;;  %v968_v7 = vpop.permute.xlu1 %967  ;;  %v549_v31 = vld [vmem:[#allocation3 + $0x10] sm:$0xff]  ;;  %v2515_v33 = vsub.f32 %v2187_v36, %v2193_v22  ;;  %v2517_v22 = vsub.f32 %v2165_v34, %v2170_v35  ;;  %v554_v35 = vld [vmem:[#allocation3 + $0x38] sm:$0xff] }
 0x3fc   : > { %1761 = vpow2.f32 %v988_v48  ;;  %1017 = vadd.xlane.f32.xlu1 %v1016_v46  ;;  %v977_v49 = vsub.f32 %v2143_v40, %v968_v7  ;;  %1661 = vmatprep.mubr.msk.bf16.mxu0 %vm426_vm2, %v1051_v6  ;;  %v916_v16 = vmul.f32 1.442695, %v2513_v15  ;;  %v557_v46 = vmul.f32 %v2291_v50, %v549_v31  ;;  %v552_v50 = vld [vmem:[#allocation3 + $0x28] sm:$0xff] }
 0x3fd   : > { %v1756_v58 = vpop.eup %1755  ;;  %v922_v62 = vmul.f32 1.442695, %v2515_v33  ;;  %v918_v36 = vmul.f32 1.442695, %v2517_v22  ;;  %v560_v3 = vmul.f32 %v2300_v63, %v552_v50  ;;  %v2519_v63 = vsub.f32 %v2224_v51, %v2227_v10  ;;  %v547_v51 = vld [vmem:[#allocation3] sm:$0xff]  ;;  %v691_v33 = vld [vmem:[#allocation4 + $0x10] sm:$0xff] }
 0x3fe   : > { %v992_v13 = vmul.f32 1.442695, %v977_v49  ;;  %v1052_v44 = vpack.c.bf16 %v1756_v58, %v1754_v45  ;;  %v1019_v54 = vsel %vm426_vm2, %v1756_v58, 0.0  ;;  %v556_v45 = vmul.f32 %v2270_v42, %v548_v18  ;;  %v550_v49 = vld [vmem:[#allocation3 + $0x18] sm:$0xff] }
 0x3ff   : > { %v1059_v14 = vpop.permute.xlu1 %1058  ;;  %v558_v42 = vmul.f32 %v2294_v56, %v550_v49  ;;  %v2518_v56 = vsub.f32 %v2205_v27, %v2210_v17  ;;  %v690_v27 = vld [vmem:[#allocation4 + $0x8] sm:$0xff]  ;;  %v555_v47 = vmul.f32 %v2285_v11, %v547_v51 }
 0x400   : > { %1763 = vpow2.f32 %v992_v13  ;;  %1011 = vadd.xlane.f32.xlu1 %v1010_v57  ;;  %v1073_v43 = vsel %vm620_vm4, %v1059_v14, 0  ;;  %1672 = vmatprep.subr.msk.bf16.mxu0 %vm620_vm4, %v1059_v14 }
 0x401   : > { %1660 = vmatpush3.bf16.msra.mxu0 %v1073_v43  ;;  %v1758_v55 = vpop.eup %1757  ;;  %1765 = vpow2.f32 %v914_v38 }
 0x402   : > { %v1028_v40 = vsel %vm426_vm2, %v1758_v55, 0.0  ;;  %1767 = vpow2.f32 %v481_v37 }
 0x403   : > { %1769 = vpow2.f32 %v916_v16 }
 0x404   : > { %1020 = vadd.xlane.f32.xlu1 %v1019_v54  ;;  %1662 = vmatmul.mubr.msk.bf16.vlgmr.msra.gmra.mxu0 %vm426_vm2, %v1052_v44  ;;  %1771 = vpow2.f32 %v920_v12  ;;  %v924_v44 = vmul.f32 1.442695, %v2518_v56 }
 0x405   : > { %v1760_v59 = vpop.eup %1759  ;;  %1773 = vpow2.f32 %v922_v62 }
 0x406   : > { %v1022_v29 = vsel %vm426_vm2, %v1760_v59, 0.0  ;;  %1775 = vpow2.f32 %v926_v19 }
 0x407   : > { %1777 = vpow2.f32 %v918_v36  ;;  %v694_v36 = vld [vmem:[#allocation4 + $0x28] sm:$0xff] }
 0x408   : > { %1029 = vadd.xlane.f32.xlu1 %v1028_v40  ;;  %1779 = vpow2.f32 %v924_v44 }
 0x409   : > { %v1762_v61 = vpop.eup %1761 }
 0x40a   : > { %v1053_v41 = vpack.c.bf16 %v1762_v61, %v1760_v59  ;;  %v1025_v20 = vsel %vm426_vm2, %v1762_v61, 0.0  ;;  %v928_v59 = vmul.f32 1.442695, %v2519_v63 }
 0x40c   : > { %1023 = vadd.xlane.f32.xlu1 %v1022_v29  ;;  %1665 = vmatprep.mubr.msk.bf16.mxu0 %vm426_vm2, %v1053_v41  ;;  %1781 = vpow2.f32 %v928_v59 }
 0x40d   : > { %v1764_v5 = vpop.eup %1763 }
 0x40e   : > { %v1031_v32 = vsel %vm426_vm2, %v1764_v5, 0.0  ;;  %v1054_v52 = vpack.c.bf16 %v1764_v5, %v1758_v55  ;;  %v2352_v58 = vpop.eup %1765 }
 0x40f   : > { %1032 = vadd.xlane.f32.xlu0 %v1031_v32  ;;  %v1768_v43 = vpop.eup %1767 }
 0x410   : > { %1666 = vmatmul.mubr.msk.bf16.gmra.mxu0 %vm426_vm2, %v1054_v52  ;;  %v2360_v9 = vpop.eup %1769  ;;  %v562_v55 = vmul.f32 %v1768_v43, %v554_v35  ;;  %v551_v52 = vld [vmem:[#allocation3 + $0x20] sm:$0xff] }
 0x411   : > { %v2367_v40 = vpop.eup %1771  ;;  %v559_v16 = vmul.f32 %v2297_v60, %v551_v52 }
 0x412   : > { %v2374_v17 = vpop.eup %1773 }
 0x413   : > { %1026 = vadd.xlane.f32.xlu0 %v1025_v20  ;;  %v2377_v53 = vpop.eup %1775  ;;  %v553_v20 = vld [vmem:[#allocation3 + $0x30] sm:$0xff] }
 0x414   : > { %v568_v48 = vpop.xlane.xlu0 %567  ;;  %v1778_v29 = vpop.eup %1777  ;;  %v561_v8 = vmul.f32 %v2303_v1, %v553_v20 }
 0x415   : > { %v588_v6 = vadd.f32 %v568_v48, %v556_v45  ;;  %v2383_v37 = vpop.eup %1779  ;;  %v689_v48 = vld [vmem:[#allocation4] sm:$0xff] }
 0x417   : > { %597 = vst.msk [vmem:[#allocation3 + $0x8] sm:$0xff] %vm595_vm3, %v588_v6 }
 0x418   : > { %v571_v7 = vpop.xlane.xlu0 %570 }
 0x419   : > { %v589_v13 = vadd.f32 %v571_v7, %v557_v46  ;;  %v2390_v18 = vpop.eup %1781  ;;  %v692_v7 = vld [vmem:[#allocation4 + $0x18] sm:$0xff] }
 0x41b   : > { %598 = vst.msk [vmem:[#allocation3 + $0x10] sm:$0xff] %vm595_vm3, %v589_v13 }
 0x41c   : > { %v574_v57 = vpop.xlane.xlu0 %573 }
 0x41d   : > { %v590_v14 = vadd.f32 %v574_v57, %v558_v42  ;;  %1150 = vperm.xlu1 %1709, %v2352_v58  }
 0x41e   : > { %v995_v56 = vld [vmem:[#allocation3 + $0x8] sm:$0xff] }
 0x41f   : > { %599 = vst.msk [vmem:[#allocation3 + $0x18] sm:$0xff] %vm595_vm3, %v590_v14  ;;  %v695_v14 = vld [vmem:[#allocation4 + $0x30] sm:$0xff] }
 0x420   : > { %v580_v34 = vpop.xlane.xlu0 %579 }
 0x421   : > { %v592_v54 = vadd.f32 %v580_v34, %v560_v3  ;;  %1155 = vperm.xlu1 %1709, %v2360_v9   ;;  %v1003_v34 = vmul.f32 %v2360_v9, %v995_v56 }
 0x422   : > { %v996_v44 = vld [vmem:[#allocation3 + $0x10] sm:$0xff] }
 0x423   : > { %601 = vst.msk [vmem:[#allocation3 + $0x28] sm:$0xff] %vm595_vm3, %v592_v54  ;;  %v1004_v35 = vmul.f32 %v1778_v29, %v996_v44 }
 0x424   : > { %v586_v61 = vpop.xlane.xlu0 %585 }
 0x425   : > { %v594_v41 = vadd.f32 %v586_v61, %v562_v55  ;;  %1165 = vperm.xlu1 %1709, %v2367_v40  }
 0x427   : > { %603 = vst.msk [vmem:[#allocation3 + $0x38] sm:$0xff] %vm595_vm3, %v594_v41 }
 0x429   : > { %1170 = vperm.xlu1 %1709, %v2374_v17   ;;  %734 = vperm.xlu0 %1708, %v1768_v43  }
 0x42c   : > { %v705_v38 = vpop.permute.xlu0 %704 }
 0x42d   : > { %v738_v5 = vmul.f32 %v705_v38, %v690_v27  ;;  %1180 = vperm.xlu1 %1709, %v2377_v53   ;;  %1710 = vset.pattern.permute.xlu0 %v2510_v2 }
 0x42e   : > { %1160 = vperm.xlu0 %1710, %v1778_v29  }
 0x42f   : > { %v746_v10 = vadd.f32 %v738_v5, %v2111_v0 }
 0x431   : > { %754 = vst.msk [vmem:[#allocation4 + $0x8] sm:$0xff] %vm337_vm0, %v746_v10  ;;  %v565_v32 = vpop.xlane.xlu1 %564  ;;  %1711 = vset.pattern.permute.xlu1 %v1824_v39 }
 0x432   : > { %v587_v15 = vadd.f32 %v565_v32, %v555_v47  ;;  %1175 = vperm.xlu0 %1710, %v2383_v37  }
 0x434   : > { %596 = vst.msk [vmem:[#allocation3] sm:$0xff] %vm595_vm3, %v587_v15  ;;  %v1001_v15 = vld [vmem:[#allocation3 + $0x38] sm:$0xff] }
 0x435   : > { %v577_v0 = vpop.xlane.xlu1 %576 }
 0x436   : > { %v591_v11 = vadd.f32 %v577_v0, %v559_v16  ;;  %1185 = vperm.xlu0 %1710, %v2390_v18   ;;  %v1009_v0 = vmul.f32 %v2390_v18, %v1001_v15 }
 0x438   : > { %600 = vst.msk [vmem:[#allocation3 + $0x20] sm:$0xff] %vm595_vm3, %v591_v11 }
 0x439   : > { %v583_v12 = vpop.xlane.xlu1 %582 }
 0x43a   : > { %v593_v45 = vadd.f32 %v583_v12, %v561_v8 }
 0x43b   : > { %v994_v63 = vld [vmem:[#allocation3] sm:$0xff] }
 0x43c   : > { %602 = vst.msk [vmem:[#allocation3 + $0x30] sm:$0xff] %vm595_vm3, %v593_v45 }
 0x43d   : > { %v700_v31 = vpop.permute.xlu1 %699 }
 0x43e   : > { %v737_v6 = vmul.f32 %v700_v31, %v689_v48 }
 0x43f   : > { %v998_v47 = vld [vmem:[#allocation3 + $0x20] sm:$0xff] }
 0x440   : > { %v745_v60 = vadd.f32 %v737_v6, %v2107_v24  ;;  %v1006_v52 = vmul.f32 %v2374_v17, %v998_v47 }
 0x441   : > { %v710_v62 = vpop.permute.xlu1 %709 }
 0x442   : > { %753 = vst.msk [vmem:[#allocation4] sm:$0xff] %vm337_vm0, %v745_v60  ;;  %v739_v46 = vmul.f32 %v710_v62, %v691_v33  ;;  %v696_v33 = vld [vmem:[#allocation4 + $0x38] sm:$0xff] }
 0x443   : > { %v1000_v38 = vld [vmem:[#allocation3 + $0x30] sm:$0xff] }
 0x444   : > { %v747_v49 = vadd.f32 %v2105_v23, %v739_v46  ;;  %v1008_v51 = vmul.f32 %v2377_v53, %v1000_v38  ;;  %v999_v53 = vld [vmem:[#allocation3 + $0x28] sm:$0xff] }
 0x445   : > { %v715_v13 = vpop.permute.xlu1 %714  ;;  %v1007_v45 = vmul.f32 %v2383_v37, %v999_v53 }
 0x446   : > { %755 = vst.msk [vmem:[#allocation4 + $0x10] sm:$0xff] %vm337_vm0, %v747_v49  ;;  %v740_v1 = vmul.f32 %v715_v13, %v692_v7 }
 0x448   : > { %v748_v19 = vadd.f32 %v2109_v26, %v740_v1 }
 0x449   : > { %v720_v42 = vpop.permute.xlu1 %719 }
 0x44a   : > { %756 = vst.msk [vmem:[#allocation4 + $0x18] sm:$0xff] %vm337_vm0, %v748_v19  ;;  %v741_v22 = vmul.f32 %v720_v42, %v693_v4 }
 0x44c   : > { %v749_v24 = vadd.f32 %v741_v22, %v2115_v30 }
 0x44d   : > { %v725_v57 = vpop.permute.xlu1 %724  ;;  %v1142_v38 = vld [vmem:[#allocation4 + $0x10] sm:$0xff] }
 0x44e   : > { %757 = vst.msk [vmem:[#allocation4 + $0x20] sm:$0xff] %vm337_vm0, %v749_v24  ;;  %v742_v50 = vmul.f32 %v725_v57, %v694_v36 }
 0x450   : > { %v750_v23 = vadd.f32 %v742_v50, %v2119_v25  ;;  %v1002_v25 = vmul.f32 %v2352_v58, %v994_v63 }
 0x451   : > { %v730_v43 = vpop.permute.xlu1 %729 }
 0x452   : > { %758 = vst.msk [vmem:[#allocation4 + $0x28] sm:$0xff] %vm337_vm0, %v750_v23  ;;  %v743_v3 = vmul.f32 %v730_v43, %v695_v14 }
 0x454   : > { %v751_v26 = vadd.f32 %v2113_v28, %v743_v3  ;;  %v997_v28 = vld [vmem:[#allocation3 + $0x18] sm:$0xff] }
 0x455   : > { %v1005_v27 = vmul.f32 %v2367_v40, %v997_v28 }
 0x456   : > { %759 = vst.msk [vmem:[#allocation4 + $0x30] sm:$0xff] %vm337_vm0, %v751_v26 }
 0x484   : > { %v1015_v30 = vpop.xlane.xlu0 %1014 }
 0x485   : > { %v1035_v54 = vadd.f32 %v1015_v30, %v1003_v34  ;;  %v1018_v55 = vpop.xlane.xlu1 %1017 }
 0x486   : > { %v1036_v59 = vadd.f32 %v1018_v55, %v1004_v35 }
 0x487   : > { %1044 = vst.msk [vmem:[#allocation3 + $0x8] sm:$0xff] %vm1042_vm5, %v1035_v54 }
 0x488   : > { %1045 = vst.msk [vmem:[#allocation3 + $0x10] sm:$0xff] %vm1042_vm5, %v1036_v59 }
 0x489   : > { %v1012_v61 = vpop.xlane.xlu1 %1011 }
 0x48a   : > { %v1034_v41 = vadd.f32 %v1012_v61, %v1002_v25 }
 0x48c   : > { %1043 = vst.msk [vmem:[#allocation3] sm:$0xff] %vm1042_vm5, %v1034_v41 }
 0x48d   : > { %v1021_v9 = vpop.xlane.xlu1 %1020 }
 0x48e   : > { %v1037_v29 = vadd.f32 %v1021_v9, %v1005_v27  ;;  %v1257_v12 = vld [vmem:[#allocation3 + $0x8] sm:$0xff] }
 0x48f   : > { %v1258_v5 = vld [vmem:[#allocation3 + $0x10] sm:$0xff] }
 0x490   : > { %1046 = vst.msk [vmem:[#allocation3 + $0x18] sm:$0xff] %vm1042_vm5, %v1037_v29  ;;  %1783 = vrcp.f32 %v1258_v5 }
 0x491   : > { %v1030_v10 = vpop.xlane.xlu1 %1029 }
 0x492   : > { %v1040_v32 = vadd.f32 %v1030_v10, %v1008_v51  ;;  %v1143_v51 = vld [vmem:[#allocation4 + $0x18] sm:$0xff] }
 0x493   : > { %v1256_v58 = vld [vmem:[#allocation3] sm:$0xff] }
 0x494   : > { %1049 = vst.msk [vmem:[#allocation3 + $0x30] sm:$0xff] %vm1042_vm5, %v1040_v32  ;;  %1785 = vrcp.f32 %v1256_v58  ;;  %v1140_v58 = vld [vmem:[#allocation4] sm:$0xff] }
 0x495   : > { %v1024_v40 = vpop.xlane.xlu1 %1023 }
 0x496   : > { %v1038_v16 = vadd.f32 %v1024_v40, %v1006_v52 }
 0x497   : > { %v1259_v20 = vld [vmem:[#allocation3 + $0x18] sm:$0xff] }
 0x498   : > { %1047 = vst.msk [vmem:[#allocation3 + $0x20] sm:$0xff] %vm1042_vm5, %v1038_v16  ;;  %v1033_v11 = vpop.xlane.xlu0 %1032  ;;  %1787 = vrcp.f32 %v1259_v20  ;;  %v1141_v16 = vld [vmem:[#allocation4 + $0x8] sm:$0xff] }
 0x499   : > { %v1041_v8 = vadd.f32 %v1033_v11, %v1009_v0  ;;  %1789 = vrcp.f32 %v1257_v12  ;;  %v1146_v12 = vld [vmem:[#allocation4 + $0x30] sm:$0xff] }
 0x49b   : > { %1050 = vst.msk [vmem:[#allocation3 + $0x38] sm:$0xff] %vm1042_vm5, %v1041_v8  ;;  %v1262_v6 = vld [vmem:[#allocation3 + $0x30] sm:$0xff] }
 0x49c   : > { %v1027_v48 = vpop.xlane.xlu0 %1026  ;;  %1791 = vrcp.f32 %v1262_v6 }
 0x49d   : > { %v1784_v17 = vpop.eup %1783  ;;  %v1039_v31 = vadd.f32 %v1027_v48, %v1007_v45 }
 0x49e   : > { %1292 = vperm.xlu1 %1711, %v1784_v17  }
 0x49f   : > { %1048 = vst.msk [vmem:[#allocation3 + $0x28] sm:$0xff] %vm1042_vm5, %v1039_v31  ;;  %v1260_v60 = vld [vmem:[#allocation3 + $0x20] sm:$0xff] }
 0x4a0   : > { %1793 = vrcp.f32 %v1260_v60 }
 0x4a1   : > { %v1786_v18 = vpop.eup %1785 }
 0x4a2   : > { %1712 = vset.pattern.permute.xlu1 %v2510_v2  ;;  %1329 = vperm.xlu0 %1710, %v1786_v18   ;;  %v1263_v7 = vld [vmem:[#allocation3 + $0x38] sm:$0xff] }
 0x4a3   : > { %1337 = vperm.xlu1 %1712, %v1784_v17   ;;  %1795 = vrcp.f32 %v1263_v7 }
 0x4a4   : > { %v735_v62 = vpop.permute.xlu0 %734 }
 0x4a5   : > { %v1788_v46 = vpop.eup %1787  ;;  %v744_v37 = vmul.f32 %v735_v62, %v696_v33 }
 0x4a6   : > { %1341 = vperm.xlu0 %1710, %v1788_v46   ;;  %v1261_v13 = vld [vmem:[#allocation3 + $0x28] sm:$0xff]  ;;  %v1790_v1 = vpop.eup %1789 }
 0x4a7   : > { %v752_v49 = vadd.f32 %v2117_v21, %v744_v37  ;;  %1713 = vset.pattern.permute.xlu1 %v1824_v39  ;;  %1797 = vrcp.f32 %v1261_v13 }
 0x4a8   : > { %1282 = vperm.xlu1 %1713, %v1786_v18  }
 0x4a9   : > { %760 = vst.msk [vmem:[#allocation4 + $0x38] sm:$0xff] %vm337_vm0, %v752_v49  ;;  %v1792_v4 = vpop.eup %1791  ;;  %v1161_v56 = vpop.permute.xlu0 %1160 }
 0x4aa   : > { %1714 = vset.pattern.permute.xlu0 %v1824_v39  ;;  %v1190_v5 = vmul.f32 %v1161_v56, %v1142_v38 }
 0x4ab   : > { %1287 = vperm.xlu0 %1714, %v1790_v1  }
 0x4ac   : > { %1297 = vperm.xlu1 %1713, %v1788_v46   ;;  %v1144_v46 = vld [vmem:[#allocation4 + $0x20] sm:$0xff] }
 0x4ad   : > { %v1794_v19 = vpop.eup %1793  ;;  %v2432_v34 = vpop.permute.xlu0 %1175 }
 0x4af   : > { %1312 = vperm.xlu0 %1714, %v1792_v4  }
 0x4b0   : > { %1715 = vset.pattern.permute.xlu1 %v2510_v2  ;;  %v1796_v21 = vpop.eup %1795  ;;  %v1147_v48 = vld [vmem:[#allocation4 + $0x38] sm:$0xff] }
 0x4b1   : > { %1333 = vperm.xlu1 %1715, %v1790_v1   ;;  %v1186_v35 = vpop.permute.xlu0 %1185 }
 0x4b2   : > { %v1195_v60 = vmul.f32 %v1186_v35, %v1147_v48 }
 0x4b3   : > { %1302 = vperm.xlu0 %1714, %v1794_v19  }
 0x4b4   : > { %v1798_v42 = vpop.eup %1797 }
 0x4b5   : > { %1716 = vset.pattern.permute.xlu1 %v1824_v39 }
 0x4b6   : > { %1317 = vperm.xlu1 %1716, %v1796_v21  }
 0x4b7   : > { %1718 = vset.pattern.permute.xlu0 %v2510_v2 }
 0x4ba   : > { %1307 = vperm.xlu1 %1716, %v1798_v42  }
 0x4be   : > { %1717 = vset.pattern.permute.xlu1 %v2510_v2  ;;  %v1151_v2 = vpop.permute.xlu1 %1150 }
 0x4bf   : > { %v1188_v15 = vmul.f32 %v1151_v2, %v1140_v58 }
 0x4c2   : > { %v1156_v43 = vpop.permute.xlu1 %1155 }
 0x4c3   : > { %v1189_v20 = vmul.f32 %v1156_v43, %v1141_v16 }
 0x4c4   : > { %v1663_v22 = vpop.f32.mrf.mxu0 }
 0x4c5   : > { %1208 = vrot.lane.b32.xlu1 %v1663_v22, %s1828_s28 }
 0x4c6   : > { %v1109_v36 = vpop.f32.mrf.mxu0  ;;  %v1166_v3 = vpop.permute.xlu1 %1165 }
 0x4c7   : > { %v1191_v47 = vmul.f32 %v1166_v3, %v1143_v51 }
 0x4c8   : > { %v1664_v24 = vpop.f32.mrf.mxu0 }
 0x4c9   : > { %1204 = vrot.lane.b32.xlu1 %v1109_v36, %s1828_s28  ;;  %1210 = vrot.lane.b32.xlu0 %v1664_v24, %s1828_s28 }
 0x4ca   : > { %v1112_v57 = vpop.f32.mrf.mxu0  ;;  %v1171_v26 = vpop.permute.xlu1 %1170 }
 0x4cb   : > { %v1192_v13 = vmul.f32 %v1171_v26, %v1144_v46 }
 0x4cd   : > { %1206 = vrot.lane.b32.xlu0 %v1112_v57, %s1828_s28  ;;  %v1145_v57 = vld [vmem:[#allocation4 + $0x28] sm:$0xff] }
 0x4ce   : > { %v1181_v44 = vpop.permute.xlu1 %1180 }
 0x4cf   : > { %v1194_v45 = vmul.f32 %v1181_v44, %v1146_v12 }
 0x4d0   : > { %v1667_v50 = vpop.f32.mrf.mxu0 }
 0x4d1   : > { %1216 = vrot.lane.b32.xlu1 %v1667_v50, %s1828_s28 }
 0x4d2   : > { %v1125_v14 = vpop.f32.mrf.mxu0 }
 0x4d4   : > { %v1668_v39 = vpop.f32.mrf.mxu0 }
 0x4d5   : > { %1212 = vrot.lane.b32.xlu1 %v1125_v14, %s1828_s28  ;;  %1218 = vrot.lane.b32.xlu0 %v1668_v39, %s1828_s28 }
 0x4d6   : > { %v1128_v23 = vpop.f32.mrf.mxu0 }
 0x4d9   : > { %1345 = vperm.xlu1 %1717, %v1794_v19   ;;  %1214 = vrot.lane.b32.xlu0 %v1128_v23, %s1828_s28  ;;  %v1193_v23 = vmul.f32 %v2432_v34, %v1145_v57 }
 0x4dd   : > { %1353 = vperm.xlu1 %1717, %v1792_v4   ;;  %1349 = vperm.xlu0 %1718, %v1798_v42  }
 0x4e1   : > { %1357 = vperm.xlu0 %1718, %v1796_v21  }
 0x519   : > { %v1293_v30 = vpop.permute.xlu1 %1292 }
 0x51d   : > { %v1330_v55 = vpop.permute.xlu0 %1329 }
 0x51e   : > { %v1338_v54 = vpop.permute.xlu1 %1337 }
 0x521   : > { %v1342_v59 = vpop.permute.xlu0 %1341 }
 0x523   : > { %v1283_v63 = vpop.permute.xlu1 %1282 }
 0x526   : > { %v1288_v61 = vpop.permute.xlu0 %1287 }
 0x527   : > { %v1298_v25 = vpop.permute.xlu1 %1297 }
 0x52a   : > { %v2434_v41 = vpop.permute.xlu0 %1312 }
 0x52c   : > { %v1334_v28 = vpop.permute.xlu1 %1333 }
 0x52e   : > { %v2440_v29 = vpop.permute.xlu0 %1302 }
 0x531   : > { %v2436_v27 = vpop.permute.xlu1 %1317 }
 0x535   : > { %v2438_v9 = vpop.permute.xlu1 %1307 }
 0x539   : > { %v1209_v10 = vpop.permute.xlu1 %1208 }
 0x53a   : > { %v1230_v32 = vadd.f32 %v1209_v10, %v1190_v5 }
 0x53b   : > { %v1211_v52 = vpop.permute.xlu0 %1210 }
 0x53c   : > { %1239 = vst.msk [vmem:[#allocation4 + $0x10] sm:$0xff] %vm1236_vm7, %v1230_v32  ;;  %v1231_v40 = vadd.f32 %v1211_v52, %v1191_v47 }
 0x53d   : > { %v1205_v0 = vpop.permute.xlu1 %1204 }
 0x53e   : > { %1240 = vst.msk [vmem:[#allocation4 + $0x18] sm:$0xff] %vm1236_vm7, %v1231_v40  ;;  %v1228_v11 = vadd.f32 %v1205_v0, %v1188_v15 }
 0x53f   : > { %v1207_v53 = vpop.permute.xlu0 %1206 }
 0x540   : > { %1237 = vst.msk [vmem:[#allocation4] sm:$0xff] %vm1236_vm7, %v1228_v11  ;;  %v1229_v8 = vadd.f32 %v1207_v53, %v1189_v20 }
 0x542   : > { %1238 = vst.msk [vmem:[#allocation4 + $0x8] sm:$0xff] %vm1236_vm7, %v1229_v8 }
 0x543   : > { %v1274_v17 = vld [vmem:[#allocation4 + $0x10] sm:$0xff]  ;;  %v1217_v31 = vpop.permute.xlu1 %1216 }
 0x544   : > { %v1322_v6 = vmul.f32 %v1293_v30, %v1274_v17  ;;  %v1362_v18 = vmul.f32 %v1338_v54, %v1274_v17  ;;  %v1234_v33 = vadd.f32 %v1217_v31, %v1194_v45 }
 0x545   : > { %v1275_v62 = vld [vmem:[#allocation4 + $0x18] sm:$0xff] }
 0x546   : > { %v1370_v7 = vsel %vm337_vm0, %v1322_v6, %v1362_v18  ;;  %v1323_v37 = vmul.f32 %v1298_v25, %v1275_v62  ;;  %v1363_v49 = vmul.f32 %v1342_v59, %v1275_v62  ;;  %1243 = vst.msk [vmem:[#allocation4 + $0x30] sm:$0xff] %vm1236_vm7, %v1234_v33 }
 0x547   : > { %v1272_v1 = vld [vmem:[#allocation4] sm:$0xff]  ;;  %v1219_v4 = vpop.permute.xlu0 %1218  ;;  %v1213_v19 = vpop.permute.xlu1 %1212  ;;  %v1584_v21 = vpack.c.bf16 %v1370_v7, %v1370_v7 }
 0x548   : > { %v1371_v42 = vsel %vm337_vm0, %v1323_v37, %v1363_v49  ;;  %v1320_v22 = vmul.f32 %v1283_v63, %v1272_v1  ;;  %v1360_v36 = vmul.f32 %v1330_v55, %v1272_v1  ;;  %v1235_v24 = vadd.f32 %v1219_v4, %v1195_v60 }
 0x549   : > { %v1273_v50 = vld [vmem:[#allocation4 + $0x8] sm:$0xff]  ;;  %v1232_v14 = vadd.f32 %v1213_v19, %v1192_v13  ;;  %v1585_v39 = vpack.c.bf16 %v1371_v42, %v1371_v42  ;;  %1411 = vst.msk [vmem:[%s2451_s4 + $0x8] sm:$0xf] %vm1408_vm8, %v1584_v21 }
 0x54a   : > { %v1368_v2 = vsel %vm337_vm0, %v1320_v22, %v1360_v36  ;;  %v1321_v43 = vmul.f32 %v1288_v61, %v1273_v50  ;;  %v1361_v3 = vmul.f32 %v1334_v28, %v1273_v50  ;;  %1244 = vst.msk [vmem:[#allocation4 + $0x38] sm:$0xff] %vm1236_vm7, %v1235_v24 }
 0x54b   : > { %1241 = vst.msk [vmem:[#allocation4 + $0x20] sm:$0xff] %vm1236_vm7, %v1232_v14  ;;  %v1215_v26 = vpop.permute.xlu0 %1214  ;;  %v1582_v56 = vpack.c.bf16 %v1368_v2, %v1368_v2 }
 0x54c   : > { %1412 = vst.msk [vmem:[%s2451_s4 + $0xc] sm:$0xf] %vm1408_vm8, %v1585_v39  ;;  %v1369_v44 = vsel %vm337_vm0, %v1321_v43, %v1361_v3  ;;  %v1233_v30 = vadd.f32 %v1215_v26, %v1193_v23 }
 0x54d   : > { %v1583_v35 = vpack.c.bf16 %v1369_v44, %v1369_v44  ;;  %1409 = vst.msk [vmem:[%s2451_s4] sm:$0xf] %vm1408_vm8, %v1582_v56  ;;  %v1278_v25 = vld [vmem:[#allocation4 + $0x30] sm:$0xff] }
 0x54e   : > { %1242 = vst.msk [vmem:[#allocation4 + $0x28] sm:$0xff] %vm1236_vm7, %v1233_v30  ;;  %v1326_v47 = vmul.f32 %v2434_v41, %v1278_v25 }
 0x54f   : > { %1410 = vst.msk [vmem:[%s2451_s4 + $0x4] sm:$0xf] %vm1408_vm8, %v1583_v35 }
 0x552   : > { %v1276_v34 = vld [vmem:[#allocation4 + $0x20] sm:$0xff] }
 0x553   : > { %v1324_v55 = vmul.f32 %v2440_v29, %v1276_v34  ;;  %v1279_v29 = vld [vmem:[#allocation4 + $0x38] sm:$0xff] }
 0x554   : > { %v1346_v54 = vpop.permute.xlu1 %1345  ;;  %v1327_v0 = vmul.f32 %v2436_v27, %v1279_v29 }
 0x555   : > { %v1364_v63 = vmul.f32 %v1346_v54, %v1276_v34  ;;  %v1277_v59 = vld [vmem:[#allocation4 + $0x28] sm:$0xff] }
 0x556   : > { %v1325_v51 = vmul.f32 %v2438_v9, %v1277_v59 }
 0x557   : > { %v1372_v61 = vsel %vm337_vm0, %v1324_v55, %v1364_v63 }
 0x558   : > { %v1586_v28 = vpack.c.bf16 %v1372_v61, %v1372_v61  ;;  %v1350_v38 = vpop.permute.xlu0 %1349  ;;  %v1354_v5 = vpop.permute.xlu1 %1353 }
 0x559   : > { %v1365_v10 = vmul.f32 %v1350_v38, %v1277_v59  ;;  %v1366_v32 = vmul.f32 %v1354_v5, %v1278_v25 }
 0x55a   : > { %1413 = vst.msk [vmem:[%s2451_s4 + $0x10] sm:$0xf] %vm1408_vm8, %v1586_v28 }
 0x55b   : > { %v1373_v58 = vsel %vm337_vm0, %v1325_v51, %v1365_v10  ;;  %v1374_v52 = vsel %vm337_vm0, %v1326_v47, %v1366_v32 }
 0x55c   : > { %v1587_v15 = vpack.c.bf16 %v1373_v58, %v1373_v58  ;;  %v1588_v40 = vpack.c.bf16 %v1374_v52, %v1374_v52  ;;  %v1358_v16 = vpop.permute.xlu0 %1357 }
 0x55d   : > { %v1367_v20 = vmul.f32 %v1358_v16, %v1279_v29 }
 0x55e   : > { %1414 = vst.msk [vmem:[%s2451_s4 + $0x14] sm:$0xf] %vm1408_vm8, %v1587_v15  ;;  %1415 = vst.msk [vmem:[%s2451_s4 + $0x18] sm:$0xf] %vm1408_vm8, %v1588_v40 }
 0x55f   : > { %v1375_v41 = vsel %vm337_vm0, %v1327_v0, %v1367_v20 }
 0x560   : > { %v1589_v9 = vpack.c.bf16 %v1375_v41, %v1375_v41 }
 0x562   : > { %1416 = vst.msk [vmem:[%s2451_s4 + $0x1c] sm:$0xf] %vm1408_vm8, %v1589_v9 }
 0x563 PF: > { %s13_s14 = sadd.s32 1, %s1821_s14   ;;  %s2520_s12 = smov %s1817_s13 }
 0x564   : > { %p10_p5 = scmp.ge.s32.totalorder %s13_s14, 4   ;;  %s2521_s13 = smov %s2523_s15 }
 0x566   :  { %12 = sbr.rel (!%p10_p5) target bundleno = 2 (0x2), region = 76 }

// kernel: basic_transformer_block.16
= control target key start
LH: loop header
LB: loop body
LE: loop exit
PB: predicated region body
PF: predicated region fallthrough
CT: control target
= control target key end

     0   :  { %vm43_vm0 = vcmask 261120   ;;  %s2064_s0 = inlined_call_operand.vmem [shape: f32[128,32], index: 0, kind: input, shape index: {}]   ;;  %s2065_s3 = inlined_call_operand.vmem [shape: bf16[32,128], index: 3, kind: input, shape index: {}]   ;;  %s2066_s4 = inlined_call_operand.vmem [shape: bf16[32,128], index: 4, kind: input, shape index: {}]   ;;  %s2067_s2 = inlined_call_operand.vmem [shape: f32[1,32], index: 2, kind: input, shape index: {}]   ;;  %s2068_s1 = inlined_call_operand.vmem [shape: f32[1,32], index: 1, kind: input, shape index: {}]   ;;  %s2069_s6 = inlined_call_operand.vmem [shape: f32[1,128], index: 6, kind: input, shape index: {}]   ;;  %s2070_s5 = inlined_call_operand.vmem [shape: f32[1,128], index: 5, kind: input, shape index: {}]   ;;  %s2071_s7 = inlined_call_operand.vmem [shape: bf16[128,128], index: 7, kind: output, shape index: {}]  }
   0x1   :  { %v27_v0 = vld [vmem:[%s2064_s0] sm:$0xff]  ;;  %v29_v1 = vld [vmem:[%s2064_s0 + $0x10] sm:$0xff]  ;;  %v28_v2 = vld [vmem:[%s2064_s0 + $0x8] sm:$0xff] }
   0x2   :  { %v44_v3 = vsel %vm43_vm0, %v27_v0, 0.0  ;;  %v50_v4 = vsel %vm43_vm0, %v29_v1, 0.0  ;;  %v30_v5 = vld [vmem:[%s2064_s0 + $0x18] sm:$0xff]  ;;  %v47_v6 = vsel %vm43_vm0, %v28_v2, 0.0  ;;  %v31_v8 = vld [vmem:[%s2064_s0 + $0x20] sm:$0xff]  ;;  %v32_v9 = vld [vmem:[%s2064_s0 + $0x28] sm:$0xff] }
   0x3   :  { %45 = vadd.xlane.f32.xlu0 %v44_v3  ;;  %51 = vadd.xlane.f32.xlu1 %v50_v4  ;;  %v53_v7 = vsel %vm43_vm0, %v30_v5, 0.0  ;;  %v56_v10 = vsel %vm43_vm0, %v31_v8, 0.0  ;;  %v59_v11 = vsel %vm43_vm0, %v32_v9, 0.0  ;;  %v1433_v12 = vld [vmem:[%s2064_s0 + $0x30] sm:$0xff]  ;;  %v1438_v13 = vld [vmem:[%s2064_s0 + $0x38] sm:$0xff]  ;;  %v1447_v16 = vld [vmem:[%s2064_s0 + $0x40] sm:$0xff] }
   0x4   :  { %v62_v14 = vsel %vm43_vm0, %v1433_v12, 0.0  ;;  %v65_v15 = vsel %vm43_vm0, %v1438_v13, 0.0  ;;  %v1452_v17 = vld [vmem:[%s2064_s0 + $0x48] sm:$0xff]  ;;  %v68_v18 = vsel %vm43_vm0, %v1447_v16, 0.0  ;;  %v1461_v20 = vld [vmem:[%s2064_s0 + $0x50] sm:$0xff]  ;;  %v1466_v21 = vld [vmem:[%s2064_s0 + $0x58] sm:$0xff] }
   0x5   :  { %v71_v19 = vsel %vm43_vm0, %v1452_v17, 0.0  ;;  %v74_v22 = vsel %vm43_vm0, %v1461_v20, 0.0  ;;  %v77_v23 = vsel %vm43_vm0, %v1466_v21, 0.0  ;;  %v1475_v24 = vld [vmem:[%s2064_s0 + $0x60] sm:$0xff]  ;;  %v1480_v25 = vld [vmem:[%s2064_s0 + $0x68] sm:$0xff]  ;;  %v1489_v28 = vld [vmem:[%s2064_s0 + $0x70] sm:$0xff] }
   0x6   :  { %v80_v26 = vsel %vm43_vm0, %v1475_v24, 0.0  ;;  %v83_v27 = vsel %vm43_vm0, %v1480_v25, 0.0  ;;  %v1494_v29 = vld [vmem:[%s2064_s0 + $0x78] sm:$0xff]  ;;  %v86_v30 = vsel %vm43_vm0, %v1489_v28, 0.0 }
   0x7   :  { %48 = vadd.xlane.f32.xlu0 %v47_v6  ;;  %54 = vadd.xlane.f32.xlu1 %v53_v7  ;;  %v89_v31 = vsel %vm43_vm0, %v1494_v29, 0.0 }
   0xb   :  { %57 = vadd.xlane.f32.xlu0 %v56_v10  ;;  %60 = vadd.xlane.f32.xlu1 %v59_v11 }
   0xf   :  { %63 = vadd.xlane.f32.xlu0 %v62_v14  ;;  %66 = vadd.xlane.f32.xlu1 %v65_v15 }
  0x13   :  { %69 = vadd.xlane.f32.xlu0 %v68_v18  ;;  %72 = vadd.xlane.f32.xlu1 %v71_v19 }
  0x17   :  { %75 = vadd.xlane.f32.xlu0 %v74_v22  ;;  %78 = vadd.xlane.f32.xlu1 %v77_v23 }
  0x1b   :  { %81 = vadd.xlane.f32.xlu0 %v80_v26  ;;  %84 = vadd.xlane.f32.xlu1 %v83_v27 }
  0x1f   :  { %87 = vadd.xlane.f32.xlu0 %v86_v30  ;;  %90 = vadd.xlane.f32.xlu1 %v89_v31 }
  0x8c   :  { %v46_v32 = vpop.xlane.xlu0 %45  ;;  %v52_v33 = vpop.xlane.xlu1 %51 }
  0x8d   :  { %v93_v34 = vmul.f32 0.03125, %v46_v32  ;;  %v95_v35 = vmul.f32 0.03125, %v52_v33 }
  0x8f   :  { %v1500_v36 = vsub.f32 %v27_v0, %v93_v34  ;;  %v1502_v37 = vsub.f32 %v29_v1, %v95_v35 }
  0x90   :  { %v49_v38 = vpop.xlane.xlu0 %48  ;;  %v55_v39 = vpop.xlane.xlu1 %54 }
  0x91   :  { %v94_v40 = vmul.f32 0.03125, %v49_v38  ;;  %v96_v41 = vmul.f32 0.03125, %v55_v39  ;;  %v125_v42 = vmul.f32 %v1500_v36, %v1500_v36  ;;  %v127_v43 = vmul.f32 %v1502_v37, %v1502_v37 }
  0x93   :  { %v1508_v44 = vsub.f32 %v28_v2, %v94_v40  ;;  %v1510_v45 = vsub.f32 %v30_v5, %v96_v41  ;;  %v141_v46 = vsel %vm43_vm0, %v125_v42, 0.0  ;;  %v147_v49 = vsel %vm43_vm0, %v127_v43, 0.0 }
  0x94   :  { %142 = vadd.xlane.f32.xlu0 %v141_v46  ;;  %v58_v47 = vpop.xlane.xlu0 %57  ;;  %v61_v48 = vpop.xlane.xlu1 %60 }
  0x95   :  { %v97_v50 = vmul.f32 0.03125, %v58_v47  ;;  %v98_v51 = vmul.f32 0.03125, %v61_v48  ;;  %v126_v52 = vmul.f32 %v1508_v44, %v1508_v44  ;;  %v128_v53 = vmul.f32 %v1510_v45, %v1510_v45 }
  0x97   :  { %v1518_v54 = vsub.f32 %v31_v8, %v97_v50  ;;  %v1520_v55 = vsub.f32 %v32_v9, %v98_v51  ;;  %v144_v56 = vsel %vm43_vm0, %v126_v52, 0.0  ;;  %v150_v59 = vsel %vm43_vm0, %v128_v53, 0.0  ;;  %v1267_v53 = vld [vmem:[%s2066_s4 + $0x8] sm:$0xff]  }
  0x98   :  { %148 = vadd.xlane.f32.xlu0 %v147_v49  ;;  %145 = vadd.xlane.f32.xlu1 %v144_v56  ;;  %v64_v57 = vpop.xlane.xlu0 %63  ;;  %v67_v58 = vpop.xlane.xlu1 %66  ;;  %v1268_v56 = vld [vmem:[%s2065_s3] sm:$0xff]  }
  0x99   :  { %v99_v60 = vmul.f32 0.03125, %v64_v57  ;;  %v100_v61 = vmul.f32 0.03125, %v67_v58  ;;  %v129_v62 = vmul.f32 %v1518_v54, %v1518_v54  ;;  %v130_v63 = vmul.f32 %v1520_v55, %v1520_v55  ;;  %1246 = vmatprep.subr.bf16.mxu1 %v1267_v53  ;;  %v1269_v57 = vld [vmem:[%s2066_s4] sm:$0xff]  }
  0x9a   :  { %1247 = vmatpush3.bf16.msra.mxu1 %v1267_v53 }
  0x9b   :  { %v1529_v0 = vsub.f32 %v1433_v12, %v99_v60  ;;  %v1532_v1 = vsub.f32 %v1438_v13, %v100_v61  ;;  %v153_v2 = vsel %vm43_vm0, %v129_v62, 0.0  ;;  %v156_v5 = vsel %vm43_vm0, %v130_v63, 0.0  ;;  %1248 = vmatprep.subr.bf16.mxu1 %v1269_v57 }
  0x9c   :  { %151 = vadd.xlane.f32.xlu1 %v150_v59  ;;  %154 = vadd.xlane.f32.xlu0 %v153_v2  ;;  %v70_v3 = vpop.xlane.xlu0 %69  ;;  %v73_v4 = vpop.xlane.xlu1 %72 }
  0x9d   :  { %v101_v6 = vmul.f32 0.03125, %v70_v3  ;;  %v102_v7 = vmul.f32 0.03125, %v73_v4  ;;  %v131_v8 = vmul.f32 %v1529_v0, %v1529_v0  ;;  %v132_v9 = vmul.f32 %v1532_v1, %v1532_v1 }
  0x9e   :  { %1249 = vmatpush3.bf16.msra.mxu1 %v1269_v57 }
  0x9f   :  { %v1541_v10 = vsub.f32 %v1447_v16, %v101_v6  ;;  %v1544_v11 = vsub.f32 %v1452_v17, %v102_v7  ;;  %v159_v12 = vsel %vm43_vm0, %v131_v8, 0.0  ;;  %v162_v15 = vsel %vm43_vm0, %v132_v9, 0.0 }
  0xa0   :  { %157 = vadd.xlane.f32.xlu1 %v156_v5  ;;  %160 = vadd.xlane.f32.xlu0 %v159_v12  ;;  %v76_v13 = vpop.xlane.xlu0 %75  ;;  %v79_v14 = vpop.xlane.xlu1 %78 }
  0xa1   :  { %v103_v18 = vmul.f32 0.03125, %v76_v13  ;;  %v104_v19 = vmul.f32 0.03125, %v79_v14  ;;  %v133_v22 = vmul.f32 %v1541_v10, %v1541_v10  ;;  %v134_v16 = vmul.f32 %v1544_v11, %v1544_v11 }
  0xa3   :  { %v1553_v23 = vsub.f32 %v1461_v20, %v103_v18  ;;  %v1556_v17 = vsub.f32 %v1466_v21, %v104_v19  ;;  %v165_v26 = vsel %vm43_vm0, %v133_v22, 0.0  ;;  %v168_v31 = vsel %vm43_vm0, %v134_v16, 0.0 }
  0xa4   :  { %163 = vadd.xlane.f32.xlu1 %v162_v15  ;;  %166 = vadd.xlane.f32.xlu0 %v165_v26  ;;  %v82_v27 = vpop.xlane.xlu0 %81  ;;  %v85_v30 = vpop.xlane.xlu1 %84 }
  0xa5   :  { %v105_v32 = vmul.f32 0.03125, %v82_v27  ;;  %v106_v33 = vmul.f32 0.03125, %v85_v30  ;;  %v135_v34 = vmul.f32 %v1553_v23, %v1553_v23  ;;  %v136_v20 = vmul.f32 %v1556_v17, %v1556_v17 }
  0xa7   :  { %v1565_v35 = vsub.f32 %v1475_v24, %v105_v32  ;;  %v1568_v21 = vsub.f32 %v1480_v25, %v106_v33  ;;  %v171_v38 = vsel %vm43_vm0, %v135_v34, 0.0  ;;  %v174_v41 = vsel %vm43_vm0, %v136_v20, 0.0  ;;  %v1606_v20 = vld [vmem:[%s2067_s2] ss:$0 sm:$0xff] }
  0xa8   :  { %169 = vadd.xlane.f32.xlu1 %v168_v31  ;;  %172 = vadd.xlane.f32.xlu0 %v171_v38  ;;  %v88_v39 = vpop.xlane.xlu0 %87  ;;  %v91_v40 = vpop.xlane.xlu1 %90 }
  0xa9   :  { %v107_v42 = vmul.f32 0.03125, %v88_v39  ;;  %v108_v43 = vmul.f32 0.03125, %v91_v40  ;;  %v137_v46 = vmul.f32 %v1565_v35, %v1565_v35  ;;  %v138_v24 = vmul.f32 %v1568_v21, %v1568_v21 }
  0xab   :  { %v1577_v47 = vsub.f32 %v1489_v28, %v107_v42  ;;  %v1580_v25 = vsub.f32 %v1494_v29, %v108_v43  ;;  %v177_v48 = vsel %vm43_vm0, %v137_v46, 0.0  ;;  %v180_v49 = vsel %vm43_vm0, %v138_v24, 0.0  ;;  %v1266_v29 = vld [vmem:[%s2065_s3 + $0x8] sm:$0xff]  }
  0xac   :  { %175 = vadd.xlane.f32.xlu1 %v174_v41  ;;  %178 = vadd.xlane.f32.xlu0 %v177_v48 }
  0xad   :  { %v139_v50 = vmul.f32 %v1577_v47, %v1577_v47  ;;  %v140_v51 = vmul.f32 %v1580_v25, %v1580_v25  ;;  %1226 = vmatprep.subr.bf16.mxu0 %v1266_v29 }
  0xae   :  { %1227 = vmatpush3.bf16.msra.mxu0 %v1266_v29 }
  0xaf   :  { %v183_v52 = vsel %vm43_vm0, %v139_v50, 0.0  ;;  %v186_v28 = vsel %vm43_vm0, %v140_v51, 0.0  ;;  %1228 = vmatprep.subr.bf16.mxu0 %v1268_v56 }
  0xb0   :  { %181 = vadd.xlane.f32.xlu1 %v180_v49  ;;  %184 = vadd.xlane.f32.xlu0 %v183_v52 }
  0xb2   :  { %1229 = vmatpush3.bf16.msra.mxu0 %v1268_v56 }
  0xb4   :  { %187 = vadd.xlane.f32.xlu1 %v186_v28 }
 0x11d   :  { %v143_v58 = vpop.xlane.xlu0 %142 }
 0x11e   :  { %v189_v59 = vmul.f32 0.03125, %v143_v58 }
 0x120   :  { %v205_v60 = vadd.f32 1e-05, %v189_v59 }
 0x121   :  { %v146_v61 = vpop.xlane.xlu1 %145  ;;  %v149_v62 = vpop.xlane.xlu0 %148 }
 0x122   :  { %1270 = vrsqrt.f32 %v205_v60  ;;  %v190_v63 = vmul.f32 0.03125, %v146_v61  ;;  %v191_v2 = vmul.f32 0.03125, %v149_v62 }
 0x124   :  { %v206_v3 = vadd.f32 1e-05, %v190_v63  ;;  %v207_v4 = vadd.f32 1e-05, %v191_v2 }
 0x125   :  { %v152_v5 = vpop.xlane.xlu1 %151  ;;  %v155_v6 = vpop.xlane.xlu0 %154 }
 0x126   :  { %1272 = vrsqrt.f32 %v206_v3  ;;  %v192_v7 = vmul.f32 0.03125, %v152_v5  ;;  %v193_v8 = vmul.f32 0.03125, %v155_v6 }
 0x127   :  { %1274 = vrsqrt.f32 %v207_v4 }
 0x128   :  { %v208_v9 = vadd.f32 1e-05, %v192_v7  ;;  %v209_v12 = vadd.f32 1e-05, %v193_v8 }
 0x129   :  { %v158_v13 = vpop.xlane.xlu1 %157  ;;  %v161_v14 = vpop.xlane.xlu0 %160 }
 0x12a   :  { %1276 = vrsqrt.f32 %v208_v9  ;;  %v194_v15 = vmul.f32 0.03125, %v158_v13  ;;  %v195_v18 = vmul.f32 0.03125, %v161_v14 }
 0x12b   :  { %1278 = vrsqrt.f32 %v209_v12 }
 0x12c   :  { %v210_v19 = vadd.f32 1e-05, %v194_v15  ;;  %v211_v22 = vadd.f32 1e-05, %v195_v18 }
 0x12d   :  { %v164_v16 = vpop.xlane.xlu1 %163  ;;  %v167_v26 = vpop.xlane.xlu0 %166 }
 0x12e   :  { %1280 = vrsqrt.f32 %v210_v19  ;;  %v196_v27 = vmul.f32 0.03125, %v164_v16  ;;  %v197_v30 = vmul.f32 0.03125, %v167_v26 }
 0x12f   :  { %v1271_v31 = vpop.eup %1270  ;;  %1282 = vrsqrt.f32 %v211_v22 }
 0x130   :  { %v212_v32 = vadd.f32 1e-05, %v196_v27  ;;  %v213_v33 = vadd.f32 1e-05, %v197_v30  ;;  %v237_v34 = vmul.f32 %v1271_v31, %v1500_v36  ;;  %v1613_v36 = vld [vmem:[%s2068_s1] ss:$0 sm:$0xff] }
 0x131   :  { %v170_v38 = vpop.xlane.xlu1 %169  ;;  %v173_v39 = vpop.xlane.xlu0 %172 }
 0x132   :  { %1284 = vrsqrt.f32 %v212_v32  ;;  %v198_v40 = vmul.f32 0.03125, %v170_v38  ;;  %v199_v41 = vmul.f32 0.03125, %v173_v39  ;;  %v260_v43 = vadd.f32 %v1606_v20, %v237_v34 }
 0x133   :  { %v1273_v42 = vpop.eup %1272  ;;  %1286 = vrsqrt.f32 %v213_v33 }
 0x134   :  { %v1275_v46 = vpop.eup %1274  ;;  %v214_v24 = vadd.f32 1e-05, %v198_v40  ;;  %v215_v48 = vadd.f32 1e-05, %v199_v41  ;;  %v238_v49 = vmul.f32 %v1273_v42, %v1508_v44  ;;  %v283_v57 = vmul.f32 %v1613_v36, %v260_v43 }
 0x135   :  { %v176_v50 = vpop.xlane.xlu1 %175  ;;  %v179_v51 = vpop.xlane.xlu0 %178  ;;  %v239_v52 = vmul.f32 %v1275_v46, %v1502_v37 }
 0x136   :  { %1288 = vrsqrt.f32 %v214_v24  ;;  %v200_v28 = vmul.f32 0.03125, %v176_v50  ;;  %v201_v29 = vmul.f32 0.03125, %v179_v51  ;;  %v261_v53 = vadd.f32 %v1606_v20, %v238_v49 }
 0x137   :  { %v1277_v56 = vpop.eup %1276  ;;  %1290 = vrsqrt.f32 %v215_v48  ;;  %v262_v37 = vadd.f32 %v1606_v20, %v239_v52 }
 0x138   :  { %v1279_v58 = vpop.eup %1278  ;;  %v216_v44 = vadd.f32 1e-05, %v200_v28  ;;  %v217_v59 = vadd.f32 1e-05, %v201_v29  ;;  %v284_v60 = vmul.f32 %v1613_v36, %v261_v53  ;;  %v240_v61 = vmul.f32 %v1277_v56, %v1510_v45 }
 0x139   :  { %v182_v62 = vpop.xlane.xlu1 %181  ;;  %v185_v63 = vpop.xlane.xlu0 %184  ;;  %v241_v2 = vmul.f32 %v1279_v58, %v1518_v54  ;;  %v285_v14 = vmul.f32 %v1613_v36, %v262_v37 }
 0x13a   :  { %1292 = vrsqrt.f32 %v216_v44  ;;  %v202_v3 = vmul.f32 0.03125, %v182_v62  ;;  %v203_v4 = vmul.f32 0.03125, %v185_v63  ;;  %v299_v5 = vpack.c.bf16 %v284_v60, %v283_v57 }
 0x13b   :  { %v1281_v6 = vpop.eup %1280  ;;  %1294 = vrsqrt.f32 %v217_v59  ;;  %v263_v7 = vadd.f32 %v1606_v20, %v240_v61  ;;  %v264_v13 = vadd.f32 %v1606_v20, %v241_v2 }
 0x13c   :  { %v1283_v8 = vpop.eup %1282  ;;  %v218_v9 = vadd.f32 1e-05, %v202_v3  ;;  %v219_v12 = vadd.f32 1e-05, %v203_v4  ;;  %1230 = vmatprep.mubr.msk.bf16.mxu0 %vm43_vm0, %v299_v5  ;;  %1250 = vmatprep.mubr.msk.bf16.mxu1 %vm43_vm0, %v299_v5  ;;  %v242_v45 = vmul.f32 %v1281_v6, %v1520_v55 }
 0x13d   :  { %v188_v54 = vpop.xlane.xlu1 %187  ;;  %v286_v15 = vmul.f32 %v1613_v36, %v263_v7  ;;  %v243_v18 = vmul.f32 %v1283_v8, %v1529_v0  ;;  %v287_v31 = vmul.f32 %v1613_v36, %v264_v13 }
 0x13e   :  { %1296 = vrsqrt.f32 %v218_v9  ;;  %v204_v19 = vmul.f32 0.03125, %v188_v54  ;;  %v265_v22 = vadd.f32 %v1606_v20, %v242_v45 }
 0x13f   :  { %v1285_v16 = vpop.eup %1284  ;;  %1298 = vrsqrt.f32 %v219_v12  ;;  %v300_v26 = vpack.c.bf16 %v286_v15, %v285_v14  ;;  %v266_v27 = vadd.f32 %v1606_v20, %v243_v18 }
 0x140   :  { %v1287_v30 = vpop.eup %1286  ;;  %v220_v55 = vadd.f32 1e-05, %v204_v19  ;;  %v288_v32 = vmul.f32 %v1613_v36, %v265_v22  ;;  %v244_v33 = vmul.f32 %v1285_v16, %v1532_v1 }
 0x141   :  { %1231 = vmatmul.mubr.msk.bf16.vlgmr.msra.gmra.mxu0 %vm43_vm0, %v300_v26  ;;  %1251 = vmatmul.mubr.msk.bf16.vlgmr.msra.gmra.mxu1 %vm43_vm0, %v300_v26  ;;  %v245_v0 = vmul.f32 %v1287_v30, %v1541_v10  ;;  %v289_v40 = vmul.f32 %v1613_v36, %v266_v27 }
 0x142   :  { %1300 = vrsqrt.f32 %v220_v55  ;;  %v301_v34 = vpack.c.bf16 %v288_v32, %v287_v31  ;;  %v267_v38 = vadd.f32 %v1606_v20, %v244_v33 }
 0x143   :  { %v1289_v39 = vpop.eup %1288  ;;  %v268_v43 = vadd.f32 %v1606_v20, %v245_v0 }
 0x144   :  { %v1291_v41 = vpop.eup %1290  ;;  %1234 = vmatprep.mubr.msk.bf16.mxu0 %vm43_vm0, %v301_v34  ;;  %1254 = vmatprep.mubr.msk.bf16.mxu1 %vm43_vm0, %v301_v34  ;;  %v290_v1 = vmul.f32 %v1613_v36, %v267_v38  ;;  %v246_v42 = vmul.f32 %v1289_v39, %v1544_v11 }
 0x145   :  { %v247_v10 = vmul.f32 %v1291_v41, %v1553_v23  ;;  %v291_v51 = vmul.f32 %v1613_v36, %v268_v43 }
 0x146   :  { %v302_v46 = vpack.c.bf16 %v290_v1, %v289_v40  ;;  %v269_v24 = vadd.f32 %v1606_v20, %v246_v42 }
 0x147   :  { %v1293_v48 = vpop.eup %1292  ;;  %v270_v49 = vadd.f32 %v1606_v20, %v247_v10 }
 0x148   :  { %v1295_v50 = vpop.eup %1294  ;;  %v292_v52 = vmul.f32 %v1613_v36, %v269_v24  ;;  %v248_v28 = vmul.f32 %v1293_v48, %v1556_v17 }
 0x149   :  { %1235 = vmatmul.mubr.msk.bf16.gmra.mxu0 %vm43_vm0, %v302_v46  ;;  %1255 = vmatmul.mubr.msk.bf16.gmra.mxu1 %vm43_vm0, %v302_v46  ;;  %v249_v11 = vmul.f32 %v1295_v50, %v1565_v35  ;;  %v293_v56 = vmul.f32 %v1613_v36, %v270_v49 }
 0x14a   :  { %v303_v23 = vpack.c.bf16 %v292_v52, %v291_v51  ;;  %v271_v29 = vadd.f32 %v1606_v20, %v248_v28 }
 0x14b   :  { %v1297_v53 = vpop.eup %1296  ;;  %v272_v44 = vadd.f32 %v1606_v20, %v249_v11 }
 0x14c   :  { %v1299_v57 = vpop.eup %1298  ;;  %1238 = vmatprep.mubr.msk.bf16.mxu0 %vm43_vm0, %v303_v23  ;;  %1258 = vmatprep.mubr.msk.bf16.mxu1 %vm43_vm0, %v303_v23  ;;  %v294_v58 = vmul.f32 %v1613_v36, %v271_v29  ;;  %v250_v17 = vmul.f32 %v1297_v53, %v1568_v21  ;;  %v1735_v53 = vld [vmem:[%s2070_s5] ss:$0 sm:$0xff] }
 0x14d   :  { %v251_v59 = vmul.f32 %v1299_v57, %v1577_v47  ;;  %v295_v62 = vmul.f32 %v1613_v36, %v272_v44 }
 0x14e   :  { %v304_v35 = vpack.c.bf16 %v294_v58, %v293_v56  ;;  %v273_v60 = vadd.f32 %v1606_v20, %v250_v17 }
 0x14f   :  { %v1301_v61 = vpop.eup %1300  ;;  %v274_v2 = vadd.f32 %v1606_v20, %v251_v59 }
 0x150   :  { %v296_v63 = vmul.f32 %v1613_v36, %v273_v60  ;;  %v252_v37 = vmul.f32 %v1301_v61, %v1580_v25  ;;  %v1679_v25 = vld [vmem:[%s2069_s6] ss:$0 sm:$0xff] }
 0x151   :  { %1239 = vmatmul.mubr.msk.bf16.gmra.mxu0 %vm43_vm0, %v304_v35  ;;  %1259 = vmatmul.mubr.msk.bf16.gmra.mxu1 %vm43_vm0, %v304_v35  ;;  %v297_v47 = vmul.f32 %v1613_v36, %v274_v2 }
 0x152   :  { %v305_v21 = vpack.c.bf16 %v296_v63, %v295_v62  ;;  %v275_v3 = vadd.f32 %v1606_v20, %v252_v37 }
 0x154   :  { %1242 = vmatprep.mubr.msk.bf16.mxu0 %vm43_vm0, %v305_v21  ;;  %1262 = vmatprep.mubr.msk.bf16.mxu1 %vm43_vm0, %v305_v21  ;;  %v298_v4 = vmul.f32 %v1613_v36, %v275_v3 }
 0x156   :  { %v306_v5 = vpack.c.bf16 %v298_v4, %v297_v47 }
 0x159   :  { %1243 = vmatmul.mubr.msk.bf16.gmra.mxu0 %vm43_vm0, %v306_v5  ;;  %1263 = vmatmul.mubr.msk.bf16.gmra.mxu1 %vm43_vm0, %v306_v5 }
 0x201   :  { %v1252_v6 = vpop.f32.mrf.mxu1  ;;  %v1232_v39 = vpop.f32.mrf.mxu0 }
 0x202   :  { %v1682_v20 = vadd.f32 %v1252_v6, %v1679_v25  ;;  %v1745_v63 = vadd.f32 %v1232_v39, %v1735_v53 }
 0x203   :  { %v508_v7 = vpop.f32.mrf.mxu1  ;;  %v388_v28 = vpop.f32.mrf.mxu0 }
 0x204   :  { %v1685_v8 = vmul.f32 0.70710677, %v1682_v20  ;;  %v1688_v36 = vadd.f32 %v1679_v25, %v508_v7  ;;  %v1753_v3 = vmul.f32 0.5, %v1682_v20  ;;  %v1757_v7 = vadd.f32 %v1735_v53, %v388_v28 }
 0x205   :  { %v1253_v9 = vpop.f32.mrf.mxu1  ;;  %v1233_v35 = vpop.f32.mrf.mxu0 }
 0x206   :  { %v605_v12 = vand.u32 2147483647, %v1685_v8  ;;  %v1692_v45 = vmul.f32 0.70710677, %v1688_v36  ;;  %v1695_v13 = vadd.f32 %v1253_v9, %v1679_v25  ;;  %v829_v26 = vsub.f32 0.0, %v1685_v8 }
 0x207   :  { %v511_v54 = vpop.f32.mrf.mxu1  ;;  %vm925_vm1 = vcmp.ge.f32.partialorder %v1685_v8, 0.0 }
 0x208   :  { %v621_v14 = vmul.f32 0.3275911, %v605_v12  ;;  %v1698_v15 = vadd.f32 %v1679_v25, %v511_v54  ;;  %v603_v18 = vand.u32 2147483647, %v1692_v45  ;;  %v1702_v16 = vmul.f32 0.70710677, %v1695_v13  ;;  %v391_v12 = vpop.f32.mrf.mxu0 }
 0x209   :  { %v1256_v19 = vpop.f32.mrf.mxu1  ;;  %v827_v31 = vsub.f32 0.0, %v1692_v45  ;;  %v845_v40 = vmul.f32 %v829_v26, %v1685_v8  ;;  %vm923_vm2 = vcmp.ge.f32.partialorder %v1692_v45, 0.0 }
 0x20a   :  { %v637_v22 = vadd.f32 1.0, %v621_v14  ;;  %v619_v27 = vmul.f32 0.3275911, %v603_v18  ;;  %v1706_v30 = vmul.f32 0.70710677, %v1698_v15  ;;  %v830_v38 = vsub.f32 0.0, %v1702_v16 }
 0x20b   :  { %v524_v55 = vpop.f32.mrf.mxu1  ;;  %v606_v32 = vand.u32 2147483647, %v1702_v16  ;;  %v1714_v1 = vadd.f32 %v1256_v19, %v1679_v25  ;;  %v843_v43 = vmul.f32 %v827_v31, %v1692_v45  ;;  %v863_v52 = vmul.f32 1.442695, %v845_v40 }
 0x20c   :  { %1302 = vrcp.f32 %v637_v22  ;;  %v635_v33 = vadd.f32 1.0, %v619_v27  ;;  %v604_v0 = vand.u32 2147483647, %v1706_v30  ;;  %v828_v24 = vsub.f32 0.0, %v1706_v30 }
 0x20d   :  { %v622_v34 = vmul.f32 0.3275911, %v606_v32  ;;  %v1257_v42 = vpop.f32.mrf.mxu1  ;;  %v1719_v48 = vmul.f32 0.70710677, %v1714_v1  ;;  %v1722_v49 = vadd.f32 %v1679_v25, %v524_v55  ;;  %v846_v50 = vmul.f32 %v830_v38, %v1702_v16 }
 0x20e   :  { %1304 = vrcp.f32 %v635_v33  ;;  %v620_v41 = vmul.f32 0.3275911, %v604_v0  ;;  %v1726_v51 = vadd.f32 %v1257_v42, %v1679_v25  ;;  %v859_v23 = vmul.f32 1.442695, %v843_v43 }
 0x20f   :  { %v638_v10 = vadd.f32 1.0, %v622_v34  ;;  %v609_v11 = vand.u32 2147483647, %v1719_v48  ;;  %v1730_v29 = vmul.f32 0.70710677, %v1722_v49  ;;  %v844_v56 = vmul.f32 %v828_v24, %v1706_v30  ;;  %v527_v17 = vpop.f32.mrf.mxu1 }
 0x210   :  { %v636_v46 = vadd.f32 1.0, %v620_v41  ;;  %v1739_v58 = vmul.f32 0.70710677, %v1726_v51  ;;  %v865_v44 = vmul.f32 1.442695, %v846_v50  ;;  %v833_v61 = vsub.f32 0.0, %v1719_v48 }
 0x211   :  { %1306 = vrcp.f32 %v638_v10  ;;  %v625_v57 = vmul.f32 0.3275911, %v609_v11  ;;  %v607_v59 = vand.u32 2147483647, %v1730_v29  ;;  %v1748_v2 = vadd.f32 %v1679_v25, %v527_v17  ;;  %v1260_v5 = vpop.f32.mrf.mxu1 }
 0x212   :  { %1308 = vrcp.f32 %v636_v46  ;;  %v610_v62 = vand.u32 2147483647, %v1739_v58  ;;  %v861_v47 = vmul.f32 1.442695, %v844_v56  ;;  %v849_v54 = vmul.f32 %v833_v61, %v1719_v48 }
 0x213   :  { %1310 = vpow2.f32 %v863_v52  ;;  %v641_v60 = vadd.f32 1.0, %v625_v57  ;;  %v623_v37 = vmul.f32 0.3275911, %v607_v59  ;;  %v831_v14 = vsub.f32 0.0, %v1730_v29  ;;  %v540_v38 = vpop.f32.mrf.mxu1 }
 0x214   :  { %1312 = vpow2.f32 %v859_v23  ;;  %v626_v4 = vmul.f32 0.3275911, %v610_v62  ;;  %v1762_v20 = vmul.f32 0.70710677, %v1748_v2  ;;  %v834_v26 = vsub.f32 0.0, %v1739_v58 }
 0x215   :  { %1314 = vrcp.f32 %v641_v60  ;;  %v639_v9 = vadd.f32 1.0, %v623_v37  ;;  %v1768_v27 = vadd.f32 %v1260_v5, %v1679_v25  ;;  %v1771_v55 = vmul.f32 0.5, %v1688_v36 }
 0x216   :  { %1316 = vpow2.f32 %v865_v44  ;;  %v642_v18 = vadd.f32 1.0, %v626_v4  ;;  %v608_v32 = vand.u32 2147483647, %v1762_v20  ;;  %v1777_v0 = vadd.f32 %v1233_v35, %v1735_v53 }
 0x217   :  { %1318 = vrcp.f32 %v639_v9  ;;  %v1780_v34 = vadd.f32 %v1735_v53, %v391_v12  ;;  %v871_v36 = vmul.f32 1.442695, %v849_v54  ;;  %v847_v41 = vmul.f32 %v831_v14, %v1730_v29 }
 0x218   :  { %1320 = vpow2.f32 %v861_v47  ;;  %v624_v42 = vmul.f32 0.3275911, %v608_v32  ;;  %v850_v46 = vmul.f32 %v834_v26, %v1739_v58  ;;  %v1788_v24 = vmul.f32 0.70710677, %v1768_v27 }
 0x219   :  { %v1750_v21 = vpop.eup %1302  ;;  %1322 = vrcp.f32 %v642_v18  ;;  %v832_v11 = vsub.f32 0.0, %v1762_v20  ;;  %v1795_v23 = vadd.f32 %v1679_v25, %v540_v38  ;;  %v1801_v35 = vmul.f32 0.5, %v1695_v13 }
 0x21a   :  { %v685_v6 = vmul.f32 1.0614054, %v1750_v21  ;;  %v640_v28 = vadd.f32 1.0, %v624_v42  ;;  %v613_v44 = vand.u32 2147483647, %v1788_v24  ;;  %vm926_vm3 = vcmp.ge.f32.partialorder %v1702_v16, 0.0 }
 0x21b   :  { %v1764_v19 = vpop.eup %1304  ;;  %v867_v60 = vmul.f32 1.442695, %v847_v41  ;;  %v873_v4 = vmul.f32 1.442695, %v850_v46  ;;  %v848_v9 = vmul.f32 %v832_v11, %v1762_v20  ;;  %vm924_vm4 = vcmp.ge.f32.partialorder %v1706_v30, 0.0 }
 0x21c   :  { %v701_v22 = vadd.f32 -1.4531521, %v685_v6  ;;  %v683_v31 = vmul.f32 1.0614054, %v1764_v19  ;;  %1324 = vrcp.f32 %v640_v28  ;;  %v629_v12 = vmul.f32 0.3275911, %v613_v44 }
 0x21d   :  { %1326 = vpow2.f32 %v871_v36  ;;  %vm929_vm5 = vcmp.ge.f32.partialorder %v1719_v48, 0.0  ;;  %vm930_vm6 = vcmp.ge.f32.partialorder %v1739_v58, 0.0  ;;  %vm927_vm7 = vcmp.ge.f32.partialorder %v1730_v29, 0.0 }
 0x21e   :  { %v717_v33 = vmul.f32 %v1750_v21, %v701_v22  ;;  %v1782_v39 = vpop.eup %1306  ;;  %v699_v40 = vadd.f32 -1.4531521, %v683_v31  ;;  %v1811_v22 = vmul.f32 0.70710677, %v1795_v23  ;;  %1328 = vpow2.f32 %v867_v60 }
 0x21f   :  { %v686_v10 = vmul.f32 1.0614054, %v1782_v39  ;;  %v1790_v50 = vpop.eup %1308  ;;  %1330 = vpow2.f32 %v873_v4  ;;  %vm928_vm8 = vcmp.ge.f32.partialorder %v1762_v20, 0.0  ;;  %vm933_vm9 = vcmp.ge.f32.partialorder %v1788_v24, 0.0 }
 0x220   :  { %v733_v43 = vadd.f32 1.4214138, %v717_v33  ;;  %v715_v52 = vmul.f32 %v1764_v19, %v699_v40  ;;  %v684_v17 = vmul.f32 1.0614054, %v1790_v50  ;;  %v1311_v61 = vpop.eup %1310  ;;  %v645_v33 = vadd.f32 1.0, %v629_v12 }
 0x221   :  { %v702_v57 = vadd.f32 -1.4531521, %v686_v10  ;;  %v1313_v5 = vpop.eup %1312  ;;  %v1819_v10 = vmul.f32 1.442695, %v848_v9  ;;  %v611_v46 = vand.u32 2147483647, %v1811_v22 }
 0x222   :  { %v749_v56 = vmul.f32 %v1750_v21, %v733_v43  ;;  %v731_v59 = vadd.f32 1.4214138, %v715_v52  ;;  %v700_v47 = vadd.f32 -1.4531521, %v684_v17  ;;  %v1806_v54 = vpop.eup %1314  ;;  %1332 = vrcp.f32 %v645_v33 }
 0x223   :  { %v718_v37 = vmul.f32 %v1782_v39, %v702_v57  ;;  %v1317_v26 = vpop.eup %1316  ;;  %v689_v32 = vmul.f32 1.0614054, %v1806_v54  ;;  %v627_v60 = vmul.f32 0.3275911, %v611_v46  ;;  %vm931_vm10 = vcmp.ge.f32.partialorder %v1811_v22, 0.0 }
 0x224   :  { %v765_v62 = vadd.f32 -0.28449672, %v749_v56  ;;  %v747_v6 = vmul.f32 %v1764_v19, %v731_v59  ;;  %v716_v18 = vmul.f32 %v1790_v50, %v700_v47  ;;  %v1815_v41 = vpop.eup %1318 }
 0x225   :  { %v734_v14 = vadd.f32 1.4214138, %v718_v37  ;;  %v705_v43 = vadd.f32 -1.4531521, %v689_v32  ;;  %v1321_v52 = vpop.eup %1320  ;;  %v687_v57 = vmul.f32 1.0614054, %v1815_v41 }
 0x226   :  { %v781_v13 = vmul.f32 %v1750_v21, %v765_v62  ;;  %v763_v31 = vadd.f32 -0.28449672, %v747_v6  ;;  %v732_v36 = vadd.f32 1.4214138, %v716_v18  ;;  %v1825_v17 = vpop.eup %1322  ;;  %v643_v12 = vadd.f32 1.0, %v627_v60 }
 0x227   :  { %v750_v40 = vmul.f32 %v1782_v39, %v734_v14  ;;  %v721_v59 = vmul.f32 %v1806_v54, %v705_v43  ;;  %v703_v4 = vadd.f32 -1.4531521, %v687_v57  ;;  %v690_v9 = vmul.f32 1.0614054, %v1825_v17 }
 0x228   :  { %v797_v38 = vadd.f32 0.2548296, %v781_v13  ;;  %v779_v42 = vmul.f32 %v1764_v19, %v763_v31  ;;  %v748_v56 = vmul.f32 %v1790_v50, %v732_v36  ;;  %1334 = vrcp.f32 %v643_v12 }
 0x229   :  { %v766_v11 = vadd.f32 -0.28449672, %v750_v40  ;;  %v737_v6 = vadd.f32 1.4214138, %v721_v59  ;;  %v719_v31 = vmul.f32 %v1815_v41, %v703_v4  ;;  %v706_v33 = vadd.f32 -1.4531521, %v690_v9 }
 0x22a   :  { %v813_v28 = vmul.f32 %v1750_v21, %v797_v38  ;;  %v795_v44 = vadd.f32 0.2548296, %v779_v42  ;;  %v764_v47 = vadd.f32 -0.28449672, %v748_v56  ;;  %v1836_v38 = vpop.eup %1324  ;;  %1336 = vpow2.f32 %v1819_v10 }
 0x22b   :  { %v782_v37 = vmul.f32 %v1782_v39, %v766_v11  ;;  %v735_v42 = vadd.f32 1.4214138, %v719_v31  ;;  %v688_v11 = vmul.f32 1.0614054, %v1836_v38 }
 0x22c   :  { %v893_v62 = vmul.f32 %v1311_v61, %v813_v28  ;;  %v811_v21 = vmul.f32 %v1764_v19, %v795_v44  ;;  %v780_v18 = vmul.f32 %v1790_v50, %v764_v47  ;;  %v753_v61 = vmul.f32 %v1806_v54, %v737_v6 }
 0x22d   :  { %v798_v14 = vadd.f32 0.2548296, %v782_v37  ;;  %v722_v28 = vmul.f32 %v1825_v17, %v706_v33  ;;  %v751_v59 = vmul.f32 %v1815_v41, %v735_v42  ;;  %v704_v9 = vadd.f32 -1.4531521, %v688_v11 }
 0x22e   :  { %v909_v13 = vsub.f32 1.0, %v893_v62  ;;  %v891_v32 = vmul.f32 %v1313_v5, %v811_v21  ;;  %v796_v36 = vadd.f32 0.2548296, %v780_v18  ;;  %v769_v46 = vadd.f32 -0.28449672, %v753_v61  ;;  %v1327_v5 = vpop.eup %1326 }
 0x22f   :  { %v814_v40 = vmul.f32 %v1782_v39, %v798_v14  ;;  %v738_v37 = vadd.f32 1.4214138, %v722_v28  ;;  %v1329_v47 = vpop.eup %1328  ;;  %v767_v6 = vadd.f32 -0.28449672, %v751_v59  ;;  %v572_v11 = vmul.f32 0.5, %v1698_v15 }
 0x230   :  { %v941_v19 = vsub.f32 0.0, %v909_v13  ;;  %v907_v43 = vsub.f32 1.0, %v891_v32  ;;  %v812_v44 = vmul.f32 %v1790_v50, %v796_v36  ;;  %v785_v39 = vmul.f32 %v1806_v54, %v769_v46  ;;  %v1331_v12 = vpop.eup %1330 }
 0x231   :  { %v894_v57 = vmul.f32 %v1317_v26, %v814_v40  ;;  %v754_v50 = vmul.f32 %v1825_v17, %v738_v37  ;;  %v783_v31 = vmul.f32 %v1815_v41, %v767_v6  ;;  %v1854_v33 = vpop.eup %1332 }
 0x232   :  { %v957_v56 = vsel %vm925_vm1, %v909_v13, %v941_v19  ;;  %v939_v62 = vsub.f32 0.0, %v907_v43  ;;  %v892_v21 = vmul.f32 %v1321_v52, %v812_v44  ;;  %v801_v26 = vadd.f32 0.2548296, %v785_v39  ;;  %v1236_v39 = vpop.f32.mrf.mxu0 }
 0x233   :  { %v973_v60 = vadd.f32 1.0, %v957_v56  ;;  %v910_v4 = vsub.f32 1.0, %v894_v57  ;;  %v770_v61 = vadd.f32 -0.28449672, %v754_v50  ;;  %v720_v52 = vmul.f32 %v1836_v38, %v704_v9 }
 0x234   :  { %v955_v8 = vsel %vm923_vm2, %v907_v43, %v939_v62  ;;  %v908_v18 = vsub.f32 1.0, %v892_v21  ;;  %v817_v32 = vmul.f32 %v1806_v54, %v801_v26  ;;  %v799_v36 = vadd.f32 0.2548296, %v783_v31  ;;  %v1261_v26 = vpop.f32.mrf.mxu1 }
 0x235   :  { %v971_v13 = vadd.f32 1.0, %v955_v8  ;;  %v942_v14 = vsub.f32 0.0, %v910_v4  ;;  %v989_v45 = vmul.f32 %v973_v60, %v1753_v3  ;;  %v786_v46 = vmul.f32 %v1825_v17, %v770_v61  ;;  %v1866_v59 = vpop.eup %1334 }
 0x236   :  { %v940_v40 = vsub.f32 0.0, %v908_v18  ;;  %v897_v43 = vmul.f32 %v1327_v5, %v817_v32  ;;  %v736_v28 = vadd.f32 1.4214138, %v720_v52  ;;  %v815_v56 = vmul.f32 %v1815_v41, %v799_v36 }
 0x237   :  { %v958_v19 = vsel %vm926_vm3, %v910_v4, %v942_v14  ;;  %v987_v54 = vmul.f32 %v971_v13, %v1771_v55  ;;  %v802_v44 = vadd.f32 0.2548296, %v786_v46  ;;  %v1005_v5 = vmul.f32 %v989_v45, %v1745_v63  ;;  %v1337_v31 = vpop.eup %1336 }
 0x238   :  { %v974_v42 = vadd.f32 1.0, %v958_v19  ;;  %v956_v10 = vsel %vm924_vm4, %v908_v18, %v940_v40  ;;  %v913_v57 = vsub.f32 1.0, %v897_v43  ;;  %v895_v60 = vmul.f32 %v1329_v47, %v815_v56 }
 0x239   :  { %v972_v16 = vadd.f32 1.0, %v956_v10  ;;  %v752_v62 = vmul.f32 %v1836_v38, %v736_v28  ;;  %v693_v55 = vmul.f32 1.0614054, %v1854_v33  ;;  %v818_v41 = vmul.f32 %v1825_v17, %v802_v44  ;;  %v404_v17 = vpop.f32.mrf.mxu0 }
 0x23a   :  { %v990_v3 = vmul.f32 %v974_v42, %v1801_v35  ;;  %v945_v37 = vsub.f32 0.0, %v913_v57  ;;  %v1003_v35 = vmul.f32 %v987_v54, %v1757_v7  ;;  %v911_v4 = vsub.f32 1.0, %v895_v60  ;;  %v543_v42 = vpop.f32.mrf.mxu1 }
 0x23b   :  { %v988_v30 = vmul.f32 %v972_v16, %v572_v11  ;;  %v768_v21 = vadd.f32 -0.28449672, %v752_v62  ;;  %v898_v9 = vmul.f32 %v1331_v12, %v818_v41  ;;  %v709_v7 = vadd.f32 -1.4531521, %v693_v55  ;;  %v1237_v45 = vpop.f32.mrf.mxu0 }
 0x23c   :  { %v1006_v15 = vmul.f32 %v990_v3, %v1777_v0  ;;  %v961_v47 = vsel %vm929_vm5, %v913_v57, %v945_v37  ;;  %v691_v48 = vmul.f32 1.0614054, %v1866_v59  ;;  %v943_v14 = vsub.f32 0.0, %v911_v4  ;;  %v1264_v37 = vpop.f32.mrf.mxu1 }
 0x23d   :  { %v1004_v63 = vmul.f32 %v988_v30, %v1780_v34  ;;  %v784_v8 = vmul.f32 %v1836_v38, %v768_v21  ;;  %v914_v50 = vsub.f32 1.0, %v898_v9  ;;  %v977_v13 = vadd.f32 1.0, %v961_v47  ;;  %v407_v55 = vpop.f32.mrf.mxu0 }
 0x23e   :  { %v1167_v6 = vpack.c.bf16 %v1006_v15, %v1005_v5  ;;  %v1885_v12 = vadd.f32 %v1261_v26, %v1679_v25  ;;  %v577_v32 = vmul.f32 0.5, %v1714_v1  ;;  %v578_v61 = vmul.f32 0.5, %v1726_v51 }
 0x23f   :  { %v1162_v0 = vpack.c.bf16 %v1004_v63, %v1003_v35  ;;  %v800_v18 = vadd.f32 0.2548296, %v784_v8  ;;  %v946_v34 = vsub.f32 0.0, %v914_v50  ;;  %v725_v40 = vmul.f32 %v1854_v33, %v709_v7  ;;  %v556_v7 = vpop.f32.mrf.mxu1 }
 0x240   :  { %1199 = vst [vmem:[%s2071_s7 + $0x8] sm:$0xff] %v1167_v6   ;;  %v707_v36 = vadd.f32 -1.4531521, %v691_v48  ;;  %v993_v43 = vmul.f32 %v977_v13, %v577_v32  ;;  %v959_v46 = vsel %vm927_vm7, %v911_v4, %v943_v14  ;;  %v413_v1 = vadd.f32 %v1236_v39, %v1735_v53 }
 0x241   :  { %1163 = vst [vmem:[%s2071_s7] sm:$0xff] %v1162_v0   ;;  %v816_v52 = vmul.f32 %v1836_v38, %v800_v18  ;;  %v962_v19 = vsel %vm930_vm6, %v914_v50, %v946_v34  ;;  %v837_v51 = vsub.f32 0.0, %v1788_v24  ;;  %v1896_v58 = vmul.f32 0.70710677, %v1885_v12 }
 0x242   :  { %v978_v28 = vadd.f32 1.0, %v962_v19  ;;  %v416_v38 = vadd.f32 %v1237_v45, %v1735_v53  ;;  %v1900_v10 = vadd.f32 %v1679_v25, %v543_v42  ;;  %v575_v56 = vmul.f32 0.5, %v1722_v49  ;;  %v1265_v19 = vpop.f32.mrf.mxu1 }
 0x243   :  { %v896_v54 = vmul.f32 %v1337_v31, %v816_v52  ;;  %v975_v3 = vadd.f32 1.0, %v959_v46  ;;  %v741_v16 = vadd.f32 1.4214138, %v725_v40  ;;  %v614_v57 = vand.u32 2147483647, %v1896_v58 }
 0x244   :  { %v994_v29 = vmul.f32 %v978_v28, %v578_v61  ;;  %v1009_v44 = vmul.f32 %v993_v43, %v413_v1  ;;  %v723_v62 = vmul.f32 %v1866_v59, %v707_v36  ;;  %v853_v15 = vmul.f32 %v837_v51, %v1788_v24 }
 0x245   :  { %v912_v11 = vsub.f32 1.0, %v896_v54  ;;  %v630_v30 = vmul.f32 0.3275911, %v614_v57  ;;  %v1908_v39 = vmul.f32 0.70710677, %v1900_v10  ;;  %v576_v41 = vmul.f32 0.5, %v1748_v2 }
 0x246   :  { %v1010_v5 = vmul.f32 %v994_v29, %v416_v38  ;;  %v835_v4 = vsub.f32 0.0, %v1811_v22  ;;  %v991_v21 = vmul.f32 %v975_v3, %v575_v56  ;;  %v757_v63 = vmul.f32 %v1854_v33, %v741_v16  ;;  %v559_v29 = vpop.f32.mrf.mxu1 }
 0x247   :  { %v944_v60 = vsub.f32 0.0, %v912_v11  ;;  %v646_v47 = vadd.f32 1.0, %v630_v30  ;;  %v405_v20 = vadd.f32 %v1735_v53, %v404_v17  ;;  %v408_v9 = vadd.f32 %v1735_v53, %v407_v55 }
 0x248   :  { %v1177_v49 = vpack.c.bf16 %v1010_v5, %v1009_v44  ;;  %v739_v8 = vadd.f32 1.4214138, %v723_v62  ;;  %v612_v26 = vand.u32 2147483647, %v1908_v39  ;;  %v879_v0 = vmul.f32 1.442695, %v853_v15 }
 0x249   :  { %v960_v35 = vsel %vm928_vm8, %v912_v11, %v944_v60  ;;  %1338 = vrcp.f32 %v646_v47  ;;  %v1920_v50 = vadd.f32 %v1264_v37, %v1679_v25  ;;  %v851_v48 = vmul.f32 %v835_v4, %v1811_v22 }
 0x24a   :  { %v976_v6 = vadd.f32 1.0, %v960_v35  ;;  %1201 = vst [vmem:[%s2071_s7 + $0x18] sm:$0xff] %v1177_v49   ;;  %v628_v13 = vmul.f32 0.3275911, %v612_v26  ;;  %v1007_v17 = vmul.f32 %v991_v21, %v405_v20  ;;  %v773_v18 = vadd.f32 -0.28449672, %v757_v63 }
 0x24b   :  { %v1924_v34 = vmul.f32 0.70710677, %v1920_v50  ;;  %v755_v31 = vmul.f32 %v1866_v59, %v739_v8  ;;  %v1928_v61 = vadd.f32 %v1679_v25, %v556_v7  ;;  %1340 = vpow2.f32 %v879_v0 }
 0x24c   :  { %v992_v2 = vmul.f32 %v976_v6, %v576_v41  ;;  %v644_v32 = vadd.f32 1.0, %v628_v13  ;;  %v875_v40 = vmul.f32 1.442695, %v851_v48  ;;  %v838_v36 = vsub.f32 0.0, %v1896_v58 }
 0x24d   :  { %v617_v45 = vand.u32 2147483647, %v1924_v34  ;;  %v789_v42 = vmul.f32 %v1854_v33, %v773_v18  ;;  %v771_v46 = vadd.f32 -0.28449672, %v755_v31  ;;  %v1937_v28 = vmul.f32 0.70710677, %v1928_v61 }
 0x24e   :  { %v1008_v14 = vmul.f32 %v992_v2, %v408_v9  ;;  %1342 = vrcp.f32 %v644_v32  ;;  %v1940_v54 = vadd.f32 %v1265_v19, %v1679_v25  ;;  %v854_v51 = vmul.f32 %v838_v36, %v1896_v58 }
 0x24f   :  { %v633_v43 = vmul.f32 0.3275911, %v617_v45  ;;  %1344 = vpow2.f32 %v875_v40  ;;  %v615_v38 = vand.u32 2147483647, %v1937_v28  ;;  %v805_v11 = vadd.f32 0.2548296, %v789_v42 }
 0x250   :  { %v1172_v52 = vpack.c.bf16 %v1008_v14, %v1007_v17  ;;  %v836_v56 = vsub.f32 0.0, %v1908_v39  ;;  %v1946_v3 = vmul.f32 0.70710677, %v1940_v54  ;;  %v787_v16 = vmul.f32 %v1866_v59, %v771_v46 }
 0x251   :  { %v649_v1 = vadd.f32 1.0, %v633_v43  ;;  %v631_v57 = vmul.f32 0.3275911, %v615_v38  ;;  %v1951_v5 = vadd.f32 %v1679_v25, %v559_v29  ;;  %v881_v62 = vmul.f32 1.442695, %v854_v51 }
 0x252   :  { %1200 = vst [vmem:[%s2071_s7 + $0x10] sm:$0xff] %v1172_v52   ;;  %v618_v44 = vand.u32 2147483647, %v1946_v3  ;;  %v821_v15 = vmul.f32 %v1854_v33, %v805_v11  ;;  %v852_v37 = vmul.f32 %v836_v56, %v1908_v39  ;;  %v803_v41 = vadd.f32 0.2548296, %v787_v16  ;;  %v1240_v33 = vpop.f32.mrf.mxu0 }
 0x253   :  { %1346 = vrcp.f32 %v649_v1  ;;  %v647_v55 = vadd.f32 1.0, %v631_v57  ;;  %v1959_v35 = vmul.f32 0.70710677, %v1951_v5  ;;  %v841_v25 = vsub.f32 0.0, %v1924_v34 }
 0x254   :  { %v634_v49 = vmul.f32 0.3275911, %v618_v44  ;;  %v877_v8 = vmul.f32 1.442695, %v852_v37  ;;  %v819_v26 = vmul.f32 %v1866_v59, %v803_v41  ;;  %v839_v17 = vsub.f32 0.0, %v1937_v28  ;;  %v1970_v32 = vpop.f32.mrf.mxu0 }
 0x255   :  { %1348 = vrcp.f32 %v647_v55  ;;  %v616_v63 = vand.u32 2147483647, %v1959_v35  ;;  %v857_v48 = vmul.f32 %v841_v25, %v1924_v34  ;;  %v842_v40 = vsub.f32 0.0, %v1946_v3 }
 0x256   :  { %v1953_v60 = vpop.eup %1338  ;;  %v650_v21 = vadd.f32 1.0, %v634_v49  ;;  %1350 = vpow2.f32 %v881_v62  ;;  %v1981_v46 = vadd.f32 %v1240_v33, %v1735_v53  ;;  %v581_v1 = vmul.f32 0.5, %v1768_v27  ;;  %v1241_v11 = vpop.f32.mrf.mxu0 }
 0x257   :  { %v694_v30 = vmul.f32 1.0614054, %v1953_v60  ;;  %v632_v0 = vmul.f32 0.3275911, %v616_v63  ;;  %v887_v43 = vmul.f32 1.442695, %v857_v48  ;;  %v855_v38 = vmul.f32 %v839_v17, %v1937_v28 }
 0x258   :  { %v1341_v6 = vpop.eup %1340  ;;  %1352 = vrcp.f32 %v650_v21  ;;  %v1987_v29 = vmul.f32 0.5, %v1795_v23  ;;  %v858_v55 = vmul.f32 %v842_v40, %v1946_v3  ;;  %v840_v23 = vsub.f32 0.0, %v1959_v35 }
 0x259   :  { %v710_v4 = vadd.f32 -1.4531521, %v694_v30  ;;  %v901_v20 = vmul.f32 %v1341_v6, %v821_v15  ;;  %v648_v14 = vadd.f32 1.0, %v632_v0  ;;  %1354 = vpow2.f32 %v877_v8 }
 0x25a   :  { %v432_v37 = vadd.f32 %v1241_v11, %v1735_v53  ;;  %v582_v21 = vmul.f32 0.5, %v1885_v12  ;;  %vm934_vm11 = vcmp.ge.f32.partialorder %v1896_v58, 0.0  ;;  %v856_v12 = vmul.f32 %v840_v23, %v1959_v35 }
 0x25b   :  { %v1963_v47 = vpop.eup %1342  ;;  %v726_v9 = vmul.f32 %v1953_v60, %v710_v4  ;;  %v917_v31 = vsub.f32 1.0, %v901_v20  ;;  %1356 = vrcp.f32 %v648_v14  ;;  %v883_v4 = vmul.f32 1.442695, %v855_v38 }
 0x25c   :  { %v692_v2 = vmul.f32 1.0614054, %v1963_v47  ;;  %v1345_v18 = vpop.eup %1344  ;;  %1358 = vpow2.f32 %v887_v43  ;;  %vm932_vm12 = vcmp.ge.f32.partialorder %v1908_v39, 0.0  ;;  %vm937_vm13 = vcmp.ge.f32.partialorder %v1924_v34, 0.0 }
 0x25d   :  { %v742_v7 = vadd.f32 1.4214138, %v726_v9  ;;  %v1975_v59 = vmul.f32 %v1345_v18, %v819_v26  ;;  %v949_v57 = vsub.f32 0.0, %v917_v31  ;;  %v889_v26 = vmul.f32 1.442695, %v858_v55 }
 0x25e   :  { %v708_v13 = vadd.f32 -1.4531521, %v692_v2  ;;  %1360 = vpow2.f32 %v883_v4  ;;  %vm935_vm14 = vcmp.ge.f32.partialorder %v1937_v28, 0.0  ;;  %vm938_vm15 = vcmp.ge.f32.partialorder %v1946_v3, 0.0 }
 0x25f   :  { %v758_v52 = vmul.f32 %v1953_v60, %v742_v7  ;;  %v915_v44 = vsub.f32 1.0, %v1975_v59  ;;  %v965_v20 = vsel %vm933_vm9, %v917_v31, %v949_v57  ;;  %1362 = vpow2.f32 %v889_v26 }
 0x260   :  { %v1973_v45 = vpop.eup %1346  ;;  %v724_v19 = vmul.f32 %v1963_v47, %v708_v13  ;;  %v981_v17 = vadd.f32 1.0, %v965_v20  ;;  %vm936_vm0 = vcmp.ge.f32.partialorder %v1959_v35, 0.0 }
 0x261   :  { %v774_v36 = vadd.f32 -0.28449672, %v758_v52  ;;  %v697_v42 = vmul.f32 1.0614054, %v1973_v45  ;;  %v580_v52 = vmul.f32 0.5, %v1900_v10 }
 0x262   :  { %v740_v51 = vadd.f32 1.4214138, %v724_v19  ;;  %v1993_v27 = vpop.eup %1348 }
 0x263   :  { %v790_v56 = vmul.f32 %v1953_v60, %v774_v36  ;;  %v713_v16 = vadd.f32 -1.4531521, %v697_v42  ;;  %v695_v41 = vmul.f32 1.0614054, %v1993_v27  ;;  %v1351_v25 = vpop.eup %1350 }
 0x264   :  { %v756_v62 = vmul.f32 %v1963_v47, %v740_v51  ;;  %v885_v51 = vmul.f32 1.442695, %v856_v12 }
 0x265   :  { %v806_v15 = vadd.f32 0.2548296, %v790_v56  ;;  %v729_v30 = vmul.f32 %v1973_v45, %v713_v16  ;;  %v2003_v33 = vpop.eup %1352  ;;  %v711_v8 = vadd.f32 -1.4531521, %v695_v41  ;;  %v997_v16 = vmul.f32 %v981_v17, %v581_v1 }
 0x266   :  { %v772_v49 = vadd.f32 -0.28449672, %v756_v62  ;;  %v698_v7 = vmul.f32 1.0614054, %v2003_v33  ;;  %v1355_v31 = vpop.eup %1354  ;;  %1364 = vpow2.f32 %v885_v51 }
 0x267   :  { %v822_v6 = vmul.f32 %v1953_v60, %v806_v15  ;;  %v745_v63 = vadd.f32 1.4214138, %v729_v30  ;;  %v947_v60 = vsub.f32 0.0, %v915_v44  ;;  %v727_v13 = vmul.f32 %v1993_v27, %v711_v8  ;;  %v423_v8 = vpop.f32.mrf.mxu0 }
 0x268   :  { %v788_v9 = vmul.f32 %v1963_v47, %v772_v49  ;;  %v714_v18 = vadd.f32 -1.4531521, %v698_v7  ;;  %v2014_v40 = vpop.eup %1356 }
 0x269   :  { %v902_v2 = vmul.f32 %v1351_v25, %v822_v6  ;;  %v761_v0 = vmul.f32 %v1973_v45, %v745_v63  ;;  %v743_v19 = vadd.f32 1.4214138, %v727_v13  ;;  %v963_v38 = vsel %vm931_vm10, %v915_v44, %v947_v60  ;;  %v1359_v44 = vpop.eup %1358 }
 0x26a   :  { %v804_v48 = vadd.f32 0.2548296, %v788_v9  ;;  %v730_v43 = vmul.f32 %v2003_v33, %v714_v18  ;;  %v696_v10 = vmul.f32 1.0614054, %v2014_v40  ;;  %v979_v49 = vadd.f32 1.0, %v963_v38 }
 0x26b   :  { %v918_v14 = vsub.f32 1.0, %v902_v2  ;;  %v777_v24 = vadd.f32 -0.28449672, %v761_v0  ;;  %v759_v56 = vmul.f32 %v1993_v27, %v743_v19  ;;  %v1013_v6 = vmul.f32 %v997_v16, %v1981_v46  ;;  %v1361_v13 = vpop.eup %1360  ;;  %v1244_v19 = vpop.f32.mrf.mxu0 }
 0x26c   :  { %v820_v59 = vmul.f32 %v1963_v47, %v804_v48  ;;  %v746_v62 = vadd.f32 1.4214138, %v730_v43  ;;  %v712_v23 = vadd.f32 -1.4531521, %v696_v10  ;;  %v995_v0 = vmul.f32 %v979_v49, %v1987_v29 }
 0x26d   :  { %v950_v36 = vsub.f32 0.0, %v918_v14  ;;  %v793_v42 = vmul.f32 %v1973_v45, %v777_v24  ;;  %v775_v30 = vadd.f32 -0.28449672, %v759_v56  ;;  %v421_v60 = vadd.f32 %v1735_v53, %v1970_v32  ;;  %v436_v56 = vpop.f32.mrf.mxu0 }
 0x26e   :  { %v900_v11 = vmul.f32 %v1355_v31, %v820_v59  ;;  %v762_v22 = vmul.f32 %v2003_v33, %v746_v62  ;;  %v728_v58 = vmul.f32 %v2014_v40, %v712_v23  ;;  %v1363_v31 = vpop.eup %1362  ;;  %v586_v49 = vmul.f32 0.5, %v1940_v54 }
 0x26f   :  { %v966_v47 = vsel %vm934_vm11, %v918_v14, %v950_v36  ;;  %v809_v57 = vadd.f32 0.2548296, %v793_v42  ;;  %v791_v1 = vmul.f32 %v1993_v27, %v775_v30  ;;  %v1011_v59 = vmul.f32 %v995_v0, %v421_v60 }
 0x270   :  { %v982_v55 = vadd.f32 1.0, %v966_v47  ;;  %v916_v15 = vsub.f32 1.0, %v900_v11  ;;  %v778_v20 = vadd.f32 -0.28449672, %v762_v22  ;;  %v744_v2 = vadd.f32 1.4214138, %v728_v58 }
 0x271   :  { %v825_v41 = vmul.f32 %v1973_v45, %v809_v57  ;;  %v807_v45 = vadd.f32 0.2548296, %v791_v1  ;;  %v585_v57 = vmul.f32 0.5, %v1920_v50  ;;  %v583_v50 = vmul.f32 0.5, %v1928_v61 }
 0x272   :  { %v998_v4 = vmul.f32 %v982_v55, %v582_v21  ;;  %v948_v25 = vsub.f32 0.0, %v916_v15  ;;  %v794_v12 = vmul.f32 %v2003_v33, %v778_v20  ;;  %v760_v39 = vmul.f32 %v2014_v40, %v744_v2 }
 0x273   :  { %v905_v63 = vmul.f32 %v1359_v44, %v825_v41  ;;  %v823_v46 = vmul.f32 %v1993_v27, %v807_v45  ;;  %v1365_v16 = vpop.eup %1364  ;;  %v584_v54 = vmul.f32 0.5, %v1951_v5 }
 0x274   :  { %v1014_v9 = vmul.f32 %v998_v4, %v432_v37  ;;  %v964_v26 = vsel %vm932_vm12, %v916_v15, %v948_v25  ;;  %v424_v37 = vadd.f32 %v1735_v53, %v423_v8  ;;  %v810_v24 = vadd.f32 0.2548296, %v794_v12  ;;  %v1245_v15 = vpop.f32.mrf.mxu0 }
 0x275   :  { %v980_v7 = vadd.f32 1.0, %v964_v26  ;;  %v921_v21 = vsub.f32 1.0, %v905_v63  ;;  %v903_v29 = vmul.f32 %v1361_v13, %v823_v46  ;;  %v776_v18 = vadd.f32 -0.28449672, %v760_v39 }
 0x276   :  { %v1187_v48 = vpack.c.bf16 %v1014_v9, %v1013_v6  ;;  %v826_v27 = vmul.f32 %v2003_v33, %v810_v24  ;;  %v445_v4 = vadd.f32 %v1244_v19, %v1735_v53  ;;  %v439_v58 = vpop.f32.mrf.mxu0  ;;  %v437_v8 = vadd.f32 %v1735_v53, %v436_v56 }
 0x277   :  { %v996_v17 = vmul.f32 %v980_v7, %v580_v52  ;;  %v953_v14 = vsub.f32 0.0, %v921_v21  ;;  %v919_v36 = vsub.f32 1.0, %v903_v29  ;;  %v792_v42 = vmul.f32 %v2014_v40, %v776_v18 }
 0x278   :  { %1203 = vst [vmem:[%s2071_s7 + $0x28] sm:$0xff] %v1187_v48   ;;  %v906_v51 = vmul.f32 %v1363_v31, %v826_v27  ;;  %v440_v26 = vadd.f32 %v1735_v53, %v439_v58 }
 0x279   :  { %v1012_v32 = vmul.f32 %v996_v17, %v424_v37  ;;  %v969_v43 = vsel %vm937_vm13, %v921_v21, %v953_v14  ;;  %v951_v38 = vsub.f32 0.0, %v919_v36  ;;  %v808_v11 = vadd.f32 0.2548296, %v792_v42 }
 0x27a   :  { %v922_v10 = vsub.f32 1.0, %v906_v51  ;;  %v985_v47 = vadd.f32 1.0, %v969_v43 }
 0x27b   :  { %v1182_v52 = vpack.c.bf16 %v1012_v32, %v1011_v59  ;;  %v824_v33 = vmul.f32 %v2014_v40, %v808_v11  ;;  %v967_v62 = vsel %vm935_vm14, %v919_v36, %v951_v38  ;;  %v448_v40 = vadd.f32 %v1245_v15, %v1735_v53 }
 0x27c   :  { %v954_v34 = vsub.f32 0.0, %v922_v10  ;;  %v1001_v23 = vmul.f32 %v985_v47, %v585_v57  ;;  %v983_v44 = vadd.f32 1.0, %v967_v62 }
 0x27d   :  { %1202 = vst [vmem:[%s2071_s7 + $0x20] sm:$0xff] %v1182_v52   ;;  %v904_v55 = vmul.f32 %v1365_v16, %v824_v33 }
 0x27e   :  { %v970_v30 = vsel %vm938_vm15, %v922_v10, %v954_v34  ;;  %v1017_v3 = vmul.f32 %v1001_v23, %v445_v4  ;;  %v999_v63 = vmul.f32 %v983_v44, %v583_v50 }
 0x27f   :  { %v986_v41 = vadd.f32 1.0, %v970_v30  ;;  %v920_v22 = vsub.f32 1.0, %v904_v55 }
 0x280   :  { %v1015_v61 = vmul.f32 %v999_v63, %v437_v8 }
 0x281   :  { %v1002_v28 = vmul.f32 %v986_v41, %v586_v49  ;;  %v952_v25 = vsub.f32 0.0, %v920_v22 }
 0x283   :  { %v1018_v1 = vmul.f32 %v1002_v28, %v448_v40  ;;  %v968_v6 = vsel %vm936_vm0, %v920_v22, %v952_v25 }
 0x284   :  { %v984_v20 = vadd.f32 1.0, %v968_v6 }
 0x285   :  { %v1197_v9 = vpack.c.bf16 %v1018_v1, %v1017_v3 }
 0x286   :  { %v1000_v45 = vmul.f32 %v984_v20, %v584_v54 }
 0x287   :  { %1205 = vst [vmem:[%s2071_s7 + $0x38] sm:$0xff] %v1197_v9  }
 0x288   :  { %v1016_v35 = vmul.f32 %v1000_v45, %v440_v26 }
 0x28a   :  { %v1192_v2 = vpack.c.bf16 %v1016_v35, %v1015_v61 }
 0x28c   :  { %1204 = vst [vmem:[%s2071_s7 + $0x30] sm:$0xff] %v1192_v2  }

// kernel: basic_transformer_block.17
= control target key start
LH: loop header
LB: loop body
LE: loop exit
PB: predicated region body
PF: predicated region fallthrough
CT: control target
= control target key end

     0   :  { %vm22_vm0 = vcmask 261120   ;;  %v505_v1 = vmov 0.0   ;;  %s744_s1 = inlined_call_operand.vmem [shape: bf16[128,32], index: 1, kind: input, shape index: {}]   ;;  %s745_s0 = inlined_call_operand.vmem [shape: bf16[128,128], index: 0, kind: input, shape index: {}]   ;;  %s746_s2 = inlined_call_operand.vmem [shape: f32[1,32], index: 2, kind: input, shape index: {}]   ;;  %s747_s3 = inlined_call_operand.vmem [shape: f32[128,32], index: 3, kind: input, shape index: {}]   ;;  %s748_s4 = inlined_call_operand.vmem [shape: f32[128,32], index: 4, kind: output, shape index: {}]  }
   0x1   :  { %v489_v0 = vld [vmem:[%s744_s1 + $0x38] sm:$0xff]   ;;  %25 = vst.msk [vmem:[#allocation2 + $0x10] sm:$0xff] %vm22_vm0, %v505_v1  ;;  %23 = vst.msk [vmem:[#allocation2] sm:$0xff] %vm22_vm0, %v505_v1  ;;  %v490_v2 = vld [vmem:[%s744_s1 + $0x30] sm:$0xff]  }
   0x2   :  { %24 = vst.msk [vmem:[#allocation2 + $0x8] sm:$0xff] %vm22_vm0, %v505_v1  ;;  %26 = vst.msk [vmem:[#allocation2 + $0x18] sm:$0xff] %vm22_vm0, %v505_v1  ;;  %440 = vmatprep.subr.bf16.mxu0 %v489_v0  ;;  %472 = vmatprep.subr.bf16.mxu1 %v489_v0  ;;  %v491_v3 = vld [vmem:[%s744_s1 + $0x28] sm:$0xff]   ;;  %v492_v4 = vld [vmem:[%s744_s1 + $0x20] sm:$0xff]  }
   0x3   :  { %27 = vst.msk [vmem:[#allocation2 + $0x20] sm:$0xff] %vm22_vm0, %v505_v1  ;;  %28 = vst.msk [vmem:[#allocation2 + $0x28] sm:$0xff] %vm22_vm0, %v505_v1  ;;  %441 = vmatpush3.bf16.msra.mxu0 %v489_v0  ;;  %480 = vmatpush3.bf16.msra.mxu1 %v489_v0  ;;  %v497_v5 = vld [vmem:[%s745_s0] sm:$0xff]   ;;  %v493_v7 = vld [vmem:[%s744_s1 + $0x18] sm:$0xff]  }
   0x4   :  { %29 = vst.msk [vmem:[#allocation2 + $0x30] sm:$0xff] %vm22_vm0, %v505_v1  ;;  %30 = vst.msk [vmem:[#allocation2 + $0x38] sm:$0xff] %vm22_vm0, %v505_v1  ;;  %442 = vmatprep.subr.bf16.mxu0 %v490_v2  ;;  %473 = vmatprep.subr.bf16.mxu1 %v490_v2  ;;  %v498_v6 = vld [vmem:[%s745_s0 + $0x20] sm:$0xff]   ;;  %v494_v8 = vld [vmem:[%s744_s1 + $0x10] sm:$0xff]  }
   0x5   :  { %31 = vst.msk [vmem:[#allocation2 + $0x40] sm:$0xff] %vm22_vm0, %v505_v1  ;;  %32 = vst.msk [vmem:[#allocation2 + $0x48] sm:$0xff] %vm22_vm0, %v505_v1  ;;  %456 = vmatprep.mubr.bf16.mxu0 %v497_v5  ;;  %464 = vmatprep.mubr.bf16.mxu1 %v498_v6  ;;  %v495_v9 = vld [vmem:[%s744_s1 + $0x8] sm:$0xff]   ;;  %v496_v10 = vld [vmem:[%s744_s1] sm:$0xff]  }
   0x6   :  { %33 = vst.msk [vmem:[#allocation2 + $0x50] sm:$0xff] %vm22_vm0, %v505_v1  ;;  %34 = vst.msk [vmem:[#allocation2 + $0x58] sm:$0xff] %vm22_vm0, %v505_v1  ;;  %v499_v11 = vld [vmem:[%s745_s0 + $0x8] sm:$0xff]   ;;  %v501_v13 = vld [vmem:[%s745_s0 + $0x10] sm:$0xff]  }
   0x7   :  { %35 = vst.msk [vmem:[#allocation2 + $0x60] sm:$0xff] %vm22_vm0, %v505_v1  ;;  %36 = vst.msk [vmem:[#allocation2 + $0x68] sm:$0xff] %vm22_vm0, %v505_v1  ;;  %443 = vmatpush3.bf16.msra.mxu0 %v490_v2  ;;  %481 = vmatpush3.bf16.msra.mxu1 %v490_v2  ;;  %v500_v12 = vld [vmem:[%s745_s0 + $0x28] sm:$0xff]   ;;  %v502_v14 = vld [vmem:[%s745_s0 + $0x30] sm:$0xff]  }
   0x8   :  { %37 = vst.msk [vmem:[#allocation2 + $0x70] sm:$0xff] %vm22_vm0, %v505_v1  ;;  %38 = vst.msk [vmem:[#allocation2 + $0x78] sm:$0xff] %vm22_vm0, %v505_v1  ;;  %444 = vmatprep.subr.bf16.mxu0 %v491_v3  ;;  %474 = vmatprep.subr.bf16.mxu1 %v491_v3  ;;  %v503_v15 = vld [vmem:[%s745_s0 + $0x18] sm:$0xff]   ;;  %v41_v17 = vld [vmem:[#allocation2 + $0x10] sm:$0xff] }
   0x9   :  { %v504_v16 = vld [vmem:[%s745_s0 + $0x38] sm:$0xff]   ;;  %v39_v21 = vld [vmem:[#allocation2] sm:$0xff]  ;;  %v40_v33 = vld [vmem:[#allocation2 + $0x8] sm:$0xff] }
   0xa   :  { %v42_v27 = vld [vmem:[#allocation2 + $0x18] sm:$0xff]  ;;  %v604_v43 = vld [vmem:[%s746_s2] ss:$0 sm:$0xff]  ;;  %v357_v48 = vld [vmem:[%s747_s3 + $0x10] sm:$0xff] }
   0xb   :  { %445 = vmatpush3.bf16.msra.mxu0 %v491_v3  ;;  %482 = vmatpush3.bf16.msra.mxu1 %v491_v3  ;;  %v45_v39 = vld [vmem:[#allocation2 + $0x30] sm:$0xff]  ;;  %v43_v46 = vld [vmem:[#allocation2 + $0x20] sm:$0xff]  ;;  %v46_v61 = vld [vmem:[#allocation2 + $0x38] sm:$0xff] }
   0xc   :  { %446 = vmatprep.subr.bf16.mxu0 %v492_v4  ;;  %475 = vmatprep.subr.bf16.mxu1 %v492_v4  ;;  %v47_v22 = vld [vmem:[#allocation2 + $0x40] sm:$0xff]  ;;  %v48_v34 = vld [vmem:[#allocation2 + $0x48] sm:$0xff]  ;;  %v365_v53 = vld [vmem:[%s747_s3 + $0x50] sm:$0xff] }
   0xd   :  { %v49_v18 = vld [vmem:[#allocation2 + $0x50] sm:$0xff]  ;;  %v50_v28 = vld [vmem:[#allocation2 + $0x58] sm:$0xff]  ;;  %v355_v58 = vld [vmem:[%s747_s3] sm:$0xff] }
   0xe   :  { %v51_v47 = vld [vmem:[#allocation2 + $0x60] sm:$0xff] }
   0xf   :  { %447 = vmatpush3.bf16.msra.mxu0 %v492_v4  ;;  %483 = vmatpush3.bf16.msra.mxu1 %v492_v4  ;;  %v53_v40 = vld [vmem:[#allocation2 + $0x70] sm:$0xff]  ;;  %v54_v62 = vld [vmem:[#allocation2 + $0x78] sm:$0xff]  ;;  %v363_v1 = vld [vmem:[%s747_s3 + $0x40] sm:$0xff] }
  0x10   :  { %448 = vmatprep.subr.bf16.mxu0 %v493_v7  ;;  %476 = vmatprep.subr.bf16.mxu1 %v493_v7 }
  0x13   :  { %449 = vmatpush3.bf16.msra.mxu0 %v493_v7  ;;  %484 = vmatpush3.bf16.msra.mxu1 %v493_v7 }
  0x14   :  { %450 = vmatprep.subr.bf16.mxu0 %v494_v8  ;;  %477 = vmatprep.subr.bf16.mxu1 %v494_v8 }
  0x17   :  { %451 = vmatpush3.bf16.msra.mxu0 %v494_v8  ;;  %485 = vmatpush3.bf16.msra.mxu1 %v494_v8  ;;  %v358_v8 = vld [vmem:[%s747_s3 + $0x18] sm:$0xff] }
  0x18   :  { %452 = vmatprep.subr.bf16.mxu0 %v495_v9  ;;  %478 = vmatprep.subr.bf16.mxu1 %v495_v9 }
  0x1b   :  { %453 = vmatpush3.bf16.msra.mxu0 %v495_v9  ;;  %486 = vmatpush3.bf16.msra.mxu1 %v495_v9  ;;  %v44_v9 = vld [vmem:[#allocation2 + $0x28] sm:$0xff] }
  0x1c   :  { %454 = vmatprep.subr.bf16.mxu0 %v496_v10  ;;  %479 = vmatprep.subr.bf16.mxu1 %v496_v10 }
  0x1f   :  { %455 = vmatpush3.bf16.msra.mxu0 %v496_v10  ;;  %487 = vmatpush3.bf16.msra.mxu1 %v496_v10  ;;  %v52_v10 = vld [vmem:[#allocation2 + $0x68] sm:$0xff] }
  0x22   :  { %457 = vmatmul.mubr.bf16.vlgmr.msra.gmra.mxu0 %v499_v11  ;;  %465 = vmatmul.mubr.bf16.vlgmr.msra.gmra.mxu1 %v500_v12 }
  0x23   :  { %460 = vmatprep.mubr.bf16.mxu0 %v501_v13  ;;  %468 = vmatprep.mubr.bf16.mxu1 %v502_v14  ;;  %v366_v13 = vld [vmem:[%s747_s3 + $0x58] sm:$0xff] }
  0x2a   :  { %461 = vmatmul.mubr.bf16.gmra.mxu0 %v503_v15  ;;  %469 = vmatmul.mubr.bf16.gmra.mxu1 %v504_v16 }
  0xe2   :  { %v458_v19 = vpop.f32.mrf.mxu0  ;;  %v466_v20 = vpop.f32.mrf.mxu1 }
  0xe3   :  { %v282_v23 = vadd.f32 %v458_v19, %v41_v17  ;;  %v290_v24 = vadd.f32 %v466_v20, %v49_v18 }
  0xe4   :  { %v217_v25 = vpop.f32.mrf.mxu0  ;;  %v249_v26 = vpop.f32.mrf.mxu1 }
  0xe5   :  { %299 = vst.msk [vmem:[#allocation2 + $0x10] sm:$0xff] %vm22_vm0, %v282_v23  ;;  %307 = vst.msk [vmem:[#allocation2 + $0x50] sm:$0xff] %vm22_vm0, %v290_v24  ;;  %v280_v29 = vadd.f32 %v217_v25, %v39_v21  ;;  %v288_v30 = vadd.f32 %v249_v26, %v47_v22  ;;  %v356_v22 = vld [vmem:[%s747_s3 + $0x8] sm:$0xff] }
  0xe6   :  { %v459_v31 = vpop.f32.mrf.mxu0  ;;  %v467_v32 = vpop.f32.mrf.mxu1  ;;  %v364_v25 = vld [vmem:[%s747_s3 + $0x48] sm:$0xff] }
  0xe7   :  { %297 = vst.msk [vmem:[#allocation2] sm:$0xff] %vm22_vm0, %v280_v29  ;;  %305 = vst.msk [vmem:[#allocation2 + $0x40] sm:$0xff] %vm22_vm0, %v288_v30  ;;  %v283_v35 = vadd.f32 %v459_v31, %v42_v27  ;;  %v291_v36 = vadd.f32 %v467_v32, %v50_v28  ;;  %v361_v32 = vld [vmem:[%s747_s3 + $0x30] sm:$0xff] }
  0xe8   :  { %v220_v37 = vpop.f32.mrf.mxu0  ;;  %v252_v38 = vpop.f32.mrf.mxu1 }
  0xe9   :  { %300 = vst.msk [vmem:[#allocation2 + $0x18] sm:$0xff] %vm22_vm0, %v283_v35  ;;  %308 = vst.msk [vmem:[#allocation2 + $0x58] sm:$0xff] %vm22_vm0, %v291_v36  ;;  %v281_v41 = vadd.f32 %v220_v37, %v40_v33  ;;  %v289_v42 = vadd.f32 %v252_v38, %v48_v34  ;;  %v369_v35 = vld [vmem:[%s747_s3 + $0x70] sm:$0xff] }
  0xea   :  { %v462_v44 = vpop.f32.mrf.mxu0  ;;  %v470_v45 = vpop.f32.mrf.mxu1 }
  0xeb   :  { %298 = vst.msk [vmem:[#allocation2 + $0x8] sm:$0xff] %vm22_vm0, %v281_v41  ;;  %306 = vst.msk [vmem:[#allocation2 + $0x48] sm:$0xff] %vm22_vm0, %v289_v42  ;;  %v286_v49 = vadd.f32 %v462_v44, %v45_v39  ;;  %v294_v50 = vadd.f32 %v470_v45, %v53_v40  ;;  %v359_v40 = vld [vmem:[%s747_s3 + $0x20] sm:$0xff] }
  0xec   :  { %v318_v51 = vld [vmem:[#allocation2 + $0x10] sm:$0xff]  ;;  %v233_v54 = vpop.f32.mrf.mxu0  ;;  %v265_v55 = vpop.f32.mrf.mxu1  ;;  %v367_v44 = vld [vmem:[%s747_s3 + $0x60] sm:$0xff] }
  0xed   :  { %v326_v52 = vld [vmem:[#allocation2 + $0x50] sm:$0xff]  ;;  %v341_v56 = vadd.f32 %v604_v43, %v318_v51  ;;  %303 = vst.msk [vmem:[#allocation2 + $0x30] sm:$0xff] %vm22_vm0, %v286_v49  ;;  %311 = vst.msk [vmem:[#allocation2 + $0x70] sm:$0xff] %vm22_vm0, %v294_v50  ;;  %v284_v59 = vadd.f32 %v233_v54, %v43_v46  ;;  %v292_v60 = vadd.f32 %v265_v55, %v51_v47  ;;  %v362_v49 = vld [vmem:[%s747_s3 + $0x38] sm:$0xff] }
  0xee   :  { %v349_v57 = vadd.f32 %v604_v43, %v326_v52  ;;  %v316_v63 = vld [vmem:[#allocation2] sm:$0xff]  ;;  %v463_v2 = vpop.f32.mrf.mxu0  ;;  %v471_v3 = vpop.f32.mrf.mxu1  ;;  %v370_v54 = vld [vmem:[%s747_s3 + $0x78] sm:$0xff] }
  0xef   :  { %v324_v0 = vld [vmem:[#allocation2 + $0x40] sm:$0xff]  ;;  %v373_v4 = vadd.f32 %v357_v48, %v341_v56  ;;  %v339_v6 = vadd.f32 %v604_v43, %v316_v63  ;;  %301 = vst.msk [vmem:[#allocation2 + $0x20] sm:$0xff] %vm22_vm0, %v284_v59  ;;  %309 = vst.msk [vmem:[#allocation2 + $0x60] sm:$0xff] %vm22_vm0, %v292_v60  ;;  %v287_v14 = vadd.f32 %v463_v2, %v46_v61  ;;  %v368_v60 = vld [vmem:[%s747_s3 + $0x68] sm:$0xff] }
  0xf0   :  { %v381_v5 = vadd.f32 %v365_v53, %v349_v57  ;;  %v347_v7 = vadd.f32 %v604_v43, %v324_v0  ;;  %v319_v11 = vld [vmem:[#allocation2 + $0x18] sm:$0xff]  ;;  %v295_v15 = vadd.f32 %v471_v3, %v54_v62  ;;  %v236_v16 = vpop.f32.mrf.mxu0  ;;  %v268_v17 = vpop.f32.mrf.mxu1  ;;  %v360_v57 = vld [vmem:[%s747_s3 + $0x28] sm:$0xff] }
  0xf1   :  { %v327_v12 = vld [vmem:[#allocation2 + $0x58] sm:$0xff]  ;;  %389 = vst.msk [vmem:[%s748_s4 + $0x10] sm:$0xff] %vm22_vm0, %v373_v4  ;;  %v371_v18 = vadd.f32 %v355_v58, %v339_v6  ;;  %v342_v20 = vadd.f32 %v604_v43, %v319_v11  ;;  %304 = vst.msk [vmem:[#allocation2 + $0x38] sm:$0xff] %vm22_vm0, %v287_v14  ;;  %v285_v26 = vadd.f32 %v236_v16, %v44_v9 }
  0xf2   :  { %397 = vst.msk [vmem:[%s748_s4 + $0x50] sm:$0xff] %vm22_vm0, %v381_v5  ;;  %v379_v19 = vadd.f32 %v363_v1, %v347_v7  ;;  %v350_v21 = vadd.f32 %v604_v43, %v327_v12  ;;  %v317_v23 = vld [vmem:[#allocation2 + $0x8] sm:$0xff]  ;;  %312 = vst.msk [vmem:[#allocation2 + $0x78] sm:$0xff] %vm22_vm0, %v295_v15  ;;  %v293_v27 = vadd.f32 %v268_v17, %v52_v10 }
  0xf3   :  { %v325_v24 = vld [vmem:[#allocation2 + $0x48] sm:$0xff]  ;;  %387 = vst.msk [vmem:[%s748_s4] sm:$0xff] %vm22_vm0, %v371_v18  ;;  %v374_v28 = vadd.f32 %v358_v8, %v342_v20  ;;  %v340_v30 = vadd.f32 %v604_v43, %v317_v23  ;;  %302 = vst.msk [vmem:[#allocation2 + $0x28] sm:$0xff] %vm22_vm0, %v285_v26 }
  0xf4   :  { %395 = vst.msk [vmem:[%s748_s4 + $0x40] sm:$0xff] %vm22_vm0, %v379_v19  ;;  %v382_v29 = vadd.f32 %v366_v13, %v350_v21  ;;  %v348_v31 = vadd.f32 %v604_v43, %v325_v24  ;;  %v322_v33 = vld [vmem:[#allocation2 + $0x30] sm:$0xff]  ;;  %310 = vst.msk [vmem:[#allocation2 + $0x68] sm:$0xff] %vm22_vm0, %v293_v27 }
  0xf5   :  { %v330_v34 = vld [vmem:[#allocation2 + $0x70] sm:$0xff]  ;;  %390 = vst.msk [vmem:[%s748_s4 + $0x18] sm:$0xff] %vm22_vm0, %v374_v28  ;;  %v372_v36 = vadd.f32 %v356_v22, %v340_v30  ;;  %v345_v38 = vadd.f32 %v604_v43, %v322_v33 }
  0xf6   :  { %398 = vst.msk [vmem:[%s748_s4 + $0x58] sm:$0xff] %vm22_vm0, %v382_v29  ;;  %v380_v37 = vadd.f32 %v364_v25, %v348_v31  ;;  %v353_v39 = vadd.f32 %v604_v43, %v330_v34  ;;  %v320_v41 = vld [vmem:[#allocation2 + $0x20] sm:$0xff] }
  0xf7   :  { %v328_v42 = vld [vmem:[#allocation2 + $0x60] sm:$0xff]  ;;  %388 = vst.msk [vmem:[%s748_s4 + $0x8] sm:$0xff] %vm22_vm0, %v372_v36  ;;  %v377_v45 = vadd.f32 %v361_v32, %v345_v38  ;;  %v343_v47 = vadd.f32 %v604_v43, %v320_v41 }
  0xf8   :  { %396 = vst.msk [vmem:[%s748_s4 + $0x48] sm:$0xff] %vm22_vm0, %v380_v37  ;;  %v385_v46 = vadd.f32 %v369_v35, %v353_v39  ;;  %v351_v48 = vadd.f32 %v604_v43, %v328_v42  ;;  %v323_v52 = vld [vmem:[#allocation2 + $0x38] sm:$0xff] }
  0xf9   :  { %393 = vst.msk [vmem:[%s748_s4 + $0x30] sm:$0xff] %vm22_vm0, %v377_v45  ;;  %v375_v50 = vadd.f32 %v359_v40, %v343_v47  ;;  %v331_v53 = vld [vmem:[#allocation2 + $0x78] sm:$0xff]  ;;  %v346_v55 = vadd.f32 %v604_v43, %v323_v52 }
  0xfa   :  { %401 = vst.msk [vmem:[%s748_s4 + $0x70] sm:$0xff] %vm22_vm0, %v385_v46  ;;  %v383_v51 = vadd.f32 %v367_v44, %v351_v48  ;;  %v354_v56 = vadd.f32 %v604_v43, %v331_v53  ;;  %v321_v58 = vld [vmem:[#allocation2 + $0x28] sm:$0xff] }
  0xfb   :  { %391 = vst.msk [vmem:[%s748_s4 + $0x20] sm:$0xff] %vm22_vm0, %v375_v50  ;;  %v329_v59 = vld [vmem:[#allocation2 + $0x68] sm:$0xff]  ;;  %v378_v61 = vadd.f32 %v362_v49, %v346_v55  ;;  %v344_v63 = vadd.f32 %v604_v43, %v321_v58 }
  0xfc   :  { %399 = vst.msk [vmem:[%s748_s4 + $0x60] sm:$0xff] %vm22_vm0, %v383_v51  ;;  %v386_v62 = vadd.f32 %v370_v54, %v354_v56  ;;  %v352_v0 = vadd.f32 %v604_v43, %v329_v59 }
  0xfd   :  { %394 = vst.msk [vmem:[%s748_s4 + $0x38] sm:$0xff] %vm22_vm0, %v378_v61  ;;  %v376_v1 = vadd.f32 %v360_v57, %v344_v63 }
  0xfe   :  { %402 = vst.msk [vmem:[%s748_s4 + $0x78] sm:$0xff] %vm22_vm0, %v386_v62  ;;  %v384_v2 = vadd.f32 %v368_v60, %v352_v0 }
  0xff   :  { %392 = vst.msk [vmem:[%s748_s4 + $0x28] sm:$0xff] %vm22_vm0, %v376_v1 }
 0x100   :  { %400 = vst.msk [vmem:[%s748_s4 + $0x68] sm:$0xff] %vm22_vm0, %v384_v2 }

</bundles_post_ra>
